<compile_context>
chip_gen: v7x
topology: tpu7x:2x2x1
jax: 0.10.0
libtpu: 0.0.40
codegen_flags: <defaults>
</compile_context>

<pallas_src>
import jax
import jax.numpy as jnp
from jax.experimental import pallas as pl
from jax.experimental.pallas import tpu as pltpu


def _fused_basic_block_kernel(x_ref, w1_ref, w2_ref, s1_ref, b1_ref,
                              s2_ref, b2_ref, out_ref,
                              xpad_ref, col1_ref, hpad_ref, col2_ref):
    """Fused BasicBlock forward for one block of images (NHWC in VMEM).

    x_ref   : (bb, H, W, Cin)       f32 input block
    w1_ref  : (9*Cin, Cout)         bf16 conv1 weights, im2col layout
    w2_ref  : (9*Cout, Cout)        bf16 conv2 weights, im2col layout
    s*/b*   : (1, Cout)             f32 folded BN scale / bias
    out_ref : (bb, H, W, Cout)
    scratch : xpad (bb,H+2,W+2,Cin) bf16, col1 (M,9*Cin) bf16,
              hpad (bb,H+2,W+2,Cout) bf16, col2 (M,9*Cout) bf16
    """
    bb, H, W, Cin = x_ref.shape
    Cout = out_ref.shape[-1]
    M = bb * H * W

    # ----- stage 1: conv1 (3x3, pad=1) as one im2col matmul -> bn1 -> relu -----
    # zero-pad spatially inside VMEM (no host jnp.pad / extra HBM pass)
    xpad_ref[...] = jnp.zeros_like(xpad_ref)
    xpad_ref[:, 1:H + 1, 1:W + 1, :] = x_ref[...].astype(xpad_ref.dtype)

    # build (M, 9*Cin) patch matrix once into VMEM scratch (static slices)
    for dh in range(3):
        for dw in range(3):
            t = dh * 3 + dw
            col1_ref[:, t * Cin:(t + 1) * Cin] = (
                xpad_ref[:, dh:dh + H, dw:dw + W, :].reshape(M, Cin))

    # single MXU push: bf16 operands, f32 accumulation
    acc1 = jnp.dot(col1_ref[...], w1_ref[...],
                   preferred_element_type=jnp.float32)
    h = acc1 * s1_ref[...] + b1_ref[...]          # folded BN (eval mode), f32
    h = jnp.maximum(h, 0.0)                       # relu; d == {} => zeroing is a no-op

    # ----- stage 2: conv2 -> bn2 -> +residual -> relu, intermediate stays in VMEM -----
    hpad_ref[...] = jnp.zeros_like(hpad_ref)
    hpad_ref[:, 1:H + 1, 1:W + 1, :] = (
        h.reshape(bb, H, W, Cout).astype(hpad_ref.dtype))

    for dh in range(3):
        for dw in range(3):
            t = dh * 3 + dw
            col2_ref[:, t * Cout:(t + 1) * Cout] = (
                hpad_ref[:, dh:dh + H, dw:dw + W, :].reshape(M, Cout))

    acc2 = jnp.dot(col2_ref[...], w2_ref[...],
                   preferred_element_type=jnp.float32)
    out = acc2 * s2_ref[...] + b2_ref[...]
    out = out + x_ref[...].reshape(M, Cout).astype(jnp.float32)   # identity residual
    out = jnp.maximum(out, 0.0)

    out_ref[...] = out.reshape(bb, H, W, Cout).astype(out_ref.dtype)


def basic_block_pallas(x_nhwc, w1_flat, w2_flat, s1, b1, s2, b2,
                       *, images_per_block=None):
    """Fused BasicBlock forward, NHWC in / NHWC out (single pallas_call)."""
    B, H, W, Cin = x_nhwc.shape
    Cout = w1_flat.shape[-1]
    assert Cin == Cout, "stride=1, downsample=None requires inplanes == planes"

    if images_per_block is None:
        # keep a >=2-way parallel grid when possible (v7x has 2 TensorCores),
        # while still folding several images into the matmul M dim for larger B.
        images_per_block = 1 if B < 4 else B // 2
        if B % images_per_block:
            images_per_block = 1
    bb = images_per_block
    assert B % bb == 0
    M = bb * H * W

    # VMEM scratch per step (bf16): 2 padded maps + 2 im2col blocks — a few tens of KiB
    # at these sizes, far under the 32 MiB default scoped VMEM on all generations.
    # TODO(synk): for large feature maps, tile H with a 2-row halo and set
    #             pltpu.CompilerParams(vmem_limit_bytes=...) against v7x's 64 MiB VMEM.
    scratch = [
        pltpu.VMEM((bb, H + 2, W + 2, Cin), jnp.bfloat16),
        pltpu.VMEM((M, 9 * Cin), jnp.bfloat16),
        pltpu.VMEM((bb, H + 2, W + 2, Cout), jnp.bfloat16),
        pltpu.VMEM((M, 9 * Cout), jnp.bfloat16),
    ]

    in_specs = [
        pl.BlockSpec((bb, H, W, Cin), lambda b: (b, 0, 0, 0)),
        pl.BlockSpec((9 * Cin, Cout), lambda b: (0, 0)),
        pl.BlockSpec((9 * Cout, Cout), lambda b: (0, 0)),
        pl.BlockSpec((1, Cout), lambda b: (0, 0)),
        pl.BlockSpec((1, Cout), lambda b: (0, 0)),
        pl.BlockSpec((1, Cout), lambda b: (0, 0)),
        pl.BlockSpec((1, Cout), lambda b: (0, 0)),
    ]
    out_spec = pl.BlockSpec((bb, H, W, Cout), lambda b: (b, 0, 0, 0))

    return pl.pallas_call(
        _fused_basic_block_kernel,
        out_shape=jax.ShapeDtypeStruct((B, H, W, Cout), x_nhwc.dtype),
        grid_spec=pltpu.PrefetchScalarGridSpec(
            num_scalar_prefetch=0,
            grid=(B // bb,),
            in_specs=in_specs,
            out_specs=out_spec,
            scratch_shapes=scratch,
        ),
        compiler_params=pltpu.CompilerParams(
            dimension_semantics=("parallel",),
        ),
    )(x_nhwc, w1_flat, w2_flat, s1, b1, s2, b2)


def init_basic_block_params(key, inplanes, planes):
    """Deterministic parameter init mirroring BasicBlock.__init__ shapes."""
    k = jax.random.split(key, 10)
    eps = 1e-5
    # PyTorch conv weight layout is (Cout, Cin, 3, 3); store as HWIO for NHWC conv.
    w1_oihw = jax.random.normal(k[0], (planes, inplanes, 3, 3), jnp.float32) * 0.1
    w2_oihw = jax.random.normal(k[1], (planes, planes, 3, 3), jnp.float32) * 0.1
    w1_hwio = jnp.transpose(w1_oihw, (2, 3, 1, 0))
    w2_hwio = jnp.transpose(w2_oihw, (2, 3, 1, 0))

    def bn(kg, kb, km, kv, c):
        gamma = 1.0 + 0.1 * jax.random.normal(kg, (c,), jnp.float32)
        beta = 0.1 * jax.random.normal(kb, (c,), jnp.float32)
        mean = 0.1 * jax.random.normal(km, (c,), jnp.float32)
        var = jax.random.uniform(kv, (c,), jnp.float32, 0.5, 1.5)
        scale = gamma / jnp.sqrt(var + eps)
        bias = beta - mean * scale
        return scale, bias

    s1, b1 = bn(k[2], k[3], k[4], k[5], planes)
    s2, b2 = bn(k[6], k[7], k[8], k[9], planes)
    return dict(w1_hwio=w1_hwio, w2_hwio=w2_hwio, s1=s1, b1=b1, s2=s2, b2=b2)


def basic_block_forward(params, x_nchw):
    """BasicBlock.forward (stride=1, downsample=None). Input/output NCHW."""
    x = jnp.transpose(x_nchw, (0, 2, 3, 1))  # -> NHWC
    cin = params["w1_hwio"].shape[2]
    cout = params["w1_hwio"].shape[3]
    # Pre-reshape / pre-cast weights on the host (im2col layout, bf16 MXU operands).
    w1 = params["w1_hwio"].reshape(9 * cin, cout).astype(jnp.bfloat16)
    w2 = params["w2_hwio"].reshape(9 * cout, cout).astype(jnp.bfloat16)
    s1 = params["s1"].reshape(1, cout).astype(jnp.float32)
    b1 = params["b1"].reshape(1, cout).astype(jnp.float32)
    s2 = params["s2"].reshape(1, cout).astype(jnp.float32)
    b2 = params["b2"].reshape(1, cout).astype(jnp.float32)
    out = basic_block_pallas(x, w1, w2, s1, b1, s2, b2)
    return jnp.transpose(out, (0, 3, 1, 2))  # -> NCHW


def _reference_forward(params, x_nchw):
    """Pure-JAX reference using the same bf16 matmul operands / f32 accumulation."""
    x = jnp.transpose(x_nchw, (0, 2, 3, 1))

    def conv(inp, w_hwio):
        return jax.lax.conv_general_dilated(
            inp.astype(jnp.bfloat16), w_hwio.astype(jnp.bfloat16),
            window_strides=(1, 1), padding="SAME",
            dimension_numbers=("NHWC", "HWIO", "NHWC"),
            preferred_element_type=jnp.float32)

    h = jnp.maximum(conv(x, params["w1_hwio"]) * params["s1"] + params["b1"], 0.0)
    o = conv(h, params["w2_hwio"]) * params["s2"] + params["b2"] + x
    o = jnp.maximum(o, 0.0)
    return jnp.transpose(o, (0, 3, 1, 2))


if __name__ == "__main__":
    key = jax.random.PRNGKey(0)
    kx, kp = jax.random.split(key)

    B, C, Hs, Ws = 2, 4, 16, 16  # inplanes = planes = 4, stride = 1
    x = jax.random.normal(kx, (B, C, Hs, Ws), jnp.float32)
    params = init_basic_block_params(kp, inplanes=C, planes=C)

    out = basic_block_forward(params, x)
    out = jax.block_until_ready(out)

    ref = _reference_forward(params, x)
    assert out.shape == (B, C, Hs, Ws)
    assert jnp.allclose(out, ref, atol=1e-2, rtol=1e-2), (
        "max abs diff = %g" % float(jnp.max(jnp.abs(out - ref))))

    print("KERNEL_OK")
</pallas_src>

<mosaic_0001>
module attributes {stable_mosaic.version = 11 : i64} {
  func.func @_fused_basic_block_kernel(%arg0: i32, %arg1: memref<1x16x16x4xf32, #tpu.memory_space<vmem>>, %arg2: memref<36x4xbf16, #tpu.memory_space<vmem>>, %arg3: memref<36x4xbf16, #tpu.memory_space<vmem>>, %arg4: memref<1x4xf32, #tpu.memory_space<vmem>>, %arg5: memref<1x4xf32, #tpu.memory_space<vmem>>, %arg6: memref<1x4xf32, #tpu.memory_space<vmem>>, %arg7: memref<1x4xf32, #tpu.memory_space<vmem>>, %arg8: memref<1x16x16x4xf32, #tpu.memory_space<vmem>>, %arg9: memref<1x18x18x4xbf16, #tpu.memory_space<vmem>>, %arg10: memref<256x36xbf16, #tpu.memory_space<vmem>>, %arg11: memref<1x18x18x4xbf16, #tpu.memory_space<vmem>>, %arg12: memref<256x36xbf16, #tpu.memory_space<vmem>>) attributes {dimension_semantics = [#tpu.dimension_semantics<parallel>], iteration_bounds = array<i64: 2>, scalar_prefetch = 0 : i64, scratch_operands = 4 : i64, tpu.core_type = #tpu.core_type<tc>, window_params = [{transform_indices = @transform_0, window_bounds = array<i64: 1, 16, 16, 4>}, {pipeline_mode = #tpu.pipeline_mode<synchronous>, transform_indices = @transform_1, window_bounds = array<i64: 36, 4>}, {pipeline_mode = #tpu.pipeline_mode<synchronous>, transform_indices = @transform_2, window_bounds = array<i64: 36, 4>}, {pipeline_mode = #tpu.pipeline_mode<synchronous>, transform_indices = @transform_3, window_bounds = array<i64: 1, 4>}, {pipeline_mode = #tpu.pipeline_mode<synchronous>, transform_indices = @transform_4, window_bounds = array<i64: 1, 4>}, {pipeline_mode = #tpu.pipeline_mode<synchronous>, transform_indices = @transform_5, window_bounds = array<i64: 1, 4>}, {pipeline_mode = #tpu.pipeline_mode<synchronous>, transform_indices = @transform_6, window_bounds = array<i64: 1, 4>}, {transform_indices = @transform_7, window_bounds = array<i64: 1, 16, 16, 4>}]} {
    %cst = arith.constant 0.000000e+00 : bf16
    %0 = vector.broadcast %cst : bf16 to vector<1x18x18x4xbf16>
    %c0 = arith.constant 0 : index
    %c0_0 = arith.constant 0 : index
    %c0_1 = arith.constant 0 : index
    %c0_2 = arith.constant 0 : index
    %1 = vector.load %arg9[%c0, %c0_0, %c0_1, %c0_2] : memref<1x18x18x4xbf16, #tpu.memory_space<vmem>>, vector<1x18x18x4xbf16>
    tpu.vector_store %arg9[%c0, %c0_0, %c0_1, %c0_2], %0 {strides = array<i32>} : memref<1x18x18x4xbf16, #tpu.memory_space<vmem>>, vector<1x18x18x4xbf16>,
    %c0_3 = arith.constant 0 : index
    %c0_4 = arith.constant 0 : index
    %c0_5 = arith.constant 0 : index
    %c0_6 = arith.constant 0 : index
    %2 = vector.load %arg1[%c0_3, %c0_4, %c0_5, %c0_6] : memref<1x16x16x4xf32, #tpu.memory_space<vmem>>, vector<1x16x16x4xf32>
    %3 = arith.truncf %2 : vector<1x16x16x4xf32> to vector<1x16x16x4xbf16>
    %c0_7 = arith.constant 0 : index
    %c1 = arith.constant 1 : index
    %c1_8 = arith.constant 1 : index
    %c0_9 = arith.constant 0 : index
    %4 = vector.load %arg9[%c0_7, %c1, %c1_8, %c0_9] : memref<1x18x18x4xbf16, #tpu.memory_space<vmem>>, vector<1x16x16x4xbf16>
    tpu.vector_store %arg9[%c0_7, %c1, %c1_8, %c0_9], %3 {strides = array<i32>} : memref<1x18x18x4xbf16, #tpu.memory_space<vmem>>, vector<1x16x16x4xbf16>,
    %c0_10 = arith.constant 0 : index
    %c0_11 = arith.constant 0 : index
    %c0_12 = arith.constant 0 : index
    %c0_13 = arith.constant 0 : index
    %5 = vector.load %arg9[%c0_10, %c0_11, %c0_12, %c0_13] : memref<1x18x18x4xbf16, #tpu.memory_space<vmem>>, vector<1x16x16x4xbf16>
    %6 = vector.shape_cast %5 : vector<1x16x16x4xbf16> to vector<256x4xbf16>
    %c0_14 = arith.constant 0 : index
    %c0_15 = arith.constant 0 : index
    %7 = vector.load %arg10[%c0_14, %c0_15] : memref<256x36xbf16, #tpu.memory_space<vmem>>, vector<256x4xbf16>
    tpu.vector_store %arg10[%c0_14, %c0_15], %6 {strides = array<i32>} : memref<256x36xbf16, #tpu.memory_space<vmem>>, vector<256x4xbf16>,
    %c0_16 = arith.constant 0 : index
    %c0_17 = arith.constant 0 : index
    %c1_18 = arith.constant 1 : index
    %c0_19 = arith.constant 0 : index
    %8 = vector.load %arg9[%c0_16, %c0_17, %c1_18, %c0_19] : memref<1x18x18x4xbf16, #tpu.memory_space<vmem>>, vector<1x16x16x4xbf16>
    %9 = vector.shape_cast %8 : vector<1x16x16x4xbf16> to vector<256x4xbf16>
    %c0_20 = arith.constant 0 : index
    %c4 = arith.constant 4 : index
    %10 = vector.load %arg10[%c0_20, %c4] : memref<256x36xbf16, #tpu.memory_space<vmem>>, vector<256x4xbf16>
    tpu.vector_store %arg10[%c0_20, %c4], %9 {strides = array<i32>} : memref<256x36xbf16, #tpu.memory_space<vmem>>, vector<256x4xbf16>,
    %c0_21 = arith.constant 0 : index
    %c0_22 = arith.constant 0 : index
    %c2 = arith.constant 2 : index
    %c0_23 = arith.constant 0 : index
    %11 = vector.load %arg9[%c0_21, %c0_22, %c2, %c0_23] : memref<1x18x18x4xbf16, #tpu.memory_space<vmem>>, vector<1x16x16x4xbf16>
    %12 = vector.shape_cast %11 : vector<1x16x16x4xbf16> to vector<256x4xbf16>
    %c0_24 = arith.constant 0 : index
    %c8 = arith.constant 8 : index
    %13 = vector.load %arg10[%c0_24, %c8] : memref<256x36xbf16, #tpu.memory_space<vmem>>, vector<256x4xbf16>
    tpu.vector_store %arg10[%c0_24, %c8], %12 {strides = array<i32>} : memref<256x36xbf16, #tpu.memory_space<vmem>>, vector<256x4xbf16>,
    %c0_25 = arith.constant 0 : index
    %c1_26 = arith.constant 1 : index
    %c0_27 = arith.constant 0 : index
    %c0_28 = arith.constant 0 : index
    %14 = vector.load %arg9[%c0_25, %c1_26, %c0_27, %c0_28] : memref<1x18x18x4xbf16, #tpu.memory_space<vmem>>, vector<1x16x16x4xbf16>
    %15 = vector.shape_cast %14 : vector<1x16x16x4xbf16> to vector<256x4xbf16>
    %c0_29 = arith.constant 0 : index
    %c12 = arith.constant 12 : index
    %16 = vector.load %arg10[%c0_29, %c12] : memref<256x36xbf16, #tpu.memory_space<vmem>>, vector<256x4xbf16>
    tpu.vector_store %arg10[%c0_29, %c12], %15 {strides = array<i32>} : memref<256x36xbf16, #tpu.memory_space<vmem>>, vector<256x4xbf16>,
    %c0_30 = arith.constant 0 : index
    %c1_31 = arith.constant 1 : index
    %c1_32 = arith.constant 1 : index
    %c0_33 = arith.constant 0 : index
    %17 = vector.load %arg9[%c0_30, %c1_31, %c1_32, %c0_33] : memref<1x18x18x4xbf16, #tpu.memory_space<vmem>>, vector<1x16x16x4xbf16>
    %18 = vector.shape_cast %17 : vector<1x16x16x4xbf16> to vector<256x4xbf16>
    %c0_34 = arith.constant 0 : index
    %c16 = arith.constant 16 : index
    %19 = vector.load %arg10[%c0_34, %c16] : memref<256x36xbf16, #tpu.memory_space<vmem>>, vector<256x4xbf16>
    tpu.vector_store %arg10[%c0_34, %c16], %18 {strides = array<i32>} : memref<256x36xbf16, #tpu.memory_space<vmem>>, vector<256x4xbf16>,
    %c0_35 = arith.constant 0 : index
    %c1_36 = arith.constant 1 : index
    %c2_37 = arith.constant 2 : index
    %c0_38 = arith.constant 0 : index
    %20 = vector.load %arg9[%c0_35, %c1_36, %c2_37, %c0_38] : memref<1x18x18x4xbf16, #tpu.memory_space<vmem>>, vector<1x16x16x4xbf16>
    %21 = vector.shape_cast %20 : vector<1x16x16x4xbf16> to vector<256x4xbf16>
    %c0_39 = arith.constant 0 : index
    %c20 = arith.constant 20 : index
    %22 = vector.load %arg10[%c0_39, %c20] : memref<256x36xbf16, #tpu.memory_space<vmem>>, vector<256x4xbf16>
    tpu.vector_store %arg10[%c0_39, %c20], %21 {strides = array<i32>} : memref<256x36xbf16, #tpu.memory_space<vmem>>, vector<256x4xbf16>,
    %c0_40 = arith.constant 0 : index
    %c2_41 = arith.constant 2 : index
    %c0_42 = arith.constant 0 : index
    %c0_43 = arith.constant 0 : index
    %23 = vector.load %arg9[%c0_40, %c2_41, %c0_42, %c0_43] : memref<1x18x18x4xbf16, #tpu.memory_space<vmem>>, vector<1x16x16x4xbf16>
    %24 = vector.shape_cast %23 : vector<1x16x16x4xbf16> to vector<256x4xbf16>
    %c0_44 = arith.constant 0 : index
    %c24 = arith.constant 24 : index
    %25 = vector.load %arg10[%c0_44, %c24] : memref<256x36xbf16, #tpu.memory_space<vmem>>, vector<256x4xbf16>
    tpu.vector_store %arg10[%c0_44, %c24], %24 {strides = array<i32>} : memref<256x36xbf16, #tpu.memory_space<vmem>>, vector<256x4xbf16>,
    %c0_45 = arith.constant 0 : index
    %c2_46 = arith.constant 2 : index
    %c1_47 = arith.constant 1 : index
    %c0_48 = arith.constant 0 : index
    %26 = vector.load %arg9[%c0_45, %c2_46, %c1_47, %c0_48] : memref<1x18x18x4xbf16, #tpu.memory_space<vmem>>, vector<1x16x16x4xbf16>
    %27 = vector.shape_cast %26 : vector<1x16x16x4xbf16> to vector<256x4xbf16>
    %c0_49 = arith.constant 0 : index
    %c28 = arith.constant 28 : index
    %28 = vector.load %arg10[%c0_49, %c28] : memref<256x36xbf16, #tpu.memory_space<vmem>>, vector<256x4xbf16>
    tpu.vector_store %arg10[%c0_49, %c28], %27 {strides = array<i32>} : memref<256x36xbf16, #tpu.memory_space<vmem>>, vector<256x4xbf16>,
    %c0_50 = arith.constant 0 : index
    %c2_51 = arith.constant 2 : index
    %c2_52 = arith.constant 2 : index
    %c0_53 = arith.constant 0 : index
    %29 = vector.load %arg9[%c0_50, %c2_51, %c2_52, %c0_53] : memref<1x18x18x4xbf16, #tpu.memory_space<vmem>>, vector<1x16x16x4xbf16>
    %30 = vector.shape_cast %29 : vector<1x16x16x4xbf16> to vector<256x4xbf16>
    %c0_54 = arith.constant 0 : index
    %c32 = arith.constant 32 : index
    %31 = vector.load %arg10[%c0_54, %c32] : memref<256x36xbf16, #tpu.memory_space<vmem>>, vector<256x4xbf16>
    tpu.vector_store %arg10[%c0_54, %c32], %30 {strides = array<i32>} : memref<256x36xbf16, #tpu.memory_space<vmem>>, vector<256x4xbf16>,
    %c0_55 = arith.constant 0 : index
    %c0_56 = arith.constant 0 : index
    %32 = vector.load %arg10[%c0_55, %c0_56] : memref<256x36xbf16, #tpu.memory_space<vmem>>, vector<256x36xbf16>
    %c0_57 = arith.constant 0 : index
    %c0_58 = arith.constant 0 : index
    %33 = vector.load %arg2[%c0_57, %c0_58] : memref<36x4xbf16, #tpu.memory_space<vmem>>, vector<36x4xbf16>
    %cst_59 = arith.constant dense<0.000000e+00> : vector<256x4xf32>
    %34 = tpu.matmul %32, %33, %cst_59 {dimension_numbers = #tpu.dot_dimension_numbers<[1], [0], [0], [1], [0, 0, 1, 1], [], []>} : vector<256x36xbf16>, vector<36x4xbf16>, vector<256x4xf32> -> vector<256x4xf32>
    %c0_60 = arith.constant 0 : index
    %c0_61 = arith.constant 0 : index
    %35 = vector.load %arg4[%c0_60, %c0_61] : memref<1x4xf32, #tpu.memory_space<vmem>>, vector<1x4xf32>
    %36 = vector.broadcast %35 : vector<1x4xf32> to vector<256x4xf32>
    %37 = arith.mulf %34, %36 : vector<256x4xf32>
    %c0_62 = arith.constant 0 : index
    %c0_63 = arith.constant 0 : index
    %38 = vector.load %arg5[%c0_62, %c0_63] : memref<1x4xf32, #tpu.memory_space<vmem>>, vector<1x4xf32>
    %39 = vector.broadcast %38 : vector<1x4xf32> to vector<256x4xf32>
    %40 = arith.addf %37, %39 : vector<256x4xf32>
    %cst_64 = arith.constant 0.000000e+00 : f32
    %41 = vector.broadcast %cst_64 : f32 to vector<256x4xf32>
    %42 = arith.maximumf %40, %41 : vector<256x4xf32>
    %cst_65 = arith.constant 0.000000e+00 : bf16
    %43 = vector.broadcast %cst_65 : bf16 to vector<1x18x18x4xbf16>
    %c0_66 = arith.constant 0 : index
    %c0_67 = arith.constant 0 : index
    %c0_68 = arith.constant 0 : index
    %c0_69 = arith.constant 0 : index
    %44 = vector.load %arg11[%c0_66, %c0_67, %c0_68, %c0_69] : memref<1x18x18x4xbf16, #tpu.memory_space<vmem>>, vector<1x18x18x4xbf16>
    tpu.vector_store %arg11[%c0_66, %c0_67, %c0_68, %c0_69], %43 {strides = array<i32>} : memref<1x18x18x4xbf16, #tpu.memory_space<vmem>>, vector<1x18x18x4xbf16>,
    %45 = vector.shape_cast %42 : vector<256x4xf32> to vector<1x16x16x4xf32>
    %46 = arith.truncf %45 : vector<1x16x16x4xf32> to vector<1x16x16x4xbf16>
    %c0_70 = arith.constant 0 : index
    %c1_71 = arith.constant 1 : index
    %c1_72 = arith.constant 1 : index
    %c0_73 = arith.constant 0 : index
    %47 = vector.load %arg11[%c0_70, %c1_71, %c1_72, %c0_73] : memref<1x18x18x4xbf16, #tpu.memory_space<vmem>>, vector<1x16x16x4xbf16>
    tpu.vector_store %arg11[%c0_70, %c1_71, %c1_72, %c0_73], %46 {strides = array<i32>} : memref<1x18x18x4xbf16, #tpu.memory_space<vmem>>, vector<1x16x16x4xbf16>,
    %c0_74 = arith.constant 0 : index
    %c0_75 = arith.constant 0 : index
    %c0_76 = arith.constant 0 : index
    %c0_77 = arith.constant 0 : index
    %48 = vector.load %arg11[%c0_74, %c0_75, %c0_76, %c0_77] : memref<1x18x18x4xbf16, #tpu.memory_space<vmem>>, vector<1x16x16x4xbf16>
    %49 = vector.shape_cast %48 : vector<1x16x16x4xbf16> to vector<256x4xbf16>
    %c0_78 = arith.constant 0 : index
    %c0_79 = arith.constant 0 : index
    %50 = vector.load %arg12[%c0_78, %c0_79] : memref<256x36xbf16, #tpu.memory_space<vmem>>, vector<256x4xbf16>
    tpu.vector_store %arg12[%c0_78, %c0_79], %49 {strides = array<i32>} : memref<256x36xbf16, #tpu.memory_space<vmem>>, vector<256x4xbf16>,
    %c0_80 = arith.constant 0 : index
    %c0_81 = arith.constant 0 : index
    %c1_82 = arith.constant 1 : index
    %c0_83 = arith.constant 0 : index
    %51 = vector.load %arg11[%c0_80, %c0_81, %c1_82, %c0_83] : memref<1x18x18x4xbf16, #tpu.memory_space<vmem>>, vector<1x16x16x4xbf16>
    %52 = vector.shape_cast %51 : vector<1x16x16x4xbf16> to vector<256x4xbf16>
    %c0_84 = arith.constant 0 : index
    %c4_85 = arith.constant 4 : index
    %53 = vector.load %arg12[%c0_84, %c4_85] : memref<256x36xbf16, #tpu.memory_space<vmem>>, vector<256x4xbf16>
    tpu.vector_store %arg12[%c0_84, %c4_85], %52 {strides = array<i32>} : memref<256x36xbf16, #tpu.memory_space<vmem>>, vector<256x4xbf16>,
    %c0_86 = arith.constant 0 : index
    %c0_87 = arith.constant 0 : index
    %c2_88 = arith.constant 2 : index
    %c0_89 = arith.constant 0 : index
    %54 = vector.load %arg11[%c0_86, %c0_87, %c2_88, %c0_89] : memref<1x18x18x4xbf16, #tpu.memory_space<vmem>>, vector<1x16x16x4xbf16>
    %55 = vector.shape_cast %54 : vector<1x16x16x4xbf16> to vector<256x4xbf16>
    %c0_90 = arith.constant 0 : index
    %c8_91 = arith.constant 8 : index
    %56 = vector.load %arg12[%c0_90, %c8_91] : memref<256x36xbf16, #tpu.memory_space<vmem>>, vector<256x4xbf16>
    tpu.vector_store %arg12[%c0_90, %c8_91], %55 {strides = array<i32>} : memref<256x36xbf16, #tpu.memory_space<vmem>>, vector<256x4xbf16>,
    %c0_92 = arith.constant 0 : index
    %c1_93 = arith.constant 1 : index
    %c0_94 = arith.constant 0 : index
    %c0_95 = arith.constant 0 : index
    %57 = vector.load %arg11[%c0_92, %c1_93, %c0_94, %c0_95] : memref<1x18x18x4xbf16, #tpu.memory_space<vmem>>, vector<1x16x16x4xbf16>
    %58 = vector.shape_cast %57 : vector<1x16x16x4xbf16> to vector<256x4xbf16>
    %c0_96 = arith.constant 0 : index
    %c12_97 = arith.constant 12 : index
    %59 = vector.load %arg12[%c0_96, %c12_97] : memref<256x36xbf16, #tpu.memory_space<vmem>>, vector<256x4xbf16>
    tpu.vector_store %arg12[%c0_96, %c12_97], %58 {strides = array<i32>} : memref<256x36xbf16, #tpu.memory_space<vmem>>, vector<256x4xbf16>,
    %c0_98 = arith.constant 0 : index
    %c1_99 = arith.constant 1 : index
    %c1_100 = arith.constant 1 : index
    %c0_101 = arith.constant 0 : index
    %60 = vector.load %arg11[%c0_98, %c1_99, %c1_100, %c0_101] : memref<1x18x18x4xbf16, #tpu.memory_space<vmem>>, vector<1x16x16x4xbf16>
    %61 = vector.shape_cast %60 : vector<1x16x16x4xbf16> to vector<256x4xbf16>
    %c0_102 = arith.constant 0 : index
    %c16_103 = arith.constant 16 : index
    %62 = vector.load %arg12[%c0_102, %c16_103] : memref<256x36xbf16, #tpu.memory_space<vmem>>, vector<256x4xbf16>
    tpu.vector_store %arg12[%c0_102, %c16_103], %61 {strides = array<i32>} : memref<256x36xbf16, #tpu.memory_space<vmem>>, vector<256x4xbf16>,
    %c0_104 = arith.constant 0 : index
    %c1_105 = arith.constant 1 : index
    %c2_106 = arith.constant 2 : index
    %c0_107 = arith.constant 0 : index
    %63 = vector.load %arg11[%c0_104, %c1_105, %c2_106, %c0_107] : memref<1x18x18x4xbf16, #tpu.memory_space<vmem>>, vector<1x16x16x4xbf16>
    %64 = vector.shape_cast %63 : vector<1x16x16x4xbf16> to vector<256x4xbf16>
    %c0_108 = arith.constant 0 : index
    %c20_109 = arith.constant 20 : index
    %65 = vector.load %arg12[%c0_108, %c20_109] : memref<256x36xbf16, #tpu.memory_space<vmem>>, vector<256x4xbf16>
    tpu.vector_store %arg12[%c0_108, %c20_109], %64 {strides = array<i32>} : memref<256x36xbf16, #tpu.memory_space<vmem>>, vector<256x4xbf16>,
    %c0_110 = arith.constant 0 : index
    %c2_111 = arith.constant 2 : index
    %c0_112 = arith.constant 0 : index
    %c0_113 = arith.constant 0 : index
    %66 = vector.load %arg11[%c0_110, %c2_111, %c0_112, %c0_113] : memref<1x18x18x4xbf16, #tpu.memory_space<vmem>>, vector<1x16x16x4xbf16>
    %67 = vector.shape_cast %66 : vector<1x16x16x4xbf16> to vector<256x4xbf16>
    %c0_114 = arith.constant 0 : index
    %c24_115 = arith.constant 24 : index
    %68 = vector.load %arg12[%c0_114, %c24_115] : memref<256x36xbf16, #tpu.memory_space<vmem>>, vector<256x4xbf16>
    tpu.vector_store %arg12[%c0_114, %c24_115], %67 {strides = array<i32>} : memref<256x36xbf16, #tpu.memory_space<vmem>>, vector<256x4xbf16>,
    %c0_116 = arith.constant 0 : index
    %c2_117 = arith.constant 2 : index
    %c1_118 = arith.constant 1 : index
    %c0_119 = arith.constant 0 : index
    %69 = vector.load %arg11[%c0_116, %c2_117, %c1_118, %c0_119] : memref<1x18x18x4xbf16, #tpu.memory_space<vmem>>, vector<1x16x16x4xbf16>
    %70 = vector.shape_cast %69 : vector<1x16x16x4xbf16> to vector<256x4xbf16>
    %c0_120 = arith.constant 0 : index
    %c28_121 = arith.constant 28 : index
    %71 = vector.load %arg12[%c0_120, %c28_121] : memref<256x36xbf16, #tpu.memory_space<vmem>>, vector<256x4xbf16>
    tpu.vector_store %arg12[%c0_120, %c28_121], %70 {strides = array<i32>} : memref<256x36xbf16, #tpu.memory_space<vmem>>, vector<256x4xbf16>,
    %c0_122 = arith.constant 0 : index
    %c2_123 = arith.constant 2 : index
    %c2_124 = arith.constant 2 : index
    %c0_125 = arith.constant 0 : index
    %72 = vector.load %arg11[%c0_122, %c2_123, %c2_124, %c0_125] : memref<1x18x18x4xbf16, #tpu.memory_space<vmem>>, vector<1x16x16x4xbf16>
    %73 = vector.shape_cast %72 : vector<1x16x16x4xbf16> to vector<256x4xbf16>
    %c0_126 = arith.constant 0 : index
    %c32_127 = arith.constant 32 : index
    %74 = vector.load %arg12[%c0_126, %c32_127] : memref<256x36xbf16, #tpu.memory_space<vmem>>, vector<256x4xbf16>
    tpu.vector_store %arg12[%c0_126, %c32_127], %73 {strides = array<i32>} : memref<256x36xbf16, #tpu.memory_space<vmem>>, vector<256x4xbf16>,
    %c0_128 = arith.constant 0 : index
    %c0_129 = arith.constant 0 : index
    %75 = vector.load %arg12[%c0_128, %c0_129] : memref<256x36xbf16, #tpu.memory_space<vmem>>, vector<256x36xbf16>
    %c0_130 = arith.constant 0 : index
    %c0_131 = arith.constant 0 : index
    %76 = vector.load %arg3[%c0_130, %c0_131] : memref<36x4xbf16, #tpu.memory_space<vmem>>, vector<36x4xbf16>
    %cst_132 = arith.constant dense<0.000000e+00> : vector<256x4xf32>
    %77 = tpu.matmul %75, %76, %cst_132 {dimension_numbers = #tpu.dot_dimension_numbers<[1], [0], [0], [1], [0, 0, 1, 1], [], []>} : vector<256x36xbf16>, vector<36x4xbf16>, vector<256x4xf32> -> vector<256x4xf32>
    %c0_133 = arith.constant 0 : index
    %c0_134 = arith.constant 0 : index
    %78 = vector.load %arg6[%c0_133, %c0_134] : memref<1x4xf32, #tpu.memory_space<vmem>>, vector<1x4xf32>
    %79 = vector.broadcast %78 : vector<1x4xf32> to vector<256x4xf32>
    %80 = arith.mulf %77, %79 : vector<256x4xf32>
    %c0_135 = arith.constant 0 : index
    %c0_136 = arith.constant 0 : index
    %81 = vector.load %arg7[%c0_135, %c0_136] : memref<1x4xf32, #tpu.memory_space<vmem>>, vector<1x4xf32>
    %82 = vector.broadcast %81 : vector<1x4xf32> to vector<256x4xf32>
    %83 = arith.addf %80, %82 : vector<256x4xf32>
    %c0_137 = arith.constant 0 : index
    %c0_138 = arith.constant 0 : index
    %c0_139 = arith.constant 0 : index
    %c0_140 = arith.constant 0 : index
    %84 = vector.load %arg1[%c0_137, %c0_138, %c0_139, %c0_140] : memref<1x16x16x4xf32, #tpu.memory_space<vmem>>, vector<1x16x16x4xf32>
    %85 = vector.shape_cast %84 : vector<1x16x16x4xf32> to vector<256x4xf32>
    %86 = arith.addf %83, %85 : vector<256x4xf32>
    %cst_141 = arith.constant 0.000000e+00 : f32
    %87 = vector.broadcast %cst_141 : f32 to vector<256x4xf32>
    %88 = arith.maximumf %86, %87 : vector<256x4xf32>
    %89 = vector.shape_cast %88 : vector<256x4xf32> to vector<1x16x16x4xf32>
    %c0_142 = arith.constant 0 : index
    %c0_143 = arith.constant 0 : index
    %c0_144 = arith.constant 0 : index
    %c0_145 = arith.constant 0 : index
    %90 = vector.load %arg8[%c0_142, %c0_143, %c0_144, %c0_145] : memref<1x16x16x4xf32, #tpu.memory_space<vmem>>, vector<1x16x16x4xf32>
    tpu.vector_store %arg8[%c0_142, %c0_143, %c0_144, %c0_145], %89 {strides = array<i32>} : memref<1x16x16x4xf32, #tpu.memory_space<vmem>>, vector<1x16x16x4xf32>,
    return
  }
  func.func @transform_0(%arg0: i32) -> (i32, i32, i32, i32) {
    %c0_i32 = arith.constant 0 : i32
    %c0_i32_0 = arith.constant 0 : i32
    %c0_i32_1 = arith.constant 0 : i32
    %c0_i32_2 = arith.constant 0 : i32
    return %arg0, %c0_i32, %c0_i32_0, %c0_i32_1 : i32, i32, i32, i32
  }
  func.func @transform_1(%arg0: i32) -> (i32, i32) {
    %c0_i32 = arith.constant 0 : i32
    %c0_i32_0 = arith.constant 0 : i32
    %c0_i32_1 = arith.constant 0 : i32
    return %c0_i32, %c0_i32_0 : i32, i32
  }
  func.func @transform_2(%arg0: i32) -> (i32, i32) {
    %c0_i32 = arith.constant 0 : i32
    %c0_i32_0 = arith.constant 0 : i32
    %c0_i32_1 = arith.constant 0 : i32
    return %c0_i32, %c0_i32_0 : i32, i32
  }
  func.func @transform_3(%arg0: i32) -> (i32, i32) {
    %c0_i32 = arith.constant 0 : i32
    %c0_i32_0 = arith.constant 0 : i32
    %c0_i32_1 = arith.constant 0 : i32
    return %c0_i32, %c0_i32_0 : i32, i32
  }
  func.func @transform_4(%arg0: i32) -> (i32, i32) {
    %c0_i32 = arith.constant 0 : i32
    %c0_i32_0 = arith.constant 0 : i32
    %c0_i32_1 = arith.constant 0 : i32
    return %c0_i32, %c0_i32_0 : i32, i32
  }
  func.func @transform_5(%arg0: i32) -> (i32, i32) {
    %c0_i32 = arith.constant 0 : i32
    %c0_i32_0 = arith.constant 0 : i32
    %c0_i32_1 = arith.constant 0 : i32
    return %c0_i32, %c0_i32_0 : i32, i32
  }
  func.func @transform_6(%arg0: i32) -> (i32, i32) {
    %c0_i32 = arith.constant 0 : i32
    %c0_i32_0 = arith.constant 0 : i32
    %c0_i32_1 = arith.constant 0 : i32
    return %c0_i32, %c0_i32_0 : i32, i32
  }
  func.func @transform_7(%arg0: i32) -> (i32, i32, i32, i32) {
    %c0_i32 = arith.constant 0 : i32
    %c0_i32_0 = arith.constant 0 : i32
    %c0_i32_1 = arith.constant 0 : i32
    %c0_i32_2 = arith.constant 0 : i32
    return %arg0, %c0_i32, %c0_i32_0, %c0_i32_1 : i32, i32, i32, i32
  }
}

</mosaic_0001>

<bundles_post_ra>
// kernel: tpu_custom_call.1
= control target key start
LH: loop header
LB: loop body
LE: loop exit
PB: predicated region body
PF: predicated region fallthrough
CT: control target
= control target key end

     0   :  { %s9416_s24 = smov 0   ;;  %s11978_s0 = inlined_call_operand.vmem [shape: f32[2,16,16,4], index: 0, kind: input, shape index: {}]   ;;  %s11979_s1 = inlined_call_operand.vmem [shape: bf16[36,4], index: 1, kind: input, shape index: {}]   ;;  %s11980_s2 = inlined_call_operand.vmem [shape: bf16[36,4], index: 2, kind: input, shape index: {}]   ;;  %s11981_s3 = inlined_call_operand.vmem [shape: f32[1,4], index: 3, kind: input, shape index: {}]   ;;  %s11982_s4 = inlined_call_operand.vmem [shape: f32[1,4], index: 4, kind: input, shape index: {}]   ;;  %s11983_s5 = inlined_call_operand.vmem [shape: f32[1,4], index: 5, kind: input, shape index: {}]   ;;  %s11984_s6 = inlined_call_operand.vmem [shape: f32[1,4], index: 6, kind: input, shape index: {}]   ;;  %s11985_s7 = inlined_call_operand.vmem [shape: f32[2,16,16,4], index: 7, kind: output, shape index: {}]  }
   0x1 LB: > { %s8550_s25 = sadd.s32 4294967295, %s9365_s24   ;;  %p8554_p0 = scmp.ge.s32.totalorder %s9365_s24, 1  ;;  %s9365_s24 = sphi %s9416_s24, %s17_s24  }
   0x2   : > { %p237_p1 = scmp.lt.s32.totalorder %s9365_s24, 3 }
   0x4   : > { %p238_p2 = pnand %p8554_p0, %p237_p1 }
   0x5   : > { %vm280_vm0 = vcmask (!%p238_p2), 27648   ;;  %vm283_vm1 = vcmask (!%p238_p2), 24576   ;;  %v9367_v0 = vmov (!%p238_p2), 0   ;;  %p269_p3 = scmp.lt.s32.totalorder (!%p238_p2), %s8550_s25, 1  ;;  %vm1098_vm2 = vsmask.f32 (!%p238_p2), 3328 }
   0x6   : > { %241 = sbr.rel (%p238_p2) target bundleno = 1232 (0x4d0), region = 48  ;;  %281 = vst.msk [vmem:[#allocation2] sm:$0xf] (!%p238_p2), %vm280_vm0, %v9367_v0  ;;  %282 = vst.msk [vmem:[#allocation2 + $0x4] sm:$0xf] (!%p238_p2), %vm280_vm0, %v9367_v0  ;;  %vm1694_vm5 = vcmask (!%p238_p2), 1042432  }
   0x7   : > { %284 = vst.msk [vmem:[#allocation2 + $0x8] sm:$0x1] (!%p238_p2), %vm283_vm1, %v9367_v0  ;;  %287 = vst.msk [vmem:[#allocation2 + $0x14] sm:$0x1] (!%p238_p2), %vm283_vm1, %v9367_v0  ;;  %vm1099_vm3 = vsmask.f32 (!%p238_p2), 7440 }
   0x8   : > { %285 = vst.msk [vmem:[#allocation2 + $0xc] sm:$0xf] (!%p238_p2), %vm280_vm0, %v9367_v0  ;;  %286 = vst.msk [vmem:[#allocation2 + $0x10] sm:$0xf] (!%p238_p2), %vm280_vm0, %v9367_v0  ;;  %vm464_vm4 = vsmask.f32 (!%p238_p2), 256 }
   0x9   : > { %288 = vst.msk [vmem:[#allocation2 + $0x18] sm:$0xf] (!%p238_p2), %vm280_vm0, %v9367_v0  ;;  %289 = vst.msk [vmem:[#allocation2 + $0x1c] sm:$0xf] (!%p238_p2), %vm280_vm0, %v9367_v0  ;;  %vm465_vm6 = vsmask.f32 (!%p238_p2), 4368 }
   0xa   : > { %290 = vst.msk [vmem:[#allocation2 + $0x20] sm:$0x1] (!%p238_p2), %vm283_vm1, %v9367_v0  ;;  %293 = vst.msk [vmem:[#allocation2 + $0x2c] sm:$0x1] (!%p238_p2), %vm283_vm1, %v9367_v0  ;;  %vm1695_vm7 = vcmask (!%p238_p2), 1046532   ;;  %s9368_s30 = smov (!%p238_p2), 8  }
   0xb   : > { %291 = vst.msk [vmem:[#allocation2 + $0x24] sm:$0xf] (!%p238_p2), %vm280_vm0, %v9367_v0  ;;  %292 = vst.msk [vmem:[#allocation2 + $0x28] sm:$0xf] (!%p238_p2), %vm280_vm0, %v9367_v0  ;;  %vm789_vm8 = vsmask.f32 (!%p238_p2), 7938 }
   0xc   : > { %294 = vst.msk [vmem:[#allocation2 + $0x30] sm:$0xf] (!%p238_p2), %vm280_vm0, %v9367_v0  ;;  %295 = vst.msk [vmem:[#allocation2 + $0x34] sm:$0xf] (!%p238_p2), %vm280_vm0, %v9367_v0  ;;  %s9369_s8 = smov (!%p238_p2), 4   ;;  %s9370_s9 = smov (!%p238_p2), 12  }
   0xd   : > { %296 = vst.msk [vmem:[#allocation2 + $0x38] sm:$0x1] %vm283_vm1, %v9367_v0  ;;  %299 = vst.msk [vmem:[#allocation2 + $0x44] sm:$0x1] %vm283_vm1, %v9367_v0  ;;  %s12051_s25 = smov (!%p269_p3, %s8550_s25), 1  ;;  %s9371_s10 = smov 24  }
   0xe   : > { %297 = vst.msk [vmem:[#allocation2 + $0x3c] sm:$0xf] %vm280_vm0, %v9367_v0  ;;  %298 = vst.msk [vmem:[#allocation2 + $0x40] sm:$0xf] %vm280_vm0, %v9367_v0  ;;  %s9051_s26 = sshll.u32 %s12051_s25, 8  ;;  %s9372_s11 = smov 20  }
   0xf   : > { %300 = vst.msk [vmem:[#allocation2 + $0x48] sm:$0xf] %vm280_vm0, %v9367_v0  ;;  %301 = vst.msk [vmem:[#allocation2 + $0x4c] sm:$0xf] %vm280_vm0, %v9367_v0  ;;  %s9652_s29 = scalar_lea.vmem %s11978_s0, %s9051_s26  ;;  %v1050_v4 = vld [vmem:[#allocation2] sm:$0xf] }
  0x10   : > { %302 = vst.msk [vmem:[#allocation2 + $0x50] sm:$0x1] %vm283_vm1, %v9367_v0  ;;  %305 = vst.msk [vmem:[#allocation2 + $0x5c] sm:$0x1] %vm283_vm1, %v9367_v0  ;;  %v336_v1 = vld [vmem:[%s9652_s29] sm:$0xff]  ;;  %v337_v2 = vld [vmem:[%s9652_s29 + $0x8] sm:$0xff] }
  0x11   : > { %303 = vst.msk [vmem:[#allocation2 + $0x54] sm:$0xf] %vm280_vm0, %v9367_v0  ;;  %304 = vst.msk [vmem:[#allocation2 + $0x58] sm:$0xf] %vm280_vm0, %v9367_v0  ;;  %v338_v3 = vld [vmem:[%s9652_s29 + $0x10] sm:$0xff]  ;;  %v9053_v7 = vpack.c.bf16 %v336_v1, %v336_v1  ;;  %v9054_v8 = vpack.c.bf16 %v337_v2, %v337_v2  ;;  %v1102_v9 = vshrl.u32 %v1050_v4, 16 }
  0x12   : > { %306 = vst.msk [vmem:[#allocation2 + $0x60] sm:$0xf] %vm280_vm0, %v9367_v0  ;;  %307 = vst.msk [vmem:[#allocation2 + $0x64] sm:$0xf] %vm280_vm0, %v9367_v0  ;;  %v1051_v5 = vld [vmem:[#allocation2 + $0x4] sm:$0xf]  ;;  %v9055_v18 = vpack.c.bf16 %v338_v3, %v338_v3 }
  0x13   : > { %308 = vst.msk [vmem:[#allocation2 + $0x68] sm:$0x1] %vm283_vm1, %v9367_v0  ;;  %311 = vst.msk [vmem:[#allocation2 + $0x74] sm:$0x1] %vm283_vm1, %v9367_v0  ;;  %v1052_v6 = vld [vmem:[#allocation2 + $0x8] sm:$0x1] }
  0x14   : > { %309 = vst.msk [vmem:[#allocation2 + $0x6c] sm:$0xf] %vm280_vm0, %v9367_v0  ;;  %310 = vst.msk [vmem:[#allocation2 + $0x70] sm:$0xf] %vm280_vm0, %v9367_v0  ;;  %v1105_v10 = vshll.u32 %v1050_v4, 16  ;;  %v1111_v11 = vshll.u32 %v1051_v5, 16 }
  0x15   : > { %312 = vst.msk [vmem:[#allocation2 + $0x78] sm:$0xf] %vm280_vm0, %v9367_v0  ;;  %313 = vst.msk [vmem:[#allocation2 + $0x7c] sm:$0xf] %vm280_vm0, %v9367_v0  ;;  %v1115_v12 = vshrl.u32 %v1051_v5, 16  ;;  %v1121_v14 = vshll.u32 %v1052_v6, 16 }
  0x16   : > { %314 = vst.msk [vmem:[#allocation2 + $0x80] sm:$0x1] %vm283_vm1, %v9367_v0  ;;  %317 = vst.msk [vmem:[#allocation2 + $0x8c] sm:$0x1] %vm283_vm1, %v9367_v0  ;;  %v1598_v13 = vld [vmem:[#allocation2] sm:$0xe] }
  0x17   : > { %315 = vst.msk [vmem:[#allocation2 + $0x84] sm:$0xf] %vm280_vm0, %v9367_v0  ;;  %316 = vst.msk [vmem:[#allocation2 + $0x88] sm:$0xf] %vm280_vm0, %v9367_v0  ;;  %v1599_v15 = vld [vmem:[#allocation2 + $0x4] sm:$0xf] }
  0x18   : > { %318 = vst.msk [vmem:[#allocation2 + $0x90] sm:$0xf] %vm280_vm0, %v9367_v0  ;;  %319 = vst.msk [vmem:[#allocation2 + $0x94] sm:$0xf] %vm280_vm0, %v9367_v0  ;;  %v1600_v16 = vld [vmem:[#allocation2 + $0x8] sm:$0x1] }
  0x19   : > { %320 = vst.msk [vmem:[#allocation2 + $0x98] sm:$0x1] %vm283_vm1, %v9367_v0  ;;  %323 = vst.msk [vmem:[#allocation2 + $0xa4] sm:$0x1] %vm283_vm1, %v9367_v0  ;;  %v8623_v17 = vrot.slane %v1598_v13, 9  ;;  %v1104_v19 = vrot.slane %v1102_v9, 4 }
  0x1a   : > { %321 = vst.msk [vmem:[#allocation2 + $0x9c] sm:$0xf] %vm280_vm0, %v9367_v0  ;;  %322 = vst.msk [vmem:[#allocation2 + $0xa0] sm:$0xf] %vm280_vm0, %v9367_v0  ;;  %v1107_v20 = vrot.slane %v1105_v10, 5  ;;  %v1113_v21 = vrot.slane %v1111_v11, 5 }
  0x1b   : > { %324 = vst.msk [vmem:[#allocation2 + $0xa8] sm:$0xf] %vm280_vm0, %v9367_v0  ;;  %325 = vst.msk [vmem:[#allocation2 + $0xac] sm:$0xf] %vm280_vm0, %v9367_v0  ;;  %v1117_v22 = vrot.slane %v1115_v12, 4  ;;  %v1123_v24 = vrot.slane %v1121_v14, 5 }
  0x1c   : > { %326 = vst.msk [vmem:[#allocation2 + $0xb0] sm:$0x1] %vm283_vm1, %v9367_v0  ;;  %329 = vst.msk [vmem:[#allocation2 + $0xbc] sm:$0x1] %vm283_vm1, %v9367_v0  ;;  %v1699_v25 = vrot.slane %v1599_v15, 5  ;;  %v1702_v26 = vrot.slane %v1600_v16, 5  ;;  %v1108_v30 = vor.u32 %v1107_v20, %v1104_v19 }
  0x1d   : > { %327 = vst.msk [vmem:[#allocation2 + $0xb4] sm:$0xf] %vm280_vm0, %v9367_v0  ;;  %328 = vst.msk [vmem:[#allocation2 + $0xb8] sm:$0xf] %vm280_vm0, %v9367_v0  ;;  %v468_v27 = vshrl.u32 %v9053_v7, 16  ;;  %v339_v28 = vld [vmem:[%s9652_s29 + $0x18] sm:$0xff]  ;;  %v1118_v31 = vor.u32 %v1117_v22, %v1113_v21 }
  0x1e   : > { %330 = vst.msk [vmem:[#allocation2 + $0xc0] sm:$0xf] %vm280_vm0, %v9367_v0  ;;  %331 = vst.msk [vmem:[#allocation2 + $0xc4] sm:$0xf] %vm280_vm0, %v9367_v0  ;;  %v471_v32 = vshll.u32 %v9053_v7, 16  ;;  %v476_v33 = vshrl.u32 %v9054_v8, 16  ;;  %v9056_v44 = vpack.c.bf16 %v339_v28, %v339_v28 }
  0x1f   : > { %332 = vst.msk [vmem:[#allocation2 + $0xc8] sm:$0x1] %vm283_vm1, %v9367_v0  ;;  %335 = vst.msk [vmem:[#allocation2 + $0xd4] sm:$0x1] %vm283_vm1, %v9367_v0  ;;  %v1701_v35 = vrot.slane %v1699_v25, 4  ;;  %v470_v37 = vrot.slane %v468_v27, 7 }
  0x20   : > { %333 = vst.msk [vmem:[#allocation2 + $0xcc] sm:$0xf] %vm280_vm0, %v9367_v0  ;;  %334 = vst.msk [vmem:[#allocation2 + $0xd0] sm:$0xf] %vm280_vm0, %v9367_v0  ;;  %v479_v38 = vshll.u32 %v9054_v8, 16  ;;  %v1109_v39 = vrot.slane %v1108_v30, 4 }
  0x21   : > { %4369 = vst.msk [vmem:[#allocation4] sm:$0xf] %vm280_vm0, %v9367_v0  ;;  %4370 = vst.msk [vmem:[#allocation4 + $0x4] sm:$0xf] %vm280_vm0, %v9367_v0  ;;  %v1119_v40 = vrot.slane %v1118_v31, 4  ;;  %v478_v41 = vrot.slane %v476_v33, 7  ;;  %v473_v46 = vor.u32 %v471_v32, %v470_v37 }
  0x22   : > { %4371 = vst.msk [vmem:[#allocation4 + $0x8] sm:$0x1] %vm283_vm1, %v9367_v0  ;;  %4374 = vst.msk [vmem:[#allocation4 + $0x14] sm:$0x1] %vm283_vm1, %v9367_v0  ;;  %v791_v43 = vld [vmem:[#allocation2 + $0xc] sm:$0xf] }
  0x23   : > { %4372 = vst.msk [vmem:[#allocation4 + $0xc] sm:$0xf] %vm280_vm0, %v9367_v0  ;;  %4373 = vst.msk [vmem:[#allocation4 + $0x10] sm:$0xf] %vm280_vm0, %v9367_v0  ;;  %v474_v47 = vrot.slane %v470_v37, 4  ;;  %v485_v49 = vshrl.u32 %v9055_v18, 16  ;;  %v481_v53 = vor.u32 %v479_v38, %v478_v41 }
  0x24   : > { %4375 = vst.msk [vmem:[#allocation4 + $0x18] sm:$0xf] %vm280_vm0, %v9367_v0  ;;  %4376 = vst.msk [vmem:[#allocation4 + $0x1c] sm:$0xf] %vm280_vm0, %v9367_v0  ;;  %v340_v54 = vld [vmem:[%s9652_s29 + $0x20] sm:$0xff]  ;;  %v341_v55 = vld [vmem:[%s9652_s29 + $0x28] sm:$0xff] }
  0x25   : > { %4377 = vst.msk [vmem:[#allocation4 + $0x20] sm:$0x1] %vm283_vm1, %v9367_v0  ;;  %4380 = vst.msk [vmem:[#allocation4 + $0x2c] sm:$0x1] %vm283_vm1, %v9367_v0  ;;  %v797_v56 = vld [vmem:[#allocation2 + $0x14] sm:$0x1]  ;;  %v9057_v5 = vpack.c.bf16 %v340_v54, %v340_v54  ;;  %v9058_v6 = vpack.c.bf16 %v341_v55, %v341_v55 }
  0x26   : > { %4378 = vst.msk [vmem:[#allocation4 + $0x24] sm:$0xf] %vm280_vm0, %v9367_v0  ;;  %4379 = vst.msk [vmem:[#allocation4 + $0x28] sm:$0xf] %vm280_vm0, %v9367_v0  ;;  %v483_v58 = vrot.slane %v478_v41, 4  ;;  %v487_v60 = vrot.slane %v485_v49, 7 }
  0x27   : > { %4381 = vst.msk [vmem:[#allocation4 + $0x30] sm:$0xf] %vm280_vm0, %v9367_v0  ;;  %4382 = vst.msk [vmem:[#allocation4 + $0x34] sm:$0xf] %vm280_vm0, %v9367_v0  ;;  %v342_v61 = vld [vmem:[%s9652_s29 + $0x30] sm:$0xff]  ;;  %v343_v62 = vld [vmem:[%s9652_s29 + $0x38] sm:$0xff] }
  0x28   : > { %4383 = vst.msk [vmem:[#allocation4 + $0x38] sm:$0x1] %vm283_vm1, %v9367_v0  ;;  %4386 = vst.msk [vmem:[#allocation4 + $0x44] sm:$0x1] %vm283_vm1, %v9367_v0  ;;  %v493_v1 = vshrl.u32 %v9056_v44, 16  ;;  %v496_v2 = vshll.u32 %v9056_v44, 16  ;;  %v9059_v10 = vpack.c.bf16 %v342_v61, %v342_v61  ;;  %v9709_v11 = vpack.c.bf16 %v343_v62, %v343_v62 }
  0x29   : > { %4384 = vst.msk [vmem:[#allocation4 + $0x3c] sm:$0xf] %vm280_vm0, %v9367_v0  ;;  %4385 = vst.msk [vmem:[#allocation4 + $0x40] sm:$0xf] %vm280_vm0, %v9367_v0  ;;  %v491_v3 = vrot.slane %v487_v60, 4  ;;  %v502_v12 = vshrl.u32 %v9057_v5, 16 }
  0x2a   : > { %4387 = vst.msk [vmem:[#allocation4 + $0x48] sm:$0xf] %vm280_vm0, %v9367_v0  ;;  %4388 = vst.msk [vmem:[#allocation4 + $0x4c] sm:$0xf] %vm280_vm0, %v9367_v0  ;;  %v800_v4 = vld [vmem:[#allocation2 + $0x18] sm:$0xf] }
  0x2b   : > { %4389 = vst.msk [vmem:[#allocation4 + $0x50] sm:$0x1] %vm283_vm1, %v9367_v0  ;;  %4392 = vst.msk [vmem:[#allocation4 + $0x5c] sm:$0x1] %vm283_vm1, %v9367_v0  ;;  %v495_v9 = vrot.slane %v493_v1, 7  ;;  %v505_v13 = vshll.u32 %v9057_v5, 16 }
  0x2c   : > { %4390 = vst.msk [vmem:[#allocation4 + $0x54] sm:$0xf] %vm280_vm0, %v9367_v0  ;;  %4391 = vst.msk [vmem:[#allocation4 + $0x58] sm:$0xf] %vm280_vm0, %v9367_v0  ;;  %v510_v14 = vshrl.u32 %v9058_v6, 16  ;;  %v513_v15 = vshll.u32 %v9058_v6, 16 }
  0x2d   : > { %4393 = vst.msk [vmem:[#allocation4 + $0x60] sm:$0xf] %vm280_vm0, %v9367_v0  ;;  %4394 = vst.msk [vmem:[#allocation4 + $0x64] sm:$0xf] %vm280_vm0, %v9367_v0  ;;  %v804_v16 = vld [vmem:[#allocation2 + $0x20] sm:$0x1] }
  0x2e   : > { %4395 = vst.msk [vmem:[#allocation4 + $0x68] sm:$0x1] %vm283_vm1, %v9367_v0  ;;  %4398 = vst.msk [vmem:[#allocation4 + $0x74] sm:$0x1] %vm283_vm1, %v9367_v0  ;;  %v807_v20 = vld [vmem:[#allocation2 + $0x24] sm:$0xf] }
  0x2f   : > { %4396 = vst.msk [vmem:[#allocation4 + $0x6c] sm:$0xf] %vm280_vm0, %v9367_v0  ;;  %4397 = vst.msk [vmem:[#allocation4 + $0x70] sm:$0xf] %vm280_vm0, %v9367_v0  ;;  %v519_v22 = vshrl.u32 %v9059_v10, 16  ;;  %v527_v32 = vshrl.u32 %v9709_v11, 16 }
  0x30   : > { %4399 = vst.msk [vmem:[#allocation4 + $0x78] sm:$0xf] %vm280_vm0, %v9367_v0  ;;  %4400 = vst.msk [vmem:[#allocation4 + $0x7c] sm:$0xf] %vm280_vm0, %v9367_v0  ;;  %v814_v27 = vld [vmem:[#allocation2 + $0x30] sm:$0xf] }
  0x31   : > { %4401 = vst.msk [vmem:[#allocation4 + $0x80] sm:$0x1] %vm283_vm1, %v9367_v0  ;;  %4404 = vst.msk [vmem:[#allocation4 + $0x8c] sm:$0x1] %vm283_vm1, %v9367_v0  ;;  %v9717_v31 = vrot.slane %v519_v22, 7  ;;  %s9373_s12 = smov 32  }
  0x32   : > { %4402 = vst.msk [vmem:[#allocation4 + $0x84] sm:$0xf] %vm280_vm0, %v9367_v0  ;;  %4403 = vst.msk [vmem:[#allocation4 + $0x88] sm:$0xf] %vm280_vm0, %v9367_v0  ;;  %s9374_s13 = smov 16   ;;  %s9375_s14 = smov 28  }
  0x33   : > { %4405 = vst.msk [vmem:[#allocation4 + $0x90] sm:$0xf] %vm280_vm0, %v9367_v0  ;;  %4406 = vst.msk [vmem:[#allocation4 + $0x94] sm:$0xf] %vm280_vm0, %v9367_v0  ;;  %vm11987_vm14 = vcmask 31744   ;;  %vm1581_vm15 = vcmask 64544  }
  0x34   : > { %4407 = vst.msk [vmem:[#allocation4 + $0x98] sm:$0x1] %vm283_vm1, %v9367_v0  ;;  %4410 = vst.msk [vmem:[#allocation4 + $0xa4] sm:$0x1] %vm283_vm1, %v9367_v0 }
  0x35   : > { %4408 = vst.msk [vmem:[#allocation4 + $0x9c] sm:$0xf] %vm280_vm0, %v9367_v0  ;;  %4409 = vst.msk [vmem:[#allocation4 + $0xa0] sm:$0xf] %vm280_vm0, %v9367_v0 }
  0x36   : > { %4411 = vst.msk [vmem:[#allocation4 + $0xa8] sm:$0xf] %vm280_vm0, %v9367_v0  ;;  %4412 = vst.msk [vmem:[#allocation4 + $0xac] sm:$0xf] %vm280_vm0, %v9367_v0 }
  0x37   : > { %4413 = vst.msk [vmem:[#allocation4 + $0xb0] sm:$0x1] %vm283_vm1, %v9367_v0  ;;  %4416 = vst.msk [vmem:[#allocation4 + $0xbc] sm:$0x1] %vm283_vm1, %v9367_v0 }
  0x38   : > { %4414 = vst.msk [vmem:[#allocation4 + $0xb4] sm:$0xf] %vm280_vm0, %v9367_v0  ;;  %4415 = vst.msk [vmem:[#allocation4 + $0xb8] sm:$0xf] %vm280_vm0, %v9367_v0 }
  0x39   : > { %4417 = vst.msk [vmem:[#allocation4 + $0xc0] sm:$0xf] %vm280_vm0, %v9367_v0  ;;  %4418 = vst.msk [vmem:[#allocation4 + $0xc4] sm:$0xf] %vm280_vm0, %v9367_v0 }
  0x3a   : > { %4419 = vst.msk [vmem:[#allocation4 + $0xc8] sm:$0x1] %vm283_vm1, %v9367_v0  ;;  %4422 = vst.msk [vmem:[#allocation4 + $0xd4] sm:$0x1] %vm283_vm1, %v9367_v0 }
  0x3b   : > { %4420 = vst.msk [vmem:[#allocation4 + $0xcc] sm:$0xf] %vm280_vm0, %v9367_v0  ;;  %4421 = vst.msk [vmem:[#allocation4 + $0xd0] sm:$0xf] %vm280_vm0, %v9367_v0  ;;  %v488_v0 = vshll.u32 %v9055_v18, 16  ;;  %v500_v18 = vrot.slane %v495_v9, 4 }
  0x3c   : > { %vm9659_vm9 = vmor %vm1694_vm5, %vm1695_vm7  ;;  %vm3126_vm5 = vcmask 228544   ;;  %vm3992_vm7 = vcmask 294144  }
  0x3d   : > { %vm9666_vm10 = vmor %vm1098_vm2, %vm1099_vm3  ;;  %v1700_v34 = vsel %vm9659_vm9, %v8623_v17, %v1699_v25  ;;  %v1703_v45 = vsel %vm9659_vm9, %v1701_v35, %v1702_v26  ;;  %v490_v8 = vor.u32 %v488_v0, %v487_v60  ;;  %v498_v17 = vor.u32 %v496_v2, %v495_v9  ;;  %v344_v60 = vld [vmem:[%s9652_s29 + $0x40] sm:$0xff]  ;;  %v345_v2 = vld [vmem:[%s9652_s29 + $0x48] sm:$0xff] }
  0x3e   : > { %vm9674_vm11 = vmor %vm464_vm4, %vm465_vm6  ;;  %v1114_v50 = vsel %vm9666_vm10, %v1109_v39, %v1113_v21  ;;  %v1124_v51 = vsel %vm9666_vm10, %v1119_v40, %v1123_v24  ;;  %v8639_v52 = vcombine.low %v1700_v34, %v1703_v45  ;;  %v811_v21 = vld [vmem:[#allocation2 + $0x2c] sm:$0x1]  ;;  %v504_v24 = vrot.slane %v502_v12, 7  ;;  %v4942_v42 = vld [vmem:[#allocation4 + $0xbc] sm:$0x1] }
  0x3f   : > { %vm9680_vm12 = vmand %vm280_vm0, %vm789_vm8  ;;  %v8607_v57 = vcombine.low %v1114_v50, %v1124_v51  ;;  %v482_v63 = vsel %vm9674_vm11, %v474_v47, %v481_v53  ;;  %v512_v25 = vrot.slane %v510_v14, 7  ;;  %v522_v26 = vshll.u32 %v9059_v10, 16 }
  0x40   : > { %vm9688_vm13 = vmand %vm283_vm1, %vm464_vm4  ;;  %v792_v59 = vsel %vm9680_vm12, %v473_v46, %v791_v43  ;;  %1857 = vrot.lane.b32.xlu1 %v8639_v52, %s9368_s30  ;;  %794 = vst.msk [vmem:[#allocation2 + $0x10] sm:$0xf] %vm280_vm0, %v482_v63  ;;  %v801_v19 = vsel %vm9680_vm12, %v490_v8, %v800_v4  ;;  %v499_v28 = vsel %vm9674_vm11, %v491_v3, %v498_v17  ;;  %v508_v34 = vrot.slane %v504_v24, 4 }
  0x41   : > { %793 = vst [vmem:[#allocation2 + $0xc] sm:$0xf] %v792_v59  ;;  %1533 = vrot.lane.b32.xlu0 %v8607_v57, %s9369_s8  ;;  %v798_v7 = vsel %vm9688_vm13, %v483_v58, %v797_v56  ;;  %802 = vst [vmem:[#allocation2 + $0x18] sm:$0xf] %v801_v19  ;;  %v805_v30 = vsel %vm9688_vm13, %v500_v18, %v804_v16  ;;  %v507_v33 = vor.u32 %v505_v13, %v504_v24  ;;  %vm1905_vm1 = vcmask 97344  }
  0x42   : > { %799 = vst [vmem:[#allocation2 + $0x14] sm:$0x1] %v798_v7  ;;  %803 = vst.msk [vmem:[#allocation2 + $0x1c] sm:$0xf] %vm280_vm0, %v499_v28  ;;  %v515_v35 = vor.u32 %v513_v15, %v512_v25  ;;  %v517_v37 = vrot.slane %v512_v25, 4  ;;  %v524_v41 = vor.u32 %v522_v26, %v9717_v31  ;;  %v530_v43 = vshll.u32 %v9709_v11, 16 }
  0x43   : > { %806 = vst [vmem:[#allocation2 + $0x20] sm:$0x1] %v805_v30  ;;  %v808_v45 = vsel %vm9680_vm12, %v507_v33, %v807_v20  ;;  %v9740_v16 = vpack.c.bf16 %v344_v60, %v344_v60  ;;  %v9749_v30 = vpack.c.bf16 %v345_v2, %v345_v2  ;;  %vm2082_vm2 = vcmask 130144  }
  0x44   : > { %v516_v44 = vsel %vm9674_vm11, %v508_v34, %v515_v35  ;;  %v812_v50 = vsel %vm9688_vm13, %v517_v37, %v811_v21  ;;  %809 = vst [vmem:[#allocation2 + $0x24] sm:$0xf] %v808_v45  ;;  %v815_v55 = vsel %vm9680_vm12, %v524_v41, %v814_v27  ;;  %vm2627_vm3 = vcmask 162944  }
  0x45   : > { %810 = vst.msk [vmem:[#allocation2 + $0x28] sm:$0xf] %vm280_vm0, %v516_v44  ;;  %813 = vst [vmem:[#allocation2 + $0x2c] sm:$0x1] %v812_v50  ;;  %vm2948_vm4 = vcmask 195744   ;;  %vm3671_vm6 = vcmask 261344  }
  0x46   : > { %816 = vst [vmem:[#allocation2 + $0x30] sm:$0xf] %v815_v55  ;;  %vm11986_vm8 = vcmask 1041408  }
  0x47   : > { %v2645_v40 = vld [vmem:[#allocation2 + $0x10] sm:$0xf] }
  0x48   : > { %v2644_v38 = vld [vmem:[#allocation2 + $0xc] sm:$0xe]  ;;  %v2742_v47 = vrot.slane %v2645_v40, 5  ;;  %v1602_v53 = vld [vmem:[#allocation2 + $0x10] sm:$0xf] }
  0x49   : > { %v9250_v39 = vld [vmem:[#allocation2 + $0xc] sm:$0xff]   ;;  %v2646_v46 = vld [vmem:[#allocation2 + $0x14] sm:$0x1]  ;;  %v8687_v51 = vrot.slane %v2644_v38, 9  ;;  %v1706_v58 = vrot.slane %v1602_v53, 5  ;;  %v9251_v3 = vld [vmem:[#allocation2 + $0x18] sm:$0xff]  }
  0x4a   : > { %v1601_v49 = vld [vmem:[#allocation2 + $0xc] sm:$0xe]  ;;  %2034 = vrot.lane.b32.xlu0 %v9250_v39, %s9370_s9  ;;  %v2745_v52 = vrot.slane %v2646_v46, 5  ;;  %v1603_v54 = vld [vmem:[#allocation2 + $0x14] sm:$0x1]  ;;  %v2744_v56 = vrot.slane %v2742_v47, 4  ;;  %2036 = vrot.lane.b32.xlu1 %v9251_v3, %s9370_s9 }
  0x4b   : > { %v8624_v57 = vrot.slane %v1601_v49, 9  ;;  %v1709_v59 = vrot.slane %v1603_v54, 5  ;;  %v3688_v61 = vld [vmem:[#allocation2 + $0x18] sm:$0xe]  ;;  %v1708_v62 = vrot.slane %v1706_v58, 4  ;;  %v2743_v4 = vsel %vm9659_vm9, %v8687_v51, %v2742_v47 }
  0x4c   : > { %v8751_v63 = vrot.slane %v3688_v61, 9  ;;  %v2647_v0 = vld [vmem:[#allocation2 + $0x18] sm:$0xe]  ;;  %v2746_v5 = vsel %vm9659_vm9, %v2744_v56, %v2745_v52  ;;  %v3689_v8 = vld [vmem:[#allocation2 + $0x1c] sm:$0xf]  ;;  %v9253_v17 = vld [vmem:[#allocation2 + $0x24] sm:$0xff]  }
  0x4d   : > { %v2102_v1 = vld [vmem:[#allocation2 + $0x18] sm:$0xf]  ;;  %v8688_v6 = vrot.slane %v2647_v0, 9  ;;  %v3690_v9 = vld [vmem:[#allocation2 + $0x20] sm:$0x1]  ;;  %v3786_v12 = vrot.slane %v3689_v8, 5  ;;  %v8703_v18 = vcombine.low %v2743_v4, %v2746_v5  ;;  %v1707_v19 = vsel %vm9659_vm9, %v8624_v57, %v1706_v58 }
  0x4e   : > { %v9252_v7 = vld [vmem:[#allocation2 + $0x18] sm:$0xff]   ;;  %v2172_v10 = vshrl.u32 %v2102_v1, 16  ;;  %v3789_v13 = vrot.slane %v3690_v9, 5  ;;  %v2649_v15 = vld [vmem:[#allocation2 + $0x20] sm:$0x1]  ;;  %v1710_v20 = vsel %vm9659_vm9, %v1708_v62, %v1709_v59  ;;  %3080 = vrot.lane.b32.xlu1 %v9253_v17, %s9371_s10  ;;  %v2175_v53 = vshll.u32 %v2102_v1, 16 }
  0x4f   : > { %v2648_v14 = vld [vmem:[#allocation2 + $0x1c] sm:$0xf]  ;;  %3078 = vrot.lane.b32.xlu0 %v9252_v7, %s9371_s10  ;;  %v3787_v22 = vsel %vm9659_vm9, %v8751_v63, %v3786_v12  ;;  %v3788_v24 = vrot.slane %v3786_v12, 4  ;;  %v2752_v25 = vrot.slane %v2649_v15, 5  ;;  %v3691_v26 = vld [vmem:[#allocation2 + $0x24] sm:$0xe]  ;;  %v8640_v39 = vcombine.low %v1707_v19, %v1710_v20 }
  0x50   : > { %v2749_v21 = vrot.slane %v2648_v14, 5  ;;  %v3692_v27 = vld [vmem:[#allocation2 + $0x28] sm:$0xf]  ;;  %v1053_v28 = vld [vmem:[#allocation2 + $0xc] sm:$0xf]  ;;  %v8752_v37 = vrot.slane %v3691_v26, 9 }
  0x51   : > { %v3693_v35 = vld [vmem:[#allocation2 + $0x2c] sm:$0x1]  ;;  %v3793_v38 = vrot.slane %v3692_v27, 5  ;;  %v3790_v40 = vsel %vm9659_vm9, %v3788_v24, %v3789_v13  ;;  %v2103_v44 = vld [vmem:[#allocation2 + $0x1c] sm:$0xf]  ;;  %v2174_v46 = vrot.slane %v2172_v10, 4 }
  0x52   : > { %v2750_v33 = vsel %vm9659_vm9, %v8688_v6, %v2749_v21  ;;  %v2751_v34 = vrot.slane %v2749_v21, 4  ;;  %v3796_v41 = vrot.slane %v3693_v35, 5  ;;  %v2104_v45 = vld [vmem:[#allocation2 + $0x20] sm:$0x1]  ;;  %v8767_v47 = vcombine.low %v3787_v22, %v3790_v40  ;;  %v1054_v56 = vld [vmem:[#allocation2 + $0x10] sm:$0xf]  ;;  %1859 = vrot.lane.b32.xlu1 %v8640_v39, %s9368_s30 }
  0x53   : > { %2900 = vrot.lane.b32.xlu0 %v8703_v18, %s9372_s11  ;;  %v3794_v50 = vsel %vm9659_vm9, %v8752_v37, %v3793_v38  ;;  %v3795_v51 = vrot.slane %v3793_v38, 4  ;;  %v2181_v54 = vshll.u32 %v2103_v44, 16  ;;  %v2185_v55 = vshrl.u32 %v2103_v44, 16  ;;  %v1055_v59 = vld [vmem:[#allocation2 + $0x14] sm:$0x1] }
  0x54   : > { %v2753_v49 = vsel %vm9659_vm9, %v2751_v34, %v2752_v25  ;;  %v2191_v58 = vshll.u32 %v2104_v45, 16  ;;  %v1126_v60 = vshrl.u32 %v1053_v28, 16  ;;  %v1129_v61 = vshll.u32 %v1053_v28, 16  ;;  %v3146_v3 = vld [vmem:[#allocation2 + $0x24] sm:$0xf] }
  0x55   : > { %v8704_v52 = vcombine.low %v2750_v33, %v2753_v49  ;;  %v3797_v57 = vsel %vm9659_vm9, %v3795_v51, %v3796_v41  ;;  %v2177_v63 = vrot.slane %v2175_v53, 5  ;;  %v2183_v0 = vrot.slane %v2181_v54, 5  ;;  %v3147_v12 = vld [vmem:[#allocation2 + $0x28] sm:$0xf]  ;;  %v3148_v22 = vld [vmem:[#allocation2 + $0x2c] sm:$0x1] }
  0x56   : > { %v8768_v62 = vcombine.low %v3794_v50, %v3797_v57  ;;  %v2187_v2 = vrot.slane %v2185_v55, 4  ;;  %v2193_v1 = vrot.slane %v2191_v58, 5  ;;  %v1128_v4 = vrot.slane %v1126_v60, 4  ;;  %v2099_v28 = vld [vmem:[#allocation2 + $0xc] sm:$0xf] }
  0x57   : > { %3944 = vrot.lane.b32.xlu0 %v8767_v47, %s9373_s12  ;;  %v1131_v5 = vrot.slane %v1129_v61, 5  ;;  %v1135_v6 = vshll.u32 %v1054_v56, 16  ;;  %v2178_v7 = vor.u32 %v2177_v63, %v2174_v46  ;;  %v1139_v9 = vshrl.u32 %v1054_v56, 16  ;;  %2902 = vrot.lane.b32.xlu1 %v8704_v52, %s9372_s11  ;;  %v2100_v38 = vld [vmem:[#allocation2 + $0x10] sm:$0xf] }
  0x58   : > { %v2188_v8 = vor.u32 %v2187_v2, %v2183_v0  ;;  %v1145_v10 = vshll.u32 %v1055_v59, 16  ;;  %v3216_v15 = vshrl.u32 %v3146_v3, 16  ;;  %v3219_v17 = vshll.u32 %v3146_v3, 16  ;;  %v2101_v49 = vld [vmem:[#allocation2 + $0x14] sm:$0x1] }
  0x59   : > { %v1132_v13 = vor.u32 %v1131_v5, %v1128_v4  ;;  %v1137_v14 = vrot.slane %v1135_v6, 5  ;;  %v2179_v18 = vrot.slane %v2178_v7, 4  ;;  %v1141_v20 = vrot.slane %v1139_v9, 4  ;;  %v1056_v55 = vld [vmem:[#allocation2 + $0x18] sm:$0xf] }
  0x5a   : > { %v2189_v19 = vrot.slane %v2188_v8, 4  ;;  %v1147_v21 = vrot.slane %v1145_v10, 5  ;;  %v3218_v25 = vrot.slane %v3216_v15, 4  ;;  %v3221_v26 = vrot.slane %v3219_v17, 5  ;;  %v1057_v60 = vld [vmem:[#allocation2 + $0x1c] sm:$0xf] }
  0x5b   : > { %3946 = vrot.lane.b32.xlu0 %v8768_v62, %s9373_s12  ;;  %v1133_v24 = vrot.slane %v1132_v13, 4  ;;  %v3225_v27 = vshll.u32 %v3147_v12, 16  ;;  %v2184_v33 = vsel %vm9666_vm10, %v2179_v18, %v2183_v0  ;;  %v1142_v35 = vor.u32 %v1141_v20, %v1137_v14  ;;  %v1058_v2 = vld [vmem:[#allocation2 + $0x20] sm:$0x1]  ;;  %v3143_v6 = vld [vmem:[#allocation2 + $0x18] sm:$0xf] }
  0x5c   : > { %v2194_v34 = vsel %vm9666_vm10, %v2189_v19, %v2193_v1  ;;  %v3229_v37 = vshrl.u32 %v3147_v12, 16  ;;  %v3222_v41 = vor.u32 %v3221_v26, %v3218_v25  ;;  %v3235_v47 = vshll.u32 %v3148_v22, 16  ;;  %v3144_v12 = vld [vmem:[#allocation2 + $0x1c] sm:$0xf] }
  0x5d   : > { %v8672_v39 = vcombine.low %v2184_v33, %v2194_v34  ;;  %v1138_v40 = vsel %vm9666_vm10, %v1133_v24, %v1137_v14  ;;  %v3227_v44 = vrot.slane %v3225_v27, 5  ;;  %v1143_v45 = vrot.slane %v1142_v35, 4  ;;  %v3145_v33 = vld [vmem:[#allocation2 + $0x20] sm:$0x1] }
  0x5e   : > { %v3231_v46 = vrot.slane %v3229_v37, 4  ;;  %v2148_v50 = vshrl.u32 %v2099_v28, 16  ;;  %v3223_v51 = vrot.slane %v3222_v41, 4  ;;  %v2151_v52 = vshll.u32 %v2099_v28, 16  ;;  %v1059_v37 = vld [vmem:[#allocation2 + $0x24] sm:$0xf] }
  0x5f   : > { %2581 = vrot.lane.b32.xlu1 %v8672_v39, %s9374_s13  ;;  %v2157_v53 = vshll.u32 %v2100_v38, 16  ;;  %v2161_v54 = vshrl.u32 %v2100_v38, 16  ;;  %v1148_v56 = vsel %vm9666_vm10, %v1143_v45, %v1147_v21  ;;  %v3237_v58 = vrot.slane %v3235_v47, 5 }
  0x60   : > { %v3232_v57 = vor.u32 %v3231_v46, %v3227_v44  ;;  %v2150_v59 = vrot.slane %v2148_v50, 4  ;;  %v8608_v61 = vcombine.low %v1138_v40, %v1148_v56  ;;  %v3228_v62 = vsel %vm9666_vm10, %v3223_v51, %v3227_v44  ;;  %v1060_v44 = vld [vmem:[#allocation2 + $0x28] sm:$0xf]  ;;  %v1061_v50 = vld [vmem:[#allocation2 + $0x2c] sm:$0x1] }
  0x61   : > { %v2153_v63 = vrot.slane %v2151_v52, 5  ;;  %v2159_v0 = vrot.slane %v2157_v53, 5  ;;  %v2163_v1 = vrot.slane %v2161_v54, 4  ;;  %v2167_v4 = vshll.u32 %v2101_v49, 16 }
  0x62   : > { %v3233_v3 = vrot.slane %v3232_v57, 4  ;;  %v1150_v5 = vshrl.u32 %v1056_v55, 16  ;;  %1535 = vrot.lane.b32.xlu0 %v8608_v61, %s9369_s8  ;;  %v1153_v8 = vshll.u32 %v1056_v55, 16  ;;  %v1159_v9 = vshll.u32 %v1057_v60, 16  ;;  %v1604_v55 = vld [vmem:[#allocation2 + $0x18] sm:$0xe] }
  0x63   : > { %v2154_v7 = vor.u32 %v2153_v63, %v2150_v59  ;;  %v1163_v10 = vshrl.u32 %v1057_v60, 16  ;;  %v2164_v14 = vor.u32 %v2163_v1, %v2159_v0  ;;  %v2169_v15 = vrot.slane %v2167_v4, 5  ;;  %v1605_v60 = vld [vmem:[#allocation2 + $0x1c] sm:$0xf] }
  0x64   : > { %v3238_v13 = vsel %vm9666_vm10, %v3233_v3, %v3237_v58  ;;  %v1152_v17 = vrot.slane %v1150_v5, 4  ;;  %v1155_v20 = vrot.slane %v1153_v8, 5  ;;  %v1161_v21 = vrot.slane %v1159_v9, 5 }
  0x65   : > { %v8736_v18 = vcombine.low %v3228_v62, %v3238_v13  ;;  %v2155_v19 = vrot.slane %v2154_v7, 4  ;;  %v2165_v22 = vrot.slane %v2164_v14, 4  ;;  %v1165_v24 = vrot.slane %v1163_v10, 4 }
  0x66   : > { %v1169_v25 = vshll.u32 %v1058_v2, 16  ;;  %v3192_v26 = vshrl.u32 %v3143_v6, 16  ;;  %v1156_v28 = vor.u32 %v1155_v20, %v1152_v17  ;;  %v3195_v34 = vshll.u32 %v3143_v6, 16  ;;  %v1606_v2 = vld [vmem:[#allocation2 + $0x20] sm:$0x1] }
  0x67   : > { %3625 = vrot.lane.b32.xlu1 %v8736_v18, %s9375_s14  ;;  %v2160_v27 = vsel %vm9666_vm10, %v2155_v19, %v2159_v0  ;;  %v3201_v35 = vshll.u32 %v3144_v12, 16  ;;  %v2170_v38 = vsel %vm9666_vm10, %v2165_v22, %v2169_v15  ;;  %v1166_v39 = vor.u32 %v1165_v24, %v1161_v21  ;;  %v1607_v6 = vld [vmem:[#allocation2 + $0x24] sm:$0xe]  ;;  %v1609_v18 = vld [vmem:[#allocation2 + $0x2c] sm:$0x1] }
  0x68   : > { %v1171_v40 = vrot.slane %v1169_v25, 5  ;;  %v3194_v41 = vrot.slane %v3192_v26, 4  ;;  %v8671_v45 = vcombine.low %v2160_v27, %v2170_v38  ;;  %v1157_v46 = vrot.slane %v1156_v28, 4  ;;  %v2105_v28 = vld [vmem:[#allocation2 + $0x24] sm:$0xf] }
  0x69   : > { %v3197_v47 = vrot.slane %v3195_v34, 5  ;;  %v3203_v49 = vrot.slane %v3201_v35, 5  ;;  %v1167_v51 = vrot.slane %v1166_v39, 4  ;;  %v3205_v52 = vshrl.u32 %v3144_v12, 16  ;;  %v1608_v12 = vld [vmem:[#allocation2 + $0x28] sm:$0xf] }
  0x6a   : > { %v3211_v53 = vshll.u32 %v3145_v33, 16  ;;  %v1174_v54 = vshrl.u32 %v1059_v37, 16  ;;  %2579 = vrot.lane.b32.xlu0 %v8671_v45, %s9374_s13  ;;  %v1162_v56 = vsel %vm9666_vm10, %v1157_v46, %v1161_v21  ;;  %v1177_v58 = vshll.u32 %v1059_v37, 16  ;;  %v2106_v38 = vld [vmem:[#allocation2 + $0x28] sm:$0xf] }
  0x6b   : > { %v3198_v57 = vor.u32 %v3197_v47, %v3194_v41  ;;  %v1183_v59 = vshll.u32 %v1060_v44, 16  ;;  %v1172_v61 = vsel %vm9666_vm10, %v1167_v51, %v1171_v40  ;;  %v3207_v62 = vrot.slane %v3205_v52, 4  ;;  %v2107_v45 = vld [vmem:[#allocation2 + $0x2c] sm:$0x1]  ;;  %v818_v51 = vld [vmem:[#allocation2 + $0x38] sm:$0x1] }
  0x6c   : > { %v3213_v63 = vrot.slane %v3211_v53, 5  ;;  %v1176_v0 = vrot.slane %v1174_v54, 4  ;;  %v8609_v3 = vcombine.low %v1162_v56, %v1172_v61  ;;  %v1179_v4 = vrot.slane %v1177_v58, 5  ;;  %v2650_v56 = vld [vmem:[#allocation2 + $0x24] sm:$0xe] }
  0x6d   : > { %v3199_v1 = vrot.slane %v3198_v57, 4  ;;  %v1185_v5 = vrot.slane %v1183_v59, 5  ;;  %v3208_v7 = vor.u32 %v3207_v62, %v3203_v49  ;;  %v1187_v8 = vshrl.u32 %v1060_v44, 16  ;;  %v2651_v57 = vld [vmem:[#allocation2 + $0x28] sm:$0xf] }
  0x6e   : > { %v1193_v9 = vshll.u32 %v1061_v50, 16  ;;  %v8625_v10 = vrot.slane %v1604_v55, 9  ;;  %1537 = vrot.lane.b32.xlu1 %v8609_v3, %s9369_s8  ;;  %v1180_v14 = vor.u32 %v1179_v4, %v1176_v0  ;;  %v1713_v15 = vrot.slane %v1605_v60, 5  ;;  %v2652_v61 = vld [vmem:[#allocation2 + $0x2c] sm:$0x1] }
  0x6f   : > { %v3204_v13 = vsel %vm9666_vm10, %v3199_v1, %v3203_v49  ;;  %v1716_v17 = vrot.slane %v1606_v2, 5  ;;  %v3209_v19 = vrot.slane %v3208_v7, 4  ;;  %v1189_v20 = vrot.slane %v1187_v8, 4 }
  0x70   : > { %v1195_v21 = vrot.slane %v1193_v9, 5  ;;  %v8626_v22 = vrot.slane %v1607_v6, 9  ;;  %v1181_v24 = vrot.slane %v1180_v14, 4  ;;  %v1714_v25 = vsel %vm9659_vm9, %v8625_v10, %v1713_v15  ;;  %v9254_v6 = vld [vmem:[#allocation2 + $0x24] sm:$0xff]  }
  0x71   : > { %v1715_v26 = vrot.slane %v1713_v15, 4  ;;  %v1720_v27 = vrot.slane %v1608_v12, 5  ;;  %v3214_v33 = vsel %vm9666_vm10, %v3209_v19, %v3213_v63  ;;  %v1190_v34 = vor.u32 %v1189_v20, %v1185_v5 }
  0x72   : > { %v1723_v35 = vrot.slane %v1609_v18, 5  ;;  %v525_v37 = vrot.slane %v9717_v31, 4  ;;  %v8735_v39 = vcombine.low %v3204_v13, %v3214_v33  ;;  %v1186_v40 = vsel %vm9666_vm10, %v1181_v24, %v1185_v5  ;;  %v2108_v31 = vld [vmem:[#allocation2 + $0x30] sm:$0xf] }
  0x73   : > { %v1717_v41 = vsel %vm9659_vm9, %v1715_v26, %v1716_v17  ;;  %v1721_v44 = vsel %vm9659_vm9, %v8626_v22, %v1720_v27  ;;  %v1191_v46 = vrot.slane %v1190_v34, 4  ;;  %v1722_v49 = vrot.slane %v1720_v27, 4 }
  0x74   : > { %v8641_v47 = vcombine.low %v1714_v25, %v1717_v41  ;;  %v529_v50 = vrot.slane %v527_v32, 7  ;;  %3623 = vrot.lane.b32.xlu0 %v8735_v39, %s9375_s14  ;;  %v2196_v52 = vshrl.u32 %v2105_v28, 16  ;;  %v2199_v53 = vshll.u32 %v2105_v28, 16  ;;  %v347_v41 = vld [vmem:[%s9652_s29 + $0x58] sm:$0xff] }
  0x75   : > { %v2205_v54 = vshll.u32 %v2106_v38, 16  ;;  %v2209_v55 = vshrl.u32 %v2106_v38, 16  ;;  %v1196_v58 = vsel %vm9666_vm10, %v1191_v46, %v1195_v21  ;;  %v1724_v59 = vsel %vm9659_vm9, %v1722_v49, %v1723_v35  ;;  %v2653_v21 = vld [vmem:[#allocation2 + $0x30] sm:$0xe] }
  0x76   : > { %v532_v60 = vor.u32 %v530_v43, %v529_v50  ;;  %v534_v32 = vrot.slane %v529_v50, 4  ;;  %v8610_v62 = vcombine.low %v1186_v40, %v1196_v58  ;;  %v8642_v63 = vcombine.low %v1721_v44, %v1724_v59  ;;  %v346_v40 = vld [vmem:[%s9652_s29 + $0x50] sm:$0xff] }
  0x77   : > { %v2198_v0 = vrot.slane %v2196_v52, 4  ;;  %v2201_v2 = vrot.slane %v2199_v53, 5  ;;  %v2207_v1 = vrot.slane %v2205_v54, 5  ;;  %v2211_v4 = vrot.slane %v2209_v55, 4 }
  0x78   : > { %v533_v3 = vsel %vm9674_vm11, %v525_v37, %v532_v60  ;;  %v2215_v5 = vshll.u32 %v2107_v45, 16  ;;  %1539 = vrot.lane.b32.xlu1 %v8610_v62, %s9369_s8  ;;  %1861 = vrot.lane.b32.xlu0 %v8641_v47, %s9368_s30  ;;  %v819_v43 = vsel %vm9688_vm13, %v534_v32, %v818_v51  ;;  %v2220_v7 = vshrl.u32 %v2108_v31, 16  ;;  %v3149_v32 = vld [vmem:[#allocation2 + $0x30] sm:$0xf] }
  0x79   : > { %817 = vst.msk [vmem:[#allocation2 + $0x34] sm:$0xf] %vm280_vm0, %v533_v3  ;;  %v2202_v11 = vor.u32 %v2201_v2, %v2198_v0  ;;  %v2223_v8 = vshll.u32 %v2108_v31, 16  ;;  %v2212_v9 = vor.u32 %v2211_v4, %v2207_v1  ;;  %820 = vst [vmem:[#allocation2 + $0x38] sm:$0x1] %v819_v43  ;;  %v8689_v12 = vrot.slane %v2650_v56, 9 }
  0x7a   : > { %v2217_v10 = vrot.slane %v2215_v5, 5  ;;  %v2756_v13 = vrot.slane %v2651_v57, 5  ;;  %v2222_v15 = vrot.slane %v2220_v7, 4  ;;  %v2759_v18 = vrot.slane %v2652_v61, 5  ;;  %v825_v61 = vld [vmem:[#allocation2 + $0x44] sm:$0x1] }
  0x7b   : > { %v2203_v14 = vrot.slane %v2202_v11, 4  ;;  %v2225_v17 = vrot.slane %v2223_v8, 5  ;;  %v2213_v19 = vrot.slane %v2212_v9, 4  ;;  %v536_v25 = vshrl.u32 %v9740_v16, 16  ;;  %v3694_v7 = vld [vmem:[#allocation2 + $0x30] sm:$0xe] }
  0x7c   : > { %v2758_v20 = vrot.slane %v2756_v13, 4  ;;  %1863 = vrot.lane.b32.xlu1 %v8642_v63, %s9368_s30  ;;  %2038 = vrot.lane.b32.xlu0 %v9254_v6, %s9370_s9  ;;  %v2757_v24 = vsel %vm9659_vm9, %v8689_v12, %v2756_v13  ;;  %v539_v26 = vshll.u32 %v9740_v16, 16  ;;  %v544_v33 = vshrl.u32 %v9749_v30, 16  ;;  %v821_v16 = vld [vmem:[#allocation2 + $0x3c] sm:$0xf] }
  0x7d   : > { %v2208_v22 = vsel %vm9666_vm10, %v2203_v14, %v2207_v1  ;;  %v2218_v27 = vsel %vm9666_vm10, %v2213_v19, %v2217_v10  ;;  %v547_v34 = vshll.u32 %v9749_v30, 16  ;;  %v2226_v37 = vor.u32 %v2225_v17, %v2222_v15 }
  0x7e   : > { %v2760_v28 = vsel %vm9659_vm9, %v2758_v20, %v2759_v18  ;;  %v8673_v35 = vcombine.low %v2208_v22, %v2218_v27  ;;  %v8690_v38 = vrot.slane %v2653_v21, 9  ;;  %v538_v39 = vrot.slane %v536_v25, 7  ;;  %v1062_v25 = vld [vmem:[#allocation2 + $0x30] sm:$0xf] }
  0x7f   : > { %v546_v46 = vrot.slane %v544_v33, 7  ;;  %v8705_v51 = vcombine.low %v2757_v24, %v2760_v28  ;;  %v9839_v56 = vpack.c.bf16 %v346_v40, %v346_v40  ;;  %v2227_v57 = vrot.slane %v2226_v37, 4  ;;  %v348_v40 = vld [vmem:[%s9652_s29 + $0x60] sm:$0xff] }
  0x80   : > { %v9255_v44 = vld [vmem:[#allocation2 + $0x30] sm:$0xff]   ;;  %2583 = vrot.lane.b32.xlu0 %v8673_v35, %s9374_s13  ;;  %v2110_v47 = vld [vmem:[#allocation2 + $0x38] sm:$0x1]  ;;  %v541_v52 = vor.u32 %v539_v26, %v538_v39  ;;  %v542_v60 = vrot.slane %v538_v39, 4  ;;  %v9841_v3 = vpack.c.bf16 %v347_v41, %v347_v41  ;;  %v3240_v9 = vshrl.u32 %v3149_v32, 16 }
  0x81   : > { %v2109_v45 = vld [vmem:[#allocation2 + $0x34] sm:$0xf]  ;;  %2040 = vrot.lane.b32.xlu1 %v9255_v44, %s9370_s9  ;;  %v2239_v30 = vshll.u32 %v2110_v47, 16  ;;  %v2655_v53 = vld [vmem:[#allocation2 + $0x38] sm:$0x1]  ;;  %v549_v55 = vor.u32 %v547_v34, %v546_v46  ;;  %v551_v0 = vrot.slane %v546_v46, 4 }
  0x82   : > { %v2229_v49 = vshll.u32 %v2109_v45, 16  ;;  %v2233_v50 = vshrl.u32 %v2109_v45, 16  ;;  %v2654_v31 = vld [vmem:[#allocation2 + $0x34] sm:$0xf]  ;;  %v2766_v63 = vrot.slane %v2655_v53, 5  ;;  %v822_v11 = vsel %vm9680_vm12, %v541_v52, %v821_v16 }
  0x83   : > { %v2763_v54 = vrot.slane %v2654_v31, 5  ;;  %v2241_v62 = vrot.slane %v2239_v30, 5  ;;  %v3150_v2 = vld [vmem:[#allocation2 + $0x34] sm:$0xf]  ;;  %v550_v6 = vsel %vm9674_vm11, %v542_v60, %v549_v55  ;;  %v3151_v43 = vld [vmem:[#allocation2 + $0x38] sm:$0x1]  ;;  %v826_v24 = vsel %vm9688_vm13, %v551_v0, %v825_v61 }
  0x84   : > { %v2231_v58 = vrot.slane %v2229_v49, 5  ;;  %v2235_v59 = vrot.slane %v2233_v50, 4  ;;  %2904 = vrot.lane.b32.xlu0 %v8705_v51, %s9372_s11  ;;  %v9256_v5 = vld [vmem:[#allocation2 + $0x30] sm:$0xff]   ;;  %823 = vst [vmem:[#allocation2 + $0x3c] sm:$0xf] %v822_v11  ;;  %v3243_v10 = vshll.u32 %v3149_v32, 16  ;;  %v9864_v30 = vpack.c.bf16 %v348_v40, %v348_v40 }
  0x85   : > { %v2765_v4 = vrot.slane %v2763_v54, 4  ;;  %v2764_v8 = vsel %vm9659_vm9, %v8690_v38, %v2763_v54  ;;  %824 = vst.msk [vmem:[#allocation2 + $0x40] sm:$0xf] %vm280_vm0, %v550_v6  ;;  %v3249_v12 = vshll.u32 %v3150_v2, 16  ;;  %v3695_v13 = vld [vmem:[#allocation2 + $0x34] sm:$0xf] }
  0x86   : > { %v2236_v1 = vor.u32 %v2235_v59, %v2231_v58  ;;  %v2232_v14 = vsel %vm9666_vm10, %v2227_v57, %v2231_v58  ;;  %v3253_v17 = vshrl.u32 %v3150_v2, 16  ;;  %v3259_v18 = vshll.u32 %v3151_v43, 16  ;;  %v3696_v19 = vld [vmem:[#allocation2 + $0x38] sm:$0x1]  ;;  %827 = vst [vmem:[#allocation2 + $0x44] sm:$0x1] %v826_v24 }
  0x87   : > { %v3242_v20 = vrot.slane %v3240_v9, 4  ;;  %v3245_v21 = vrot.slane %v3243_v10, 5  ;;  %v3251_v22 = vrot.slane %v3249_v12, 5  ;;  %v2767_v27 = vsel %vm9659_vm9, %v2765_v4, %v2766_v63  ;;  %v1063_v34 = vld [vmem:[#allocation2 + $0x34] sm:$0xf] }
  0x88   : > { %v2237_v15 = vrot.slane %v2236_v1, 4  ;;  %3082 = vrot.lane.b32.xlu0 %v9256_v5, %s9371_s10  ;;  %v3255_v28 = vrot.slane %v3253_v17, 4  ;;  %v8753_v33 = vrot.slane %v3694_v7, 9  ;;  %v3800_v38 = vrot.slane %v3695_v13, 5  ;;  %v1064_v58 = vld [vmem:[#allocation2 + $0x38] sm:$0x1] }
  0x89   : > { %v3246_v37 = vor.u32 %v3245_v21, %v3242_v20  ;;  %v3803_v39 = vrot.slane %v3696_v19, 5  ;;  %v3261_v44 = vrot.slane %v3259_v18, 5  ;;  %v1198_v45 = vshrl.u32 %v1062_v25, 16 }
  0x8a   : > { %v2242_v26 = vsel %vm9666_vm10, %v2237_v15, %v2241_v62  ;;  %v3256_v41 = vor.u32 %v3255_v28, %v3251_v22  ;;  %v1201_v46 = vshll.u32 %v1062_v25, 16  ;;  %v8706_v16 = vcombine.low %v2764_v8, %v2767_v27 }
  0x8b   : > { %v8674_v35 = vcombine.low %v2232_v14, %v2242_v26  ;;  %v3247_v47 = vrot.slane %v3246_v37, 4  ;;  %v3802_v49 = vrot.slane %v3800_v38, 4  ;;  %v1207_v50 = vshll.u32 %v1063_v34, 16  ;;  %v3152_v54 = vld [vmem:[#allocation2 + $0x3c] sm:$0xf] }
  0x8c   : > { %v3257_v51 = vrot.slane %v3256_v41, 4  ;;  %v3801_v31 = vsel %vm9659_vm9, %v8753_v33, %v3800_v38  ;;  %v1211_v52 = vshrl.u32 %v1063_v34, 16  ;;  %v3153_v55 = vld [vmem:[#allocation2 + $0x40] sm:$0xf]  ;;  %v1200_v59 = vrot.slane %v1198_v45, 4 }
  0x8d   : > { %2585 = vrot.lane.b32.xlu1 %v8674_v35, %s9374_s13  ;;  %v3252_v53 = vsel %vm9666_vm10, %v3247_v47, %v3251_v22  ;;  %v3804_v57 = vsel %vm9659_vm9, %v3802_v49, %v3803_v39  ;;  %v1203_v60 = vrot.slane %v1201_v46, 5  ;;  %v3264_v61 = vshrl.u32 %v3152_v54, 16  ;;  %v3697_v0 = vld [vmem:[#allocation2 + $0x3c] sm:$0xe]  ;;  %v3154_v4 = vld [vmem:[#allocation2 + $0x44] sm:$0x1] }
  0x8e   : > { %v3262_v32 = vsel %vm9666_vm10, %v3257_v51, %v3261_v44  ;;  %v3267_v62 = vshll.u32 %v3152_v54, 16  ;;  %v3273_v63 = vshll.u32 %v3153_v55, 16  ;;  %v9257_v2 = vld [vmem:[#allocation2 + $0x3c] sm:$0xff]   ;;  %v3277_v5 = vshrl.u32 %v3153_v55, 16  ;;  %v3699_v12 = vld [vmem:[#allocation2 + $0x44] sm:$0x1] }
  0x8f   : > { %v8737_v1 = vcombine.low %v3252_v53, %v3262_v32  ;;  %v8769_v6 = vcombine.low %v3801_v31, %v3804_v57  ;;  %v1204_v11 = vor.u32 %v1203_v60, %v1200_v59  ;;  %v3698_v43 = vld [vmem:[#allocation2 + $0x40] sm:$0xf]  ;;  %v3266_v7 = vrot.slane %v3264_v61, 4  ;;  %v1065_v18 = vld [vmem:[#allocation2 + $0x3c] sm:$0xf] }
  0x90   : > { %v3269_v8 = vrot.slane %v3267_v62, 5  ;;  %v3275_v9 = vrot.slane %v3273_v63, 5  ;;  %v3283_v10 = vshll.u32 %v3154_v4, 16  ;;  %v3279_v13 = vrot.slane %v3277_v5, 4  ;;  %v1066_v28 = vld [vmem:[#allocation2 + $0x40] sm:$0xf] }
  0x91   : > { %2906 = vrot.lane.b32.xlu1 %v8706_v16, %s9372_s11  ;;  %3627 = vrot.lane.b32.xlu0 %v8737_v1, %s9375_s14  ;;  %v1205_v14 = vrot.slane %v1204_v11, 4  ;;  %v1209_v15 = vrot.slane %v1207_v50, 5  ;;  %v1213_v17 = vrot.slane %v1211_v52, 4  ;;  %v1217_v21 = vshll.u32 %v1064_v58, 16  ;;  %v1610_v38 = vld [vmem:[#allocation2 + $0x30] sm:$0xe] }
  0x92   : > { %v3270_v19 = vor.u32 %v3269_v8, %v3266_v7  ;;  %v3285_v20 = vrot.slane %v3283_v10, 5  ;;  %v8754_v22 = vrot.slane %v3697_v0, 9  ;;  %v3280_v24 = vor.u32 %v3279_v13, %v3275_v9  ;;  %v1067_v45 = vld [vmem:[#allocation2 + $0x44] sm:$0x1]  ;;  %v1611_v46 = vld [vmem:[#allocation2 + $0x34] sm:$0xf] }
  0x93   : > { %v1210_v25 = vsel %vm9666_vm10, %v1205_v14, %v1209_v15  ;;  %v1214_v26 = vor.u32 %v1213_v17, %v1209_v15  ;;  %v3807_v27 = vrot.slane %v3698_v43, 5  ;;  %v1219_v34 = vrot.slane %v1217_v21, 5  ;;  %v1612_v16 = vld [vmem:[#allocation2 + $0x38] sm:$0x1]  ;;  %v9271_v31 = vld [vmem:[%s11979_s1] sm:$0xff]   ;;  %v9274_v43 = vld [vmem:[%s11979_s1 + $0x8] sm:$0xff]  }
  0x94   : > { %v3271_v33 = vrot.slane %v3270_v19, 4  ;;  %v3810_v35 = vrot.slane %v3699_v12, 5  ;;  %v1222_v37 = vshrl.u32 %v1065_v18, 16  ;;  %v3281_v39 = vrot.slane %v3280_v24, 4  ;;  %v1613_v57 = vld [vmem:[#allocation2 + $0x3c] sm:$0xe]  ;;  %9155 = vmatprep.subr.bf16.mxu0 %v9271_v31 }
  0x95   : > { %3084 = vrot.lane.b32.xlu1 %v9257_v2, %s9371_s10  ;;  %3948 = vrot.lane.b32.xlu0 %v8769_v6, %s9373_s12  ;;  %v1215_v40 = vrot.slane %v1214_v26, 4  ;;  %v3808_v41 = vsel %vm9659_vm9, %v8754_v22, %v3807_v27  ;;  %v3809_v44 = vrot.slane %v3807_v27, 4  ;;  %v1225_v50 = vshll.u32 %v1065_v18, 16  ;;  %v1614_v61 = vld [vmem:[#allocation2 + $0x40] sm:$0xf]  ;;  %v349_v24 = vld [vmem:[%s9652_s29 + $0x68] sm:$0xff] }
  0x96   : > { %v3276_v47 = vsel %vm9666_vm10, %v3271_v33, %v3275_v9  ;;  %v1224_v49 = vrot.slane %v1222_v37, 4  ;;  %v1231_v51 = vshll.u32 %v1066_v28, 16  ;;  %v3286_v52 = vsel %vm9666_vm10, %v3281_v39, %v3285_v20  ;;  %v1615_v62 = vld [vmem:[#allocation2 + $0x44] sm:$0x1]  ;;  %9156 = vmatpush3.bf16.msra.mxu0 %v9271_v31  ;;  %v2111_v17 = vld [vmem:[#allocation2 + $0x3c] sm:$0xf] }
  0x97   : > { %v1220_v53 = vsel %vm9666_vm10, %v1215_v40, %v1219_v34  ;;  %v3811_v54 = vsel %vm9659_vm9, %v3809_v44, %v3810_v35  ;;  %v1235_v55 = vshrl.u32 %v1066_v28, 16  ;;  %v8738_v58 = vcombine.low %v3276_v47, %v3286_v52  ;;  %9157 = vmatprep.subr.bf16.mxu0 %v9274_v43  ;;  %v2112_v22 = vld [vmem:[#allocation2 + $0x40] sm:$0xf]  ;;  %v828_v37 = vld [vmem:[#allocation2 + $0x48] sm:$0xf] }
  0x98   : > { %v8611_v59 = vcombine.low %v1210_v25, %v1220_v53  ;;  %v8770_v60 = vcombine.low %v3808_v41, %v3811_v54  ;;  %v1227_v32 = vrot.slane %v1225_v50, 5  ;;  %v1233_v63 = vrot.slane %v1231_v51, 5  ;;  %v9258_v40 = vld [vmem:[#allocation2 + $0x3c] sm:$0xff]   ;;  %v832_v54 = vld [vmem:[#allocation2 + $0x50] sm:$0x1] }
  0x99   : > { %v1237_v0 = vrot.slane %v1235_v55, 4  ;;  %v1241_v2 = vshll.u32 %v1067_v45, 16  ;;  %v8627_v1 = vrot.slane %v1610_v38, 9  ;;  %3629 = vrot.lane.b32.xlu1 %v8738_v58, %s9375_s14  ;;  %v1727_v5 = vrot.slane %v1611_v46, 5  ;;  %v2113_v38 = vld [vmem:[#allocation2 + $0x44] sm:$0x1] }
  0x9a   : > { %3950 = vrot.lane.b32.xlu0 %v8770_v60, %s9373_s12  ;;  %v1228_v4 = vor.u32 %v1227_v32, %v1224_v49  ;;  %v1730_v6 = vrot.slane %v1612_v16, 5  ;;  %v8628_v11 = vrot.slane %v1613_v57, 9  ;;  %v1734_v9 = vrot.slane %v1614_v61, 5  ;;  %9158 = vmatpush3.bf16.msra.mxu0 %v9274_v43  ;;  %v2656_v45 = vld [vmem:[#allocation2 + $0x3c] sm:$0xe] }
  0x9b   : > { %v1238_v7 = vor.u32 %v1237_v0, %v1233_v63  ;;  %v1243_v8 = vrot.slane %v1241_v2, 5  ;;  %v1737_v10 = vrot.slane %v1615_v62, 5  ;;  %v1728_v13 = vsel %vm9659_vm9, %v8627_v1, %v1727_v5  ;;  %v2657_v51 = vld [vmem:[#allocation2 + $0x40] sm:$0xf]  ;;  %v2658_v60 = vld [vmem:[#allocation2 + $0x44] sm:$0x1] }
  0x9c   : > { %v1229_v12 = vrot.slane %v1228_v4, 4  ;;  %v1729_v14 = vrot.slane %v1727_v5, 4  ;;  %v553_v15 = vshrl.u32 %v9839_v56, 16  ;;  %v1735_v19 = vsel %vm9659_vm9, %v8628_v11, %v1734_v9 }
  0x9d   : > { %v1239_v18 = vrot.slane %v1238_v7, 4  ;;  %v1736_v20 = vrot.slane %v1734_v9, 4  ;;  %v556_v21 = vshll.u32 %v9839_v56, 16  ;;  %1541 = vrot.lane.b32.xlu1 %v8611_v59, %s9369_s8  ;;  %v561_v28 = vshrl.u32 %v9841_v3, 16 }
  0x9e   : > { %v1234_v25 = vsel %vm9666_vm10, %v1229_v12, %v1233_v63  ;;  %v1731_v26 = vsel %vm9659_vm9, %v1729_v14, %v1730_v6  ;;  %v555_v27 = vrot.slane %v553_v15, 7  ;;  %v564_v35 = vshll.u32 %v9841_v3, 16 }
  0x9f   : > { %v1244_v33 = vsel %vm9666_vm10, %v1239_v18, %v1243_v8  ;;  %v8643_v34 = vcombine.low %v1728_v13, %v1731_v26  ;;  %v1738_v56 = vsel %vm9659_vm9, %v1736_v20, %v1737_v10  ;;  %v9066_v46 = vpack.c.bf16 %v349_v24, %v349_v24  ;;  %v350_v18 = vld [vmem:[%s9652_s29 + $0x70] sm:$0xff] }
  0xa0   : > { %v8612_v39 = vcombine.low %v1234_v25, %v1244_v33  ;;  %v558_v41 = vor.u32 %v556_v21, %v555_v27  ;;  %v559_v44 = vrot.slane %v555_v27, 4  ;;  %v563_v16 = vrot.slane %v561_v28, 7  ;;  %v839_v25 = vld [vmem:[#allocation2 + $0x5c] sm:$0x1] }
  0xa1   : > { %1865 = vrot.lane.b32.xlu0 %v8643_v34, %s9368_s30  ;;  %v2244_v47 = vshrl.u32 %v2111_v17, 16  ;;  %v2247_v49 = vshll.u32 %v2111_v17, 16  ;;  %v2253_v50 = vshll.u32 %v2112_v22, 16  ;;  %v8644_v31 = vcombine.low %v1735_v19, %v1738_v56  ;;  %v835_v17 = vld [vmem:[#allocation2 + $0x54] sm:$0xf] }
  0xa2   : > { %1543 = vrot.lane.b32.xlu1 %v8612_v39, %s9369_s8  ;;  %v829_v3 = vsel %vm9680_vm12, %v558_v41, %v828_v37  ;;  %v2257_v52 = vshrl.u32 %v2112_v22, 16  ;;  %v2263_v53 = vshll.u32 %v2113_v38, 16  ;;  %v566_v55 = vor.u32 %v564_v35, %v563_v16  ;;  %v351_v39 = vld [vmem:[%s9652_s29 + $0x78] sm:$0xff] }
  0xa3   : > { %v568_v57 = vrot.slane %v563_v16, 4  ;;  %830 = vst [vmem:[#allocation2 + $0x48] sm:$0xf] %v829_v3  ;;  %v2246_v58 = vrot.slane %v2244_v47, 4  ;;  %v2249_v59 = vrot.slane %v2247_v49, 5  ;;  %v2255_v32 = vrot.slane %v2253_v50, 5 }
  0xa4   : > { %v2259_v61 = vrot.slane %v2257_v52, 4  ;;  %v8691_v62 = vrot.slane %v2656_v45, 9  ;;  %v2770_v63 = vrot.slane %v2657_v51, 5  ;;  %v567_v0 = vsel %vm9674_vm11, %v559_v44, %v566_v55  ;;  %v353_v3 = vld [vmem:[%s9652_s29 + $0x88] sm:$0xff] }
  0xa5   : > { %2042 = vrot.lane.b32.xlu0 %v9258_v40, %s9370_s9  ;;  %v2250_v2 = vor.u32 %v2249_v59, %v2246_v58  ;;  %v2265_v1 = vrot.slane %v2263_v53, 5  ;;  %v833_v4 = vsel %vm9688_vm13, %v568_v57, %v832_v54  ;;  %831 = vst.msk [vmem:[#allocation2 + $0x4c] sm:$0xf] %vm280_vm0, %v567_v0  ;;  %v2773_v11 = vrot.slane %v2658_v60, 5  ;;  %v352_v40 = vld [vmem:[%s9652_s29 + $0x80] sm:$0xff] }
  0xa6   : > { %1867 = vrot.lane.b32.xlu1 %v8644_v31, %s9368_s30  ;;  %v2260_v5 = vor.u32 %v2259_v61, %v2255_v32  ;;  %834 = vst [vmem:[#allocation2 + $0x50] sm:$0x1] %v833_v4  ;;  %v2772_v6 = vrot.slane %v2770_v63, 4  ;;  %v570_v43 = vshrl.u32 %v9864_v30, 16  ;;  %v573_v8 = vshll.u32 %v9864_v30, 16 }
  0xa7   : > { %v2251_v7 = vrot.slane %v2250_v2, 4  ;;  %v578_v9 = vshrl.u32 %v9066_v46, 16  ;;  %v581_v13 = vshll.u32 %v9066_v46, 16  ;;  %v2771_v21 = vsel %vm9659_vm9, %v8691_v62, %v2770_v63 }
  0xa8   : > { %v2261_v10 = vrot.slane %v2260_v5, 4  ;;  %v572_v12 = vrot.slane %v570_v43, 7  ;;  %v2774_v30 = vsel %vm9659_vm9, %v2772_v6, %v2773_v11  ;;  %v9941_v16 = vpack.c.bf16 %v350_v18, %v350_v18 }
  0xa9   : > { %v2256_v14 = vsel %vm9666_vm10, %v2251_v7, %v2255_v32  ;;  %v580_v15 = vrot.slane %v578_v9, 7  ;;  %v8707_v46 = vcombine.low %v2771_v21, %v2774_v30  ;;  %v9950_v58 = vpack.c.bf16 %v351_v39, %v351_v39 }
  0xaa   : > { %v2266_v19 = vsel %vm9666_vm10, %v2261_v10, %v2265_v1  ;;  %v2114_v20 = vld [vmem:[#allocation2 + $0x48] sm:$0xf]  ;;  %v575_v24 = vor.u32 %v573_v8, %v572_v12  ;;  %v576_v34 = vrot.slane %v572_v12, 4  ;;  %v9953_v4 = vpack.c.bf16 %v352_v40, %v352_v40 }
  0xab   : > { %v2659_v22 = vld [vmem:[#allocation2 + $0x48] sm:$0xe]  ;;  %v8675_v26 = vcombine.low %v2256_v14, %v2266_v19  ;;  %v2268_v27 = vshrl.u32 %v2114_v20, 16  ;;  %v2271_v28 = vshll.u32 %v2114_v20, 16  ;;  %v583_v56 = vor.u32 %v581_v13, %v580_v15 }
  0xac   : > { %v8692_v33 = vrot.slane %v2659_v22, 9  ;;  %v585_v35 = vrot.slane %v580_v15, 4  ;;  %v836_v37 = vsel %vm9680_vm12, %v575_v24, %v835_v17  ;;  %v3155_v38 = vld [vmem:[#allocation2 + $0x48] sm:$0xf]  ;;  %v2115_v44 = vld [vmem:[#allocation2 + $0x4c] sm:$0xf]  ;;  %v9955_v5 = vpack.c.bf16 %v353_v3, %v353_v3 }
  0xad   : > { %v9259_v41 = vld [vmem:[#allocation2 + $0x48] sm:$0xff]   ;;  %2587 = vrot.lane.b32.xlu0 %v8675_v26, %s9374_s13  ;;  %v2270_v45 = vrot.slane %v2268_v27, 4  ;;  %837 = vst [vmem:[#allocation2 + $0x54] sm:$0xf] %v836_v37  ;;  %v2116_v47 = vld [vmem:[#allocation2 + $0x50] sm:$0x1]  ;;  %v584_v31 = vsel %vm9674_vm11, %v576_v34, %v583_v56 }
  0xae   : > { %v2273_v49 = vrot.slane %v2271_v28, 5  ;;  %v2277_v50 = vshll.u32 %v2115_v44, 16  ;;  %v2281_v51 = vshrl.u32 %v2115_v44, 16  ;;  %2044 = vrot.lane.b32.xlu1 %v9259_v41, %s9370_s9  ;;  %v2287_v52 = vshll.u32 %v2116_v47, 16  ;;  %v2660_v53 = vld [vmem:[#allocation2 + $0x4c] sm:$0xf] }
  0xaf   : > { %v2661_v54 = vld [vmem:[#allocation2 + $0x50] sm:$0x1]  ;;  %838 = vst.msk [vmem:[#allocation2 + $0x58] sm:$0xf] %vm280_vm0, %v584_v31  ;;  %v3288_v55 = vshrl.u32 %v3155_v38, 16  ;;  %v840_v57 = vsel %vm9688_vm13, %v585_v35, %v839_v25  ;;  %v2777_v61 = vrot.slane %v2660_v53, 5 }
  0xb0   : > { %v2274_v59 = vor.u32 %v2273_v49, %v2270_v45  ;;  %v2279_v60 = vrot.slane %v2277_v50, 5  ;;  %v2283_v32 = vrot.slane %v2281_v51, 4  ;;  %v9260_v62 = vld [vmem:[#allocation2 + $0x48] sm:$0xff]   ;;  %841 = vst [vmem:[#allocation2 + $0x5c] sm:$0x1] %v840_v57  ;;  %v2289_v63 = vrot.slane %v2287_v52, 5 }
  0xb1   : > { %2908 = vrot.lane.b32.xlu0 %v8707_v46, %s9372_s11  ;;  %v2780_v0 = vrot.slane %v2661_v54, 5  ;;  %v3156_v2 = vld [vmem:[#allocation2 + $0x4c] sm:$0xf]  ;;  %v3157_v1 = vld [vmem:[#allocation2 + $0x50] sm:$0x1]  ;;  %v2778_v43 = vsel %vm9659_vm9, %v8692_v33, %v2777_v61  ;;  %v2779_v7 = vrot.slane %v2777_v61, 4 }
  0xb2   : > { %v2275_v6 = vrot.slane %v2274_v59, 4  ;;  %v2284_v11 = vor.u32 %v2283_v32, %v2279_v60  ;;  %v3290_v8 = vrot.slane %v3288_v55, 4  ;;  %v3291_v9 = vshll.u32 %v3155_v38, 16  ;;  %v3700_v22 = vld [vmem:[#allocation2 + $0x48] sm:$0xe]  ;;  %v9971_v3 = vpop.permute.xlu1 %1857 }
  0xb3   : > { %v3297_v10 = vshll.u32 %v3156_v2, 16  ;;  %v3301_v12 = vshrl.u32 %v3156_v2, 16  ;;  %v2781_v15 = vsel %vm9659_vm9, %v2779_v7, %v2780_v0  ;;  %v3307_v17 = vshll.u32 %v3157_v1, 16  ;;  %v9963_v19 = vpop.permute.xlu0 %1533  ;;  %v3701_v39 = vld [vmem:[#allocation2 + $0x4c] sm:$0xf] }
  0xb4   : > { %v2280_v13 = vsel %vm9666_vm10, %v2275_v6, %v2279_v60  ;;  %v2285_v14 = vrot.slane %v2284_v11, 4  ;;  %v3158_v18 = vld [vmem:[#allocation2 + $0x54] sm:$0xf]  ;;  %v3293_v20 = vrot.slane %v3291_v9, 5  ;;  %v587_v24 = vshrl.u32 %v9941_v16, 16 }
  0xb5   : > { %3086 = vrot.lane.b32.xlu0 %v9260_v62, %s9371_s10  ;;  %v3299_v21 = vrot.slane %v3297_v10, 5  ;;  %v3303_v30 = vrot.slane %v3301_v12, 4  ;;  %v8708_v26 = vcombine.low %v2778_v43, %v2781_v15  ;;  %v3309_v27 = vrot.slane %v3307_v17, 5  ;;  %v3702_v46 = vld [vmem:[#allocation2 + $0x50] sm:$0x1] }
  0xb6   : > { %v2290_v25 = vsel %vm9666_vm10, %v2285_v14, %v2289_v63  ;;  %v3159_v28 = vld [vmem:[#allocation2 + $0x58] sm:$0xf]  ;;  %v590_v33 = vshll.u32 %v9941_v16, 16  ;;  %v3294_v56 = vor.u32 %v3293_v20, %v3290_v8  ;;  %v3312_v38 = vshrl.u32 %v3158_v18, 16  ;;  %v1068_v31 = vld [vmem:[#allocation2 + $0x48] sm:$0xf] }
  0xb7   : > { %v8676_v34 = vcombine.low %v2280_v13, %v2290_v25  ;;  %v3304_v35 = vor.u32 %v3303_v30, %v3299_v21  ;;  %v3160_v37 = vld [vmem:[#allocation2 + $0x5c] sm:$0x1]  ;;  %v3315_v40 = vshll.u32 %v3158_v18, 16  ;;  %v3321_v41 = vshll.u32 %v3159_v28, 16  ;;  %v1069_v57 = vld [vmem:[#allocation2 + $0x4c] sm:$0xf] }
  0xb8   : > { %v3325_v44 = vshrl.u32 %v3159_v28, 16  ;;  %v3331_v45 = vshll.u32 %v3160_v37, 16  ;;  %v3295_v47 = vrot.slane %v3294_v56, 4  ;;  %v3314_v50 = vrot.slane %v3312_v38, 4  ;;  %v1070_v1 = vld [vmem:[#allocation2 + $0x50] sm:$0x1] }
  0xb9   : > { %2589 = vrot.lane.b32.xlu1 %v8676_v34, %s9374_s13  ;;  %v3305_v49 = vrot.slane %v3304_v35, 4  ;;  %v8755_v51 = vrot.slane %v3700_v22, 9  ;;  %v3317_v52 = vrot.slane %v3315_v40, 5  ;;  %v3323_v53 = vrot.slane %v3321_v41, 5  ;;  %v3703_v11 = vld [vmem:[#allocation2 + $0x54] sm:$0xe] }
  0xba   : > { %v3327_v54 = vrot.slane %v3325_v44, 4  ;;  %v3333_v55 = vrot.slane %v3331_v45, 5  ;;  %v3300_v60 = vsel %vm9666_vm10, %v3295_v47, %v3299_v21  ;;  %v3814_v61 = vrot.slane %v3701_v39, 5  ;;  %v9261_v43 = vld [vmem:[#allocation2 + $0x54] sm:$0xff]   ;;  %v3705_v18 = vld [vmem:[#allocation2 + $0x5c] sm:$0x1] }
  0xbb   : > { %v3310_v32 = vsel %vm9666_vm10, %v3305_v49, %v3309_v27  ;;  %v3817_v62 = vrot.slane %v3702_v46, 5  ;;  %v3318_v0 = vor.u32 %v3317_v52, %v3314_v50  ;;  %v1246_v6 = vshrl.u32 %v1068_v31, 16  ;;  %v3704_v12 = vld [vmem:[#allocation2 + $0x58] sm:$0xf]  ;;  %v1071_v25 = vld [vmem:[#allocation2 + $0x54] sm:$0xf] }
  0xbc   : > { %v9973_v59 = vpop.permute.xlu0 %2034  ;;  %v8739_v63 = vcombine.low %v3300_v60, %v3310_v32  ;;  %v3328_v2 = vor.u32 %v3327_v54, %v3323_v53  ;;  %v3815_v7 = vsel %vm9659_vm9, %v8755_v51, %v3814_v61  ;;  %v3816_v8 = vrot.slane %v3814_v61, 4  ;;  %v1072_v35 = vld [vmem:[#allocation2 + $0x58] sm:$0xf]  ;;  %v1073_v44 = vld [vmem:[#allocation2 + $0x5c] sm:$0x1] }
  0xbd   : > { %2910 = vrot.lane.b32.xlu1 %v8708_v26, %s9372_s11  ;;  %v1249_v9 = vshll.u32 %v1068_v31, 16  ;;  %v1255_v10 = vshll.u32 %v1069_v57, 16  ;;  %v3319_v13 = vrot.slane %v3318_v0, 4  ;;  %v1248_v15 = vrot.slane %v1246_v6, 4  ;;  %v9985_v26 = vpop.permute.xlu1 %2036  ;;  %v1616_v50 = vld [vmem:[#allocation2 + $0x48] sm:$0xe] }
  0xbe   : > { %3631 = vrot.lane.b32.xlu0 %v8739_v63, %s9375_s14  ;;  %v3329_v14 = vrot.slane %v3328_v2, 4  ;;  %v1259_v17 = vshrl.u32 %v1069_v57, 16  ;;  %v3818_v20 = vsel %vm9659_vm9, %v3816_v8, %v3817_v62  ;;  %v1265_v22 = vshll.u32 %v1070_v1, 16  ;;  %v1617_v54 = vld [vmem:[#allocation2 + $0x4c] sm:$0xf] }
  0xbf   : > { %v1251_v21 = vrot.slane %v1249_v9, 5  ;;  %v1257_v30 = vrot.slane %v1255_v10, 5  ;;  %v3324_v27 = vsel %vm9666_vm10, %v3319_v13, %v3323_v53  ;;  %v8771_v34 = vcombine.low %v3815_v7, %v3818_v20  ;;  %v1618_v62 = vld [vmem:[#allocation2 + $0x50] sm:$0x1]  ;;  %v1620_v10 = vld [vmem:[#allocation2 + $0x58] sm:$0xf] }
  0xc0   : > { %v3334_v28 = vsel %vm9666_vm10, %v3329_v14, %v3333_v55  ;;  %v1261_v56 = vrot.slane %v1259_v17, 4  ;;  %v1267_v40 = vrot.slane %v1265_v22, 5  ;;  %v8756_v41 = vrot.slane %v3703_v11, 9  ;;  %v1619_v11 = vld [vmem:[#allocation2 + $0x54] sm:$0xe] }
  0xc1   : > { %v9991_v37 = vpop.permute.xlu0 %3078  ;;  %3088 = vrot.lane.b32.xlu1 %v9261_v43, %s9371_s10  ;;  %v8740_v38 = vcombine.low %v3324_v27, %v3334_v28  ;;  %v1252_v39 = vor.u32 %v1251_v21, %v1248_v15  ;;  %v3821_v46 = vrot.slane %v3704_v12, 5  ;;  %v3824_v47 = vrot.slane %v3705_v18, 5  ;;  %v9995_v55 = vpop.permute.xlu1 %3080  ;;  %v1621_v12 = vld [vmem:[#allocation2 + $0x5c] sm:$0x1] }
  0xc2   : > { %3952 = vrot.lane.b32.xlu0 %v8771_v34, %s9373_s12  ;;  %v1262_v45 = vor.u32 %v1261_v56, %v1257_v30  ;;  %v1270_v49 = vshrl.u32 %v1071_v25, 16  ;;  %v1273_v31 = vshll.u32 %v1071_v25, 16  ;;  %v1279_v52 = vshll.u32 %v1072_v35, 16 }
  0xc3   : > { %v1253_v51 = vrot.slane %v1252_v39, 4  ;;  %v1283_v53 = vshrl.u32 %v1072_v35, 16  ;;  %v3822_v60 = vsel %vm9659_vm9, %v8756_v41, %v3821_v46  ;;  %v3823_v32 = vrot.slane %v3821_v46, 4  ;;  %v842_v35 = vld [vmem:[#allocation2 + $0x60] sm:$0xf] }
  0xc4   : > { %v1263_v57 = vrot.slane %v1262_v45, 4  ;;  %v1272_v61 = vrot.slane %v1270_v49, 4  ;;  %v1275_v2 = vrot.slane %v1273_v31, 5  ;;  %v1281_v1 = vrot.slane %v1279_v52, 5  ;;  %v2118_v45 = vld [vmem:[#allocation2 + $0x58] sm:$0xf] }
  0xc5   : > { %v9999_v63 = vpop.permute.xlu0 %2900  ;;  %3633 = vrot.lane.b32.xlu1 %v8740_v38, %s9375_s14  ;;  %v1258_v0 = vsel %vm9666_vm10, %v1253_v51, %v1257_v30  ;;  %v1285_v6 = vrot.slane %v1283_v53, 4  ;;  %v3825_v7 = vsel %vm9659_vm9, %v3823_v32, %v3824_v47  ;;  %v1289_v8 = vshll.u32 %v1073_v44, 16  ;;  %v10008_v22 = vpop.permute.xlu1 %1859  ;;  %v2117_v38 = vld [vmem:[#allocation2 + $0x54] sm:$0xf]  ;;  %v846_v53 = vld [vmem:[#allocation2 + $0x68] sm:$0x1] }
  0xc6   : > { %v1268_v43 = vsel %vm9666_vm10, %v1263_v57, %v1267_v40  ;;  %v8629_v9 = vrot.slane %v1616_v50, 9  ;;  %v8772_v14 = vcombine.low %v3822_v60, %v3825_v7  ;;  %v1276_v15 = vor.u32 %v1275_v2, %v1272_v61  ;;  %v2119_v61 = vld [vmem:[#allocation2 + $0x5c] sm:$0x1]  ;;  %v9269_v7 = vld [vmem:[#allocation2 + $0xc] sm:$0xff]  }
  0xc7   : > { %v8613_v13 = vcombine.low %v1258_v0, %v1268_v43  ;;  %v1286_v17 = vor.u32 %v1285_v6, %v1281_v1  ;;  %v1291_v18 = vrot.slane %v1289_v8, 5  ;;  %v1741_v20 = vrot.slane %v1617_v54, 5  ;;  %v9264_v6 = vld [vmem:[#allocation2] sm:$0xff]   ;;  %v9270_v8 = vld [vmem:[#allocation2 + $0x18] sm:$0xff]   ;;  %1035 = vst.msk [vmem:[#allocation3 + $0x8] sm:$0xff] %vm11987_vm14, %v9269_v7 }
  0xc8   : > { %v1744_v21 = vrot.slane %v1618_v62, 5  ;;  %v8630_v30 = vrot.slane %v1619_v11, 9  ;;  %3954 = vrot.lane.b32.xlu0 %v8772_v14, %s9373_s12  ;;  %v1277_v27 = vrot.slane %v1276_v15, 4  ;;  %v1748_v34 = vrot.slane %v1620_v10, 5  ;;  %v2662_v62 = vld [vmem:[#allocation2 + $0x54] sm:$0xe] }
  0xc9   : > { %v10010_v25 = vpop.permute.xlu0 %3944  ;;  %1545 = vrot.lane.b32.xlu1 %v8613_v13, %s9369_s8  ;;  %v1287_v28 = vrot.slane %v1286_v17, 4  ;;  %v1751_v56 = vrot.slane %v1621_v12, 5  ;;  %v1742_v39 = vsel %vm9659_vm9, %v8629_v9, %v1741_v20  ;;  %v1743_v40 = vrot.slane %v1741_v20, 4  ;;  %v10035_v11 = vpop.permute.xlu1 %2902  ;;  %v9272_v9 = vld [vmem:[#allocation2 + $0x24] sm:$0xff]   ;;  %v2664_v15 = vld [vmem:[#allocation2 + $0x5c] sm:$0x1] }
  0xca   : > { %v589_v41 = vrot.slane %v587_v24, 7  ;;  %v595_v44 = vshrl.u32 %v9950_v58, 16  ;;  %v1282_v46 = vsel %vm9666_vm10, %v1277_v27, %v1281_v1  ;;  %v1749_v49 = vsel %vm9659_vm9, %v8630_v30, %v1748_v34  ;;  %v9279_v30 = vld [vmem:[#allocation2 + $0x30] sm:$0xff]   ;;  %v9280_v27 = vld [vmem:[#allocation2 + $0x3c] sm:$0xff]   ;;  %1034 = vst.msk [vmem:[#allocation3] sm:$0xff] %vm11987_vm14, %v9264_v6  ;;  %1036 = vst.msk [vmem:[#allocation3 + $0x10] sm:$0xff] %vm11987_vm14, %v9270_v8 }
  0xcb   : > { %v1292_v47 = vsel %vm9666_vm10, %v1287_v28, %v1291_v18  ;;  %v1750_v50 = vrot.slane %v1748_v34, 4  ;;  %v1745_v31 = vsel %vm9659_vm9, %v1743_v40, %v1744_v21  ;;  %v598_v32 = vshll.u32 %v9950_v58, 16  ;;  %v9262_v58 = vld [vmem:[#allocation2 + $0x54] sm:$0xff]   ;;  %1037 = vst.msk [vmem:[#allocation3 + $0x18] sm:$0xff] %vm11987_vm14, %v9272_v9  ;;  %1038 = vst.msk [vmem:[#allocation3 + $0x20] sm:$0xff] %vm11987_vm14, %v9279_v30 }
  0xcc   : > { %v8614_v51 = vcombine.low %v1282_v46, %v1292_v47  ;;  %v592_v24 = vor.u32 %v590_v33, %v589_v41  ;;  %v593_v52 = vrot.slane %v589_v41, 4  ;;  %v8645_v54 = vcombine.low %v1742_v39, %v1745_v31  ;;  %v2663_v33 = vld [vmem:[#allocation2 + $0x58] sm:$0xf]  ;;  %1039 = vst.msk [vmem:[#allocation3 + $0x28] sm:$0xff] %vm11987_vm14, %v9280_v27 }
  0xcd   : > { %v1752_v57 = vsel %vm9659_vm9, %v1750_v50, %v1751_v56  ;;  %v597_v60 = vrot.slane %v595_v44, 7  ;;  %v2292_v1 = vshrl.u32 %v2117_v38, 16  ;;  %v2295_v16 = vshll.u32 %v2117_v38, 16  ;;  %v10037_v43 = vpop.permute.xlu0 %3946  ;;  %1582 = vst.msk [vmem:[#allocation3] sm:$0xff] %vm1581_vm15, %v9963_v19 }
  0xce   : > { %1547 = vrot.lane.b32.xlu1 %v8614_v51, %s9369_s8  ;;  %v8646_v0 = vcombine.low %v1749_v49, %v1752_v57  ;;  %v843_v2 = vsel %vm9680_vm12, %v592_v24, %v842_v35  ;;  %1869 = vrot.lane.b32.xlu0 %v8645_v54, %s9368_s30  ;;  %v2301_v13 = vshll.u32 %v2118_v45, 16  ;;  %v2305_v14 = vshrl.u32 %v2118_v45, 16  ;;  %1906 = vst.msk [vmem:[#allocation3] sm:$0xff] %vm1905_vm1, %v9971_v3 }
  0xcf   : > { %v600_v10 = vor.u32 %v598_v32, %v597_v60  ;;  %v602_v12 = vrot.slane %v597_v60, 4  ;;  %844 = vst [vmem:[#allocation2 + $0x60] sm:$0xf] %v843_v2  ;;  %v2294_v17 = vrot.slane %v2292_v1, 4  ;;  %v2297_v18 = vrot.slane %v2295_v16, 5  ;;  %2083 = vst.msk [vmem:[#allocation3] sm:$0xff] %vm2082_vm2, %v9973_v59 }
  0xd0   : > { %v2311_v20 = vshll.u32 %v2119_v61, 16  ;;  %v8693_v21 = vrot.slane %v2662_v62, 9  ;;  %v2303_v34 = vrot.slane %v2301_v13, 5  ;;  %v2307_v56 = vrot.slane %v2305_v14, 4 }
  0xd1   : > { %v601_v28 = vsel %vm9674_vm11, %v593_v52, %v600_v10  ;;  %v847_v35 = vsel %vm9688_vm13, %v602_v12, %v846_v53  ;;  %v2298_v38 = vor.u32 %v2297_v18, %v2294_v17  ;;  %v2784_v40 = vrot.slane %v2663_v33, 5  ;;  %v10049_v49 = vpop.permute.xlu1 %2581  ;;  %v354_v52 = vld [vmem:[%s9652_s29 + $0x90] sm:$0xff]  ;;  %v355_v33 = vld [vmem:[%s9652_s29 + $0x98] sm:$0xff]  ;;  %v849_v12 = vld [vmem:[#allocation2 + $0x6c] sm:$0xf] }
  0xd2   : > { %1871 = vrot.lane.b32.xlu1 %v8646_v0, %s9368_s30  ;;  %845 = vst.msk [vmem:[#allocation2 + $0x64] sm:$0xf] %vm280_vm0, %v601_v28  ;;  %v2313_v39 = vrot.slane %v2311_v20, 5  ;;  %848 = vst [vmem:[#allocation2 + $0x68] sm:$0x1] %v847_v35  ;;  %v2787_v41 = vrot.slane %v2664_v15, 5  ;;  %2046 = vrot.lane.b32.xlu0 %v9262_v58, %s9370_s9  ;;  %v2308_v44 = vor.u32 %v2307_v56, %v2303_v34 }
  0xd3   : > { %v2299_v45 = vrot.slane %v2298_v38, 4  ;;  %v2786_v46 = vrot.slane %v2784_v40, 4  ;;  %v604_v47 = vshrl.u32 %v9953_v4, 16  ;;  %v2785_v31 = vsel %vm9659_vm9, %v8693_v21, %v2784_v40 }
  0xd4   : > { %v1536_v50 = vpop.permute.xlu0 %1535  ;;  %v2309_v51 = vrot.slane %v2308_v44, 4  ;;  %v612_v24 = vshrl.u32 %v9955_v5, 16  ;;  %v607_v60 = vshll.u32 %v9953_v4, 16  ;;  %v615_v19 = vshll.u32 %v9955_v5, 16 }
  0xd5   : > { %1583 = vst.msk [vmem:[#allocation3 + $0x8] sm:$0xff] %vm1581_vm15, %v1536_v50  ;;  %v2304_v53 = vsel %vm9666_vm10, %v2299_v45, %v2303_v34  ;;  %v2788_v57 = vsel %vm9659_vm9, %v2786_v46, %v2787_v41  ;;  %v606_v1 = vrot.slane %v604_v47, 7  ;;  %v10078_v8 = vpack.c.bf16 %v354_v52, %v354_v52  ;;  %v853_v41 = vld [vmem:[#allocation2 + $0x74] sm:$0x1] }
  0xd6   : > { %v2120_v54 = vld [vmem:[#allocation2 + $0x60] sm:$0xf]  ;;  %1907 = vst.msk [vmem:[#allocation3 + $0x8] sm:$0xff] %vm1905_vm1, %v10008_v22  ;;  %v2314_v32 = vsel %vm9666_vm10, %v2309_v51, %v2313_v39  ;;  %v10075_v16 = vrot.slane %v612_v24, 7  ;;  %v8709_v4 = vcombine.low %v2785_v31, %v2788_v57  ;;  %v10087_v44 = vpack.c.bf16 %v355_v33, %v355_v33 }
  0xd7   : > { %v2316_v61 = vshrl.u32 %v2120_v54, 16  ;;  %v2319_v62 = vshll.u32 %v2120_v54, 16  ;;  %v2665_v0 = vld [vmem:[#allocation2 + $0x60] sm:$0xe]  ;;  %v8677_v2 = vcombine.low %v2304_v53, %v2314_v32  ;;  %v609_v20 = vor.u32 %v607_v60, %v606_v1  ;;  %2084 = vst.msk [vmem:[#allocation3 + $0x8] sm:$0xff] %vm2082_vm2, %v9985_v26 }
  0xd8   : > { %v8694_v10 = vrot.slane %v2665_v0, 9  ;;  %v3161_v13 = vld [vmem:[#allocation2 + $0x60] sm:$0xf]  ;;  %v610_v21 = vrot.slane %v606_v1, 4  ;;  %v617_v30 = vor.u32 %v615_v19, %v10075_v16  ;;  %v619_v51 = vrot.slane %v10075_v16, 4  ;;  %2629 = vst.msk [vmem:[#allocation3 + $0x8] sm:$0xff] %vm2627_vm3, %v10049_v49 }
  0xd9   : > { %v9263_v6 = vld [vmem:[#allocation2 + $0x60] sm:$0xff]   ;;  %v2318_v7 = vrot.slane %v2316_v61, 4  ;;  %2591 = vrot.lane.b32.xlu0 %v8677_v2, %s9374_s13  ;;  %v2122_v5 = vld [vmem:[#allocation2 + $0x68] sm:$0x1]  ;;  %v2321_v22 = vrot.slane %v2319_v62, 5  ;;  %v10081_v14 = vpop.permute.xlu1 %3625  ;;  %v850_v24 = vsel %vm9680_vm12, %v609_v20, %v849_v12  ;;  %v3336_v53 = vshrl.u32 %v3161_v13, 16 }
  0xda   : > { %v2121_v3 = vld [vmem:[#allocation2 + $0x64] sm:$0xf]  ;;  %2048 = vrot.lane.b32.xlu1 %v9263_v6, %s9370_s9  ;;  %v2335_v15 = vshll.u32 %v2122_v5, 16  ;;  %v2667_v18 = vld [vmem:[#allocation2 + $0x68] sm:$0x1]  ;;  %v618_v39 = vsel %vm9674_vm11, %v610_v21, %v617_v30  ;;  %v3339_v54 = vshll.u32 %v3161_v13, 16 }
  0xdb   : > { %v2325_v9 = vshll.u32 %v2121_v3, 16  ;;  %v2329_v58 = vshrl.u32 %v2121_v3, 16  ;;  %v2666_v17 = vld [vmem:[#allocation2 + $0x64] sm:$0xf]  ;;  %v2322_v27 = vor.u32 %v2321_v22, %v2318_v7  ;;  %v2794_v38 = vrot.slane %v2667_v18, 5  ;;  %v357_v18 = vld [vmem:[%s9652_s29 + $0xa8] sm:$0xff] }
  0xdc   : > { %v2791_v56 = vrot.slane %v2666_v17, 5  ;;  %v2337_v35 = vrot.slane %v2335_v15, 5  ;;  %v3162_v40 = vld [vmem:[#allocation2 + $0x64] sm:$0xf]  ;;  %852 = vst.msk [vmem:[#allocation2 + $0x70] sm:$0xf] %vm280_vm0, %v618_v39  ;;  %v10102_v0 = vpop.permute.xlu0 %2579 }
  0xdd   : > { %v2327_v28 = vrot.slane %v2325_v9, 5  ;;  %v2331_v34 = vrot.slane %v2329_v58, 4  ;;  %v2323_v45 = vrot.slane %v2322_v27, 4  ;;  %2912 = vrot.lane.b32.xlu0 %v8709_v4, %s9372_s11  ;;  %v9265_v50 = vld [vmem:[#allocation2 + $0x60] sm:$0xff]   ;;  %v3163_v52 = vld [vmem:[#allocation2 + $0x68] sm:$0x1]  ;;  %v854_v4 = vsel %vm9688_vm13, %v619_v51, %v853_v41 }
  0xde   : > { %v2793_v47 = vrot.slane %v2791_v56, 4  ;;  %v3706_v31 = vld [vmem:[#allocation2 + $0x60] sm:$0xe]  ;;  %v2792_v19 = vsel %vm9659_vm9, %v8694_v10, %v2791_v56  ;;  %851 = vst [vmem:[#allocation2 + $0x6c] sm:$0xf] %v850_v24  ;;  %v3345_v32 = vshll.u32 %v3162_v40, 16 }
  0xdf   : > { %v2332_v46 = vor.u32 %v2331_v34, %v2327_v28  ;;  %v2328_v57 = vsel %vm9666_vm10, %v2323_v45, %v2327_v28  ;;  %v3707_v61 = vld [vmem:[#allocation2 + $0x64] sm:$0xf]  ;;  %v3708_v62 = vld [vmem:[#allocation2 + $0x68] sm:$0x1]  ;;  %v3338_v16 = vrot.slane %v3336_v53, 4  ;;  %v3341_v33 = vrot.slane %v3339_v54, 5 }
  0xe0   : > { %v1538_v2 = vpop.permute.xlu1 %1537  ;;  %v2795_v1 = vsel %vm9659_vm9, %v2793_v47, %v2794_v38  ;;  %v3349_v6 = vshrl.u32 %v3162_v40, 16  ;;  %v1074_v3 = vld [vmem:[#allocation2 + $0x60] sm:$0xf]  ;;  %v3347_v26 = vrot.slane %v3345_v32, 5  ;;  %v3355_v7 = vshll.u32 %v3163_v52, 16  ;;  %2628 = vst.msk [vmem:[#allocation3] sm:$0xff] %vm2627_vm3, %v10102_v0 }
  0xe1   : > { %v2333_v60 = vrot.slane %v2332_v46, 4  ;;  %1584 = vst.msk [vmem:[#allocation3 + $0x10] sm:$0xff] %vm1581_vm15, %v1538_v2  ;;  %3090 = vrot.lane.b32.xlu0 %v9265_v50, %s9371_s10  ;;  %v3342_v22 = vor.u32 %v3341_v33, %v3338_v16  ;;  %855 = vst [vmem:[#allocation2 + $0x74] sm:$0x1] %v854_v4  ;;  %v8757_v58 = vrot.slane %v3706_v31, 9  ;;  %v356_v10 = vld [vmem:[%s9652_s29 + $0xa0] sm:$0xff]  ;;  %v8710_v20 = vcombine.low %v2792_v19, %v2795_v1 }
  0xe2   : > { %v3351_v9 = vrot.slane %v3349_v6, 4  ;;  %v3357_v12 = vrot.slane %v3355_v7, 5  ;;  %v3828_v13 = vrot.slane %v3707_v61, 5  ;;  %v3831_v15 = vrot.slane %v3708_v62, 5  ;;  %v1075_v52 = vld [vmem:[#allocation2 + $0x64] sm:$0xf] }
  0xe3   : > { %v2338_v59 = vsel %vm9666_vm10, %v2333_v60, %v2337_v35  ;;  %v1294_v17 = vshrl.u32 %v1074_v3, 16  ;;  %v3343_v21 = vrot.slane %v3342_v22, 4  ;;  %v3165_v27 = vld [vmem:[#allocation2 + $0x70] sm:$0xf]  ;;  %v1297_v28 = vshll.u32 %v1074_v3, 16  ;;  %2950 = vst.msk [vmem:[#allocation3 + $0x8] sm:$0xff] %vm2948_vm4, %v10035_v11 }
  0xe4   : > { %v8678_v5 = vcombine.low %v2328_v57, %v2338_v59  ;;  %v3352_v30 = vor.u32 %v3351_v9, %v3347_v26  ;;  %v3369_v34 = vshll.u32 %v3165_v27, 16  ;;  %v3373_v56 = vshrl.u32 %v3165_v27, 16  ;;  %v1076_v60 = vld [vmem:[#allocation2 + $0x68] sm:$0x1]  ;;  %2949 = vst.msk [vmem:[#allocation3] sm:$0xff] %vm2948_vm4, %v9999_v63 }
  0xe5   : > { %v3830_v35 = vrot.slane %v3828_v13, 4  ;;  %v10117_v39 = vpack.c.bf16 %v356_v10, %v356_v10  ;;  %v3348_v40 = vsel %vm9666_vm10, %v3343_v21, %v3347_v26  ;;  %v3164_v45 = vld [vmem:[#allocation2 + $0x6c] sm:$0xf]  ;;  %v3829_v46 = vsel %vm9659_vm9, %v8757_v58, %v3828_v13  ;;  %v1078_v21 = vld [vmem:[#allocation2 + $0x70] sm:$0xf]  ;;  %3128 = vst.msk [vmem:[#allocation3 + $0x8] sm:$0xff] %vm3126_vm5, %v9995_v55 }
  0xe6   : > { %2593 = vrot.lane.b32.xlu1 %v8678_v5, %s9374_s13  ;;  %v10115_v38 = vpop.permute.xlu0 %3623  ;;  %v3353_v41 = vrot.slane %v3352_v30, 4  ;;  %v10123_v47 = vpack.c.bf16 %v357_v18, %v357_v18  ;;  %v3360_v50 = vshrl.u32 %v3164_v45, 16  ;;  %v3363_v51 = vshll.u32 %v3164_v45, 16  ;;  %v9266_v53 = vld [vmem:[#allocation2 + $0x6c] sm:$0xff]   ;;  %3127 = vst.msk [vmem:[#allocation3] sm:$0xff] %vm3126_vm5, %v9991_v37 }
  0xe7   : > { %v3371_v31 = vrot.slane %v3369_v34, 5  ;;  %v3375_v24 = vrot.slane %v3373_v56, 4  ;;  %v3832_v57 = vsel %vm9659_vm9, %v3830_v35, %v3831_v15  ;;  %v1296_v19 = vrot.slane %v1294_v17, 4  ;;  %v3709_v33 = vld [vmem:[#allocation2 + $0x6c] sm:$0xe]  ;;  %3673 = vst.msk [vmem:[#allocation3 + $0x8] sm:$0xff] %vm3671_vm6, %v10081_v14 }
  0xe8   : > { %v3358_v54 = vsel %vm9666_vm10, %v3353_v41, %v3357_v12  ;;  %v1299_v32 = vrot.slane %v1297_v28, 5  ;;  %v3166_v62 = vld [vmem:[#allocation2 + $0x74] sm:$0x1]  ;;  %v3362_v2 = vrot.slane %v3360_v50, 4  ;;  %v3365_v1 = vrot.slane %v3363_v51, 5  ;;  %3672 = vst.msk [vmem:[#allocation3] sm:$0xff] %vm3671_vm6, %v10115_v38 }
  0xe9   : > { %v8741_v61 = vcombine.low %v3348_v40, %v3358_v54  ;;  %v3376_v16 = vor.u32 %v3375_v24, %v3371_v31  ;;  %v3379_v59 = vshll.u32 %v3166_v62, 16  ;;  %v8773_v26 = vcombine.low %v3829_v46, %v3832_v57  ;;  %v3710_v5 = vld [vmem:[#allocation2 + $0x70] sm:$0xf]  ;;  %v1077_v22 = vld [vmem:[#allocation2 + $0x6c] sm:$0xf]  ;;  %3994 = vst.msk [vmem:[#allocation3 + $0x8] sm:$0xff] %vm3992_vm7, %v10037_v43 }
  0xea   : > { %2914 = vrot.lane.b32.xlu1 %v8710_v20, %s9372_s11  ;;  %v1540_v6 = vpop.permute.xlu1 %1539  ;;  %v1862_v3 = vpop.permute.xlu0 %1861  ;;  %v1300_v7 = vor.u32 %v1299_v32, %v1296_v19  ;;  %v1303_v4 = vshll.u32 %v1075_v52, 16  ;;  %v3366_v9 = vor.u32 %v3365_v1, %v3362_v2  ;;  %v1307_v10 = vshrl.u32 %v1075_v52, 16  ;;  %v3711_v13 = vld [vmem:[#allocation2 + $0x74] sm:$0x1]  ;;  %v1622_v54 = vld [vmem:[#allocation2 + $0x60] sm:$0xe] }
  0xeb   : > { %1585 = vst.msk [vmem:[#allocation3 + $0x18] sm:$0xff] %vm1581_vm15, %v1540_v6  ;;  %3635 = vrot.lane.b32.xlu0 %v8741_v61, %s9375_s14  ;;  %v3377_v58 = vrot.slane %v3376_v16, 4  ;;  %v1313_v12 = vshll.u32 %v1076_v60, 16  ;;  %v3381_v15 = vrot.slane %v3379_v59, 5  ;;  %v8758_v20 = vrot.slane %v3709_v33, 9  ;;  %v9285_v60 = vld [vmem:[#allocation2 + $0x48] sm:$0xff]  }
  0xec   : > { %1908 = vst.msk [vmem:[#allocation3 + $0x10] sm:$0xff] %vm1905_vm1, %v1862_v3  ;;  %v1301_v17 = vrot.slane %v1300_v7, 4  ;;  %v1305_v18 = vrot.slane %v1303_v4, 5  ;;  %v3367_v30 = vrot.slane %v3366_v9, 4  ;;  %v1309_v27 = vrot.slane %v1307_v10, 4  ;;  %v9286_v59 = vld [vmem:[#allocation2 + $0x54] sm:$0xff]  }
  0xed   : > { %v1315_v28 = vrot.slane %v1313_v12, 5  ;;  %v3835_v34 = vrot.slane %v3710_v5, 5  ;;  %v3382_v40 = vsel %vm9666_vm10, %v3377_v58, %v3381_v15  ;;  %v3838_v45 = vrot.slane %v3711_v13, 5  ;;  %v1079_v46 = vld [vmem:[#allocation2 + $0x74] sm:$0x1]  ;;  %1040 = vst.msk [vmem:[#allocation3 + $0x30] sm:$0xff] %vm11987_vm14, %v9285_v60 }
  0xee   : > { %3092 = vrot.lane.b32.xlu1 %v9266_v53, %s9371_s10  ;;  %v1864_v56 = vpop.permute.xlu1 %1863  ;;  %v2039_v35 = vpop.permute.xlu0 %2038  ;;  %v1306_v41 = vsel %vm9666_vm10, %v1301_v17, %v1305_v18  ;;  %v1318_v50 = vshrl.u32 %v1077_v22, 16  ;;  %v3372_v51 = vsel %vm9666_vm10, %v3367_v30, %v3371_v31  ;;  %v1310_v24 = vor.u32 %v1309_v27, %v1305_v18  ;;  %v1623_v57 = vld [vmem:[#allocation2 + $0x64] sm:$0xf]  ;;  %v1624_v2 = vld [vmem:[#allocation2 + $0x68] sm:$0x1]  ;;  %1041 = vst.msk [vmem:[#allocation3 + $0x38] sm:$0xff] %vm11987_vm14, %v9286_v59 }
  0xef   : > { %1909 = vst.msk [vmem:[#allocation3 + $0x18] sm:$0xff] %vm1905_vm1, %v1864_v56  ;;  %3956 = vrot.lane.b32.xlu0 %v8773_v26, %s9373_s12  ;;  %v3836_v52 = vsel %vm9659_vm9, %v8758_v20, %v3835_v34  ;;  %v3837_v53 = vrot.slane %v3835_v34, 4  ;;  %v8742_v19 = vcombine.low %v3372_v51, %v3382_v40  ;;  %v1321_v61 = vshll.u32 %v1077_v22, 16  ;;  %v1625_v6 = vld [vmem:[#allocation2 + $0x6c] sm:$0xe] }
  0xf0   : > { %2085 = vst.msk [vmem:[#allocation3 + $0x10] sm:$0xff] %vm2082_vm2, %v2039_v35  ;;  %v1320_v32 = vrot.slane %v1318_v50, 4  ;;  %v1327_v62 = vshll.u32 %v1078_v21, 16  ;;  %v1311_v1 = vrot.slane %v1310_v24, 4  ;;  %v1331_v31 = vshrl.u32 %v1078_v21, 16 }
  0xf1   : > { %v3839_v16 = vsel %vm9659_vm9, %v3837_v53, %v3838_v45  ;;  %v1337_v33 = vshll.u32 %v1079_v46, 16  ;;  %v1323_v7 = vrot.slane %v1321_v61, 5  ;;  %v8631_v5 = vrot.slane %v1622_v54, 9  ;;  %v1626_v22 = vld [vmem:[#allocation2 + $0x70] sm:$0xf]  ;;  %3993 = vst.msk [vmem:[#allocation3] sm:$0xff] %vm3992_vm7, %v10010_v25 }
  0xf2   : > { %v2584_v3 = vpop.permute.xlu0 %2583  ;;  %3637 = vrot.lane.b32.xlu1 %v8742_v19, %s9375_s14  ;;  %v8774_v26 = vcombine.low %v3836_v52, %v3839_v16  ;;  %v1329_v4 = vrot.slane %v1327_v62, 5  ;;  %v1316_v58 = vsel %vm9666_vm10, %v1311_v1, %v1315_v28  ;;  %v1333_v10 = vrot.slane %v1331_v31, 4  ;;  %v1627_v15 = vld [vmem:[#allocation2 + $0x74] sm:$0x1]  ;;  %v2123_v61 = vld [vmem:[#allocation2 + $0x6c] sm:$0xf] }
  0xf3   : > { %v2041_v9 = vpop.permute.xlu1 %2040  ;;  %v1339_v12 = vrot.slane %v1337_v33, 5  ;;  %v1755_v13 = vrot.slane %v1623_v57, 5  ;;  %v8615_v17 = vcombine.low %v1306_v41, %v1316_v58  ;;  %v1324_v18 = vor.u32 %v1323_v7, %v1320_v32  ;;  %v856_v32 = vld [vmem:[#allocation2 + $0x78] sm:$0xf]  ;;  %v9267_v1 = vld [vmem:[#allocation2 + $0x6c] sm:$0xff]   ;;  %2630 = vst.msk [vmem:[#allocation3 + $0x10] sm:$0xff] %vm2627_vm3, %v2584_v3 }
  0xf4   : > { %2086 = vst.msk [vmem:[#allocation3 + $0x18] sm:$0xff] %vm2082_vm2, %v2041_v9  ;;  %3958 = vrot.lane.b32.xlu0 %v8774_v26, %s9373_s12  ;;  %v1758_v20 = vrot.slane %v1624_v2, 5  ;;  %v8632_v21 = vrot.slane %v1625_v6, 9  ;;  %v1334_v30 = vor.u32 %v1333_v10, %v1329_v4  ;;  %v1762_v28 = vrot.slane %v1626_v22, 5  ;;  %v2124_v33 = vld [vmem:[#allocation2 + $0x70] sm:$0xf] }
  0xf5   : > { %v1756_v27 = vsel %vm9659_vm9, %v8631_v5, %v1755_v13  ;;  %v1757_v34 = vrot.slane %v1755_v13, 4  ;;  %v1325_v35 = vrot.slane %v1324_v18, 4  ;;  %v1765_v40 = vrot.slane %v1627_v15, 5  ;;  %v2125_v6 = vld [vmem:[#allocation2 + $0x74] sm:$0x1] }
  0xf6   : > { %v2905_v56 = vpop.permute.xlu0 %2904  ;;  %1549 = vrot.lane.b32.xlu1 %v8615_v17, %s9369_s8  ;;  %v621_v45 = vshrl.u32 %v10078_v8, 16  ;;  %v624_v41 = vshll.u32 %v10078_v8, 16  ;;  %v1335_v46 = vrot.slane %v1334_v30, 4  ;;  %v1763_v51 = vsel %vm9659_vm9, %v8632_v21, %v1762_v28  ;;  %v860_v59 = vld [vmem:[#allocation2 + $0x80] sm:$0x1] }
  0xf7   : > { %v1759_v50 = vsel %vm9659_vm9, %v1757_v34, %v1758_v20  ;;  %v1764_v24 = vrot.slane %v1762_v28, 4  ;;  %v1330_v52 = vsel %vm9666_vm10, %v1325_v35, %v1329_v4  ;;  %v629_v57 = vshrl.u32 %v10087_v44, 16  ;;  %v2668_v7 = vld [vmem:[#allocation2 + $0x6c] sm:$0xe]  ;;  %v2669_v0 = vld [vmem:[#allocation2 + $0x70] sm:$0xf] }
  0xf8   : > { %v8647_v53 = vcombine.low %v1756_v27, %v1759_v50  ;;  %v623_v54 = vrot.slane %v621_v45, 7  ;;  %v1340_v60 = vsel %vm9666_vm10, %v1335_v46, %v1339_v12  ;;  %v632_v19 = vshll.u32 %v10087_v44, 16  ;;  %2951 = vst.msk [vmem:[#allocation3 + $0x10] sm:$0xff] %vm2948_vm4, %v2905_v56  ;;  %v2670_v11 = vld [vmem:[#allocation2 + $0x74] sm:$0x1] }
  0xf9   : > { %v1766_v8 = vsel %vm9659_vm9, %v1764_v24, %v1765_v40  ;;  %v8616_v62 = vcombine.low %v1330_v52, %v1340_v60  ;;  %v631_v26 = vrot.slane %v629_v57, 7  ;;  %v2340_v49 = vshrl.u32 %v2123_v61, 16  ;;  %v10209_v43 = vld [vmem:[%s11979_s1 + $0x10] ss:$0 sps:$4 sm:$0x33]  }
  0xfa   : > { %1873 = vrot.lane.b32.xlu0 %v8647_v53, %s9368_s30  ;;  %v8648_v2 = vcombine.low %v1763_v51, %v1766_v8  ;;  %v626_v16 = vor.u32 %v624_v41, %v623_v54  ;;  %v627_v31 = vrot.slane %v623_v54, 4  ;;  %v3083_v44 = vpop.permute.xlu0 %3082  ;;  %v2343_v5 = vshll.u32 %v2123_v61, 16  ;;  %v358_v51 = vld [vmem:[%s9652_s29 + $0xb0] sm:$0xff]  ;;  %9231 = vmatprep.subr.msk.bf16.mxu0 %vm11986_vm8, %v10209_v43 }
  0xfb   : > { %1551 = vrot.lane.b32.xlu1 %v8616_v62, %s9369_s8  ;;  %v634_v22 = vor.u32 %v632_v19, %v631_v26  ;;  %v636_v9 = vrot.slane %v631_v26, 4  ;;  %v2349_v58 = vshll.u32 %v2124_v33, 16  ;;  %v2353_v10 = vshrl.u32 %v2124_v33, 16  ;;  %3129 = vst.msk [vmem:[#allocation3 + $0x10] sm:$0xff] %vm3126_vm5, %v3083_v44  ;;  %v863_v19 = vld [vmem:[#allocation2 + $0x84] sm:$0xf] }
  0xfc   : > { %v857_v4 = vsel %vm9680_vm12, %v626_v16, %v856_v32  ;;  %v2342_v63 = vrot.slane %v2340_v49, 4  ;;  %v2345_v12 = vrot.slane %v2343_v5, 5  ;;  %v2359_v13 = vshll.u32 %v2125_v6, 16  ;;  %v359_v16 = vld [vmem:[%s9652_s29 + $0xb8] sm:$0xff] }
  0xfd   : > { %858 = vst [vmem:[#allocation2 + $0x78] sm:$0xf] %v857_v4  ;;  %v635_v55 = vsel %vm9674_vm11, %v627_v31, %v634_v22  ;;  %v2351_v37 = vrot.slane %v2349_v58, 5  ;;  %v2355_v15 = vrot.slane %v2353_v10, 4  ;;  %v861_v17 = vsel %vm9688_vm13, %v636_v9, %v860_v59  ;;  %v360_v9 = vld [vmem:[%s9652_s29 + $0xc0] sm:$0xff] }
  0xfe   : > { %2050 = vrot.lane.b32.xlu0 %v9267_v1, %s9370_s9  ;;  %859 = vst.msk [vmem:[#allocation2 + $0x7c] sm:$0xf] %vm280_vm0, %v635_v55  ;;  %v2346_v14 = vor.u32 %v2345_v12, %v2342_v63  ;;  %862 = vst [vmem:[#allocation2 + $0x80] sm:$0x1] %v861_v17  ;;  %v8695_v38 = vrot.slane %v2668_v7, 9  ;;  %v2798_v18 = vrot.slane %v2669_v0, 5  ;;  %v10230_v7 = vpack.c.bf16 %v358_v51, %v358_v51 }
  0xff   : > { %v2586_v3 = vpop.permute.xlu1 %2585  ;;  %1875 = vrot.lane.b32.xlu1 %v8648_v2, %s9368_s30  ;;  %v2801_v20 = vrot.slane %v2670_v11, 5  ;;  %v2356_v30 = vor.u32 %v2355_v15, %v2351_v37  ;;  %v2361_v27 = vrot.slane %v2359_v13, 5  ;;  %v638_v25 = vshrl.u32 %v10117_v39, 16  ;;  %v867_v1 = vld [vmem:[#allocation2 + $0x8c] sm:$0x1] }
 0x100   : > { %2631 = vst.msk [vmem:[#allocation3 + $0x18] sm:$0xff] %vm2627_vm3, %v2586_v3  ;;  %v646_v34 = vshrl.u32 %v10123_v47, 16  ;;  %v2347_v28 = vrot.slane %v2346_v14, 4  ;;  %v2800_v56 = vrot.slane %v2798_v18, 4  ;;  %v641_v35 = vshll.u32 %v10117_v39, 16 }
 0x101   : > { %v649_v40 = vshll.u32 %v10123_v47, 16  ;;  %v2357_v41 = vrot.slane %v2356_v30, 4  ;;  %v640_v46 = vrot.slane %v638_v25, 7  ;;  %v2799_v53 = vsel %vm9659_vm9, %v8695_v38, %v2798_v18 }
 0x102   : > { %v648_v50 = vrot.slane %v646_v34, 7  ;;  %v2352_v24 = vsel %vm9666_vm10, %v2347_v28, %v2351_v37  ;;  %v2802_v39 = vsel %vm9659_vm9, %v2800_v56, %v2801_v20  ;;  %v10240_v13 = vpack.c.bf16 %v359_v16, %v359_v16 }
 0x103   : > { %v2907_v21 = vpop.permute.xlu1 %2906  ;;  %v3628_v45 = vpop.permute.xlu0 %3627  ;;  %v2362_v57 = vsel %vm9666_vm10, %v2357_v41, %v2361_v27  ;;  %v643_v62 = vor.u32 %v641_v35, %v640_v46  ;;  %v644_v2 = vrot.slane %v640_v46, 4  ;;  %v8711_v44 = vcombine.low %v2799_v53, %v2802_v39 }
 0x104   : > { %2952 = vst.msk [vmem:[#allocation3 + $0x18] sm:$0xff] %vm2948_vm4, %v2907_v21  ;;  %v2126_v52 = vld [vmem:[#allocation2 + $0x78] sm:$0xf]  ;;  %v8679_v32 = vcombine.low %v2352_v24, %v2362_v57  ;;  %v651_v26 = vor.u32 %v649_v40, %v648_v50  ;;  %v653_v12 = vrot.slane %v648_v50, 4  ;;  %v10245_v25 = vpack.c.bf16 %v360_v9, %v360_v9  ;;  %v362_v24 = vld [vmem:[%s9652_s29 + $0xd0] sm:$0xff] }
 0x105   : > { %3674 = vst.msk [vmem:[#allocation3 + $0x10] sm:$0xff] %vm3671_vm6, %v3628_v45  ;;  %v2671_v47 = vld [vmem:[#allocation2 + $0x78] sm:$0xe]  ;;  %v2364_v60 = vshrl.u32 %v2126_v52, 16  ;;  %v2367_v8 = vshll.u32 %v2126_v52, 16  ;;  %v864_v3 = vsel %vm9680_vm12, %v643_v62, %v863_v19  ;;  %v361_v45 = vld [vmem:[%s9652_s29 + $0xc8] sm:$0xff] }
 0x106   : > { %v8696_v61 = vrot.slane %v2671_v47, 9  ;;  %v9268_v33 = vld [vmem:[#allocation2 + $0x78] sm:$0xff]   ;;  %2595 = vrot.lane.b32.xlu0 %v8679_v32, %s9374_s13  ;;  %v2128_v4 = vld [vmem:[#allocation2 + $0x80] sm:$0x1]  ;;  %v652_v63 = vsel %vm9674_vm11, %v644_v2, %v651_v26  ;;  %865 = vst [vmem:[#allocation2 + $0x84] sm:$0xf] %v864_v3  ;;  %v868_v21 = vsel %vm9688_vm13, %v653_v12, %v867_v1  ;;  %v10260_v32 = vpack.c.bf16 %v361_v45, %v361_v45 }
 0x107   : > { %v3085_v54 = vpop.permute.xlu1 %3084  ;;  %v3949_v31 = vpop.permute.xlu0 %3948  ;;  %v2127_v6 = vld [vmem:[#allocation2 + $0x7c] sm:$0xf]  ;;  %v2366_v59 = vrot.slane %v2364_v60, 4  ;;  %v2369_v49 = vrot.slane %v2367_v8, 5  ;;  %v3167_v22 = vld [vmem:[#allocation2 + $0x78] sm:$0xf]  ;;  %2052 = vrot.lane.b32.xlu1 %v9268_v33, %s9370_s9 }
 0x108   : > { %3130 = vst.msk [vmem:[#allocation3 + $0x18] sm:$0xff] %vm3126_vm5, %v3085_v54  ;;  %v2373_v5 = vshll.u32 %v2127_v6, 16  ;;  %v2377_v0 = vshrl.u32 %v2127_v6, 16  ;;  %v2383_v58 = vshll.u32 %v2128_v4, 16  ;;  %v2672_v10 = vld [vmem:[#allocation2 + $0x7c] sm:$0xf] }
 0x109   : > { %3995 = vst.msk [vmem:[#allocation3 + $0x10] sm:$0xff] %vm3992_vm7, %v3949_v31  ;;  %v2673_v11 = vld [vmem:[#allocation2 + $0x80] sm:$0x1]  ;;  %v2370_v55 = vor.u32 %v2369_v49, %v2366_v59  ;;  %v2805_v17 = vrot.slane %v2672_v10, 5  ;;  %v3168_v18 = vld [vmem:[#allocation2 + $0x7c] sm:$0xf]  ;;  %v10267_v31 = vpack.c.bf16 %v362_v24, %v362_v24 }
 0x10a   : > { %v2375_v37 = vrot.slane %v2373_v5, 5  ;;  %v2379_v15 = vrot.slane %v2377_v0, 4  ;;  %866 = vst.msk [vmem:[#allocation2 + $0x88] sm:$0xf] %vm280_vm0, %v652_v63  ;;  %v2385_v14 = vrot.slane %v2383_v58, 5  ;;  %v2808_v38 = vrot.slane %v2673_v11, 5  ;;  %2916 = vrot.lane.b32.xlu0 %v8711_v44, %s9372_s11 }
 0x10b   : > { %v3169_v20 = vld [vmem:[#allocation2 + $0x80] sm:$0x1]  ;;  %v3630_v30 = vpop.permute.xlu1 %3629  ;;  %v2371_v34 = vrot.slane %v2370_v55, 4  ;;  %v10250_v56 = vsel %vm9659_vm9, %v8696_v61, %v2805_v17  ;;  %v2807_v35 = vrot.slane %v2805_v17, 4  ;;  %v9273_v40 = vld [vmem:[#allocation2 + $0x78] sm:$0xff]   ;;  %v3384_v41 = vshrl.u32 %v3167_v22, 16 }
 0x10c   : > { %v3951_v27 = vpop.permute.xlu0 %3950  ;;  %v2380_v28 = vor.u32 %v2379_v15, %v2375_v37  ;;  %869 = vst [vmem:[#allocation2 + $0x8c] sm:$0x1] %v868_v21  ;;  %3675 = vst.msk [vmem:[#allocation3 + $0x18] sm:$0xff] %vm3671_vm6, %v3630_v30  ;;  %v3387_v46 = vshll.u32 %v3167_v22, 16  ;;  %v3393_v50 = vshll.u32 %v3168_v18, 16  ;;  %v3397_v51 = vshrl.u32 %v3168_v18, 16 }
 0x10d   : > { %3996 = vst.msk [vmem:[#allocation3 + $0x18] sm:$0xff] %vm3992_vm7, %v3951_v27  ;;  %v2376_v52 = vsel %vm9666_vm10, %v2371_v34, %v2375_v37  ;;  %v2809_v39 = vsel %vm9659_vm9, %v2807_v35, %v2808_v38  ;;  %v3403_v47 = vshll.u32 %v3169_v20, 16  ;;  %v3386_v54 = vrot.slane %v3384_v41, 4  ;;  %v3712_v8 = vld [vmem:[#allocation2 + $0x78] sm:$0xe]  ;;  %v4010_v24 = vld [vmem:[#allocation3 + $0x8] sm:$0xff] }
 0x10e   : > { %v2381_v53 = vrot.slane %v2380_v28, 4  ;;  %v3389_v57 = vrot.slane %v3387_v46, 5  ;;  %v3395_v60 = vrot.slane %v3393_v50, 5  ;;  %v8712_v62 = vcombine.low %v10250_v56, %v2809_v39  ;;  %3094 = vrot.lane.b32.xlu0 %v9273_v40, %s9371_s10  ;;  %v3170_v1 = vld [vmem:[#allocation2 + $0x84] sm:$0xf] }
 0x10f   : > { %v1542_v19 = vpop.permute.xlu1 %1541  ;;  %v3399_v2 = vrot.slane %v3397_v51, 4  ;;  %v3713_v16 = vld [vmem:[#allocation2 + $0x7c] sm:$0xf]  ;;  %v3405_v59 = vrot.slane %v3403_v47, 5  ;;  %v3408_v26 = vshrl.u32 %v3170_v1, 16  ;;  %v3411_v49 = vshll.u32 %v3170_v1, 16 }
 0x110   : > { %v2386_v61 = vsel %vm9666_vm10, %v2381_v53, %v2385_v14  ;;  %1586 = vst.msk [vmem:[#allocation3 + $0x20] sm:$0xff] %vm1581_vm15, %v1542_v19  ;;  %v3390_v6 = vor.u32 %v3389_v57, %v3386_v54  ;;  %v3714_v3 = vld [vmem:[#allocation2 + $0x80] sm:$0x1]  ;;  %v4096_v11 = vsel %vm11986_vm8, %v10209_v43, 0  ;;  %v8759_v63 = vrot.slane %v3712_v8, 9  ;;  %v4009_v14 = vld [vmem:[#allocation3] sm:$0xff] }
 0x111   : > { %v8680_v33 = vcombine.low %v2376_v52, %v2386_v61  ;;  %v3171_v44 = vld [vmem:[#allocation2 + $0x88] sm:$0xf]  ;;  %v3400_v4 = vor.u32 %v3399_v2, %v3395_v60  ;;  %v3410_v10 = vrot.slane %v3408_v26, 4  ;;  %v3413_v37 = vrot.slane %v3411_v49, 5  ;;  %9160 = vmatpush3.bf16.msra.mxu0 %v4096_v11  ;;  %v1080_v30 = vld [vmem:[#allocation2 + $0x78] sm:$0xf] }
 0x112   : > { %v3417_v5 = vshll.u32 %v3171_v44, 16  ;;  %v3421_v0 = vshrl.u32 %v3171_v44, 16  ;;  %v3391_v9 = vrot.slane %v3390_v6, 4  ;;  %v3842_v20 = vrot.slane %v3713_v16, 5  ;;  %v1081_v28 = vld [vmem:[#allocation2 + $0x7c] sm:$0xf] }
 0x113   : > { %v1866_v22 = vpop.permute.xlu0 %1865  ;;  %2597 = vrot.lane.b32.xlu1 %v8680_v33, %s9374_s13  ;;  %v3172_v58 = vld [vmem:[#allocation2 + $0x8c] sm:$0x1]  ;;  %v3401_v55 = vrot.slane %v3400_v4, 4  ;;  %v3845_v21 = vrot.slane %v3714_v3, 5  ;;  %v3414_v27 = vor.u32 %v3413_v37, %v3410_v10  ;;  %vm11988_vm8 = vcmask 293888   ;;  %v9275_v45 = vld [vmem:[#allocation2 + $0x84] sm:$0xff]  }
 0x114   : > { %v1544_v12 = vpop.permute.xlu1 %1543  ;;  %1910 = vst.msk [vmem:[#allocation3 + $0x20] sm:$0xff] %vm1905_vm1, %v1866_v22  ;;  %v3419_v15 = vrot.slane %v3417_v5, 5  ;;  %v3423_v17 = vrot.slane %v3421_v0, 4  ;;  %v3396_v38 = vsel %vm9666_vm10, %v3391_v9, %v3395_v60  ;;  %v3427_v18 = vshll.u32 %v3172_v58, 16  ;;  %v1082_v56 = vld [vmem:[#allocation2 + $0x80] sm:$0x1]  ;;  %9161 = vmatprep.mubr.msk.bf16.mxu0 %vm11988_vm8, %v4009_v14 }
 0x115   : > { %1587 = vst.msk [vmem:[#allocation3 + $0x28] sm:$0xff] %vm1581_vm15, %v1544_v12  ;;  %v3406_v43 = vsel %vm9666_vm10, %v3401_v55, %v3405_v59  ;;  %v4011_v35 = vld [vmem:[#allocation3 + $0x10] sm:$0xff]  ;;  %v3843_v50 = vsel %vm9659_vm9, %v8759_v63, %v3842_v20  ;;  %v3844_v51 = vrot.slane %v3842_v20, 4  ;;  %v3715_v52 = vld [vmem:[#allocation2 + $0x84] sm:$0xe]  ;;  %v3415_v39 = vrot.slane %v3414_v27, 4  ;;  %9162 = vmatmul.mubr.msk.bf16.vlgmr.msra.gmra.mrb[0].mxu0 %vm11988_vm8, %v4010_v24 }
 0x116   : > { %v3424_v34 = vor.u32 %v3423_v17, %v3419_v15  ;;  %v8743_v41 = vcombine.low %v3396_v38, %v3406_v43  ;;  %v3429_v46 = vrot.slane %v3427_v18, 5  ;;  %v1342_v54 = vshrl.u32 %v1080_v30, 16  ;;  %v3716_v60 = vld [vmem:[#allocation2 + $0x88] sm:$0xf]  ;;  %v3717_v2 = vld [vmem:[#allocation2 + $0x8c] sm:$0x1]  ;;  %9165 = vmatprep.mubr.msk.bf16.mxu0 %vm11988_vm8, %v4011_v35 }
 0x117   : > { %v2043_v40 = vpop.permute.xlu0 %2042  ;;  %2918 = vrot.lane.b32.xlu1 %v8712_v62, %s9372_s11  ;;  %v1345_v57 = vshll.u32 %v1080_v30, 16  ;;  %v3846_v8 = vsel %vm9659_vm9, %v3844_v51, %v3845_v21  ;;  %v1351_v19 = vshll.u32 %v1081_v28, 16  ;;  %v1355_v61 = vshrl.u32 %v1081_v28, 16  ;;  %v1083_v59 = vld [vmem:[#allocation2 + $0x84] sm:$0xf]  ;;  %v9292_v30 = vld [vmem:[#allocation2 + $0x6c] sm:$0xff]  }
 0x118   : > { %v1868_v53 = vpop.permute.xlu1 %1867  ;;  %2087 = vst.msk [vmem:[#allocation3 + $0x20] sm:$0xff] %vm2082_vm2, %v2043_v40  ;;  %v3425_v47 = vrot.slane %v3424_v34, 4  ;;  %3639 = vrot.lane.b32.xlu0 %v8743_v41, %s9375_s14  ;;  %v1361_v62 = vshll.u32 %v1082_v56, 16  ;;  %v3420_v1 = vsel %vm9666_vm10, %v3415_v39, %v3419_v15  ;;  %v8775_v33 = vcombine.low %v3843_v50, %v3846_v8  ;;  %v1084_v44 = vld [vmem:[#allocation2 + $0x88] sm:$0xf]  ;;  %v9291_v26 = vld [vmem:[#allocation2 + $0x60] sm:$0xff]  }
 0x119   : > { %1911 = vst.msk [vmem:[#allocation3 + $0x28] sm:$0xff] %vm1905_vm1, %v1868_v53  ;;  %v1344_v6 = vrot.slane %v1342_v54, 4  ;;  %v1347_v49 = vrot.slane %v1345_v57, 5  ;;  %v1353_v5 = vrot.slane %v1351_v19, 5  ;;  %v1357_v0 = vrot.slane %v1355_v61, 4  ;;  %v4012_v15 = vld [vmem:[#allocation3 + $0x18] sm:$0xff] }
 0x11a   : > { %v3430_v16 = vsel %vm9666_vm10, %v3425_v47, %v3429_v46  ;;  %v1363_v3 = vrot.slane %v1361_v62, 5  ;;  %v8760_v22 = vrot.slane %v3715_v52, 9  ;;  %v3849_v9 = vrot.slane %v3716_v60, 5  ;;  %1042 = vst.msk [vmem:[#allocation3 + $0x40] sm:$0xff] %vm11987_vm14, %v9291_v26  ;;  %v1085_v63 = vld [vmem:[#allocation2 + $0x8c] sm:$0x1] }
 0x11b   : > { %3096 = vrot.lane.b32.xlu1 %v9275_v45, %s9371_s10  ;;  %v8744_v4 = vcombine.low %v3420_v1, %v3430_v16  ;;  %v3852_v58 = vrot.slane %v3717_v2, 5  ;;  %v1348_v10 = vor.u32 %v1347_v49, %v1344_v6  ;;  %v1358_v11 = vor.u32 %v1357_v0, %v1353_v5  ;;  %v1628_v37 = vld [vmem:[#allocation2 + $0x78] sm:$0xe]  ;;  %v1629_v20 = vld [vmem:[#allocation2 + $0x7c] sm:$0xf]  ;;  %1043 = vst.msk [vmem:[#allocation3 + $0x48] sm:$0xff] %vm11987_vm14, %v9292_v30 }
 0x11c   : > { %3960 = vrot.lane.b32.xlu0 %v8775_v33, %s9373_s12  ;;  %v1366_v12 = vshrl.u32 %v1083_v59, 16  ;;  %v1369_v55 = vshll.u32 %v1083_v59, 16  ;;  %v3850_v17 = vsel %vm9659_vm9, %v8760_v22, %v3849_v9  ;;  %v3851_v14 = vrot.slane %v3849_v9, 4  ;;  %v1630_v56 = vld [vmem:[#allocation2 + $0x80] sm:$0x1] }
 0x11d   : > { %v1375_v38 = vshll.u32 %v1084_v44, 16  ;;  %v1379_v18 = vshrl.u32 %v1084_v44, 16  ;;  %v1349_v43 = vrot.slane %v1348_v10, 4  ;;  %v1359_v27 = vrot.slane %v1358_v11, 4  ;;  %v1631_v46 = vld [vmem:[#allocation2 + $0x84] sm:$0xe]  ;;  %9166 = vmatmul.mubr.msk.bf16.gmra.mrb[4].mxu0 %vm11988_vm8, %v4012_v15 }
 0x11e   : > { %v1368_v34 = vrot.slane %v1366_v12, 4  ;;  %v1371_v28 = vrot.slane %v1369_v55, 5  ;;  %v3853_v35 = vsel %vm9659_vm9, %v3851_v14, %v3852_v58  ;;  %v1385_v41 = vshll.u32 %v1085_v63, 16  ;;  %v1632_v39 = vld [vmem:[#allocation2 + $0x88] sm:$0xf] }
 0x11f   : > { %v2588_v21 = vpop.permute.xlu0 %2587  ;;  %3641 = vrot.lane.b32.xlu1 %v8744_v4, %s9375_s14  ;;  %v1377_v40 = vrot.slane %v1375_v38, 5  ;;  %v1381_v45 = vrot.slane %v1379_v18, 4  ;;  %v1354_v51 = vsel %vm9666_vm10, %v1349_v43, %v1353_v5  ;;  %v1364_v24 = vsel %vm9666_vm10, %v1359_v27, %v1363_v3  ;;  %v1633_v47 = vld [vmem:[#allocation2 + $0x8c] sm:$0x1]  ;;  %v2129_v44 = vld [vmem:[#allocation2 + $0x84] sm:$0xf] }
 0x120   : > { %2632 = vst.msk [vmem:[#allocation3 + $0x20] sm:$0xff] %vm2627_vm3, %v2588_v21  ;;  %v2045_v50 = vpop.permute.xlu1 %2044  ;;  %v8776_v52 = vcombine.low %v3850_v17, %v3853_v35  ;;  %v1372_v53 = vor.u32 %v1371_v28, %v1368_v34  ;;  %v8617_v54 = vcombine.low %v1354_v51, %v1364_v24  ;;  %v1387_v60 = vrot.slane %v1385_v41, 5  ;;  %v870_v0 = vld [vmem:[#allocation2 + $0x90] sm:$0xf]  ;;  %v2130_v3 = vld [vmem:[#allocation2 + $0x88] sm:$0xf] }
 0x121   : > { %2088 = vst.msk [vmem:[#allocation3 + $0x28] sm:$0xff] %vm2082_vm2, %v2045_v50  ;;  %v1382_v57 = vor.u32 %v1381_v45, %v1377_v40  ;;  %v8633_v8 = vrot.slane %v1628_v37, 9  ;;  %v1769_v62 = vrot.slane %v1629_v20, 5  ;;  %v1772_v2 = vrot.slane %v1630_v56, 5  ;;  %v2131_v22 = vld [vmem:[#allocation2 + $0x8c] sm:$0x1] }
 0x122   : > { %3962 = vrot.lane.b32.xlu0 %v8776_v52, %s9373_s12  ;;  %v1373_v61 = vrot.slane %v1372_v53, 4  ;;  %v8634_v1 = vrot.slane %v1631_v46, 9  ;;  %v1776_v33 = vrot.slane %v1632_v39, 5  ;;  %v1779_v6 = vrot.slane %v1633_v47, 5  ;;  %v874_v18 = vld [vmem:[#allocation2 + $0x98] sm:$0x1] }
 0x123   : > { %v2909_v19 = vpop.permute.xlu0 %2908  ;;  %1553 = vrot.lane.b32.xlu1 %v8617_v54, %s9369_s8  ;;  %v1383_v16 = vrot.slane %v1382_v57, 4  ;;  %v655_v59 = vshrl.u32 %v10230_v7, 16  ;;  %v1770_v4 = vsel %vm9659_vm9, %v8633_v8, %v1769_v62  ;;  %v1771_v49 = vrot.slane %v1769_v62, 4  ;;  %v2674_v20 = vld [vmem:[#allocation2 + $0x84] sm:$0xe]  ;;  %v9295_v41 = vld [vmem:[#allocation2 + $0x78] sm:$0xff]  }
 0x124   : > { %2953 = vst.msk [vmem:[#allocation3 + $0x20] sm:$0xff] %vm2948_vm4, %v2909_v19  ;;  %v1378_v26 = vsel %vm9666_vm10, %v1373_v61, %v1377_v40  ;;  %v658_v5 = vshll.u32 %v10230_v7, 16  ;;  %v1777_v58 = vsel %vm9659_vm9, %v8634_v1, %v1776_v33  ;;  %v1778_v10 = vrot.slane %v1776_v33, 4  ;;  %v2675_v34 = vld [vmem:[#allocation2 + $0x88] sm:$0xf] }
 0x125   : > { %v1388_v9 = vsel %vm9666_vm10, %v1383_v16, %v1387_v60  ;;  %v657_v11 = vrot.slane %v655_v59, 7  ;;  %v1773_v55 = vsel %vm9659_vm9, %v1771_v49, %v1772_v2  ;;  %v663_v37 = vshrl.u32 %v10240_v13, 16  ;;  %v9296_v46 = vld [vmem:[#allocation2 + $0x84] sm:$0xff]   ;;  %v2676_v53 = vld [vmem:[#allocation2 + $0x8c] sm:$0x1]  ;;  %1044 = vst.msk [vmem:[#allocation3 + $0x50] sm:$0xff] %vm11987_vm14, %v9295_v41 }
 0x126   : > { %v8618_v12 = vcombine.low %v1378_v26, %v1388_v9  ;;  %v666_v7 = vshll.u32 %v10240_v13, 16  ;;  %v8649_v15 = vcombine.low %v1770_v4, %v1773_v55  ;;  %v1780_v17 = vsel %vm9659_vm9, %v1778_v10, %v1779_v6  ;;  %v9277_v13 = vld [vmem:[#allocation2 + $0x84] sm:$0xff]   ;;  %1045 = vst.msk [vmem:[#allocation3 + $0x58] sm:$0xff] %vm11987_vm14, %v9296_v46 }
 0x127   : > { %v3087_v63 = vpop.permute.xlu0 %3086  ;;  %v660_v14 = vor.u32 %v658_v5, %v657_v11  ;;  %v661_v38 = vrot.slane %v657_v11, 4  ;;  %v8650_v21 = vcombine.low %v1777_v58, %v1780_v17  ;;  %v665_v30 = vrot.slane %v663_v37, 7 }
 0x128   : > { %3131 = vst.msk [vmem:[#allocation3 + $0x20] sm:$0xff] %vm3126_vm5, %v3087_v63  ;;  %1555 = vrot.lane.b32.xlu1 %v8618_v12, %s9369_s8  ;;  %v2388_v43 = vshrl.u32 %v2129_v44, 16  ;;  %v2391_v27 = vshll.u32 %v2129_v44, 16  ;;  %1877 = vrot.lane.b32.xlu0 %v8649_v15, %s9368_s30  ;;  %v2397_v56 = vshll.u32 %v2130_v3, 16  ;;  %v2401_v35 = vshrl.u32 %v2130_v3, 16 }
 0x129   : > { %v871_v28 = vsel %vm9680_vm12, %v660_v14, %v870_v0  ;;  %v2407_v40 = vshll.u32 %v2131_v22, 16  ;;  %v668_v50 = vor.u32 %v666_v7, %v665_v30  ;;  %v670_v51 = vrot.slane %v665_v30, 4  ;;  %v877_v22 = vld [vmem:[#allocation2 + $0x9c] sm:$0xf]  ;;  %v881_v12 = vld [vmem:[#allocation2 + $0xa4] sm:$0x1] }
 0x12a   : > { %872 = vst [vmem:[#allocation2 + $0x90] sm:$0xf] %v871_v28  ;;  %v2390_v24 = vrot.slane %v2388_v43, 4  ;;  %v2393_v52 = vrot.slane %v2391_v27, 5  ;;  %v2399_v39 = vrot.slane %v2397_v56, 5  ;;  %v2403_v47 = vrot.slane %v2401_v35, 4 }
 0x12b   : > { %v2590_v45 = vpop.permute.xlu1 %2589  ;;  %v2409_v54 = vrot.slane %v2407_v40, 5  ;;  %v8697_v57 = vrot.slane %v2674_v20, 9  ;;  %v669_v60 = vsel %vm9674_vm11, %v661_v38, %v668_v50  ;;  %v875_v19 = vsel %vm9688_vm13, %v670_v51, %v874_v18  ;;  %v363_v43 = vld [vmem:[%s9652_s29 + $0xd8] sm:$0xff]  ;;  %v364_v50 = vld [vmem:[%s9652_s29 + $0xe0] sm:$0xff] }
 0x12c   : > { %2633 = vst.msk [vmem:[#allocation3 + $0x28] sm:$0xff] %vm2627_vm3, %v2590_v45  ;;  %1879 = vrot.lane.b32.xlu1 %v8650_v21, %s9368_s30  ;;  %v2394_v8 = vor.u32 %v2393_v52, %v2390_v24  ;;  %v2812_v61 = vrot.slane %v2675_v34, 5  ;;  %2054 = vrot.lane.b32.xlu0 %v9277_v13, %s9370_s9  ;;  %v2404_v62 = vor.u32 %v2403_v47, %v2399_v39  ;;  %876 = vst [vmem:[#allocation2 + $0x98] sm:$0x1] %v875_v19 }
 0x12d   : > { %873 = vst.msk [vmem:[#allocation2 + $0x94] sm:$0xf] %vm280_vm0, %v669_v60  ;;  %v2815_v2 = vrot.slane %v2676_v53, 5  ;;  %v672_v1 = vshrl.u32 %v10245_v25, 16  ;;  %v675_v16 = vshll.u32 %v10245_v25, 16  ;;  %v680_v44 = vshrl.u32 %v10260_v32, 16 }
 0x12e   : > { %v2395_v6 = vrot.slane %v2394_v8, 4  ;;  %v2814_v59 = vrot.slane %v2812_v61, 4  ;;  %v2405_v4 = vrot.slane %v2404_v62, 4  ;;  %v683_v5 = vshll.u32 %v10260_v32, 16 }
 0x12f   : > { %v2911_v33 = vpop.permute.xlu1 %2910  ;;  %v674_v49 = vrot.slane %v672_v1, 7  ;;  %v682_v3 = vrot.slane %v680_v44, 7  ;;  %v689_v25 = vshrl.u32 %v10267_v31, 16  ;;  %v2813_v10 = vsel %vm9659_vm9, %v8697_v57, %v2812_v61 }
 0x130   : > { %2954 = vst.msk [vmem:[#allocation3 + $0x28] sm:$0xff] %vm2948_vm4, %v2911_v33  ;;  %v3632_v26 = vpop.permute.xlu0 %3631  ;;  %v2400_v0 = vsel %vm9666_vm10, %v2395_v6, %v2399_v39  ;;  %v2410_v9 = vsel %vm9666_vm10, %v2405_v4, %v2409_v54  ;;  %v2816_v11 = vsel %vm9659_vm9, %v2814_v59, %v2815_v2  ;;  %v10373_v1 = vpack.c.bf16 %v363_v43, %v363_v43 }
 0x131   : > { %3676 = vst.msk [vmem:[#allocation3 + $0x20] sm:$0xff] %vm3671_vm6, %v3632_v26  ;;  %v2132_v58 = vld [vmem:[#allocation2 + $0x90] sm:$0xf]  ;;  %v677_v63 = vor.u32 %v675_v16, %v674_v49  ;;  %v8681_v37 = vcombine.low %v2400_v0, %v2410_v9  ;;  %v678_v38 = vrot.slane %v674_v49, 4  ;;  %v685_v18 = vor.u32 %v683_v5, %v682_v3  ;;  %v365_v49 = vld [vmem:[%s9652_s29 + $0xe8] sm:$0xff] }
 0x132   : > { %v2677_v32 = vld [vmem:[#allocation2 + $0x90] sm:$0xe]  ;;  %v2412_v7 = vshrl.u32 %v2132_v58, 16  ;;  %v2415_v15 = vshll.u32 %v2132_v58, 16  ;;  %v687_v20 = vrot.slane %v682_v3, 4  ;;  %v8713_v28 = vcombine.low %v2813_v10, %v2816_v11 }
 0x133   : > { %v3089_v55 = vpop.permute.xlu1 %3088  ;;  %v8698_v17 = vrot.slane %v2677_v32, 9  ;;  %v878_v21 = vsel %vm9680_vm12, %v677_v63, %v877_v22  ;;  %v3173_v30 = vld [vmem:[#allocation2 + $0x90] sm:$0xf]  ;;  %2599 = vrot.lane.b32.xlu0 %v8681_v37, %s9374_s13  ;;  %v2134_v56 = vld [vmem:[#allocation2 + $0x98] sm:$0x1]  ;;  %v686_v41 = vsel %vm9674_vm11, %v678_v38, %v685_v18  ;;  %v10375_v16 = vpack.c.bf16 %v364_v50, %v364_v50 }
 0x134   : > { %3132 = vst.msk [vmem:[#allocation3 + $0x28] sm:$0xff] %vm3126_vm5, %v3089_v55  ;;  %v3953_v14 = vpop.permute.xlu0 %3952  ;;  %v9278_v27 = vld [vmem:[#allocation2 + $0x90] sm:$0xff]   ;;  %v2414_v13 = vrot.slane %v2412_v7, 4  ;;  %879 = vst [vmem:[#allocation2 + $0x9c] sm:$0xf] %v878_v21  ;;  %v2417_v35 = vrot.slane %v2415_v15, 5  ;;  %v882_v39 = vsel %vm9688_vm13, %v687_v20, %v881_v12  ;;  %v10389_v7 = vpack.c.bf16 %v365_v49, %v365_v49 }
 0x135   : > { %3997 = vst.msk [vmem:[#allocation3 + $0x20] sm:$0xff] %vm3992_vm7, %v3953_v14  ;;  %v2133_v34 = vld [vmem:[#allocation2 + $0x94] sm:$0xf]  ;;  %2056 = vrot.lane.b32.xlu1 %v9278_v27, %s9370_s9  ;;  %v2431_v51 = vshll.u32 %v2134_v56, 16  ;;  %v2679_v52 = vld [vmem:[#allocation2 + $0x98] sm:$0x1] }
 0x136   : > { %v2421_v40 = vshll.u32 %v2133_v34, 16  ;;  %v2425_v45 = vshrl.u32 %v2133_v34, 16  ;;  %v2678_v24 = vld [vmem:[#allocation2 + $0x94] sm:$0xf]  ;;  %880 = vst.msk [vmem:[#allocation2 + $0xa0] sm:$0xf] %vm280_vm0, %v686_v41  ;;  %v2418_v47 = vor.u32 %v2417_v35, %v2414_v13 }
 0x137   : > { %v3634_v46 = vpop.permute.xlu1 %3633  ;;  %v3432_v53 = vshrl.u32 %v3173_v30, 16  ;;  %v2819_v60 = vrot.slane %v2678_v24, 5  ;;  %v9281_v8 = vld [vmem:[#allocation2 + $0x90] sm:$0xff]   ;;  %883 = vst [vmem:[#allocation2 + $0xa4] sm:$0x1] %v882_v39  ;;  %v2433_v19 = vrot.slane %v2431_v51, 5  ;;  %2920 = vrot.lane.b32.xlu0 %v8713_v28, %s9372_s11 }
 0x138   : > { %3677 = vst.msk [vmem:[#allocation3 + $0x28] sm:$0xff] %vm3671_vm6, %v3634_v46  ;;  %v2423_v54 = vrot.slane %v2421_v40, 5  ;;  %v2427_v57 = vrot.slane %v2425_v45, 4  ;;  %v2822_v61 = vrot.slane %v2679_v52, 5  ;;  %v3174_v62 = vld [vmem:[#allocation2 + $0x94] sm:$0xf] }
 0x139   : > { %v3175_v2 = vld [vmem:[#allocation2 + $0x98] sm:$0x1]  ;;  %v2419_v33 = vrot.slane %v2418_v47, 4  ;;  %v10379_v59 = vsel %vm9659_vm9, %v8698_v17, %v2819_v60  ;;  %v2821_v44 = vrot.slane %v2819_v60, 4  ;;  %v3434_v5 = vrot.slane %v3432_v53, 4 }
 0x13a   : > { %v2428_v6 = vor.u32 %v2427_v57, %v2423_v54  ;;  %v3955_v4 = vpop.permute.xlu0 %3954  ;;  %v3435_v0 = vshll.u32 %v3173_v30, 16  ;;  %v3441_v3 = vshll.u32 %v3174_v62, 16  ;;  %v3445_v22 = vshrl.u32 %v3174_v62, 16  ;;  %v3718_v37 = vld [vmem:[#allocation2 + $0x90] sm:$0xe] }
 0x13b   : > { %v1546_v26 = vpop.permute.xlu1 %1545  ;;  %3998 = vst.msk [vmem:[#allocation3 + $0x28] sm:$0xff] %vm3992_vm7, %v3955_v4  ;;  %v2424_v9 = vsel %vm9666_vm10, %v2419_v33, %v2423_v54  ;;  %v2823_v10 = vsel %vm9659_vm9, %v2821_v44, %v2822_v61  ;;  %v3451_v11 = vshll.u32 %v3175_v2, 16  ;;  %v3176_v32 = vld [vmem:[#allocation2 + $0x9c] sm:$0xf]  ;;  %3098 = vrot.lane.b32.xlu0 %v9281_v8, %s9371_s10  ;;  %v692_v20 = vshll.u32 %v10267_v31, 16 }
 0x13c   : > { %1588 = vst.msk [vmem:[#allocation3 + $0x30] sm:$0xff] %vm1581_vm15, %v1546_v26  ;;  %v2429_v58 = vrot.slane %v2428_v6, 4  ;;  %v3437_v63 = vrot.slane %v3435_v0, 5  ;;  %v3443_v12 = vrot.slane %v3441_v3, 5  ;;  %v3447_v55 = vrot.slane %v3445_v22, 4  ;;  %v4013_v15 = vld [vmem:[#allocation3 + $0x20] sm:$0xff] }
 0x13d   : > { %v8714_v14 = vcombine.low %v10379_v59, %v2823_v10  ;;  %v3453_v38 = vrot.slane %v3451_v11, 5  ;;  %v3177_v18 = vld [vmem:[#allocation2 + $0xa0] sm:$0xf]  ;;  %9169 = vmatprep.mubr.msk.bf16.mxu0 %vm11988_vm8, %v4013_v15  ;;  %v3456_v34 = vshrl.u32 %v3176_v32, 16  ;;  %v3719_v13 = vld [vmem:[#allocation2 + $0x94] sm:$0xf] }
 0x13e   : > { %v2434_v17 = vsel %vm9666_vm10, %v2429_v58, %v2433_v19  ;;  %v3438_v30 = vor.u32 %v3437_v63, %v3434_v5  ;;  %v3448_v43 = vor.u32 %v3447_v55, %v3443_v12  ;;  %v3178_v27 = vld [vmem:[#allocation2 + $0xa4] sm:$0x1]  ;;  %v3459_v56 = vshll.u32 %v3176_v32, 16  ;;  %v3720_v41 = vld [vmem:[#allocation2 + $0x98] sm:$0x1]  ;;  %v9282_v8 = vld [vmem:[#allocation2 + $0x9c] sm:$0xff]  }
 0x13f   : > { %v8682_v21 = vcombine.low %v2424_v9, %v2434_v17  ;;  %v3465_v35 = vshll.u32 %v3177_v18, 16  ;;  %v3469_v40 = vshrl.u32 %v3177_v18, 16  ;;  %v3475_v45 = vshll.u32 %v3178_v27, 16  ;;  %v1086_v53 = vld [vmem:[#allocation2 + $0x90] sm:$0xf] }
 0x140   : > { %v1548_v28 = vpop.permute.xlu1 %1547  ;;  %v1870_v46 = vpop.permute.xlu0 %1869  ;;  %v3439_v50 = vrot.slane %v3438_v30, 4  ;;  %v3449_v51 = vrot.slane %v3448_v43, 4  ;;  %v3458_v24 = vrot.slane %v3456_v34, 4  ;;  %v8761_v52 = vrot.slane %v3718_v37, 9  ;;  %v1087_v60 = vld [vmem:[#allocation2 + $0x94] sm:$0xf] }
 0x141   : > { %1589 = vst.msk [vmem:[#allocation3 + $0x38] sm:$0xff] %vm1581_vm15, %v1548_v28  ;;  %2601 = vrot.lane.b32.xlu1 %v8682_v21, %s9374_s13  ;;  %v3461_v39 = vrot.slane %v3459_v56, 5  ;;  %v3467_v47 = vrot.slane %v3465_v35, 5  ;;  %v3471_v54 = vrot.slane %v3469_v40, 4  ;;  %v3477_v57 = vrot.slane %v3475_v45, 5  ;;  %v9297_v11 = vld [vmem:[#allocation2 + $0x90] sm:$0xff]  }
 0x142   : > { %1912 = vst.msk [vmem:[#allocation3 + $0x30] sm:$0xff] %vm1905_vm1, %v1870_v46  ;;  %v3444_v19 = vsel %vm9666_vm10, %v3439_v50, %v3443_v12  ;;  %v3454_v61 = vsel %vm9666_vm10, %v3449_v51, %v3453_v38  ;;  %v3856_v62 = vrot.slane %v3719_v13, 5  ;;  %v3859_v2 = vrot.slane %v3720_v41, 5  ;;  %v1088_v26 = vld [vmem:[#allocation2 + $0x98] sm:$0x1]  ;;  %v4014_v0 = vld [vmem:[#allocation3 + $0x28] sm:$0xff] }
 0x143   : > { %v8745_v6 = vcombine.low %v3444_v19, %v3454_v61  ;;  %v3462_v59 = vor.u32 %v3461_v39, %v3458_v24  ;;  %v3472_v44 = vor.u32 %v3471_v54, %v3467_v47  ;;  %v1390_v4 = vshrl.u32 %v1086_v53, 16  ;;  %v3721_v49 = vld [vmem:[#allocation2 + $0x9c] sm:$0xe]  ;;  %v3722_v10 = vld [vmem:[#allocation2 + $0xa0] sm:$0xf]  ;;  %9170 = vmatmul.mubr.msk.bf16.gmra.mrb[8].mxu0 %vm11988_vm8, %v4014_v0  ;;  %1046 = vst.msk [vmem:[#allocation3 + $0x60] sm:$0xff] %vm11987_vm14, %v9297_v11 }
 0x144   : > { %v1872_v33 = vpop.permute.xlu1 %1871  ;;  %v2047_v5 = vpop.permute.xlu0 %2046  ;;  %v3857_v3 = vsel %vm9659_vm9, %v8761_v52, %v3856_v62  ;;  %v3858_v22 = vrot.slane %v3856_v62, 4  ;;  %v1393_v9 = vshll.u32 %v1086_v53, 16  ;;  %v1399_v58 = vshll.u32 %v1087_v60, 16  ;;  %v3723_v37 = vld [vmem:[#allocation2 + $0xa4] sm:$0x1]  ;;  %v9298_v21 = vld [vmem:[#allocation2 + $0x9c] sm:$0xff]  }
 0x145   : > { %1913 = vst.msk [vmem:[#allocation3 + $0x38] sm:$0xff] %vm1905_vm1, %v1872_v33  ;;  %2922 = vrot.lane.b32.xlu1 %v8714_v14, %s9372_s11  ;;  %3643 = vrot.lane.b32.xlu0 %v8745_v6, %s9375_s14  ;;  %v3463_v32 = vrot.slane %v3462_v59, 4  ;;  %v3473_v63 = vrot.slane %v3472_v44, 4  ;;  %v1392_v12 = vrot.slane %v1390_v4, 4  ;;  %v1403_v55 = vshrl.u32 %v1087_v60, 16 }
 0x146   : > { %2089 = vst.msk [vmem:[#allocation3 + $0x30] sm:$0xff] %vm2082_vm2, %v2047_v5  ;;  %v3860_v15 = vsel %vm9659_vm9, %v3858_v22, %v3859_v2  ;;  %v1395_v17 = vrot.slane %v1393_v9, 5  ;;  %v1401_v14 = vrot.slane %v1399_v58, 5  ;;  %v1409_v38 = vshll.u32 %v1088_v26, 16  ;;  %v1089_v18 = vld [vmem:[#allocation2 + $0x9c] sm:$0xf] }
 0x147   : > { %v3468_v30 = vsel %vm9666_vm10, %v3463_v32, %v3467_v47  ;;  %v3478_v43 = vsel %vm9666_vm10, %v3473_v63, %v3477_v57  ;;  %v8777_v27 = vcombine.low %v3857_v3, %v3860_v15  ;;  %v1405_v34 = vrot.slane %v1403_v55, 4  ;;  %v1090_v13 = vld [vmem:[#allocation2 + $0xa0] sm:$0xf]  ;;  %v1091_v45 = vld [vmem:[#allocation2 + $0xa4] sm:$0x1]  ;;  %1047 = vst.msk [vmem:[#allocation3 + $0x68] sm:$0xff] %vm11987_vm14, %v9298_v21 }
 0x148   : > { %v8746_v28 = vcombine.low %v3468_v30, %v3478_v43  ;;  %v1396_v56 = vor.u32 %v1395_v17, %v1392_v12  ;;  %v1411_v35 = vrot.slane %v1409_v38, 5  ;;  %v8762_v40 = vrot.slane %v3721_v49, 9  ;;  %v1634_v24 = vld [vmem:[#allocation2 + $0x90] sm:$0xe]  ;;  %v1635_v54 = vld [vmem:[#allocation2 + $0x94] sm:$0xf] }
 0x149   : > { %3100 = vrot.lane.b32.xlu1 %v9282_v8, %s9371_s10  ;;  %3964 = vrot.lane.b32.xlu0 %v8777_v27, %s9373_s12  ;;  %v1406_v41 = vor.u32 %v1405_v34, %v1401_v14  ;;  %v3863_v46 = vrot.slane %v3722_v10, 5  ;;  %v3866_v50 = vrot.slane %v3723_v37, 5  ;;  %v1414_v51 = vshrl.u32 %v1089_v18, 16  ;;  %v1636_v62 = vld [vmem:[#allocation2 + $0x98] sm:$0x1] }
 0x14a   : > { %v1397_v52 = vrot.slane %v1396_v56, 4  ;;  %v1417_v53 = vshll.u32 %v1089_v18, 16  ;;  %v1423_v39 = vshll.u32 %v1090_v13, 16  ;;  %v1427_v47 = vshrl.u32 %v1090_v13, 16  ;;  %v1637_v26 = vld [vmem:[#allocation2 + $0x9c] sm:$0xe] }
 0x14b   : > { %v2592_v57 = vpop.permute.xlu0 %2591  ;;  %v1407_v60 = vrot.slane %v1406_v41, 4  ;;  %v3864_v8 = vsel %vm9659_vm9, %v8762_v40, %v3863_v46  ;;  %v3865_v19 = vrot.slane %v3863_v46, 4  ;;  %v1416_v61 = vrot.slane %v1414_v51, 4  ;;  %v1638_v3 = vld [vmem:[#allocation2 + $0xa0] sm:$0xf] }
 0x14c   : > { %v2049_v2 = vpop.permute.xlu1 %2048  ;;  %2634 = vst.msk [vmem:[#allocation3 + $0x30] sm:$0xff] %vm2627_vm3, %v2592_v57  ;;  %v1402_v33 = vsel %vm9666_vm10, %v1397_v52, %v1401_v14  ;;  %v1419_v6 = vrot.slane %v1417_v53, 5  ;;  %v1425_v59 = vrot.slane %v1423_v39, 5  ;;  %v1429_v44 = vrot.slane %v1427_v47, 4  ;;  %v1639_v22 = vld [vmem:[#allocation2 + $0xa4] sm:$0x1] }
 0x14d   : > { %3645 = vrot.lane.b32.xlu1 %v8746_v28, %s9375_s14  ;;  %2090 = vst.msk [vmem:[#allocation3 + $0x38] sm:$0xff] %vm2082_vm2, %v2049_v2  ;;  %v1412_v4 = vsel %vm9666_vm10, %v1407_v60, %v1411_v35  ;;  %v3867_v49 = vsel %vm9659_vm9, %v3865_v19, %v3866_v50  ;;  %v1433_v5 = vshll.u32 %v1091_v45, 16  ;;  %v8635_v0 = vrot.slane %v1634_v24, 9  ;;  %v884_v56 = vld [vmem:[#allocation2 + $0xa8] sm:$0xf] }
 0x14e   : > { %v8619_v9 = vcombine.low %v1402_v33, %v1412_v4  ;;  %v8778_v58 = vcombine.low %v3864_v8, %v3867_v49  ;;  %v1420_v10 = vor.u32 %v1419_v6, %v1416_v61  ;;  %v1430_v11 = vor.u32 %v1429_v44, %v1425_v59  ;;  %v2135_v35 = vld [vmem:[#allocation2 + $0x9c] sm:$0xf]  ;;  %v2136_v50 = vld [vmem:[#allocation2 + $0xa0] sm:$0xf]  ;;  %v2137_v39 = vld [vmem:[#allocation2 + $0xa4] sm:$0x1] }
 0x14f   : > { %v2913_v32 = vpop.permute.xlu0 %2912  ;;  %v1435_v63 = vrot.slane %v1433_v5, 5  ;;  %v1783_v12 = vrot.slane %v1635_v54, 5  ;;  %v1786_v55 = vrot.slane %v1636_v62, 5  ;;  %v8636_v37 = vrot.slane %v1637_v26, 9  ;;  %v888_v47 = vld [vmem:[#allocation2 + $0xb0] sm:$0x1] }
 0x150   : > { %2955 = vst.msk [vmem:[#allocation3 + $0x30] sm:$0xff] %vm2948_vm4, %v2913_v32  ;;  %3966 = vrot.lane.b32.xlu0 %v8778_v58, %s9373_s12  ;;  %v1421_v15 = vrot.slane %v1420_v10, 4  ;;  %v1431_v17 = vrot.slane %v1430_v11, 4  ;;  %v1790_v14 = vrot.slane %v1638_v3, 5  ;;  %v1793_v38 = vrot.slane %v1639_v22, 5  ;;  %v9283_v61 = vld [vmem:[#allocation2 + $0x9c] sm:$0xff]  }
 0x151   : > { %1557 = vrot.lane.b32.xlu1 %v8619_v9, %s9369_s8  ;;  %v1784_v18 = vsel %vm9659_vm9, %v8635_v0, %v1783_v12  ;;  %v1785_v21 = vrot.slane %v1783_v12, 4  ;;  %v691_v30 = vrot.slane %v689_v25, 7  ;;  %v697_v43 = vshrl.u32 %v10373_v1, 16  ;;  %v2680_v60 = vld [vmem:[#allocation2 + $0x9c] sm:$0xe] }
 0x152   : > { %v1426_v27 = vsel %vm9666_vm10, %v1421_v15, %v1425_v59  ;;  %v1436_v34 = vsel %vm9666_vm10, %v1431_v17, %v1435_v63  ;;  %v1791_v13 = vsel %vm9659_vm9, %v8636_v37, %v1790_v14  ;;  %v1792_v28 = vrot.slane %v1790_v14, 4  ;;  %v2681_v8 = vld [vmem:[#allocation2 + $0xa0] sm:$0xf]  ;;  %v2682_v6 = vld [vmem:[#allocation2 + $0xa4] sm:$0x1] }
 0x153   : > { %v3091_v40 = vpop.permute.xlu0 %3090  ;;  %v8620_v45 = vcombine.low %v1426_v27, %v1436_v34  ;;  %v1787_v41 = vsel %vm9659_vm9, %v1785_v21, %v1786_v55  ;;  %v694_v25 = vor.u32 %v692_v20, %v691_v30  ;;  %v695_v46 = vrot.slane %v691_v30, 4 }
 0x154   : > { %3133 = vst.msk [vmem:[#allocation3 + $0x30] sm:$0xff] %vm3126_vm5, %v3091_v40  ;;  %v8651_v51 = vcombine.low %v1784_v18, %v1787_v41  ;;  %v1794_v24 = vsel %vm9659_vm9, %v1792_v28, %v1793_v38  ;;  %v699_v52 = vrot.slane %v697_v43, 7  ;;  %v700_v53 = vshll.u32 %v10373_v1, 16 }
 0x155   : > { %1559 = vrot.lane.b32.xlu1 %v8620_v45, %s9369_s8  ;;  %v8652_v54 = vcombine.low %v1791_v13, %v1794_v24  ;;  %v885_v31 = vsel %vm9680_vm12, %v694_v25, %v884_v56  ;;  %v2436_v20 = vshrl.u32 %v2135_v35, 16  ;;  %v2439_v57 = vshll.u32 %v2135_v35, 16  ;;  %v891_v35 = vld [vmem:[#allocation2 + $0xb4] sm:$0xf] }
 0x156   : > { %1881 = vrot.lane.b32.xlu0 %v8651_v51, %s9368_s30  ;;  %v702_v62 = vor.u32 %v700_v53, %v699_v52  ;;  %v704_v2 = vrot.slane %v699_v52, 4  ;;  %886 = vst [vmem:[#allocation2 + $0xa8] sm:$0xf] %v885_v31  ;;  %v2445_v1 = vshll.u32 %v2136_v50, 16  ;;  %v2449_v33 = vshrl.u32 %v2136_v50, 16 }
 0x157   : > { %v2438_v59 = vrot.slane %v2436_v20, 4  ;;  %v2441_v44 = vrot.slane %v2439_v57, 5  ;;  %v2455_v26 = vshll.u32 %v2137_v39, 16  ;;  %v8699_v22 = vrot.slane %v2680_v60, 9 }
 0x158   : > { %v2594_v19 = vpop.permute.xlu1 %2593  ;;  %v703_v4 = vsel %vm9674_vm11, %v695_v46, %v702_v62  ;;  %v2447_v49 = vrot.slane %v2445_v1, 5  ;;  %v2451_v5 = vrot.slane %v2449_v33, 4  ;;  %v889_v0 = vsel %vm9688_vm13, %v704_v2, %v888_v47  ;;  %v895_v46 = vld [vmem:[#allocation2 + $0xbc] sm:$0x1] }
 0x159   : > { %2635 = vst.msk [vmem:[#allocation3 + $0x38] sm:$0xff] %vm2627_vm3, %v2594_v19  ;;  %1883 = vrot.lane.b32.xlu1 %v8652_v54, %s9368_s30  ;;  %v2442_v3 = vor.u32 %v2441_v44, %v2438_v59  ;;  %890 = vst [vmem:[#allocation2 + $0xb0] sm:$0x1] %v889_v0  ;;  %v2826_v9 = vrot.slane %v2681_v8, 5  ;;  %v2829_v58 = vrot.slane %v2682_v6, 5  ;;  %v2457_v32 = vrot.slane %v2455_v26, 5 }
 0x15a   : > { %887 = vst.msk [vmem:[#allocation2 + $0xac] sm:$0xf] %vm280_vm0, %v703_v4  ;;  %2058 = vrot.lane.b32.xlu0 %v9283_v61, %s9370_s9  ;;  %v2452_v11 = vor.u32 %v2451_v5, %v2447_v49  ;;  %v706_v63 = vshrl.u32 %v10375_v16, 16  ;;  %v714_v12 = vshrl.u32 %v10389_v7, 16  ;;  %v709_v15 = vshll.u32 %v10375_v16, 16  ;;  %v366_v8 = vld [vmem:[%s9652_s29 + $0xf0] sm:$0xff] }
 0x15b   : > { %v2443_v55 = vrot.slane %v2442_v3, 4  ;;  %v2828_v37 = vrot.slane %v2826_v9, 4  ;;  %v717_v18 = vshll.u32 %v10389_v7, 16  ;;  %v2827_v27 = vsel %vm9659_vm9, %v8699_v22, %v2826_v9 }
 0x15c   : > { %v2915_v10 = vpop.permute.xlu1 %2914  ;;  %v2453_v17 = vrot.slane %v2452_v11, 4  ;;  %v708_v14 = vrot.slane %v706_v63, 7  ;;  %v716_v38 = vrot.slane %v714_v12, 7  ;;  %v10491_v22 = vpack.c.bf16 %v366_v8, %v366_v8  ;;  %v367_v63 = vld [vmem:[%s9652_s29 + $0xf8] sm:$0xff] }
 0x15d   : > { %2956 = vst.msk [vmem:[#allocation3 + $0x38] sm:$0xff] %vm2948_vm4, %v2915_v10  ;;  %v3636_v21 = vpop.permute.xlu0 %3635  ;;  %v2448_v30 = vsel %vm9666_vm10, %v2443_v55, %v2447_v49  ;;  %v2138_v43 = vld [vmem:[#allocation2 + $0xa8] sm:$0xf]  ;;  %v2830_v34 = vsel %vm9659_vm9, %v2828_v37, %v2829_v58 }
 0x15e   : > { %v2683_v13 = vld [vmem:[#allocation2 + $0xa8] sm:$0xe]  ;;  %3678 = vst.msk [vmem:[#allocation3 + $0x30] sm:$0xff] %vm3671_vm6, %v3636_v21  ;;  %v2458_v16 = vsel %vm9666_vm10, %v2453_v17, %v2457_v32  ;;  %v2460_v56 = vshrl.u32 %v2138_v43, 16  ;;  %v2463_v7 = vshll.u32 %v2138_v43, 16  ;;  %v711_v41 = vor.u32 %v709_v15, %v708_v14 }
 0x15f   : > { %v8683_v40 = vcombine.low %v2448_v30, %v2458_v16  ;;  %v8700_v45 = vrot.slane %v2683_v13, 9  ;;  %v712_v25 = vrot.slane %v708_v14, 4  ;;  %v8715_v52 = vcombine.low %v2827_v27, %v2830_v34  ;;  %v3179_v60 = vld [vmem:[#allocation2 + $0xa8] sm:$0xf] }
 0x160   : > { %v3093_v28 = vpop.permute.xlu1 %3092  ;;  %v2462_v24 = vrot.slane %v2460_v56, 4  ;;  %v719_v53 = vor.u32 %v717_v18, %v716_v38  ;;  %v2140_v47 = vld [vmem:[#allocation2 + $0xb0] sm:$0x1]  ;;  %v2465_v54 = vrot.slane %v2463_v7, 5  ;;  %v892_v57 = vsel %vm9680_vm12, %v711_v41, %v891_v35  ;;  %v3724_v30 = vld [vmem:[#allocation2 + $0xa8] sm:$0xe] }
 0x161   : > { %3134 = vst.msk [vmem:[#allocation3 + $0x38] sm:$0xff] %vm3126_vm5, %v3093_v28  ;;  %v9284_v50 = vld [vmem:[#allocation2 + $0xa8] sm:$0xff]   ;;  %v3957_v39 = vpop.permute.xlu0 %3956  ;;  %2603 = vrot.lane.b32.xlu0 %v8683_v40, %s9374_s13  ;;  %v2479_v19 = vshll.u32 %v2140_v47, 16  ;;  %v2685_v62 = vld [vmem:[#allocation2 + $0xb0] sm:$0x1]  ;;  %v721_v1 = vrot.slane %v716_v38, 4  ;;  %v10505_v16 = vpack.c.bf16 %v367_v63, %v367_v63 }
 0x162   : > { %v2139_v51 = vld [vmem:[#allocation2 + $0xac] sm:$0xf]  ;;  %3999 = vst.msk [vmem:[#allocation3 + $0x30] sm:$0xff] %vm3992_vm7, %v3957_v39  ;;  %2060 = vrot.lane.b32.xlu1 %v9284_v50, %s9370_s9  ;;  %v720_v2 = vsel %vm9674_vm11, %v712_v25, %v719_v53  ;;  %893 = vst [vmem:[#allocation2 + $0xb4] sm:$0xf] %v892_v57  ;;  %v2466_v33 = vor.u32 %v2465_v54, %v2462_v24  ;;  %v2836_v49 = vrot.slane %v2685_v62, 5 }
 0x163   : > { %v2469_v31 = vshll.u32 %v2139_v51, 16  ;;  %v2473_v20 = vshrl.u32 %v2139_v51, 16  ;;  %v2684_v61 = vld [vmem:[#allocation2 + $0xac] sm:$0xf]  ;;  %894 = vst.msk [vmem:[#allocation2 + $0xb8] sm:$0xf] %vm280_vm0, %v720_v2  ;;  %v896_v3 = vsel %vm9688_vm13, %v721_v1, %v895_v46 }
 0x164   : > { %v2833_v44 = vrot.slane %v2684_v61, 5  ;;  %v3638_v26 = vpop.permute.xlu1 %3637  ;;  %v2481_v4 = vrot.slane %v2479_v19, 5  ;;  %v3180_v5 = vld [vmem:[#allocation2 + $0xac] sm:$0xf]  ;;  %v3181_v0 = vld [vmem:[#allocation2 + $0xb0] sm:$0x1] }
 0x165   : > { %v2471_v6 = vrot.slane %v2469_v31, 5  ;;  %v2475_v59 = vrot.slane %v2473_v20, 4  ;;  %3679 = vst.msk [vmem:[#allocation3 + $0x38] sm:$0xff] %vm3671_vm6, %v3638_v26  ;;  %v2467_v9 = vrot.slane %v2466_v33, 4  ;;  %2924 = vrot.lane.b32.xlu0 %v8715_v52, %s9372_s11  ;;  %v9287_v32 = vld [vmem:[#allocation2 + $0xa8] sm:$0xff]   ;;  %v3480_v55 = vshrl.u32 %v3179_v60, 16 }
 0x166   : > { %v10497_v10 = vsel %vm9659_vm9, %v8700_v45, %v2833_v44  ;;  %v2835_v11 = vrot.slane %v2833_v44, 4  ;;  %897 = vst [vmem:[#allocation2 + $0xbc] sm:$0x1] %v896_v3  ;;  %v3959_v12 = vpop.permute.xlu0 %3958  ;;  %v3483_v37 = vshll.u32 %v3179_v60, 16  ;;  %v3489_v15 = vshll.u32 %v3180_v5, 16 }
 0x167   : > { %v2476_v58 = vor.u32 %v2475_v59, %v2471_v6  ;;  %v3493_v17 = vshrl.u32 %v3180_v5, 16  ;;  %4000 = vst.msk [vmem:[#allocation3 + $0x38] sm:$0xff] %vm3992_vm7, %v3959_v12  ;;  %v2472_v14 = vsel %vm9666_vm10, %v2467_v9, %v2471_v6  ;;  %v3499_v21 = vshll.u32 %v3181_v0, 16  ;;  %v3725_v28 = vld [vmem:[#allocation2 + $0xac] sm:$0xf] }
 0x168   : > { %v2837_v18 = vsel %vm9659_vm9, %v2835_v11, %v2836_v49  ;;  %v1550_v43 = vpop.permute.xlu1 %1549  ;;  %v3482_v27 = vrot.slane %v3480_v55, 4  ;;  %v3485_v34 = vrot.slane %v3483_v37, 5  ;;  %v3491_v13 = vrot.slane %v3489_v15, 5  ;;  %v3726_v54 = vld [vmem:[#allocation2 + $0xb0] sm:$0x1] }
 0x169   : > { %v2477_v38 = vrot.slane %v2476_v58, 4  ;;  %1590 = vst.msk [vmem:[#allocation3 + $0x40] sm:$0xff] %vm1581_vm15, %v1550_v43  ;;  %v4015_v56 = vld [vmem:[#allocation3 + $0x30] sm:$0xff]  ;;  %v8716_v35 = vcombine.low %v10497_v10, %v2837_v18  ;;  %3102 = vrot.lane.b32.xlu0 %v9287_v32, %s9371_s10  ;;  %v3495_v40 = vrot.slane %v3493_v17, 4  ;;  %v3182_v45 = vld [vmem:[#allocation2 + $0xb4] sm:$0xf] }
 0x16a   : > { %v723_v41 = vshrl.u32 %v10491_v22, 16  ;;  %9173 = vmatprep.mubr.msk.bf16.mxu0 %vm11988_vm8, %v4015_v56  ;;  %v3486_v46 = vor.u32 %v3485_v34, %v3482_v27  ;;  %v3501_v50 = vrot.slane %v3499_v21, 5  ;;  %v3183_v51 = vld [vmem:[#allocation2 + $0xb8] sm:$0xf]  ;;  %v3504_v24 = vshrl.u32 %v3182_v45, 16 }
 0x16b   : > { %v2482_v7 = vsel %vm9666_vm10, %v2477_v38, %v2481_v4  ;;  %v3496_v52 = vor.u32 %v3495_v40, %v3491_v13  ;;  %v3507_v53 = vshll.u32 %v3182_v45, 16  ;;  %v3513_v39 = vshll.u32 %v3183_v51, 16  ;;  %v1092_v33 = vld [vmem:[#allocation2 + $0xa8] sm:$0xf]  ;;  %v1093_v49 = vld [vmem:[#allocation2 + $0xac] sm:$0xf] }
 0x16c   : > { %v8684_v25 = vcombine.low %v2472_v14, %v2482_v7  ;;  %v3517_v47 = vshrl.u32 %v3183_v51, 16  ;;  %v1874_v31 = vpop.permute.xlu0 %1873  ;;  %v3487_v20 = vrot.slane %v3486_v46, 4  ;;  %v3506_v60 = vrot.slane %v3504_v24, 4  ;;  %v1094_v5 = vld [vmem:[#allocation2 + $0xb0] sm:$0x1]  ;;  %v9288_v0 = vld [vmem:[#allocation2 + $0xb4] sm:$0xff]  }
 0x16d   : > { %v3184_v57 = vld [vmem:[#allocation2 + $0xbc] sm:$0x1]  ;;  %v8763_v8 = vrot.slane %v3724_v30, 9  ;;  %v3870_v19 = vrot.slane %v3725_v28, 5  ;;  %1914 = vst.msk [vmem:[#allocation3 + $0x40] sm:$0xff] %vm1905_vm1, %v1874_v31  ;;  %v3497_v61 = vrot.slane %v3496_v52, 4  ;;  %v1552_v6 = vpop.permute.xlu1 %1551 }
 0x16e   : > { %2605 = vrot.lane.b32.xlu1 %v8684_v25, %s9374_s13  ;;  %v3509_v62 = vrot.slane %v3507_v53, 5  ;;  %v3515_v2 = vrot.slane %v3513_v39, 5  ;;  %v3519_v1 = vrot.slane %v3517_v47, 4  ;;  %v3492_v59 = vsel %vm9666_vm10, %v3487_v20, %v3491_v13  ;;  %1591 = vst.msk [vmem:[#allocation3 + $0x48] sm:$0xff] %vm1581_vm15, %v1552_v6  ;;  %v3727_v11 = vld [vmem:[#allocation2 + $0xb4] sm:$0xe] }
 0x16f   : > { %v3523_v44 = vshll.u32 %v3184_v57, 16  ;;  %v3871_v26 = vsel %vm9659_vm9, %v8763_v8, %v3870_v19  ;;  %v3872_v4 = vrot.slane %v3870_v19, 4  ;;  %v3502_v3 = vsel %vm9666_vm10, %v3497_v61, %v3501_v50  ;;  %v4016_v63 = vld [vmem:[#allocation3 + $0x38] sm:$0xff]  ;;  %v3728_v17 = vld [vmem:[#allocation2 + $0xb8] sm:$0xf]  ;;  %v9299_v14 = vld [vmem:[#allocation2 + $0xa8] sm:$0xff]  }
 0x170   : > { %v3510_v9 = vor.u32 %v3509_v62, %v3506_v60  ;;  %v3520_v58 = vor.u32 %v3519_v1, %v3515_v2  ;;  %v3873_v10 = vrot.slane %v3726_v54, 5  ;;  %v2051_v32 = vpop.permute.xlu0 %2050  ;;  %v8747_v12 = vcombine.low %v3492_v59, %v3502_v3  ;;  %9174 = vmatmul.mubr.msk.bf16.gmra.mrb[12].mxu0 %vm11988_vm8, %v4016_v63  ;;  %v3729_v43 = vld [vmem:[#allocation2 + $0xbc] sm:$0x1]  ;;  %v9300_v34 = vld [vmem:[#allocation2 + $0xb4] sm:$0xff]   ;;  %1048 = vst.msk [vmem:[#allocation3 + $0x70] sm:$0xff] %vm11987_vm14, %v9299_v14 }
 0x171   : > { %v3525_v55 = vrot.slane %v3523_v44, 5  ;;  %v1438_v37 = vshrl.u32 %v1092_v33, 16  ;;  %v1441_v15 = vshll.u32 %v1092_v33, 16  ;;  %2091 = vst.msk [vmem:[#allocation3 + $0x40] sm:$0xff] %vm2082_vm2, %v2051_v32  ;;  %v1447_v30 = vshll.u32 %v1093_v49, 16  ;;  %v1876_v27 = vpop.permute.xlu1 %1875 }
 0x172   : > { %2926 = vrot.lane.b32.xlu1 %v8716_v35, %s9372_s11  ;;  %v3511_v38 = vrot.slane %v3510_v9, 4  ;;  %v3521_v18 = vrot.slane %v3520_v58, 4  ;;  %v3874_v21 = vsel %vm9659_vm9, %v3872_v4, %v3873_v10  ;;  %3647 = vrot.lane.b32.xlu0 %v8747_v12, %s9375_s14  ;;  %v1451_v7 = vshrl.u32 %v1093_v49, 16  ;;  %v1095_v35 = vld [vmem:[#allocation2 + $0xb4] sm:$0xf]  ;;  %1915 = vst.msk [vmem:[#allocation3 + $0x48] sm:$0xff] %vm1905_vm1, %v1876_v27 }
 0x173   : > { %v8779_v13 = vcombine.low %v3871_v26, %v3874_v21  ;;  %v1440_v28 = vrot.slane %v1438_v37, 4  ;;  %v1443_v56 = vrot.slane %v1441_v15, 5  ;;  %v1449_v25 = vrot.slane %v1447_v30, 5  ;;  %v1096_v50 = vld [vmem:[#allocation2 + $0xb8] sm:$0xf]  ;;  %1049 = vst.msk [vmem:[#allocation3 + $0x78] sm:$0xff] %vm11987_vm14, %v9300_v34 }
 0x174   : > { %v3516_v40 = vsel %vm9666_vm10, %v3511_v38, %v3515_v2  ;;  %v3526_v45 = vsel %vm9666_vm10, %v3521_v18, %v3525_v55  ;;  %v1457_v46 = vshll.u32 %v1094_v5, 16  ;;  %v1453_v52 = vrot.slane %v1451_v7, 4  ;;  %v1640_v39 = vld [vmem:[#allocation2 + $0xa8] sm:$0xe]  ;;  %v1097_v20 = vld [vmem:[#allocation2 + $0xbc] sm:$0x1] }
 0x175   : > { %v8748_v51 = vcombine.low %v3516_v40, %v3526_v45  ;;  %v1444_v24 = vor.u32 %v1443_v56, %v1440_v28  ;;  %v8764_v53 = vrot.slane %v3727_v11, 9  ;;  %v3877_v54 = vrot.slane %v3728_v17, 5  ;;  %v1641_v60 = vld [vmem:[#allocation2 + $0xac] sm:$0xf]  ;;  %v1642_v2 = vld [vmem:[#allocation2 + $0xb0] sm:$0x1] }
 0x176   : > { %3104 = vrot.lane.b32.xlu1 %v9288_v0, %s9371_s10  ;;  %v1459_v47 = vrot.slane %v1457_v46, 5  ;;  %v3880_v31 = vrot.slane %v3729_v43, 5  ;;  %v1462_v57 = vshrl.u32 %v1095_v35, 16  ;;  %3968 = vrot.lane.b32.xlu0 %v8779_v13, %s9373_s12  ;;  %v1454_v19 = vor.u32 %v1453_v52, %v1449_v25  ;;  %v1643_v44 = vld [vmem:[#allocation2 + $0xb4] sm:$0xe] }
 0x177   : > { %v1445_v8 = vrot.slane %v1444_v24, 4  ;;  %v1465_v61 = vshll.u32 %v1095_v35, 16  ;;  %v1471_v62 = vshll.u32 %v1096_v50, 16  ;;  %v3878_v1 = vsel %vm9659_vm9, %v8764_v53, %v3877_v54  ;;  %v1644_v0 = vld [vmem:[#allocation2 + $0xb8] sm:$0xf] }
 0x178   : > { %v3879_v33 = vrot.slane %v3877_v54, 4  ;;  %v1464_v6 = vrot.slane %v1462_v57, 4  ;;  %v1475_v59 = vshrl.u32 %v1096_v50, 16  ;;  %v1455_v4 = vrot.slane %v1454_v19, 4  ;;  %v1645_v11 = vld [vmem:[#allocation2 + $0xbc] sm:$0x1]  ;;  %v2596_v32 = vpop.permute.xlu0 %2595 }
 0x179   : > { %v1450_v26 = vsel %vm9666_vm10, %v1445_v8, %v1449_v25  ;;  %v1467_v49 = vrot.slane %v1465_v61, 5  ;;  %v1473_v5 = vrot.slane %v1471_v62, 5  ;;  %v1481_v58 = vshll.u32 %v1097_v20, 16  ;;  %v2053_v15 = vpop.permute.xlu1 %2052  ;;  %2636 = vst.msk [vmem:[#allocation3 + $0x40] sm:$0xff] %vm2627_vm3, %v2596_v32  ;;  %v2141_v46 = vld [vmem:[#allocation2 + $0xb4] sm:$0xf] }
 0x17a   : > { %3649 = vrot.lane.b32.xlu1 %v8748_v51, %s9375_s14  ;;  %v3881_v3 = vsel %vm9659_vm9, %v3879_v33, %v3880_v31  ;;  %v1477_v9 = vrot.slane %v1475_v59, 4  ;;  %v8637_v10 = vrot.slane %v1640_v39, 9  ;;  %v1460_v63 = vsel %vm9666_vm10, %v1455_v4, %v1459_v47  ;;  %2092 = vst.msk [vmem:[#allocation3 + $0x48] sm:$0xff] %vm2082_vm2, %v2053_v15  ;;  %v898_v52 = vld [vmem:[#allocation2 + $0xc0] sm:$0xf]  ;;  %v9289_v57 = vld [vmem:[#allocation2 + $0xb4] sm:$0xff]  }
 0x17b   : > { %v8780_v12 = vcombine.low %v3878_v1, %v3881_v3  ;;  %v1468_v55 = vor.u32 %v1467_v49, %v1464_v6  ;;  %v1797_v37 = vrot.slane %v1641_v60, 5  ;;  %v8621_v17 = vcombine.low %v1450_v26, %v1460_v63  ;;  %v2142_v53 = vld [vmem:[#allocation2 + $0xb8] sm:$0xf]  ;;  %v2143_v8 = vld [vmem:[#allocation2 + $0xbc] sm:$0x1] }
 0x17c   : > { %v1478_v14 = vor.u32 %v1477_v9, %v1473_v5  ;;  %v1483_v38 = vrot.slane %v1481_v58, 5  ;;  %v1800_v18 = vrot.slane %v1642_v2, 5  ;;  %v8638_v27 = vrot.slane %v1643_v44, 9  ;;  %v2917_v7 = vpop.permute.xlu0 %2916  ;;  %v3188_v62 = vld [vmem:[#allocation2 + $0xcc] sm:$0xf] }
 0x17d   : > { %3970 = vrot.lane.b32.xlu0 %v8780_v12, %s9373_s12  ;;  %v1469_v21 = vrot.slane %v1468_v55, 4  ;;  %v1798_v30 = vsel %vm9659_vm9, %v8637_v10, %v1797_v37  ;;  %v1799_v43 = vrot.slane %v1797_v37, 4  ;;  %v1804_v13 = vrot.slane %v1644_v0, 5  ;;  %2957 = vst.msk [vmem:[#allocation3 + $0x40] sm:$0xff] %vm2948_vm4, %v2917_v7  ;;  %v2686_v44 = vld [vmem:[#allocation2 + $0xb4] sm:$0xe] }
 0x17e   : > { %1561 = vrot.lane.b32.xlu1 %v8621_v17, %s9369_s8  ;;  %v1479_v34 = vrot.slane %v1478_v14, 4  ;;  %v1807_v28 = vrot.slane %v1645_v11, 5  ;;  %v725_v56 = vrot.slane %v723_v41, 7  ;;  %v726_v45 = vshll.u32 %v10491_v22, 16  ;;  %v902_v22 = vld [vmem:[#allocation2 + $0xc8] sm:$0x1] }
 0x17f   : > { %v1474_v35 = vsel %vm9666_vm10, %v1469_v21, %v1473_v5  ;;  %v1801_v40 = vsel %vm9659_vm9, %v1799_v43, %v1800_v18  ;;  %v731_v25 = vshrl.u32 %v10505_v16, 16  ;;  %v1805_v41 = vsel %vm9659_vm9, %v8638_v27, %v1804_v13  ;;  %v2687_v26 = vld [vmem:[#allocation2 + $0xb8] sm:$0xf]  ;;  %v2688_v0 = vld [vmem:[#allocation2 + $0xbc] sm:$0x1] }
 0x180   : > { %v1484_v50 = vsel %vm9666_vm10, %v1479_v34, %v1483_v38  ;;  %v8653_v51 = vcombine.low %v1798_v30, %v1801_v40  ;;  %v1806_v24 = vrot.slane %v1804_v13, 4  ;;  %v728_v47 = vor.u32 %v726_v45, %v725_v56  ;;  %v3095_v2 = vpop.permute.xlu0 %3094  ;;  %v10582_v30 = vld [vmem:[#allocation2 + $0xd0] sm:$0xf] }
 0x181   : > { %v8622_v39 = vcombine.low %v1474_v35, %v1484_v50  ;;  %v729_v54 = vrot.slane %v725_v56, 4  ;;  %v733_v31 = vrot.slane %v731_v25, 7  ;;  %v734_v60 = vshll.u32 %v10505_v16, 16  ;;  %3135 = vst.msk [vmem:[#allocation3 + $0x40] sm:$0xff] %vm3126_vm5, %v3095_v2 }
 0x182   : > { %1885 = vrot.lane.b32.xlu0 %v8653_v51, %s9368_s30  ;;  %v1808_v20 = vsel %vm9659_vm9, %v1806_v24, %v1807_v28  ;;  %v2484_v19 = vshrl.u32 %v2141_v46, 16  ;;  %v2487_v61 = vshll.u32 %v2141_v46, 16  ;;  %v899_v6 = vsel %vm9680_vm12, %v728_v47, %v898_v52 }
 0x183   : > { %1563 = vrot.lane.b32.xlu1 %v8622_v39, %s9369_s8  ;;  %v8654_v1 = vcombine.low %v1805_v41, %v1808_v20  ;;  %v738_v33 = vrot.slane %v733_v31, 4  ;;  %v2493_v59 = vshll.u32 %v2142_v53, 16  ;;  %v736_v4 = vor.u32 %v734_v60, %v733_v31  ;;  %900 = vst [vmem:[#allocation2 + $0xc0] sm:$0xf] %v899_v6 }
 0x184   : > { %v2486_v16 = vrot.slane %v2484_v19, 4  ;;  %v2489_v49 = vrot.slane %v2487_v61, 5  ;;  %v2497_v5 = vshrl.u32 %v2142_v53, 16  ;;  %v2503_v9 = vshll.u32 %v2143_v8, 16  ;;  %v10601_v61 = vld [vmem:[#allocation2 + $0xd4] sm:$0x1] }
 0x185   : > { %v2495_v3 = vrot.slane %v2493_v59, 5  ;;  %v903_v58 = vsel %vm9688_vm13, %v738_v33, %v902_v22  ;;  %v2598_v10 = vpop.permute.xlu1 %2597  ;;  %v737_v11 = vsel %vm9674_vm11, %v729_v54, %v736_v4  ;;  %v2840_v12 = vrot.slane %v2687_v26, 5 }
 0x186   : > { %2062 = vrot.lane.b32.xlu0 %v9289_v57, %s9370_s9  ;;  %v2490_v32 = vor.u32 %v2489_v49, %v2486_v16  ;;  %v2499_v63 = vrot.slane %v2497_v5, 4  ;;  %904 = vst [vmem:[#allocation2 + $0xc8] sm:$0x1] %v903_v58  ;;  %2637 = vst.msk [vmem:[#allocation3 + $0x48] sm:$0xff] %vm2627_vm3, %v2598_v10  ;;  %v8701_v55 = vrot.slane %v2686_v44, 9  ;;  %v2843_v37 = vrot.slane %v2688_v0, 5 }
 0x187   : > { %1887 = vrot.lane.b32.xlu1 %v8654_v1, %s9368_s30  ;;  %901 = vst.msk [vmem:[#allocation2 + $0xc4] sm:$0xf] %vm280_vm0, %v737_v11  ;;  %v3552_v15 = vshrl.u32 %v3188_v62, 16  ;;  %v3555_v17 = vshll.u32 %v3188_v62, 16  ;;  %v2505_v18 = vrot.slane %v2503_v9, 5  ;;  %v2842_v21 = vrot.slane %v2840_v12, 4 }
 0x188   : > { %v2491_v14 = vrot.slane %v2490_v32, 4  ;;  %v2500_v38 = vor.u32 %v2499_v63, %v2495_v3  ;;  %v2841_v56 = vsel %vm9659_vm9, %v8701_v55, %v2840_v12  ;;  %v3561_v40 = vshll.u32 %v10582_v30, 16 }
 0x189   : > { %v2919_v43 = vpop.permute.xlu1 %2918  ;;  %v10586_v13 = vrot.slane %v3552_v15, 4  ;;  %v2844_v7 = vsel %vm9659_vm9, %v2842_v21, %v2843_v37  ;;  %v10593_v35 = vrot.slane %v3555_v17, 5  ;;  %v3565_v6 = vshrl.u32 %v10582_v30, 16 }
 0x18a   : > { %v2496_v27 = vsel %vm9666_vm10, %v2491_v14, %v2495_v3  ;;  %v2501_v34 = vrot.slane %v2500_v38, 4  ;;  %2958 = vst.msk [vmem:[#allocation3 + $0x48] sm:$0xff] %vm2948_vm4, %v2919_v43  ;;  %v2144_v28 = vld [vmem:[#allocation2 + $0xc0] sm:$0xf]  ;;  %v3640_v45 = vpop.permute.xlu0 %3639  ;;  %v8717_v22 = vcombine.low %v2841_v56, %v2844_v7  ;;  %v3571_v15 = vshll.u32 %v10601_v61, 16 }
 0x18b   : > { %v2508_v46 = vshrl.u32 %v2144_v28, 16  ;;  %v2511_v50 = vshll.u32 %v2144_v28, 16  ;;  %v2689_v51 = vld [vmem:[#allocation2 + $0xc0] sm:$0xe]  ;;  %3680 = vst.msk [vmem:[#allocation3 + $0x40] sm:$0xff] %vm3671_vm6, %v3640_v45  ;;  %v3563_v28 = vrot.slane %v3561_v40, 5 }
 0x18c   : > { %v2506_v25 = vsel %vm9666_vm10, %v2501_v34, %v2505_v18  ;;  %v3185_v53 = vld [vmem:[#allocation2 + $0xc0] sm:$0xf]  ;;  %v8702_v2 = vrot.slane %v2689_v51, 9  ;;  %v3558_v18 = vor.u32 %v10593_v35, %v10586_v13  ;;  %v3567_v35 = vrot.slane %v3565_v6, 4 }
 0x18d   : > { %v8685_v41 = vcombine.low %v2496_v27, %v2506_v25  ;;  %v2146_v24 = vld [vmem:[#allocation2 + $0xc8] sm:$0x1]  ;;  %v3097_v39 = vpop.permute.xlu1 %3096  ;;  %v2510_v31 = vrot.slane %v2508_v46, 4  ;;  %v2513_v20 = vrot.slane %v2511_v50, 5  ;;  %v3528_v33 = vshrl.u32 %v3185_v53, 16 }
 0x18e   : > { %v2691_v52 = vld [vmem:[#allocation2 + $0xc8] sm:$0x1]  ;;  %v9290_v47 = vld [vmem:[#allocation2 + $0xc0] sm:$0xff]   ;;  %3136 = vst.msk [vmem:[#allocation3 + $0x48] sm:$0xff] %vm3126_vm5, %v3097_v39  ;;  %v2527_v8 = vshll.u32 %v2146_v24, 16  ;;  %v3961_v62 = vpop.permute.xlu0 %3960  ;;  %v3531_v58 = vshll.u32 %v3185_v53, 16  ;;  %v3568_v53 = vor.u32 %v3567_v35, %v3563_v28 }
 0x18f   : > { %v2145_v54 = vld [vmem:[#allocation2 + $0xc4] sm:$0xf]  ;;  %2607 = vrot.lane.b32.xlu0 %v8685_v41, %s9374_s13  ;;  %2064 = vrot.lane.b32.xlu1 %v9290_v47, %s9370_s9  ;;  %4001 = vst.msk [vmem:[#allocation3 + $0x40] sm:$0xff] %vm3992_vm7, %v3961_v62  ;;  %v2514_v59 = vor.u32 %v2513_v20, %v2510_v31  ;;  %v2850_v4 = vrot.slane %v2691_v52, 5  ;;  %v3187_v3 = vld [vmem:[#allocation2 + $0xc8] sm:$0x1] }
 0x190   : > { %v2517_v57 = vshll.u32 %v2145_v54, 16  ;;  %v2521_v60 = vshrl.u32 %v2145_v54, 16  ;;  %v2690_v19 = vld [vmem:[#allocation2 + $0xc4] sm:$0xf]  ;;  %v2529_v5 = vrot.slane %v2527_v8, 5  ;;  %v3530_v9 = vrot.slane %v3528_v33, 4 }
 0x191   : > { %v2847_v1 = vrot.slane %v2690_v19, 5  ;;  %v3186_v16 = vld [vmem:[#allocation2 + $0xc4] sm:$0xf]  ;;  %v3642_v49 = vpop.permute.xlu1 %3641  ;;  %v2515_v10 = vrot.slane %v2514_v59, 4  ;;  %v3533_v55 = vrot.slane %v3531_v58, 5  ;;  %v3547_v37 = vshll.u32 %v3187_v3, 16 }
 0x192   : > { %v2519_v44 = vrot.slane %v2517_v57, 5  ;;  %v2523_v26 = vrot.slane %v2521_v60, 4  ;;  %3681 = vst.msk [vmem:[#allocation3 + $0x48] sm:$0xff] %vm3671_vm6, %v3642_v49  ;;  %v9293_v32 = vld [vmem:[#allocation2 + $0xc0] sm:$0xff]   ;;  %v3537_v63 = vshll.u32 %v3186_v16, 16  ;;  %v3541_v12 = vshrl.u32 %v3186_v16, 16 }
 0x193   : > { %v2849_v0 = vrot.slane %v2847_v1, 4  ;;  %2928 = vrot.lane.b32.xlu0 %v8717_v22, %s9372_s11  ;;  %v3730_v21 = vld [vmem:[#allocation2 + $0xc0] sm:$0xe]  ;;  %v2848_v43 = vsel %vm9659_vm9, %v8702_v2, %v2847_v1  ;;  %v3534_v27 = vor.u32 %v3533_v55, %v3530_v9  ;;  %v3731_v56 = vld [vmem:[#allocation2 + $0xc4] sm:$0xf]  ;;  %v3549_v13 = vrot.slane %v3547_v37, 5 }
 0x194   : > { %v2524_v11 = vor.u32 %v2523_v26, %v2519_v44  ;;  %v2520_v17 = vsel %vm9666_vm10, %v2515_v10, %v2519_v44  ;;  %v3539_v38 = vrot.slane %v3537_v63, 5  ;;  %v3963_v30 = vpop.permute.xlu0 %3962  ;;  %v3543_v34 = vrot.slane %v3541_v12, 4  ;;  %v3732_v7 = vld [vmem:[#allocation2 + $0xc8] sm:$0x1]  ;;  %v3734_v52 = vld [vmem:[#allocation2 + $0xd0] sm:$0xf] }
 0x195   : > { %v1554_v45 = vpop.permute.xlu1 %1553  ;;  %4002 = vst.msk [vmem:[#allocation3 + $0x48] sm:$0xff] %vm3992_vm7, %v3963_v30  ;;  %v2851_v46 = vsel %vm9659_vm9, %v2849_v0, %v2850_v4  ;;  %v3535_v40 = vrot.slane %v3534_v27, 4  ;;  %v8765_v24 = vrot.slane %v3730_v21, 9  ;;  %v3884_v39 = vrot.slane %v3731_v56, 5  ;;  %v3733_v19 = vld [vmem:[#allocation2 + $0xcc] sm:$0xe] }
 0x196   : > { %v2525_v14 = vrot.slane %v2524_v11, 4  ;;  %1592 = vst.msk [vmem:[#allocation3 + $0x50] sm:$0xff] %vm1581_vm15, %v1554_v45  ;;  %v4017_v50 = vld [vmem:[#allocation3 + $0x40] sm:$0xff]  ;;  %v3544_v41 = vor.u32 %v3543_v34, %v3539_v38  ;;  %v3887_v47 = vrot.slane %v3732_v7, 5  ;;  %v8718_v54 = vcombine.low %v2848_v43, %v2851_v46  ;;  %v3735_v33 = vld [vmem:[#allocation2 + $0xd4] sm:$0x1] }
 0x197   : > { %3106 = vrot.lane.b32.xlu0 %v9293_v32, %s9371_s10  ;;  %9177 = vmatprep.mubr.msk.bf16.mxu0 %vm11988_vm8, %v4017_v50  ;;  %v3540_v31 = vsel %vm9666_vm10, %v3535_v40, %v3539_v38  ;;  %v3559_v20 = vrot.slane %v3558_v18, 4  ;;  %v3569_v57 = vrot.slane %v3568_v53, 4  ;;  %v3573_v60 = vrot.slane %v3571_v15, 5  ;;  %v9294_v4 = vld [vmem:[#allocation2 + $0xcc] sm:$0xff]   ;;  %v5096_v12 = vld [vmem:[#allocation4] sm:$0xf] }
 0x198   : > { %v2530_v25 = vsel %vm9666_vm10, %v2525_v14, %v2529_v5  ;;  %v3545_v22 = vrot.slane %v3544_v41, 4  ;;  %v3886_v8 = vrot.slane %v3884_v39, 4  ;;  %v3891_v61 = vrot.slane %v3734_v52, 5  ;;  %v5097_v55 = vld [vmem:[#allocation4 + $0x4] sm:$0xf] }
 0x199   : > { %v8686_v51 = vcombine.low %v2520_v17, %v2530_v25  ;;  %v3885_v1 = vsel %vm9659_vm9, %v8765_v24, %v3884_v39  ;;  %v3564_v16 = vsel %vm9666_vm10, %v3559_v20, %v3563_v28  ;;  %v8766_v49 = vrot.slane %v3733_v19, 9  ;;  %v5098_v37 = vld [vmem:[#allocation4 + $0x8] sm:$0x1]  ;;  %v5640_v30 = vld [vmem:[#allocation4] sm:$0xe] }
 0x19a   : > { %v1556_v62 = vpop.permute.xlu1 %1555  ;;  %v3550_v2 = vsel %vm9666_vm10, %v3545_v22, %v3549_v13  ;;  %v1878_v6 = vpop.permute.xlu0 %1877  ;;  %v3888_v44 = vsel %vm9659_vm9, %v3886_v8, %v3887_v47  ;;  %v3574_v5 = vsel %vm9666_vm10, %v3569_v57, %v3573_v60  ;;  %v3893_v3 = vrot.slane %v3891_v61, 4  ;;  %v5641_v43 = vld [vmem:[#allocation4 + $0x4] sm:$0xf]  ;;  %v5642_v45 = vld [vmem:[#allocation4 + $0x8] sm:$0x1] }
 0x19b   : > { %2609 = vrot.lane.b32.xlu1 %v8686_v51, %s9374_s13  ;;  %1593 = vst.msk [vmem:[#allocation3 + $0x58] sm:$0xff] %vm1581_vm15, %v1556_v62  ;;  %v8749_v59 = vcombine.low %v3540_v31, %v3550_v2  ;;  %v8781_v0 = vcombine.low %v3885_v1, %v3888_v44  ;;  %v3894_v9 = vrot.slane %v3735_v33, 5  ;;  %v8750_v11 = vcombine.low %v3564_v16, %v3574_v5 }
 0x19c   : > { %1916 = vst.msk [vmem:[#allocation3 + $0x50] sm:$0xff] %vm1905_vm1, %v1878_v6  ;;  %v4018_v26 = vld [vmem:[#allocation3 + $0x48] sm:$0xff]  ;;  %v3892_v32 = vsel %vm9659_vm9, %v8766_v49, %v3891_v61  ;;  %v5145_v15 = vshrl.u32 %v5096_v12, 16  ;;  %v5148_v17 = vshll.u32 %v5096_v12, 16  ;;  %v5154_v14 = vshll.u32 %v5097_v55, 16 }
 0x19d   : > { %9178 = vmatmul.mubr.msk.bf16.gmra.mrb[16].mxu0 %vm11988_vm8, %v4018_v26  ;;  %3651 = vrot.lane.b32.xlu0 %v8749_v59, %s9375_s14  ;;  %v3895_v63 = vsel %vm9659_vm9, %v3893_v3, %v3894_v9  ;;  %v5158_v38 = vshrl.u32 %v5097_v55, 16  ;;  %v5164_v21 = vshll.u32 %v5098_v37, 16  ;;  %v5738_v46 = vrot.slane %v5641_v43, 5  ;;  %v10696_v37 = vld [vmem:[%s11982_s4] ss:$0 sm:$0xff] }
 0x19e   : > { %v1880_v58 = vpop.permute.xlu1 %1879  ;;  %v2055_v10 = vpop.permute.xlu0 %2054  ;;  %v8782_v18 = vcombine.low %v3892_v32, %v3895_v63  ;;  %v5147_v34 = vrot.slane %v5145_v15, 4  ;;  %v5150_v28 = vrot.slane %v5148_v17, 5  ;;  %v5156_v56 = vrot.slane %v5154_v14, 5  ;;  %v10690_v63 = vld [vmem:[%s11981_s3] ss:$0 sm:$0xff] }
 0x19f   : > { %2930 = vrot.lane.b32.xlu1 %v8718_v54, %s9372_s11  ;;  %1917 = vst.msk [vmem:[#allocation3 + $0x58] sm:$0xff] %vm1905_vm1, %v1880_v58  ;;  %v5160_v7 = vrot.slane %v5158_v38, 4  ;;  %v5166_v25 = vrot.slane %v5164_v21, 5  ;;  %v8868_v51 = vrot.slane %v5640_v30, 9  ;;  %v5741_v40 = vrot.slane %v5642_v45, 5 }
 0x1a0   : > { %2093 = vst.msk [vmem:[#allocation3 + $0x50] sm:$0xff] %vm2082_vm2, %v2055_v10  ;;  %v5151_v35 = vor.u32 %v5150_v28, %v5147_v34  ;;  %v5740_v41 = vrot.slane %v5738_v46, 4 }
 0x1a1   : > { %3972 = vrot.lane.b32.xlu0 %v8781_v0, %s9373_s12  ;;  %v5161_v50 = vor.u32 %v5160_v7, %v5156_v56  ;;  %v5739_v54 = vsel %vm9659_vm9, %v8868_v51, %v5738_v46 }
 0x1a2   : > { %v5152_v52 = vrot.slane %v5151_v35, 4  ;;  %v5742_v31 = vsel %vm9659_vm9, %v5740_v41, %v5741_v40 }
 0x1a3   : > { %3108 = vrot.lane.b32.xlu1 %v9294_v4, %s9371_s10  ;;  %v5162_v53 = vrot.slane %v5161_v50, 4  ;;  %v8884_v57 = vcombine.low %v5739_v54, %v5742_v31 }
 0x1a4   : > { %v5157_v39 = vsel %vm9666_vm10, %v5152_v52, %v5156_v56 }
 0x1a5   : > { %v2600_v27 = vpop.permute.xlu0 %2599  ;;  %v5167_v47 = vsel %vm9666_vm10, %v5162_v53, %v5166_v25 }
 0x1a6   : > { %2638 = vst.msk [vmem:[#allocation3 + $0x50] sm:$0xff] %vm2627_vm3, %v2600_v27  ;;  %v8852_v22 = vcombine.low %v5157_v39, %v5167_v47 }
 0x1a7   : > { %3653 = vrot.lane.b32.xlu1 %v8750_v11, %s9375_s14  ;;  %v2057_v13 = vpop.permute.xlu1 %2056 }
 0x1a8   : > { %2094 = vst.msk [vmem:[#allocation3 + $0x58] sm:$0xff] %vm2082_vm2, %v2057_v13  ;;  %5576 = vrot.lane.b32.xlu0 %v8852_v22, %s9369_s8 }
 0x1a9   : > { %v2921_v24 = vpop.permute.xlu0 %2920 }
 0x1aa   : > { %2959 = vst.msk [vmem:[#allocation3 + $0x50] sm:$0xff] %vm2948_vm4, %v2921_v24 }
 0x1ab   : > { %3974 = vrot.lane.b32.xlu1 %v8782_v18, %s9373_s12 }
 0x1ac   : > { %5896 = vrot.lane.b32.xlu0 %v8884_v57, %s9368_s30 }
 0x1ad   : > { %v3099_v20 = vpop.permute.xlu0 %3098 }
 0x1ae   : > { %3137 = vst.msk [vmem:[#allocation3 + $0x50] sm:$0xff] %vm3126_vm5, %v3099_v20 }
 0x1b3   : > { %v2602_v60 = vpop.permute.xlu1 %2601 }
 0x1b4   : > { %2639 = vst.msk [vmem:[#allocation3 + $0x58] sm:$0xff] %vm2627_vm3, %v2602_v60 }
 0x1b7   : > { %v2923_v8 = vpop.permute.xlu1 %2922  ;;  %v3644_v19 = vpop.permute.xlu0 %3643 }
 0x1b8   : > { %2960 = vst.msk [vmem:[#allocation3 + $0x58] sm:$0xff] %vm2948_vm4, %v2923_v8 }
 0x1b9   : > { %3682 = vst.msk [vmem:[#allocation3 + $0x50] sm:$0xff] %vm3671_vm6, %v3644_v19 }
 0x1bb   : > { %v3101_v61 = vpop.permute.xlu1 %3100  ;;  %v3965_v62 = vpop.permute.xlu0 %3964 }
 0x1bc   : > { %3138 = vst.msk [vmem:[#allocation3 + $0x58] sm:$0xff] %vm3126_vm5, %v3101_v61 }
 0x1bd   : > { %4003 = vst.msk [vmem:[#allocation3 + $0x50] sm:$0xff] %vm3992_vm7, %v3965_v62 }
 0x1bf   : > { %v3646_v2 = vpop.permute.xlu1 %3645 }
 0x1c0   : > { %3683 = vst.msk [vmem:[#allocation3 + $0x58] sm:$0xff] %vm3671_vm6, %v3646_v2 }
 0x1c2   : > { %v3967_v33 = vpop.permute.xlu0 %3966 }
 0x1c3   : > { %v1558_v1 = vpop.permute.xlu1 %1557  ;;  %4004 = vst.msk [vmem:[#allocation3 + $0x58] sm:$0xff] %vm3992_vm7, %v3967_v33  ;;  %v4847_v33 = vld [vmem:[#allocation4 + $0x18] sm:$0xf] }
 0x1c4   : > { %1594 = vst.msk [vmem:[#allocation3 + $0x60] sm:$0xff] %vm1581_vm15, %v1558_v1  ;;  %v4019_v6 = vld [vmem:[#allocation3 + $0x50] sm:$0xff] }
 0x1c5   : > { %9181 = vmatprep.mubr.msk.bf16.mxu0 %vm11988_vm8, %v4019_v6 }
 0x1c7   : > { %v1560_v59 = vpop.permute.xlu1 %1559 }
 0x1c8   : > { %1595 = vst.msk [vmem:[#allocation3 + $0x68] sm:$0xff] %vm1581_vm15, %v1560_v59  ;;  %v1882_v44 = vpop.permute.xlu0 %1881 }
 0x1c9   : > { %1918 = vst.msk [vmem:[#allocation3 + $0x60] sm:$0xff] %vm1905_vm1, %v1882_v44 }
 0x1ca   : > { %v4020_v26 = vld [vmem:[#allocation3 + $0x58] sm:$0xff] }
 0x1cb   : > { %v1884_v4 = vpop.permute.xlu1 %1883  ;;  %9182 = vmatmul.mubr.msk.bf16.gmra.mrb[20].mxu0 %vm11988_vm8, %v4020_v26 }
 0x1cc   : > { %1919 = vst.msk [vmem:[#allocation3 + $0x68] sm:$0xff] %vm1905_vm1, %v1884_v4  ;;  %v2059_v16 = vpop.permute.xlu0 %2058 }
 0x1cd   : > { %2095 = vst.msk [vmem:[#allocation3 + $0x60] sm:$0xff] %vm2082_vm2, %v2059_v16 }
 0x1d3   : > { %v2604_v49 = vpop.permute.xlu0 %2603 }
 0x1d4   : > { %v2061_v5 = vpop.permute.xlu1 %2060  ;;  %2640 = vst.msk [vmem:[#allocation3 + $0x60] sm:$0xff] %vm2627_vm3, %v2604_v49 }
 0x1d5   : > { %2096 = vst.msk [vmem:[#allocation3 + $0x68] sm:$0xff] %vm2082_vm2, %v2061_v5  ;;  %v4840_v5 = vld [vmem:[#allocation4 + $0xc] sm:$0xf] }
 0x1d7   : > { %v2925_v0 = vpop.permute.xlu0 %2924 }
 0x1d8   : > { %2961 = vst.msk [vmem:[#allocation3 + $0x60] sm:$0xff] %vm2948_vm4, %v2925_v0 }
 0x1db   : > { %v3103_v3 = vpop.permute.xlu0 %3102 }
 0x1dc   : > { %3139 = vst.msk [vmem:[#allocation3 + $0x60] sm:$0xff] %vm3126_vm5, %v3103_v3 }
 0x1e0   : > { %v2606_v9 = vpop.permute.xlu1 %2605 }
 0x1e1   : > { %2641 = vst.msk [vmem:[#allocation3 + $0x68] sm:$0xff] %vm2627_vm3, %v2606_v9 }
 0x1e4   : > { %v2927_v58 = vpop.permute.xlu1 %2926  ;;  %v3648_v10 = vpop.permute.xlu0 %3647 }
 0x1e5   : > { %2962 = vst.msk [vmem:[#allocation3 + $0x68] sm:$0xff] %vm2948_vm4, %v2927_v58 }
 0x1e6   : > { %3684 = vst.msk [vmem:[#allocation3 + $0x60] sm:$0xff] %vm3671_vm6, %v3648_v10 }
 0x1e8   : > { %v3105_v11 = vpop.permute.xlu1 %3104  ;;  %v3969_v32 = vpop.permute.xlu0 %3968 }
 0x1e9   : > { %3140 = vst.msk [vmem:[#allocation3 + $0x68] sm:$0xff] %vm3126_vm5, %v3105_v11  ;;  %v9163_v55 = vpop.f32.mrb[0].mxu0  ;;  %v4851_v11 = vld [vmem:[#allocation4 + $0x20] sm:$0x1] }
 0x1ea   : > { %4005 = vst.msk [vmem:[#allocation3 + $0x60] sm:$0xff] %vm3992_vm7, %v3969_v32  ;;  %v4268_v15 = vmul.f32 %v9163_v55, %v10690_v63  ;;  %v4132_v17 = vpop.f32.mrb[1].mxu0 }
 0x1eb   : > { %v4266_v14 = vmul.f32 %v10690_v63, %v4132_v17  ;;  %v9164_v38 = vpop.f32.mrb[2].mxu0 }
 0x1ec   : > { %v3650_v12 = vpop.permute.xlu1 %3649  ;;  %v4307_v18 = vadd.f32 %v10696_v37, %v4268_v15  ;;  %v4269_v21 = vmul.f32 %v9164_v38, %v10690_v63  ;;  %v4135_v30 = vpop.f32.mrb[3].mxu0 }
 0x1ed   : > { %3685 = vst.msk [vmem:[#allocation3 + $0x68] sm:$0xff] %vm3671_vm6, %v3650_v12  ;;  %v4305_v27 = vadd.f32 %v10696_v37, %v4266_v14  ;;  %v4267_v34 = vmul.f32 %v10690_v63, %v4135_v30  ;;  %v4844_v14 = vld [vmem:[#allocation4 + $0x14] sm:$0x1] }
 0x1ee   : > { %v4339_v56 = vmax.f32 %v4307_v18, 0.0  ;;  %v4308_v7 = vadd.f32 %v10696_v37, %v4269_v21 }
 0x1ef   : > { %v3971_v43 = vpop.permute.xlu0 %3970  ;;  %v4337_v25 = vmax.f32 %v4305_v27, 0.0  ;;  %v4306_v46 = vadd.f32 %v10696_v37, %v4267_v34 }
 0x1f0   : > { %v1562_v28 = vpop.permute.xlu1 %1561  ;;  %4006 = vst.msk [vmem:[#allocation3 + $0x68] sm:$0xff] %vm3992_vm7, %v3971_v43  ;;  %v9087_v13 = vpack.c.bf16 %v4339_v56, %v4339_v56  ;;  %v4340_v35 = vmax.f32 %v4308_v7, 0.0  ;;  %v9167_v40 = vpop.f32.mrb[4].mxu0 }
 0x1f1   : > { %1596 = vst.msk [vmem:[#allocation3 + $0x70] sm:$0xff] %vm1581_vm15, %v1562_v28  ;;  %v4021_v45 = vld [vmem:[#allocation3 + $0x60] sm:$0xff]  ;;  %v9085_v50 = vpack.c.bf16 %v4337_v25, %v4337_v25  ;;  %v4338_v51 = vmax.f32 %v4306_v46, 0.0  ;;  %v4272_v39 = vmul.f32 %v9167_v40, %v10690_v63  ;;  %v4148_v47 = vpop.f32.mrb[5].mxu0 }
 0x1f2   : > { %9185 = vmatprep.mubr.msk.bf16.mxu0 %vm11988_vm8, %v4021_v45  ;;  %v4537_v24 = vshrl.u32 %v9087_v13, 16  ;;  %v4540_v52 = vshll.u32 %v9087_v13, 16  ;;  %v9088_v53 = vpack.c.bf16 %v4340_v35, %v4340_v35  ;;  %v4270_v57 = vmul.f32 %v10690_v63, %v4148_v47  ;;  %v9168_v60 = vpop.f32.mrb[6].mxu0 }
 0x1f3   : > { %v4520_v31 = vshrl.u32 %v9085_v50, 16  ;;  %v4523_v22 = vshll.u32 %v9085_v50, 16  ;;  %v9086_v20 = vpack.c.bf16 %v4338_v51, %v4338_v51  ;;  %v4311_v62 = vadd.f32 %v10696_v37, %v4272_v39  ;;  %v4151_v2 = vpop.f32.mrb[7].mxu0  ;;  %v4861_v50 = vld [vmem:[#allocation4 + $0x30] sm:$0xf] }
 0x1f4   : > { %v1886_v41 = vpop.permute.xlu0 %1885  ;;  %v4539_v8 = vrot.slane %v4537_v24, 7  ;;  %v4545_v19 = vshrl.u32 %v9088_v53, 16  ;;  %v4548_v61 = vshll.u32 %v9088_v53, 16  ;;  %v4309_v26 = vadd.f32 %v10696_v37, %v4270_v57  ;;  %v4854_v24 = vld [vmem:[#allocation4 + $0x24] sm:$0xf] }
 0x1f5   : > { %v1564_v54 = vpop.permute.xlu1 %1563  ;;  %1920 = vst.msk [vmem:[#allocation3 + $0x70] sm:$0xff] %vm1905_vm1, %v1886_v41  ;;  %v4522_v6 = vrot.slane %v4520_v31, 7  ;;  %v4528_v59 = vshrl.u32 %v9086_v20, 16  ;;  %v4531_v44 = vshll.u32 %v9086_v20, 16  ;;  %v4343_v3 = vmax.f32 %v4311_v62, 0.0 }
 0x1f6   : > { %1597 = vst.msk [vmem:[#allocation3 + $0x78] sm:$0xff] %vm1581_vm15, %v1564_v54  ;;  %v4542_v16 = vor.u32 %v4540_v52, %v4539_v8  ;;  %v4543_v49 = vrot.slane %v4539_v8, 4  ;;  %v4547_v0 = vrot.slane %v4545_v19, 7  ;;  %v4341_v12 = vmax.f32 %v4309_v26, 0.0 }
 0x1f7   : > { %v4022_v1 = vld [vmem:[#allocation3 + $0x68] sm:$0xff]  ;;  %v4525_v58 = vor.u32 %v4523_v22, %v4522_v6  ;;  %v4526_v10 = vrot.slane %v4522_v6, 4  ;;  %v4530_v32 = vrot.slane %v4528_v59, 7  ;;  %v9091_v38 = vpack.c.bf16 %v4343_v3, %v4343_v3 }
 0x1f8   : > { %v2063_v4 = vpop.permute.xlu0 %2062  ;;  %9186 = vmatmul.mubr.msk.bf16.gmra.mrb[24].mxu0 %vm11988_vm8, %v4022_v1  ;;  %v4848_v55 = vsel %vm9680_vm12, %v4542_v16, %v4847_v33  ;;  %v4550_v15 = vor.u32 %v4548_v61, %v4547_v0  ;;  %v4552_v17 = vrot.slane %v4547_v0, 4  ;;  %v9089_v43 = vpack.c.bf16 %v4341_v12, %v4341_v12  ;;  %v4865_v0 = vld [vmem:[#allocation4 + $0x38] sm:$0x1]  ;;  %v4858_v12 = vld [vmem:[#allocation4 + $0x2c] sm:$0x1] }
 0x1f9   : > { %v1888_v9 = vpop.permute.xlu1 %1887  ;;  %2097 = vst.msk [vmem:[#allocation3 + $0x70] sm:$0xff] %vm2082_vm2, %v2063_v4  ;;  %4849 = vst [vmem:[#allocation4 + $0x18] sm:$0xf] %v4848_v55  ;;  %v4841_v18 = vsel %vm9680_vm12, %v4525_v58, %v4840_v5  ;;  %v4533_v21 = vor.u32 %v4531_v44, %v4530_v32  ;;  %v4535_v30 = vrot.slane %v4530_v32, 4  ;;  %v4571_v28 = vshrl.u32 %v9091_v38, 16 }
 0x1fa   : > { %1921 = vst.msk [vmem:[#allocation3 + $0x78] sm:$0xff] %vm1905_vm1, %v1888_v9  ;;  %4842 = vst [vmem:[#allocation4 + $0xc] sm:$0xf] %v4841_v18  ;;  %v4551_v27 = vsel %vm9674_vm11, %v4543_v49, %v4550_v15  ;;  %v4852_v34 = vsel %vm9688_vm13, %v4552_v17, %v4851_v11  ;;  %v4554_v45 = vshrl.u32 %v9089_v43, 16  ;;  %v4574_v46 = vshll.u32 %v9091_v38, 16 }
 0x1fb   : > { %4850 = vst.msk [vmem:[#allocation4 + $0x1c] sm:$0xf] %vm280_vm0, %v4551_v27  ;;  %4853 = vst [vmem:[#allocation4 + $0x20] sm:$0x1] %v4852_v34  ;;  %v4534_v56 = vsel %vm9674_vm11, %v4526_v10, %v4533_v21  ;;  %v4845_v7 = vsel %vm9688_vm13, %v4535_v30, %v4844_v14  ;;  %v10733_v25 = vrot.slane %v4571_v28, 7  ;;  %v4273_v13 = vmul.f32 %v9168_v60, %v10690_v63  ;;  %v9316_v27 = vld [vmem:[#allocation4] sm:$0xff]  }
 0x1fc   : > { %4843 = vst.msk [vmem:[#allocation4 + $0x10] sm:$0xf] %vm280_vm0, %v4534_v56  ;;  %4846 = vst [vmem:[#allocation4 + $0x14] sm:$0x1] %v4845_v7  ;;  %v4271_v35 = vmul.f32 %v10690_v63, %v4151_v2  ;;  %v10737_v51 = vrot.slane %v4554_v45, 7  ;;  %v4557_v40 = vshll.u32 %v9089_v43, 16 }
 0x1fd   : > { %v4576_v41 = vor.u32 %v4574_v46, %v10733_v25  ;;  %v4312_v52 = vadd.f32 %v10696_v37, %v4273_v13  ;;  %v4577_v61 = vrot.slane %v10733_v25, 4  ;;  %5080 = vst.msk [vmem:[#allocation5] sm:$0xff] %vm11987_vm14, %v9316_v27 }
 0x1fe   : > { %v4310_v53 = vadd.f32 %v10696_v37, %v4271_v35  ;;  %v4559_v47 = vor.u32 %v4557_v40, %v10737_v51  ;;  %v4560_v6 = vrot.slane %v10737_v51, 4 }
 0x1ff   : > { %v4862_v31 = vsel %vm9680_vm12, %v4576_v41, %v4861_v50  ;;  %v4344_v22 = vmax.f32 %v4312_v52, 0.0 }
 0x200   : > { %v4342_v20 = vmax.f32 %v4310_v53, 0.0  ;;  %4863 = vst [vmem:[#allocation4 + $0x30] sm:$0xf] %v4862_v31  ;;  %v4855_v57 = vsel %vm9680_vm12, %v4559_v47, %v4854_v24  ;;  %v6683_v60 = vld [vmem:[#allocation4 + $0x18] sm:$0xe] }
 0x201   : > { %v2608_v39 = vpop.permute.xlu0 %2607  ;;  %v2065_v54 = vpop.permute.xlu1 %2064  ;;  %v7721_v8 = vld [vmem:[#allocation4 + $0x18] sm:$0xe]  ;;  %4856 = vst [vmem:[#allocation4 + $0x24] sm:$0xf] %v4855_v57  ;;  %v9092_v62 = vpack.c.bf16 %v4344_v22, %v4344_v22  ;;  %v8933_v59 = vrot.slane %v6683_v60, 9 }
 0x202   : > { %2642 = vst.msk [vmem:[#allocation3 + $0x70] sm:$0xff] %vm2627_vm3, %v2608_v39  ;;  %v9301_v19 = vld [vmem:[#allocation4 + $0x18] sm:$0xff]   ;;  %v9090_v2 = vpack.c.bf16 %v4342_v20, %v4342_v20  ;;  %v8996_v44 = vrot.slane %v7721_v8, 9  ;;  %v6685_v5 = vld [vmem:[#allocation4 + $0x20] sm:$0x1] }
 0x203   : > { %2098 = vst.msk [vmem:[#allocation3 + $0x78] sm:$0xff] %vm2082_vm2, %v2065_v54  ;;  %v9302_v33 = vld [vmem:[#allocation4 + $0x18] sm:$0xff]   ;;  %7113 = vrot.lane.b32.xlu0 %v9301_v19, %s9371_s10  ;;  %v9303_v26 = vld [vmem:[#allocation4 + $0xc] sm:$0xff]   ;;  %v4579_v4 = vshrl.u32 %v9092_v62, 16  ;;  %v4582_v16 = vshll.u32 %v9092_v62, 16  ;;  %v6788_v9 = vrot.slane %v6685_v5, 5 }
 0x204   : > { %v6684_v49 = vld [vmem:[#allocation4 + $0x1c] sm:$0xf]  ;;  %6074 = vrot.lane.b32.xlu1 %v9302_v33, %s9370_s9  ;;  %v4562_v58 = vshrl.u32 %v9090_v2, 16  ;;  %v4565_v10 = vshll.u32 %v9090_v2, 16  ;;  %v7723_v55 = vld [vmem:[#allocation4 + $0x20] sm:$0x1] }
 0x205   : > { %v2929_v1 = vpop.permute.xlu0 %2928  ;;  %v6785_v3 = vrot.slane %v6684_v49, 5  ;;  %v7722_v11 = vld [vmem:[#allocation4 + $0x1c] sm:$0xf]  ;;  %v4581_v32 = vrot.slane %v4579_v4, 7  ;;  %v5643_v17 = vld [vmem:[#allocation4 + $0xc] sm:$0xe] }
 0x206   : > { %2963 = vst.msk [vmem:[#allocation3 + $0x70] sm:$0xff] %vm2948_vm4, %v2929_v1  ;;  %v7819_v15 = vrot.slane %v7722_v11, 5  ;;  %v4564_v21 = vrot.slane %v4562_v58, 7  ;;  %v7822_v30 = vrot.slane %v7723_v55, 5  ;;  %v5644_v43 = vld [vmem:[#allocation4 + $0x10] sm:$0xf] }
 0x207   : > { %v6786_v38 = vsel %vm9659_vm9, %v8933_v59, %v6785_v3  ;;  %v6787_v18 = vrot.slane %v6785_v3, 4  ;;  %6072 = vrot.lane.b32.xlu0 %v9303_v26, %s9370_s9  ;;  %v4584_v34 = vor.u32 %v4582_v16, %v4581_v32  ;;  %v4586_v28 = vrot.slane %v4581_v32, 4  ;;  %v5645_v45 = vld [vmem:[#allocation4 + $0x14] sm:$0x1]  ;;  %v5646_v25 = vld [vmem:[#allocation4 + $0x18] sm:$0xe] }
 0x208   : > { %v7820_v56 = vsel %vm9659_vm9, %v8996_v44, %v7819_v15  ;;  %v7821_v7 = vrot.slane %v7819_v15, 4  ;;  %v4567_v13 = vor.u32 %v4565_v10, %v4564_v21  ;;  %v4569_v35 = vrot.slane %v4564_v21, 4  ;;  %v5647_v51 = vld [vmem:[#allocation4 + $0x1c] sm:$0xf]  ;;  %v5648_v40 = vld [vmem:[#allocation4 + $0x20] sm:$0x1] }
 0x209   : > { %v3107_v14 = vpop.permute.xlu0 %3106  ;;  %v6789_v46 = vsel %vm9659_vm9, %v6787_v18, %v6788_v9  ;;  %v8869_v50 = vrot.slane %v5643_v17, 9  ;;  %v4585_v24 = vsel %vm9674_vm11, %v4577_v61, %v4584_v34  ;;  %v4866_v52 = vsel %vm9688_vm13, %v4586_v28, %v4865_v0  ;;  %v6680_v47 = vld [vmem:[#allocation4 + $0xc] sm:$0xe]  ;;  %v6681_v54 = vld [vmem:[#allocation4 + $0x10] sm:$0xf]  ;;  %v9321_v8 = vld [vmem:[#allocation4 + $0x18] sm:$0xff]  }
 0x20a   : > { %3141 = vst.msk [vmem:[#allocation3 + $0x70] sm:$0xff] %vm3126_vm5, %v3107_v14  ;;  %v8949_v53 = vcombine.low %v6786_v38, %v6789_v46  ;;  %v7823_v39 = vsel %vm9659_vm9, %v7821_v7, %v7822_v30  ;;  %v6682_v31 = vld [vmem:[#allocation4 + $0x14] sm:$0x1]  ;;  %4867 = vst [vmem:[#allocation4 + $0x38] sm:$0x1] %v4866_v52  ;;  %v4568_v22 = vsel %vm9674_vm11, %v4560_v6, %v4567_v13  ;;  %v5745_v60 = vrot.slane %v5644_v43, 5 }
 0x20b   : > { %4864 = vst.msk [vmem:[#allocation4 + $0x34] sm:$0xf] %vm280_vm0, %v4585_v24  ;;  %v4859_v20 = vsel %vm9688_vm13, %v4569_v35, %v4858_v12  ;;  %v9012_v57 = vcombine.low %v7820_v56, %v7823_v39  ;;  %4857 = vst.msk [vmem:[#allocation4 + $0x28] sm:$0xf] %vm280_vm0, %v4568_v22  ;;  %v5748_v19 = vrot.slane %v5645_v45, 5  ;;  %v8870_v61 = vrot.slane %v5646_v25, 9 }
 0x20c   : > { %6938 = vrot.lane.b32.xlu1 %v8949_v53, %s9372_s11  ;;  %4860 = vst [vmem:[#allocation4 + $0x2c] sm:$0x1] %v4859_v20  ;;  %v5752_v62 = vrot.slane %v5647_v51, 5  ;;  %v7177_v2 = vld [vmem:[#allocation4 + $0x18] sm:$0xf]  ;;  %v5746_v1 = vsel %vm9659_vm9, %v8869_v50, %v5745_v60  ;;  %v5747_v33 = vrot.slane %v5745_v60, 4 }
 0x20d   : > { %v2610_v41 = vpop.permute.xlu1 %2609  ;;  %7977 = vrot.lane.b32.xlu0 %v9012_v57, %s9373_s12  ;;  %v5755_v6 = vrot.slane %v5648_v40, 5  ;;  %v6778_v59 = vrot.slane %v6681_v54, 5  ;;  %v7178_v44 = vld [vmem:[#allocation4 + $0x1c] sm:$0xf]  ;;  %5082 = vst.msk [vmem:[#allocation5 + $0x10] sm:$0xff] %vm11987_vm14, %v9321_v8  ;;  %v9324_v26 = vld [vmem:[#allocation4 + $0xc] sm:$0xff]  }
 0x20e   : > { %2643 = vst.msk [vmem:[#allocation3 + $0x78] sm:$0xff] %vm2627_vm3, %v2610_v41  ;;  %v5754_v16 = vrot.slane %v5752_v62, 4  ;;  %v8932_v49 = vrot.slane %v6680_v47, 9  ;;  %v6781_v5 = vrot.slane %v6682_v31, 5  ;;  %v7226_v0 = vshrl.u32 %v7177_v2, 16 }
 0x20f   : > { %v3652_v3 = vpop.permute.xlu0 %3651  ;;  %v5749_v9 = vsel %vm9659_vm9, %v5747_v33, %v5748_v19  ;;  %v5753_v58 = vsel %vm9659_vm9, %v8870_v61, %v5752_v62  ;;  %v6780_v10 = vrot.slane %v6778_v59, 4  ;;  %v7179_v11 = vld [vmem:[#allocation4 + $0x20] sm:$0x1]  ;;  %v7229_v32 = vshll.u32 %v7177_v2, 16  ;;  %v6139_v12 = vld [vmem:[#allocation4 + $0x18] sm:$0xf] }
 0x210   : > { %5081 = vst.msk [vmem:[#allocation5 + $0x8] sm:$0xff] %vm11987_vm14, %v9324_v26  ;;  %v8885_v55 = vcombine.low %v5746_v1, %v5749_v9  ;;  %v5756_v15 = vsel %vm9659_vm9, %v5754_v16, %v5755_v6  ;;  %v7228_v17 = vrot.slane %v7226_v0, 4  ;;  %v7235_v14 = vshll.u32 %v7178_v44, 16  ;;  %v6140_v38 = vld [vmem:[#allocation4 + $0x1c] sm:$0xf] }
 0x211   : > { %v2931_v4 = vpop.permute.xlu1 %2930  ;;  %3686 = vst.msk [vmem:[#allocation3 + $0x70] sm:$0xff] %vm3671_vm6, %v3652_v3  ;;  %v8886_v18 = vcombine.low %v5753_v58, %v5756_v15  ;;  %v7231_v21 = vrot.slane %v7229_v32, 5  ;;  %v7239_v30 = vshrl.u32 %v7178_v44, 16  ;;  %v6141_v43 = vld [vmem:[#allocation4 + $0x20] sm:$0x1]  ;;  %v6779_v34 = vsel %vm9659_vm9, %v8932_v49, %v6778_v59 }
 0x212   : > { %2964 = vst.msk [vmem:[#allocation3 + $0x78] sm:$0xff] %vm2948_vm4, %v2931_v4  ;;  %5898 = vrot.lane.b32.xlu1 %v8885_v55, %s9368_s30  ;;  %v6782_v28 = vsel %vm9659_vm9, %v6780_v10, %v6781_v5  ;;  %v7237_v56 = vrot.slane %v7235_v14, 5  ;;  %v9305_v45 = vld [vmem:[#allocation4 + $0x30] sm:$0xff]   ;;  %v7245_v13 = vshll.u32 %v7179_v11, 16  ;;  %v6209_v35 = vshrl.u32 %v6139_v12, 16  ;;  %v9332_v19 = vld [vmem:[#allocation4 + $0x24] sm:$0xff]  }
 0x213   : > { %v3973_v7 = vpop.permute.xlu0 %3972  ;;  %5900 = vrot.lane.b32.xlu0 %v8886_v18, %s9368_s30  ;;  %v7232_v25 = vor.u32 %v7231_v21, %v7228_v17  ;;  %v7241_v46 = vrot.slane %v7239_v30, 4  ;;  %v6212_v50 = vshll.u32 %v6139_v12, 16  ;;  %v6218_v51 = vshll.u32 %v6140_v38, 16  ;;  %v5102_v24 = vld [vmem:[#allocation4 + $0x18] sm:$0xf]  ;;  %v9327_v54 = vld [vmem:[#allocation4 + $0x30] sm:$0xff]  }
 0x214   : > { %4007 = vst.msk [vmem:[#allocation3 + $0x70] sm:$0xff] %vm3992_vm7, %v3973_v7  ;;  %v6222_v40 = vshrl.u32 %v6140_v38, 16  ;;  %v6228_v41 = vshll.u32 %v6141_v43, 16  ;;  %v8948_v52 = vcombine.low %v6779_v34, %v6782_v28  ;;  %v6211_v47 = vrot.slane %v6209_v35, 4  ;;  %v9304_v61 = vld [vmem:[#allocation4 + $0x30] sm:$0xff]  }
 0x215   : > { %v3109_v27 = vpop.permute.xlu1 %3108  ;;  %v7233_v53 = vrot.slane %v7232_v25, 4  ;;  %v7242_v39 = vor.u32 %v7241_v46, %v7237_v56  ;;  %v7247_v22 = vrot.slane %v7245_v13, 5  ;;  %v6214_v20 = vrot.slane %v6212_v50, 5  ;;  %5084 = vst.msk [vmem:[#allocation5 + $0x20] sm:$0xff] %vm11987_vm14, %v9327_v54  ;;  %5083 = vst.msk [vmem:[#allocation5 + $0x18] sm:$0xff] %vm11987_vm14, %v9332_v19  ;;  %v9307_v19 = vld [vmem:[#allocation4 + $0x24] sm:$0xff]  }
 0x216   : > { %3142 = vst.msk [vmem:[#allocation3 + $0x78] sm:$0xff] %vm3126_vm5, %v3109_v27  ;;  %6078 = vrot.lane.b32.xlu1 %v9305_v45, %s9370_s9  ;;  %v6220_v57 = vrot.slane %v6218_v51, 5  ;;  %v6224_v60 = vrot.slane %v6222_v40, 4  ;;  %v9171_v8 = vpop.f32.mrb[8].mxu0  ;;  %v6230_v1 = vrot.slane %v6228_v41, 5  ;;  %v5193_v16 = vshrl.u32 %v5102_v24, 16 }
 0x217   : > { %6936 = vrot.lane.b32.xlu0 %v8948_v52, %s9372_s11  ;;  %v7238_v62 = vsel %vm9666_vm10, %v7233_v53, %v7237_v56  ;;  %v7243_v2 = vrot.slane %v7242_v39, 4  ;;  %v4276_v33 = vmul.f32 %v9171_v8, %v10690_v63  ;;  %v4164_v6 = vpop.f32.mrb[9].mxu0  ;;  %v6215_v59 = vor.u32 %v6214_v20, %v6211_v47  ;;  %v5103_v38 = vld [vmem:[#allocation4 + $0x1c] sm:$0xf]  ;;  %v5104_v40 = vld [vmem:[#allocation4 + $0x20] sm:$0x1] }
 0x218   : > { %v6225_v44 = vor.u32 %v6224_v60, %v6220_v57  ;;  %v4274_v26 = vmul.f32 %v10690_v63, %v4164_v6  ;;  %v9172_v4 = vpop.f32.mrb[10].mxu0  ;;  %v5196_v9 = vshll.u32 %v5102_v24, 16  ;;  %v5195_v18 = vrot.slane %v5193_v16, 4  ;;  %v4875_v41 = vld [vmem:[#allocation4 + $0x48] sm:$0xf] }
 0x219   : > { %v3654_v31 = vpop.permute.xlu1 %3653  ;;  %v7248_v49 = vsel %vm9666_vm10, %v7243_v2, %v7247_v22  ;;  %v4315_v5 = vadd.f32 %v10696_v37, %v4276_v33  ;;  %v4277_v0 = vmul.f32 %v9172_v4, %v10690_v63  ;;  %v4167_v3 = vpop.f32.mrb[11].mxu0  ;;  %v6216_v11 = vrot.slane %v6215_v59, 4  ;;  %v4868_v54 = vld [vmem:[#allocation4 + $0x3c] sm:$0xf]  ;;  %v4879_v16 = vld [vmem:[#allocation4 + $0x50] sm:$0x1] }
 0x21a   : > { %3687 = vst.msk [vmem:[#allocation3 + $0x78] sm:$0xff] %vm3671_vm6, %v3654_v31  ;;  %v8980_v10 = vcombine.low %v7238_v62, %v7248_v49  ;;  %v6226_v32 = vrot.slane %v6225_v44, 4  ;;  %v4313_v12 = vadd.f32 %v10696_v37, %v4274_v26  ;;  %v4275_v14 = vmul.f32 %v10690_v63, %v4167_v3  ;;  %v5577_v47 = vpop.permute.xlu0 %5576  ;;  %v6136_v44 = vld [vmem:[#allocation4 + $0xc] sm:$0xf] }
 0x21b   : > { %v4023_v55 = vld [vmem:[#allocation3 + $0x70] sm:$0xff]  ;;  %7117 = vrot.lane.b32.xlu0 %v9304_v61, %s9371_s10  ;;  %v4347_v15 = vmax.f32 %v4315_v5, 0.0  ;;  %v4316_v17 = vadd.f32 %v10696_v37, %v4277_v0  ;;  %v6221_v21 = vsel %vm9666_vm10, %v6216_v11, %v6220_v57  ;;  %v5198_v27 = vrot.slane %v5196_v9, 5  ;;  %v9306_v57 = vld [vmem:[#allocation4 + $0x24] sm:$0xff]   ;;  %5624 = vst.msk [vmem:[#allocation5] sm:$0xff] %vm1581_vm15, %v5577_v47 }
 0x21c   : > { %9189 = vmatprep.mubr.msk.bf16.mxu0 %vm11988_vm8, %v4023_v55  ;;  %v6231_v30 = vsel %vm9666_vm10, %v6226_v32, %v6230_v1  ;;  %v4345_v43 = vmax.f32 %v4313_v12, 0.0  ;;  %v4314_v7 = vadd.f32 %v10696_v37, %v4275_v14  ;;  %v5202_v63 = vshll.u32 %v5103_v38, 16  ;;  %v4872_v11 = vld [vmem:[#allocation4 + $0x44] sm:$0x1]  ;;  %v6137_v32 = vld [vmem:[#allocation4 + $0x10] sm:$0xf] }
 0x21d   : > { %v3975_v58 = vpop.permute.xlu1 %3974  ;;  %v8917_v34 = vcombine.low %v6221_v21, %v6231_v30  ;;  %v9095_v28 = vpack.c.bf16 %v4347_v15, %v4347_v15  ;;  %v4348_v56 = vmax.f32 %v4316_v17, 0.0  ;;  %v5199_v25 = vor.u32 %v5198_v27, %v5195_v18  ;;  %v6138_v17 = vld [vmem:[#allocation4 + $0x14] sm:$0x1]  ;;  %v5100_v27 = vld [vmem:[#allocation4 + $0x10] sm:$0xf] }
 0x21e   : > { %4008 = vst.msk [vmem:[#allocation3 + $0x78] sm:$0xff] %vm3992_vm7, %v3975_v58  ;;  %v9093_v45 = vpack.c.bf16 %v4345_v43, %v4345_v43  ;;  %v5206_v46 = vshrl.u32 %v5103_v38, 16  ;;  %v4346_v51 = vmax.f32 %v4314_v7, 0.0  ;;  %v5204_v39 = vrot.slane %v5202_v63, 5  ;;  %v5897_v0 = vpop.permute.xlu0 %5896  ;;  %v5099_v43 = vld [vmem:[#allocation4 + $0xc] sm:$0xf] }
 0x21f   : > { %7657 = vrot.lane.b32.xlu0 %v8980_v10, %s9375_s14  ;;  %6618 = vrot.lane.b32.xlu1 %v8917_v34, %s9374_s13  ;;  %v4605_v13 = vshrl.u32 %v9095_v28, 16  ;;  %v4608_v35 = vshll.u32 %v9095_v28, 16  ;;  %v9096_v50 = vpack.c.bf16 %v4348_v56, %v4348_v56  ;;  %v5200_v53 = vrot.slane %v5199_v25, 4  ;;  %5944 = vst.msk [vmem:[#allocation5] sm:$0xff] %vm1905_vm1, %v5897_v0  ;;  %v5654_v0 = vld [vmem:[#allocation4 + $0x38] sm:$0x1] }
 0x220   : > { %v4588_v24 = vshrl.u32 %v9093_v45, 16  ;;  %v4591_v52 = vshll.u32 %v9093_v45, 16  ;;  %v9094_v20 = vpack.c.bf16 %v4346_v51, %v4346_v51  ;;  %v5208_v62 = vrot.slane %v5206_v46, 4  ;;  %v5101_v45 = vld [vmem:[#allocation4 + $0x14] sm:$0x1] }
 0x221   : > { %v4607_v37 = vrot.slane %v4605_v13, 7  ;;  %v4613_v31 = vshrl.u32 %v9096_v50, 16  ;;  %v4616_v22 = vshll.u32 %v9096_v50, 16  ;;  %v5205_v61 = vsel %vm9666_vm10, %v5200_v53, %v5204_v39  ;;  %v7728_v50 = vld [vmem:[#allocation4 + $0x34] sm:$0xf] }
 0x222   : > { %v4590_v8 = vrot.slane %v4588_v24, 7  ;;  %v5212_v2 = vshll.u32 %v5104_v40, 16  ;;  %v4596_v59 = vshrl.u32 %v9094_v20, 16  ;;  %v4599_v49 = vshll.u32 %v9094_v20, 16 }
 0x223   : > { %v4610_v1 = vor.u32 %v4608_v35, %v4607_v37  ;;  %v4611_v33 = vrot.slane %v4607_v37, 4  ;;  %v4615_v6 = vrot.slane %v4613_v31, 7  ;;  %7115 = vrot.lane.b32.xlu1 %v9306_v57, %s9371_s10  ;;  %6076 = vrot.lane.b32.xlu0 %v9307_v19, %s9370_s9  ;;  %v5209_v5 = vor.u32 %v5208_v62, %v5204_v39  ;;  %v7727_v35 = vld [vmem:[#allocation4 + $0x30] sm:$0xe] }
 0x224   : > { %v4593_v26 = vor.u32 %v4591_v52, %v4590_v8  ;;  %v4594_v4 = vrot.slane %v4590_v8, 4  ;;  %v4598_v10 = vrot.slane %v4596_v59, 7  ;;  %v5214_v15 = vrot.slane %v5212_v2, 5  ;;  %v7729_v52 = vld [vmem:[#allocation4 + $0x38] sm:$0x1] }
 0x225   : > { %v4024_v60 = vld [vmem:[#allocation3 + $0x78] sm:$0xff]  ;;  %v4876_v3 = vsel %vm9680_vm12, %v4610_v1, %v4875_v41  ;;  %v4618_v9 = vor.u32 %v4616_v22, %v4615_v6  ;;  %v4620_v58 = vrot.slane %v4615_v6, 4  ;;  %v5210_v55 = vrot.slane %v5209_v5, 4  ;;  %v5652_v1 = vld [vmem:[#allocation4 + $0x30] sm:$0xe] }
 0x226   : > { %9190 = vmatmul.mubr.msk.bf16.gmra.mrb[28].mxu0 %vm11988_vm8, %v4024_v60  ;;  %4877 = vst [vmem:[#allocation4 + $0x48] sm:$0xf] %v4876_v3  ;;  %v4869_v12 = vsel %vm9680_vm12, %v4593_v26, %v4868_v54  ;;  %v6185_v14 = vshrl.u32 %v6136_v44, 16  ;;  %v4601_v21 = vor.u32 %v4599_v49, %v4598_v10  ;;  %v4603_v30 = vrot.slane %v4598_v10, 4  ;;  %v6689_v54 = vld [vmem:[#allocation4 + $0x30] sm:$0xe] }
 0x227   : > { %4870 = vst [vmem:[#allocation4 + $0x3c] sm:$0xf] %v4869_v12  ;;  %v4619_v38 = vsel %vm9674_vm11, %v4611_v33, %v4618_v9  ;;  %v4880_v18 = vsel %vm9688_vm13, %v4620_v58, %v4879_v16  ;;  %v5215_v34 = vsel %vm9666_vm10, %v5210_v55, %v5214_v15  ;;  %v6188_v56 = vshll.u32 %v6136_v44, 16  ;;  %v6690_v60 = vld [vmem:[#allocation4 + $0x34] sm:$0xf] }
 0x228   : > { %4878 = vst.msk [vmem:[#allocation4 + $0x4c] sm:$0xf] %vm280_vm0, %v4619_v38  ;;  %4881 = vst [vmem:[#allocation4 + $0x50] sm:$0x1] %v4880_v18  ;;  %v6187_v28 = vrot.slane %v6185_v14, 4  ;;  %v6194_v7 = vshll.u32 %v6137_v32, 16  ;;  %v4602_v25 = vsel %vm9674_vm11, %v4594_v4, %v4601_v21  ;;  %v4873_v63 = vsel %vm9688_vm13, %v4603_v30, %v4872_v11 }
 0x229   : > { %v8854_v46 = vcombine.low %v5205_v61, %v5215_v34  ;;  %v6198_v13 = vshrl.u32 %v6137_v32, 16  ;;  %4871 = vst.msk [vmem:[#allocation4 + $0x40] sm:$0xf] %vm280_vm0, %v4602_v25  ;;  %4874 = vst [vmem:[#allocation4 + $0x44] sm:$0x1] %v4873_v63  ;;  %v6190_v51 = vrot.slane %v6188_v56, 5 }
 0x22a   : > { %v6196_v40 = vrot.slane %v6194_v7, 5  ;;  %v6204_v41 = vshll.u32 %v6138_v17, 16  ;;  %v5169_v24 = vshrl.u32 %v5099_v43, 16  ;;  %v5172_v39 = vshll.u32 %v5099_v43, 16  ;;  %v6691_v2 = vld [vmem:[#allocation4 + $0x38] sm:$0x1] }
 0x22b   : > { %5580 = vrot.lane.b32.xlu1 %v8854_v46, %s9369_s8  ;;  %v6200_v53 = vrot.slane %v6198_v13, 4  ;;  %v5178_v47 = vshll.u32 %v5100_v27, 16  ;;  %v5182_v37 = vshrl.u32 %v5100_v27, 16  ;;  %v6191_v31 = vor.u32 %v6190_v51, %v6187_v28  ;;  %v5653_v5 = vld [vmem:[#allocation4 + $0x34] sm:$0xf] }
 0x22c   : > { %v6206_v22 = vrot.slane %v6204_v41, 5  ;;  %v5171_v20 = vrot.slane %v5169_v24, 4  ;;  %v5188_v57 = vshll.u32 %v5101_v45, 16  ;;  %v5174_v19 = vrot.slane %v5172_v39, 5  ;;  %v7724_v11 = vld [vmem:[#allocation4 + $0x24] sm:$0xe] }
 0x22d   : > { %v6201_v8 = vor.u32 %v6200_v53, %v6196_v40  ;;  %v5180_v61 = vrot.slane %v5178_v47, 5  ;;  %v5184_v62 = vrot.slane %v5182_v37, 4  ;;  %v6192_v33 = vrot.slane %v6191_v31, 4  ;;  %v7725_v32 = vld [vmem:[#allocation4 + $0x28] sm:$0xf] }
 0x22e   : > { %v5190_v6 = vrot.slane %v5188_v57, 5  ;;  %v8998_v59 = vrot.slane %v7727_v35, 9  ;;  %v7833_v44 = vrot.slane %v7728_v50, 5  ;;  %v5175_v4 = vor.u32 %v5174_v19, %v5171_v20  ;;  %v7726_v12 = vld [vmem:[#allocation4 + $0x2c] sm:$0x1] }
 0x22f   : > { %v6202_v26 = vrot.slane %v6201_v8, 4  ;;  %v5185_v16 = vor.u32 %v5184_v62, %v5180_v61  ;;  %v7836_v49 = vrot.slane %v7729_v52, 5  ;;  %v6197_v3 = vsel %vm9666_vm10, %v6192_v33, %v6196_v40  ;;  %v5649_v55 = vld [vmem:[#allocation4 + $0x24] sm:$0xe]  ;;  %v5650_v7 = vld [vmem:[#allocation4 + $0x28] sm:$0xf] }
 0x230   : > { %v7834_v9 = vsel %vm9659_vm9, %v8998_v59, %v7833_v44  ;;  %v7835_v58 = vrot.slane %v7833_v44, 4  ;;  %v8935_v10 = vrot.slane %v6689_v54, 9  ;;  %v5176_v17 = vrot.slane %v5175_v4, 4  ;;  %v5651_v13 = vld [vmem:[#allocation4 + $0x2c] sm:$0x1] }
 0x231   : > { %v6207_v15 = vsel %vm9666_vm10, %v6202_v26, %v6206_v22  ;;  %v5186_v14 = vrot.slane %v5185_v16, 4  ;;  %v6799_v38 = vrot.slane %v6690_v60, 5  ;;  %v6802_v30 = vrot.slane %v6691_v2, 5  ;;  %v6686_v41 = vld [vmem:[#allocation4 + $0x24] sm:$0xe] }
 0x232   : > { %v8916_v18 = vcombine.low %v6197_v3, %v6207_v15  ;;  %v7837_v21 = vsel %vm9659_vm9, %v7835_v58, %v7836_v49  ;;  %v8872_v43 = vrot.slane %v5652_v1, 9  ;;  %v5181_v27 = vsel %vm9666_vm10, %v5176_v17, %v5180_v61  ;;  %v6687_v47 = vld [vmem:[#allocation4 + $0x28] sm:$0xf]  ;;  %v6688_v37 = vld [vmem:[#allocation4 + $0x2c] sm:$0x1] }
 0x233   : > { %v5191_v34 = vsel %vm9666_vm10, %v5186_v14, %v5190_v6  ;;  %v9014_v28 = vcombine.low %v7834_v9, %v7837_v21  ;;  %v6800_v56 = vsel %vm9659_vm9, %v8935_v10, %v6799_v38  ;;  %v6801_v25 = vrot.slane %v6799_v38, 4  ;;  %v7183_v57 = vld [vmem:[#allocation4 + $0x30] sm:$0xf]  ;;  %v7184_v62 = vld [vmem:[#allocation4 + $0x34] sm:$0xf]  ;;  %v9336_v21 = vld [vmem:[#allocation4 + $0x48] sm:$0xff]  }
 0x234   : > { %6616 = vrot.lane.b32.xlu0 %v8916_v18, %s9374_s13  ;;  %v8853_v45 = vcombine.low %v5181_v27, %v5191_v34  ;;  %v5766_v63 = vrot.slane %v5653_v5, 5  ;;  %v5769_v46 = vrot.slane %v5654_v0, 5  ;;  %v8997_v35 = vrot.slane %v7724_v11, 9  ;;  %v7185_v59 = vld [vmem:[#allocation4 + $0x38] sm:$0x1]  ;;  %5086 = vst.msk [vmem:[#allocation5 + $0x30] sm:$0xff] %vm11987_vm14, %v9336_v21 }
 0x235   : > { %v7826_v50 = vrot.slane %v7725_v32, 5  ;;  %v7829_v51 = vrot.slane %v7726_v12, 5  ;;  %v8871_v40 = vrot.slane %v5649_v55, 9  ;;  %v6803_v24 = vsel %vm9659_vm9, %v6801_v25, %v6802_v30  ;;  %v6145_v49 = vld [vmem:[#allocation4 + $0x30] sm:$0xf] }
 0x236   : > { %5578 = vrot.lane.b32.xlu1 %v8853_v45, %s9369_s8  ;;  %v5767_v52 = vsel %vm9659_vm9, %v8872_v43, %v5766_v63  ;;  %v5768_v53 = vrot.slane %v5766_v63, 4  ;;  %v5759_v39 = vrot.slane %v5650_v7, 5  ;;  %v8951_v54 = vcombine.low %v6800_v56, %v6803_v24  ;;  %v6146_v58 = vld [vmem:[#allocation4 + $0x34] sm:$0xf]  ;;  %v6147_v55 = vld [vmem:[#allocation4 + $0x38] sm:$0x1] }
 0x237   : > { %v7827_v31 = vsel %vm9659_vm9, %v8997_v35, %v7826_v50  ;;  %v7828_v22 = vrot.slane %v7826_v50, 4  ;;  %v5762_v20 = vrot.slane %v5651_v13, 5  ;;  %v8934_v61 = vrot.slane %v6686_v41, 9  ;;  %v5108_v18 = vld [vmem:[#allocation4 + $0x30] sm:$0xf]  ;;  %v9309_v43 = vld [vmem:[#allocation4 + $0x48] sm:$0xff]  }
 0x238   : > { %7981 = vrot.lane.b32.xlu0 %v9014_v28, %s9373_s12  ;;  %v5770_v60 = vsel %vm9659_vm9, %v5768_v53, %v5769_v46  ;;  %v5760_v8 = vsel %vm9659_vm9, %v8871_v40, %v5759_v39  ;;  %v5761_v19 = vrot.slane %v5759_v39, 4  ;;  %v6792_v33 = vrot.slane %v6687_v47, 5  ;;  %v9337_v50 = vld [vmem:[#allocation4 + $0x3c] sm:$0xff]   ;;  %v5109_v24 = vld [vmem:[#allocation4 + $0x34] sm:$0xf] }
 0x239   : > { %v8888_v2 = vcombine.low %v5767_v52, %v5770_v60  ;;  %v7830_v1 = vsel %vm9659_vm9, %v7828_v22, %v7829_v51  ;;  %v6795_v6 = vrot.slane %v6688_v37, 5  ;;  %v7274_v4 = vshrl.u32 %v7183_v57, 16  ;;  %5085 = vst.msk [vmem:[#allocation5 + $0x28] sm:$0xff] %vm11987_vm14, %v9337_v50 }
 0x23a   : > { %6942 = vrot.lane.b32.xlu1 %v8951_v54, %s9372_s11  ;;  %v9013_v44 = vcombine.low %v7827_v31, %v7830_v1  ;;  %v5763_v26 = vsel %vm9659_vm9, %v5761_v19, %v5762_v20  ;;  %v7277_v16 = vshll.u32 %v7183_v57, 16  ;;  %v6793_v0 = vsel %vm9659_vm9, %v8934_v61, %v6792_v33  ;;  %v10895_v20 = vld [vmem:[%s11981_s3] ss:$0 sm:$0xff] }
 0x23b   : > { %v8887_v5 = vcombine.low %v5760_v8, %v5763_v26  ;;  %v6794_v3 = vrot.slane %v6792_v33, 4  ;;  %v7283_v9 = vshll.u32 %v7184_v62, 16  ;;  %v7276_v10 = vrot.slane %v7274_v4, 4  ;;  %v9308_v19 = vld [vmem:[#allocation4 + $0x48] sm:$0xff]  }
 0x23c   : > { %5904 = vrot.lane.b32.xlu0 %v8888_v2, %s9368_s30  ;;  %v7279_v11 = vrot.slane %v7277_v16, 5  ;;  %v7287_v32 = vshrl.u32 %v7184_v62, 16  ;;  %v7293_v12 = vshll.u32 %v7185_v59, 16  ;;  %v6257_v14 = vshrl.u32 %v6145_v49, 16  ;;  %v10907_v26 = vld [vmem:[%s11982_s4] ss:$0 sm:$0xff] }
 0x23d   : > { %v6796_v15 = vsel %vm9659_vm9, %v6794_v3, %v6795_v6  ;;  %v7285_v17 = vrot.slane %v7283_v9, 5  ;;  %v6260_v38 = vshll.u32 %v6145_v49, 16  ;;  %v6266_v45 = vshll.u32 %v6146_v58, 16  ;;  %v5110_v3 = vld [vmem:[#allocation4 + $0x38] sm:$0x1] }
 0x23e   : > { %5902 = vrot.lane.b32.xlu1 %v8887_v5, %s9368_s30  ;;  %v8950_v30 = vcombine.low %v6793_v0, %v6796_v15  ;;  %v7280_v27 = vor.u32 %v7279_v11, %v7276_v10  ;;  %v7289_v34 = vrot.slane %v7287_v32, 4  ;;  %v7295_v28 = vrot.slane %v7293_v12, 5  ;;  %v6142_v12 = vld [vmem:[#allocation4 + $0x24] sm:$0xf] }
 0x23f   : > { %v6259_v56 = vrot.slane %v6257_v14, 4  ;;  %v6262_v7 = vrot.slane %v6260_v38, 5  ;;  %v6270_v25 = vshrl.u32 %v6146_v58, 16  ;;  %v6276_v13 = vshll.u32 %v6147_v55, 16 }
 0x240   : > { %7979 = vrot.lane.b32.xlu0 %v9013_v44, %s9373_s12  ;;  %v7281_v63 = vrot.slane %v7280_v27, 4  ;;  %v7290_v46 = vor.u32 %v7289_v34, %v7285_v17  ;;  %v5241_v35 = vshrl.u32 %v5108_v18, 16  ;;  %v6268_v40 = vrot.slane %v6266_v45, 5 }
 0x241   : > { %v6263_v51 = vor.u32 %v6262_v7, %v6259_v56  ;;  %v6272_v41 = vrot.slane %v6270_v25, 4  ;;  %v5244_v52 = vshll.u32 %v5108_v18, 16  ;;  %v6278_v47 = vrot.slane %v6276_v13, 5 }
 0x242   : > { %6082 = vrot.lane.b32.xlu1 %v9309_v43, %s9370_s9  ;;  %v7286_v53 = vsel %vm9666_vm10, %v7281_v63, %v7285_v17  ;;  %v7291_v39 = vrot.slane %v7290_v46, 4  ;;  %v5243_v54 = vrot.slane %v5241_v35, 4  ;;  %v5250_v1 = vshll.u32 %v5109_v24, 16  ;;  %v4889_v63 = vld [vmem:[#allocation4 + $0x60] sm:$0xf] }
 0x243   : > { %v9175_v37 = vpop.f32.mrb[12].mxu0  ;;  %v6264_v31 = vrot.slane %v6263_v51, 4  ;;  %v6273_v22 = vor.u32 %v6272_v41, %v6268_v40  ;;  %v5246_v8 = vrot.slane %v5244_v52, 5  ;;  %v5254_v33 = vshrl.u32 %v5109_v24, 16  ;;  %v9310_v51 = vld [vmem:[#allocation4 + $0x3c] sm:$0xff]  }
 0x244   : > { %v4280_v57 = vmul.f32 %v10895_v20, %v9175_v37  ;;  %v4180_v60 = vpop.f32.mrb[13].mxu0  ;;  %6940 = vrot.lane.b32.xlu0 %v8950_v30, %s9372_s11  ;;  %v7296_v61 = vsel %vm9666_vm10, %v7291_v39, %v7295_v28  ;;  %v5252_v11 = vrot.slane %v5250_v1, 5  ;;  %v5260_v30 = vshll.u32 %v5110_v3, 16  ;;  %v9311_v41 = vld [vmem:[#allocation4 + $0x3c] sm:$0xff]  }
 0x245   : > { %v4278_v62 = vmul.f32 %v10895_v20, %v4180_v60  ;;  %v9176_v2 = vpop.f32.mrb[14].mxu0  ;;  %v8982_v6 = vcombine.low %v7286_v53, %v7296_v61  ;;  %v6269_v59 = vsel %vm9666_vm10, %v6264_v31, %v6268_v40  ;;  %v6274_v44 = vrot.slane %v6273_v22, 4  ;;  %v6143_v31 = vld [vmem:[#allocation4 + $0x28] sm:$0xf]  ;;  %v4882_v60 = vld [vmem:[#allocation4 + $0x54] sm:$0xf] }
 0x246   : > { %v4319_v4 = vadd.f32 %v10907_v26, %v4280_v57  ;;  %v4183_v16 = vpop.f32.mrb[15].mxu0  ;;  %v4281_v5 = vmul.f32 %v10895_v20, %v9176_v2  ;;  %v5247_v9 = vor.u32 %v5246_v8, %v5243_v54  ;;  %v5256_v32 = vrot.slane %v5254_v33, 4  ;;  %v4893_v8 = vld [vmem:[#allocation4 + $0x68] sm:$0x1] }
 0x247   : > { %v4317_v49 = vadd.f32 %v10907_v26, %v4278_v62  ;;  %v4279_v0 = vmul.f32 %v10895_v20, %v4183_v16  ;;  %v6279_v58 = vsel %vm9666_vm10, %v6274_v44, %v6278_v47  ;;  %v6233_v28 = vshrl.u32 %v6142_v12, 16 }
 0x248   : > { %v4351_v10 = vmax.f32 %v4319_v4, 0.0  ;;  %7121 = vrot.lane.b32.xlu0 %v9308_v19, %s9371_s10  ;;  %v8919_v55 = vcombine.low %v6269_v59, %v6279_v58  ;;  %v4320_v17 = vadd.f32 %v10907_v26, %v4281_v5  ;;  %v5248_v18 = vrot.slane %v5247_v9, 4  ;;  %v6144_v4 = vld [vmem:[#allocation4 + $0x2c] sm:$0x1]  ;;  %v7180_v5 = vld [vmem:[#allocation4 + $0x24] sm:$0xf] }
 0x249   : > { %v4349_v15 = vmax.f32 %v4317_v49, 0.0  ;;  %v4318_v14 = vadd.f32 %v10907_v26, %v4279_v0  ;;  %v5257_v21 = vor.u32 %v5256_v32, %v5252_v11  ;;  %v5262_v24 = vrot.slane %v5260_v30, 5  ;;  %v7734_v30 = vld [vmem:[#allocation4 + $0x4c] sm:$0xf] }
 0x24a   : > { %v9099_v38 = vpack.c.bf16 %v4351_v10, %v4351_v10  ;;  %6622 = vrot.lane.b32.xlu1 %v8919_v55, %s9374_s13  ;;  %v4352_v27 = vmax.f32 %v4320_v17, 0.0  ;;  %v5253_v45 = vsel %vm9666_vm10, %v5248_v18, %v5252_v11  ;;  %v6235_v52 = vrot.slane %v6233_v28, 4  ;;  %v7181_v10 = vld [vmem:[#allocation4 + $0x28] sm:$0xf]  ;;  %v7182_v11 = vld [vmem:[#allocation4 + $0x2c] sm:$0x1] }
 0x24b   : > { %v9097_v43 = vpack.c.bf16 %v4349_v15, %v4349_v15  ;;  %v4350_v34 = vmax.f32 %v4318_v14, 0.0  ;;  %v5258_v25 = vrot.slane %v5257_v21, 4  ;;  %v6236_v53 = vshll.u32 %v6142_v12, 16  ;;  %v7733_v17 = vld [vmem:[#allocation4 + $0x48] sm:$0xe] }
 0x24c   : > { %v4639_v56 = vshrl.u32 %v9099_v38, 16  ;;  %v4642_v7 = vshll.u32 %v9099_v38, 16  ;;  %7661 = vrot.lane.b32.xlu0 %v8982_v6, %s9375_s14  ;;  %v9100_v35 = vpack.c.bf16 %v4352_v27, %v4352_v27  ;;  %v4886_v6 = vld [vmem:[#allocation4 + $0x5c] sm:$0x1]  ;;  %v6242_v49 = vshll.u32 %v6143_v31, 16 }
 0x24d   : > { %v4622_v46 = vshrl.u32 %v9097_v43, 16  ;;  %v4625_v13 = vshll.u32 %v9097_v43, 16  ;;  %v9098_v50 = vpack.c.bf16 %v4350_v34, %v4350_v34  ;;  %v5263_v61 = vsel %vm9666_vm10, %v5258_v25, %v5262_v24  ;;  %v7735_v43 = vld [vmem:[#allocation4 + $0x50] sm:$0x1] }
 0x24e   : > { %v4641_v40 = vrot.slane %v4639_v56, 7  ;;  %v4647_v47 = vshrl.u32 %v9100_v35, 16  ;;  %v4650_v37 = vshll.u32 %v9100_v35, 16  ;;  %7119 = vrot.lane.b32.xlu1 %v9310_v51, %s9371_s10  ;;  %v8856_v44 = vcombine.low %v5253_v45, %v5263_v61 }
 0x24f   : > { %v4624_v39 = vrot.slane %v4622_v46, 7  ;;  %v4630_v54 = vshrl.u32 %v9098_v50, 16  ;;  %v4633_v19 = vshll.u32 %v9098_v50, 16  ;;  %v6238_v16 = vrot.slane %v6236_v53, 5 }
 0x250   : > { %v4644_v22 = vor.u32 %v4642_v7, %v4641_v40  ;;  %v4645_v57 = vrot.slane %v4641_v40, 4  ;;  %v4649_v1 = vrot.slane %v4647_v47, 7  ;;  %6080 = vrot.lane.b32.xlu0 %v9311_v41, %s9370_s9  ;;  %v6244_v55 = vrot.slane %v6242_v49, 5  ;;  %v5105_v7 = vld [vmem:[#allocation4 + $0x24] sm:$0xf] }
 0x251   : > { %v4627_v62 = vor.u32 %v4625_v13, %v4624_v39  ;;  %v4628_v2 = vrot.slane %v4624_v39, 4  ;;  %v4632_v33 = vrot.slane %v4630_v54, 7  ;;  %v6239_v12 = vor.u32 %v6238_v16, %v6235_v52  ;;  %v5106_v13 = vld [vmem:[#allocation4 + $0x28] sm:$0xf] }
 0x252   : > { %v4890_v59 = vsel %vm9680_vm12, %v4644_v22, %v4889_v63  ;;  %v4652_v3 = vor.u32 %v4650_v37, %v4649_v1  ;;  %v4654_v9 = vrot.slane %v4649_v1, 4  ;;  %5584 = vrot.lane.b32.xlu1 %v8856_v44, %s9369_s8  ;;  %v6246_v15 = vshrl.u32 %v6143_v31, 16  ;;  %v5107_v31 = vld [vmem:[#allocation4 + $0x2c] sm:$0x1] }
 0x253   : > { %4891 = vst [vmem:[#allocation4 + $0x60] sm:$0xf] %v4890_v59  ;;  %v4883_v0 = vsel %vm9680_vm12, %v4627_v62, %v4882_v60  ;;  %v4635_v58 = vor.u32 %v4633_v19, %v4632_v33  ;;  %v4637_v32 = vrot.slane %v4632_v33, 4  ;;  %v6252_v21 = vshll.u32 %v6144_v4, 16  ;;  %v5658_v19 = vld [vmem:[#allocation4 + $0x48] sm:$0xe] }
 0x254   : > { %4884 = vst [vmem:[#allocation4 + $0x54] sm:$0xf] %v4883_v0  ;;  %v4653_v14 = vsel %vm9674_vm11, %v4645_v57, %v4652_v3  ;;  %v4894_v38 = vsel %vm9688_vm13, %v4654_v9, %v4893_v8  ;;  %v6240_v34 = vrot.slane %v6239_v12, 4  ;;  %v6248_v28 = vrot.slane %v6246_v15, 4  ;;  %v5659_v33 = vld [vmem:[#allocation4 + $0x4c] sm:$0xf] }
 0x255   : > { %v4636_v18 = vsel %vm9674_vm11, %v4628_v2, %v4635_v58  ;;  %4892 = vst.msk [vmem:[#allocation4 + $0x64] sm:$0xf] %vm280_vm0, %v4653_v14  ;;  %4895 = vst [vmem:[#allocation4 + $0x68] sm:$0x1] %v4894_v38  ;;  %v4887_v27 = vsel %vm9688_vm13, %v4637_v32, %v4886_v6  ;;  %v7250_v56 = vshrl.u32 %v7180_v5, 16  ;;  %v6254_v45 = vrot.slane %v6252_v21, 5 }
 0x256   : > { %4885 = vst.msk [vmem:[#allocation4 + $0x58] sm:$0xf] %vm280_vm0, %v4636_v18  ;;  %4888 = vst [vmem:[#allocation4 + $0x5c] sm:$0x1] %v4887_v27  ;;  %v7253_v25 = vshll.u32 %v7180_v5, 16  ;;  %v7259_v63 = vshll.u32 %v7181_v10, 16  ;;  %v6245_v35 = vsel %vm9666_vm10, %v6240_v34, %v6244_v55  ;;  %v6249_v50 = vor.u32 %v6248_v28, %v6244_v55 }
 0x257   : > { %v7263_v46 = vshrl.u32 %v7181_v10, 16  ;;  %v7252_v51 = vrot.slane %v7250_v56, 4  ;;  %v7269_v40 = vshll.u32 %v7182_v11, 16  ;;  %v9000_v53 = vrot.slane %v7733_v17, 9  ;;  %v5660_v6 = vld [vmem:[#allocation4 + $0x50] sm:$0x1] }
 0x258   : > { %v7255_v41 = vrot.slane %v7253_v25, 5  ;;  %v7261_v24 = vrot.slane %v7259_v63, 5  ;;  %v6250_v39 = vrot.slane %v6249_v50, 4  ;;  %v7847_v37 = vrot.slane %v7734_v30, 5  ;;  %v6695_v59 = vld [vmem:[#allocation4 + $0x48] sm:$0xe] }
 0x259   : > { %v7265_v52 = vrot.slane %v7263_v46, 4  ;;  %v7271_v47 = vrot.slane %v7269_v40, 5  ;;  %v7850_v54 = vrot.slane %v7735_v43, 5  ;;  %v5217_v60 = vshrl.u32 %v5105_v7, 16  ;;  %v6696_v5 = vld [vmem:[#allocation4 + $0x4c] sm:$0xf] }
 0x25a   : > { %v7256_v22 = vor.u32 %v7255_v41, %v7252_v51  ;;  %v5220_v8 = vshll.u32 %v5105_v7, 16  ;;  %v6255_v61 = vsel %vm9666_vm10, %v6250_v39, %v6254_v45  ;;  %v7848_v62 = vsel %vm9659_vm9, %v9000_v53, %v7847_v37  ;;  %v6697_v0 = vld [vmem:[#allocation4 + $0x50] sm:$0x1]  ;;  %v7730_v18 = vld [vmem:[#allocation4 + $0x3c] sm:$0xe] }
 0x25b   : > { %v7266_v57 = vor.u32 %v7265_v52, %v7261_v24  ;;  %v7849_v2 = vrot.slane %v7847_v37, 4  ;;  %v5226_v1 = vshll.u32 %v5106_v13, 16  ;;  %v8918_v44 = vcombine.low %v6245_v35, %v6255_v61  ;;  %v7731_v21 = vld [vmem:[#allocation4 + $0x40] sm:$0xf]  ;;  %v7732_v25 = vld [vmem:[#allocation4 + $0x44] sm:$0x1] }
 0x25c   : > { %v7257_v4 = vrot.slane %v7256_v22, 4  ;;  %v5219_v49 = vrot.slane %v5217_v60, 4  ;;  %v5222_v9 = vrot.slane %v5220_v8, 5  ;;  %v5230_v10 = vshrl.u32 %v5106_v13, 16  ;;  %v6692_v50 = vld [vmem:[#allocation4 + $0x3c] sm:$0xe] }
 0x25d   : > { %v7267_v16 = vrot.slane %v7266_v57, 4  ;;  %v7851_v3 = vsel %vm9659_vm9, %v7849_v2, %v7850_v54  ;;  %v5228_v58 = vrot.slane %v5226_v1, 5  ;;  %6620 = vrot.lane.b32.xlu0 %v8918_v44, %s9374_s13  ;;  %v5236_v55 = vshll.u32 %v5107_v31, 16  ;;  %v6693_v52 = vld [vmem:[#allocation4 + $0x40] sm:$0xf] }
 0x25e   : > { %v7262_v11 = vsel %vm9666_vm10, %v7257_v4, %v7261_v24  ;;  %v9016_v12 = vcombine.low %v7848_v62, %v7851_v3  ;;  %v5223_v17 = vor.u32 %v5222_v9, %v5219_v49  ;;  %v5232_v14 = vrot.slane %v5230_v10, 4  ;;  %v6694_v53 = vld [vmem:[#allocation4 + $0x44] sm:$0x1]  ;;  %v5655_v31 = vld [vmem:[#allocation4 + $0x3c] sm:$0xe]  ;;  %v9343_v4 = vld [vmem:[#allocation4 + $0x54] sm:$0xff]  }
 0x25f   : > { %v7272_v32 = vsel %vm9666_vm10, %v7267_v16, %v7271_v47  ;;  %v8874_v38 = vrot.slane %v5658_v19, 9  ;;  %v5238_v30 = vrot.slane %v5236_v55, 5  ;;  %v5780_v43 = vrot.slane %v5659_v33, 5  ;;  %v5656_v22 = vld [vmem:[#allocation4 + $0x40] sm:$0xf]  ;;  %5087 = vst.msk [vmem:[#allocation5 + $0x38] sm:$0xff] %vm11987_vm14, %v9343_v4 }
 0x260   : > { %v8981_v15 = vcombine.low %v7262_v11, %v7272_v32  ;;  %v5783_v27 = vrot.slane %v5660_v6, 5  ;;  %v8937_v34 = vrot.slane %v6695_v59, 9  ;;  %v5224_v28 = vrot.slane %v5223_v17, 4  ;;  %v5657_v61 = vld [vmem:[#allocation4 + $0x44] sm:$0x1] }
 0x261   : > { %v5233_v56 = vor.u32 %v5232_v14, %v5228_v58  ;;  %v6813_v7 = vrot.slane %v6696_v5, 5  ;;  %v6816_v45 = vrot.slane %v6697_v0, 5  ;;  %7985 = vrot.lane.b32.xlu0 %v9016_v12, %s9373_s12  ;;  %v5781_v63 = vsel %vm9659_vm9, %v8874_v38, %v5780_v43  ;;  %v7189_v62 = vld [vmem:[#allocation4 + $0x48] sm:$0xf]  ;;  %v9341_v2 = vld [vmem:[#allocation4 + $0x60] sm:$0xff]  }
 0x262   : > { %7659 = vrot.lane.b32.xlu1 %v8981_v15, %s9375_s14  ;;  %v5782_v46 = vrot.slane %v5780_v43, 4  ;;  %v8999_v13 = vrot.slane %v7730_v18, 9  ;;  %v7840_v35 = vrot.slane %v7731_v21, 5  ;;  %v5229_v51 = vsel %vm9666_vm10, %v5224_v28, %v5228_v58  ;;  %v7190_v44 = vld [vmem:[#allocation4 + $0x4c] sm:$0xf]  ;;  %5088 = vst.msk [vmem:[#allocation5 + $0x40] sm:$0xff] %vm11987_vm14, %v9341_v2 }
 0x263   : > { %v5234_v40 = vrot.slane %v5233_v56, 4  ;;  %v6814_v41 = vsel %vm9659_vm9, %v8937_v34, %v6813_v7  ;;  %v6815_v24 = vrot.slane %v6813_v7, 4  ;;  %v7843_v54 = vrot.slane %v7732_v25, 5  ;;  %v7191_v3 = vld [vmem:[#allocation4 + $0x50] sm:$0x1] }
 0x264   : > { %v5784_v39 = vsel %vm9659_vm9, %v5782_v46, %v5783_v27  ;;  %v7841_v47 = vsel %vm9659_vm9, %v8999_v13, %v7840_v35  ;;  %v7842_v37 = vrot.slane %v7840_v35, 4  ;;  %v8936_v19 = vrot.slane %v6692_v50, 9  ;;  %v6151_v17 = vld [vmem:[#allocation4 + $0x48] sm:$0xf]  ;;  %v6153_v56 = vld [vmem:[#allocation4 + $0x50] sm:$0x1] }
 0x265   : > { %v5239_v57 = vsel %vm9666_vm10, %v5234_v40, %v5238_v30  ;;  %v8890_v60 = vcombine.low %v5781_v63, %v5784_v39  ;;  %v6817_v8 = vsel %vm9659_vm9, %v6815_v24, %v6816_v45  ;;  %v6806_v59 = vrot.slane %v6693_v52, 5  ;;  %v6152_v30 = vld [vmem:[#allocation4 + $0x4c] sm:$0xf]  ;;  %v5114_v7 = vld [vmem:[#allocation4 + $0x48] sm:$0xf] }
 0x266   : > { %v8855_v1 = vcombine.low %v5229_v51, %v5239_v57  ;;  %v8953_v33 = vcombine.low %v6814_v41, %v6817_v8  ;;  %v7844_v6 = vsel %vm9659_vm9, %v7842_v37, %v7843_v54  ;;  %v6809_v49 = vrot.slane %v6694_v53, 5  ;;  %v9312_v53 = vld [vmem:[#allocation4 + $0x60] sm:$0xff]  }
 0x267   : > { %5908 = vrot.lane.b32.xlu0 %v8890_v60, %s9368_s30  ;;  %v9015_v16 = vcombine.low %v7841_v47, %v7844_v6  ;;  %v8873_v5 = vrot.slane %v5655_v31, 9  ;;  %v5773_v0 = vrot.slane %v5656_v22, 5  ;;  %v6807_v9 = vsel %vm9659_vm9, %v8936_v19, %v6806_v59  ;;  %v9313_v22 = vld [vmem:[#allocation4 + $0x60] sm:$0xff]  }
 0x268   : > { %5582 = vrot.lane.b32.xlu1 %v8855_v1, %s9369_s8  ;;  %v6808_v58 = vrot.slane %v6806_v59, 4  ;;  %v5776_v10 = vrot.slane %v5657_v61, 5  ;;  %v7322_v11 = vshrl.u32 %v7189_v62, 16  ;;  %v7325_v55 = vshll.u32 %v7189_v62, 16 }
 0x269   : > { %v5774_v32 = vsel %vm9659_vm9, %v8873_v5, %v5773_v0  ;;  %v5775_v12 = vrot.slane %v5773_v0, 4  ;;  %v7331_v15 = vshll.u32 %v7190_v44, 16  ;;  %v7335_v18 = vshrl.u32 %v7190_v44, 16 }
 0x26a   : > { %v6810_v14 = vsel %vm9659_vm9, %v6808_v58, %v6809_v49  ;;  %v7324_v38 = vrot.slane %v7322_v11, 4  ;;  %v7341_v21 = vshll.u32 %v7191_v3, 16  ;;  %v7327_v34 = vrot.slane %v7325_v55, 5  ;;  %v5115_v49 = vld [vmem:[#allocation4 + $0x4c] sm:$0xf] }
 0x26b   : > { %7983 = vrot.lane.b32.xlu0 %v9015_v16, %s9373_s12  ;;  %v8952_v43 = vcombine.low %v6807_v9, %v6810_v14  ;;  %v5777_v27 = vsel %vm9659_vm9, %v5775_v12, %v5776_v10  ;;  %v7333_v28 = vrot.slane %v7331_v15, 5  ;;  %v7337_v25 = vrot.slane %v7335_v18, 4 }
 0x26c   : > { %6946 = vrot.lane.b32.xlu1 %v8953_v33, %s9372_s11  ;;  %v8889_v45 = vcombine.low %v5774_v32, %v5777_v27  ;;  %v7343_v63 = vrot.slane %v7341_v21, 5  ;;  %v6305_v46 = vshrl.u32 %v6151_v17, 16  ;;  %v7328_v13 = vor.u32 %v7327_v34, %v7324_v38 }
 0x26d   : > { %v6308_v35 = vshll.u32 %v6151_v17, 16  ;;  %v6314_v50 = vshll.u32 %v6152_v30, 16  ;;  %v6318_v51 = vshrl.u32 %v6152_v30, 16  ;;  %v7338_v40 = vor.u32 %v7337_v25, %v7333_v28 }
 0x26e   : > { %v6307_v41 = vrot.slane %v6305_v46, 4  ;;  %v6324_v24 = vshll.u32 %v6153_v56, 16  ;;  %v5289_v52 = vshrl.u32 %v5114_v7, 16  ;;  %v7329_v39 = vrot.slane %v7328_v13, 4  ;;  %v4903_v46 = vld [vmem:[#allocation4 + $0x78] sm:$0xf] }
 0x26f   : > { %6944 = vrot.lane.b32.xlu0 %v8952_v43, %s9372_s11  ;;  %v6310_v47 = vrot.slane %v6308_v35, 5  ;;  %v6316_v37 = vrot.slane %v6314_v50, 5  ;;  %v6320_v54 = vrot.slane %v6318_v51, 4  ;;  %v7339_v57 = vrot.slane %v7338_v40, 4 }
 0x270   : > { %v9179_v31 = vpop.f32.mrb[16].mxu0  ;;  %5906 = vrot.lane.b32.xlu1 %v8889_v45, %s9368_s30  ;;  %v6326_v60 = vrot.slane %v6324_v24, 5  ;;  %v5291_v61 = vrot.slane %v5289_v52, 4  ;;  %v7334_v62 = vsel %vm9666_vm10, %v7329_v39, %v7333_v28  ;;  %v5292_v5 = vshll.u32 %v5114_v7, 16  ;;  %v9314_v39 = vld [vmem:[#allocation4 + $0x54] sm:$0xff]  }
 0x271   : > { %v4284_v8 = vmul.f32 %v10895_v20, %v9179_v31  ;;  %v4196_v19 = vpop.f32.mrb[17].mxu0  ;;  %v6311_v2 = vor.u32 %v6310_v47, %v6307_v41  ;;  %v6321_v1 = vor.u32 %v6320_v54, %v6316_v37  ;;  %v7344_v59 = vsel %vm9666_vm10, %v7339_v57, %v7343_v63  ;;  %v5116_v63 = vld [vmem:[#allocation4 + $0x50] sm:$0x1]  ;;  %v4896_v41 = vld [vmem:[#allocation4 + $0x6c] sm:$0xf] }
 0x272   : > { %v4282_v33 = vmul.f32 %v10895_v20, %v4196_v19  ;;  %v9180_v6 = vpop.f32.mrb[18].mxu0  ;;  %v8984_v0 = vcombine.low %v7334_v62, %v7344_v59  ;;  %v5294_v12 = vrot.slane %v5292_v5, 5  ;;  %v5298_v14 = vshll.u32 %v5115_v49, 16  ;;  %v6148_v47 = vld [vmem:[#allocation4 + $0x3c] sm:$0xf] }
 0x273   : > { %v4323_v44 = vadd.f32 %v10907_v26, %v4284_v8  ;;  %v4285_v4 = vmul.f32 %v10895_v20, %v9180_v6  ;;  %v4199_v16 = vpop.f32.mrb[19].mxu0  ;;  %7125 = vrot.lane.b32.xlu0 %v9312_v53, %s9371_s10  ;;  %v6312_v3 = vrot.slane %v6311_v2, 4  ;;  %v6322_v9 = vrot.slane %v6321_v1, 4  ;;  %v4907_v31 = vld [vmem:[#allocation4 + $0x80] sm:$0x1]  ;;  %v9328_v1 = vld [vmem:[%s11980_s2] sm:$0xff]  }
 0x274   : > { %v4321_v58 = vadd.f32 %v10907_v26, %v4282_v33  ;;  %6086 = vrot.lane.b32.xlu1 %v9313_v22, %s9370_s9  ;;  %v4283_v32 = vmul.f32 %v10895_v20, %v4199_v16  ;;  %v5295_v20 = vor.u32 %v5294_v12, %v5291_v61  ;;  %v11009_v34 = vrot.slane %v5298_v14, 5  ;;  %v6149_v2 = vld [vmem:[#allocation4 + $0x40] sm:$0xf]  ;;  %9193 = vmatprep.subr.bf16.mxu1 %v9328_v1 }
 0x275   : > { %v4355_v10 = vmax.f32 %v4323_v44, 0.0  ;;  %v4324_v11 = vadd.f32 %v10907_v26, %v4285_v4  ;;  %v6317_v55 = vsel %vm9666_vm10, %v6312_v3, %v6316_v37  ;;  %v6327_v15 = vsel %vm9666_vm10, %v6322_v9, %v6326_v60  ;;  %v11006_v43 = vpop.permute.xlu0 %7113  ;;  %v4900_v44 = vld [vmem:[#allocation4 + $0x74] sm:$0x1]  ;;  %v6150_v9 = vld [vmem:[#allocation4 + $0x44] sm:$0x1]  ;;  %9194 = vmatpush3.bf16.msra.mxu1 %v9328_v1 }
 0x276   : > { %v4353_v17 = vmax.f32 %v4321_v58, 0.0  ;;  %v8921_v38 = vcombine.low %v6317_v55, %v6327_v15  ;;  %v4322_v30 = vadd.f32 %v10907_v26, %v4283_v32  ;;  %v5302_v28 = vshrl.u32 %v5115_v49, 16  ;;  %v9315_v26 = vld [vmem:[#allocation4 + $0x54] sm:$0xff]   ;;  %v11022_v16 = vpop.permute.xlu1 %6074  ;;  %v7186_v58 = vld [vmem:[#allocation4 + $0x3c] sm:$0xf] }
 0x277   : > { %v9103_v18 = vpack.c.bf16 %v4355_v10, %v4355_v10  ;;  %v4356_v21 = vmax.f32 %v4324_v11, 0.0  ;;  %7665 = vrot.lane.b32.xlu0 %v8984_v0, %s9375_s14  ;;  %v5296_v50 = vrot.slane %v5295_v20, 4  ;;  %v5308_v60 = vshll.u32 %v5116_v63, 16  ;;  %v7187_v55 = vld [vmem:[#allocation4 + $0x40] sm:$0xf] }
 0x278   : > { %v9101_v27 = vpack.c.bf16 %v4353_v17, %v4353_v17  ;;  %6626 = vrot.lane.b32.xlu1 %v8921_v38, %s9374_s13  ;;  %v4354_v25 = vmax.f32 %v4322_v30, 0.0  ;;  %v5304_v51 = vrot.slane %v5302_v28, 4  ;;  %v6281_v32 = vshrl.u32 %v6148_v47, 16 }
 0x279   : > { %v4673_v56 = vshrl.u32 %v9103_v18, 16  ;;  %v4676_v7 = vshll.u32 %v9103_v18, 16  ;;  %v9104_v45 = vpack.c.bf16 %v4356_v21, %v4356_v21  ;;  %v6073_v37 = vpop.permute.xlu0 %6072  ;;  %v5301_v22 = vsel %vm9666_vm10, %v5296_v50, %v11009_v34  ;;  %v7188_v18 = vld [vmem:[#allocation4 + $0x44] sm:$0x1] }
 0x27a   : > { %v4656_v13 = vshrl.u32 %v9101_v27, 16  ;;  %v4659_v35 = vshll.u32 %v9101_v27, 16  ;;  %v9102_v53 = vpack.c.bf16 %v4354_v25, %v4354_v25  ;;  %v5305_v57 = vor.u32 %v5304_v51, %v11009_v34  ;;  %6120 = vst.msk [vmem:[#allocation5] sm:$0xff] %vm2082_vm2, %v6073_v37 }
 0x27b   : > { %v4675_v40 = vrot.slane %v4673_v56, 7  ;;  %v4681_v24 = vshrl.u32 %v9104_v45, 16  ;;  %v4684_v52 = vshll.u32 %v9104_v45, 16  ;;  %6084 = vrot.lane.b32.xlu0 %v9315_v26, %s9370_s9  ;;  %v5310_v11 = vrot.slane %v5308_v60, 5 }
 0x27c   : > { %v4658_v54 = vrot.slane %v4656_v13, 7  ;;  %v4664_v62 = vshrl.u32 %v9102_v53, 16  ;;  %7123 = vrot.lane.b32.xlu1 %v9314_v39, %s9371_s10  ;;  %v4667_v59 = vshll.u32 %v9102_v53, 16  ;;  %v5306_v4 = vrot.slane %v5305_v57, 4 }
 0x27d   : > { %v4678_v8 = vor.u32 %v4676_v7, %v4675_v40  ;;  %v4679_v19 = vrot.slane %v4675_v40, 4  ;;  %v4683_v61 = vrot.slane %v4681_v24, 7  ;;  %v6284_v12 = vshll.u32 %v6148_v47, 16  ;;  %v7740_v24 = vld [vmem:[#allocation4 + $0x64] sm:$0xf] }
 0x27e   : > { %v4661_v33 = vor.u32 %v4659_v35, %v4658_v54  ;;  %v4662_v6 = vrot.slane %v4658_v54, 4  ;;  %v4666_v3 = vrot.slane %v4664_v62, 7  ;;  %v5311_v21 = vsel %vm9666_vm10, %v5306_v4, %v5310_v11  ;;  %v11035_v34 = vpop.permute.xlu1 %6938  ;;  %v7739_v35 = vld [vmem:[#allocation4 + $0x60] sm:$0xe]  ;;  %v7741_v54 = vld [vmem:[#allocation4 + $0x68] sm:$0x1] }
 0x27f   : > { %v4904_v49 = vsel %vm9680_vm12, %v4678_v8, %v4903_v46  ;;  %v4686_v5 = vor.u32 %v4684_v52, %v4683_v61  ;;  %v4688_v0 = vrot.slane %v4683_v61, 4  ;;  %v6283_v30 = vrot.slane %v6281_v32, 4  ;;  %v11042_v26 = vpop.permute.xlu0 %7977  ;;  %v5111_v52 = vld [vmem:[#allocation4 + $0x3c] sm:$0xf]  ;;  %v5113_v4 = vld [vmem:[#allocation4 + $0x44] sm:$0x1] }
 0x280   : > { %4905 = vst [vmem:[#allocation4 + $0x78] sm:$0xf] %v4904_v49  ;;  %v4897_v10 = vsel %vm9680_vm12, %v4661_v33, %v4896_v41  ;;  %v4669_v14 = vor.u32 %v4667_v59, %v4666_v3  ;;  %v4671_v38 = vrot.slane %v4666_v3, 4  ;;  %v6286_v27 = vrot.slane %v6284_v12, 5  ;;  %v6701_v11 = vld [vmem:[#allocation4 + $0x60] sm:$0xe] }
 0x281   : > { %4898 = vst [vmem:[#allocation4 + $0x6c] sm:$0xf] %v4897_v10  ;;  %v4687_v15 = vsel %vm9674_vm11, %v4679_v19, %v4686_v5  ;;  %v4908_v17 = vsel %vm9688_vm13, %v4688_v0, %v4907_v31  ;;  %v6290_v20 = vshll.u32 %v6149_v2, 16  ;;  %v8858_v7 = vcombine.low %v5301_v22, %v5311_v21  ;;  %v5112_v31 = vld [vmem:[#allocation4 + $0x40] sm:$0xf]  ;;  %v9330_v12 = vld [vmem:[%s11980_s2 + $0x8] sm:$0xff]  }
 0x282   : > { %4906 = vst.msk [vmem:[#allocation4 + $0x7c] sm:$0xf] %vm280_vm0, %v4687_v15  ;;  %4909 = vst [vmem:[#allocation4 + $0x80] sm:$0x1] %v4908_v17  ;;  %v4670_v28 = vsel %vm9674_vm11, %v4662_v6, %v4669_v14  ;;  %v4901_v56 = vsel %vm9688_vm13, %v4671_v38, %v4900_v44  ;;  %v6294_v45 = vshrl.u32 %v6149_v2, 16  ;;  %v6287_v25 = vor.u32 %v6286_v27, %v6283_v30 }
 0x283   : > { %4899 = vst.msk [vmem:[#allocation4 + $0x70] sm:$0xf] %vm280_vm0, %v4670_v28  ;;  %4902 = vst [vmem:[#allocation4 + $0x74] sm:$0x1] %v4901_v56  ;;  %v6292_v63 = vrot.slane %v6290_v20, 5  ;;  %v6300_v46 = vshll.u32 %v6150_v9, 16  ;;  %5588 = vrot.lane.b32.xlu1 %v8858_v7, %s9369_s8  ;;  %9195 = vmatprep.subr.bf16.mxu1 %v9330_v12 }
 0x284   : > { %v7298_v13 = vshrl.u32 %v7186_v58, 16  ;;  %v6296_v50 = vrot.slane %v6294_v45, 4  ;;  %v7301_v51 = vshll.u32 %v7186_v58, 16  ;;  %v7307_v40 = vshll.u32 %v7187_v55, 16  ;;  %v11047_v1 = vpop.permute.xlu1 %5898  ;;  %v5664_v9 = vld [vmem:[#allocation4 + $0x60] sm:$0xe]  ;;  %9196 = vmatpush3.bf16.msra.mxu1 %v9330_v12 }
 0x285   : > { %v7311_v41 = vshrl.u32 %v7187_v55, 16  ;;  %v6288_v53 = vrot.slane %v6287_v25, 4  ;;  %v6302_v39 = vrot.slane %v6300_v46, 5  ;;  %v7317_v37 = vshll.u32 %v7188_v18, 16  ;;  %v5665_v58 = vld [vmem:[#allocation4 + $0x64] sm:$0xf]  ;;  %v11051_v32 = vpop.permute.xlu0 %5900 }
 0x286   : > { %v7300_v47 = vrot.slane %v7298_v13, 4  ;;  %v6297_v22 = vor.u32 %v6296_v50, %v6292_v63  ;;  %v7303_v57 = vrot.slane %v7301_v51, 5  ;;  %v7309_v60 = vrot.slane %v7307_v40, 5  ;;  %v5666_v10 = vld [vmem:[#allocation4 + $0x68] sm:$0x1] }
 0x287   : > { %v7313_v8 = vrot.slane %v7311_v41, 4  ;;  %v6293_v19 = vsel %vm9666_vm10, %v6288_v53, %v6292_v63  ;;  %v7319_v61 = vrot.slane %v7317_v37, 5  ;;  %v9002_v62 = vrot.slane %v7739_v35, 9  ;;  %v6702_v38 = vld [vmem:[#allocation4 + $0x64] sm:$0xf] }
 0x288   : > { %v7861_v2 = vrot.slane %v7740_v24, 5  ;;  %v6298_v33 = vrot.slane %v6297_v22, 4  ;;  %v7304_v6 = vor.u32 %v7303_v57, %v7300_v47  ;;  %v7864_v44 = vrot.slane %v7741_v54, 5  ;;  %v11060_v20 = vpop.permute.xlu1 %6078  ;;  %v6703_v25 = vld [vmem:[#allocation4 + $0x68] sm:$0x1] }
 0x289   : > { %v7314_v59 = vor.u32 %v7313_v8, %v7309_v60  ;;  %v5265_v0 = vshrl.u32 %v5111_v52, 16  ;;  %v5268_v3 = vshll.u32 %v5111_v52, 16  ;;  %v5274_v14 = vshll.u32 %v5112_v31, 16  ;;  %v7736_v50 = vld [vmem:[#allocation4 + $0x54] sm:$0xe]  ;;  %v11068_v57 = vpop.permute.xlu0 %6936 }
 0x28a   : > { %v7862_v49 = vsel %vm9659_vm9, %v9002_v62, %v7861_v2  ;;  %v7863_v5 = vrot.slane %v7861_v2, 4  ;;  %v6303_v55 = vsel %vm9666_vm10, %v6298_v33, %v6302_v39  ;;  %v7305_v15 = vrot.slane %v7304_v6, 4  ;;  %v7737_v51 = vld [vmem:[#allocation4 + $0x58] sm:$0xf]  ;;  %v7738_v53 = vld [vmem:[#allocation4 + $0x5c] sm:$0x1] }
 0x28b   : > { %v7315_v17 = vrot.slane %v7314_v59, 4  ;;  %v8920_v18 = vcombine.low %v6293_v19, %v6303_v55  ;;  %v5267_v30 = vrot.slane %v5265_v0, 4  ;;  %v5270_v27 = vrot.slane %v5268_v3, 5  ;;  %v6698_v22 = vld [vmem:[#allocation4 + $0x54] sm:$0xe]  ;;  %v9345_v62 = vld [vmem:[#allocation4 + $0x78] sm:$0xff]  }
 0x28c   : > { %v7865_v21 = vsel %vm9659_vm9, %v7863_v5, %v7864_v44  ;;  %v7310_v28 = vsel %vm9666_vm10, %v7305_v15, %v7309_v60  ;;  %v5276_v45 = vrot.slane %v5274_v14, 5  ;;  %v5278_v13 = vshrl.u32 %v5112_v31, 16  ;;  %v6700_v44 = vld [vmem:[#allocation4 + $0x5c] sm:$0x1]  ;;  %5090 = vst.msk [vmem:[#allocation5 + $0x50] sm:$0xff] %vm11987_vm14, %v9345_v62 }
 0x28d   : > { %v7320_v56 = vsel %vm9666_vm10, %v7315_v17, %v7319_v61  ;;  %v9018_v7 = vcombine.low %v7862_v49, %v7865_v21  ;;  %6624 = vrot.lane.b32.xlu0 %v8920_v18, %s9374_s13  ;;  %v5271_v46 = vor.u32 %v5270_v27, %v5267_v30  ;;  %v5284_v35 = vshll.u32 %v5113_v4, 16  ;;  %v6699_v61 = vld [vmem:[#allocation4 + $0x58] sm:$0xf]  ;;  %v9346_v49 = vld [vmem:[#allocation4 + $0x6c] sm:$0xff]   ;;  %v5663_v17 = vld [vmem:[#allocation4 + $0x5c] sm:$0x1]  ;;  %v11086_v14 = vpop.permute.xlu0 %7117 }
 0x28e   : > { %v8983_v63 = vcombine.low %v7310_v28, %v7320_v56  ;;  %v8876_v40 = vrot.slane %v5664_v9, 9  ;;  %v5794_v41 = vrot.slane %v5665_v58, 5  ;;  %v5797_v24 = vrot.slane %v5666_v10, 5  ;;  %v5661_v58 = vld [vmem:[#allocation4 + $0x54] sm:$0xe]  ;;  %5089 = vst.msk [vmem:[#allocation5 + $0x48] sm:$0xff] %vm11987_vm14, %v9346_v49 }
 0x28f   : > { %v8939_v52 = vrot.slane %v6701_v11, 9  ;;  %v5272_v39 = vrot.slane %v5271_v46, 4  ;;  %v5280_v47 = vrot.slane %v5278_v13, 4  ;;  %v5286_v37 = vrot.slane %v5284_v35, 5  ;;  %v5662_v15 = vld [vmem:[#allocation4 + $0x58] sm:$0xf] }
 0x290   : > { %7663 = vrot.lane.b32.xlu1 %v8983_v63, %s9375_s14  ;;  %v6827_v54 = vrot.slane %v6702_v38, 5  ;;  %v5795_v31 = vsel %vm9659_vm9, %v8876_v40, %v5794_v41  ;;  %v5796_v60 = vrot.slane %v5794_v41, 4  ;;  %v6830_v8 = vrot.slane %v6703_v25, 5  ;;  %v7195_v27 = vld [vmem:[#allocation4 + $0x60] sm:$0xf] }
 0x291   : > { %v9001_v19 = vrot.slane %v7736_v50, 9  ;;  %7989 = vrot.lane.b32.xlu0 %v9018_v7, %s9373_s12  ;;  %v5277_v2 = vsel %vm9666_vm10, %v5272_v39, %v5276_v45  ;;  %v5281_v33 = vor.u32 %v5280_v47, %v5276_v45  ;;  %v11079_v4 = vpop.permute.xlu1 %6618  ;;  %v7854_v0 = vrot.slane %v7737_v51, 5  ;;  %v7196_v25 = vld [vmem:[#allocation4 + $0x64] sm:$0xf]  ;;  %v7197_v50 = vld [vmem:[#allocation4 + $0x68] sm:$0x1]  ;;  %v11107_v62 = vpop.permute.xlu0 %7657 }
 0x292   : > { %v11077_v6 = vsel %vm9659_vm9, %v8939_v52, %v6827_v54  ;;  %v6829_v59 = vrot.slane %v6827_v54, 4  ;;  %v5798_v5 = vsel %vm9659_vm9, %v5796_v60, %v5797_v24  ;;  %v7857_v3 = vrot.slane %v7738_v53, 5  ;;  %v6157_v52 = vld [vmem:[#allocation4 + $0x60] sm:$0xf] }
 0x293   : > { %v8938_v9 = vrot.slane %v6698_v22, 9  ;;  %v5282_v10 = vrot.slane %v5281_v33, 4  ;;  %v8892_v11 = vcombine.low %v5795_v31, %v5798_v5  ;;  %v6820_v55 = vrot.slane %v6699_v61, 5  ;;  %v6158_v22 = vld [vmem:[#allocation4 + $0x64] sm:$0xf] }
 0x294   : > { %v6831_v12 = vsel %vm9659_vm9, %v6829_v59, %v6830_v8  ;;  %v7855_v18 = vsel %vm9659_vm9, %v9001_v19, %v7854_v0  ;;  %v7856_v21 = vrot.slane %v7854_v0, 4  ;;  %v6823_v30 = vrot.slane %v6700_v44, 5  ;;  %v6159_v61 = vld [vmem:[#allocation4 + $0x68] sm:$0x1]  ;;  %v11111_v44 = vld [vmem:[#allocation4 + $0x60] sm:$0xf] }
 0x295   : > { %v8955_v38 = vcombine.low %v11077_v6, %v6831_v12  ;;  %v5287_v28 = vsel %vm9666_vm10, %v5282_v10, %v5286_v37  ;;  %5912 = vrot.lane.b32.xlu0 %v8892_v11, %s9368_s30  ;;  %v6821_v56 = vsel %vm9659_vm9, %v8938_v9, %v6820_v55  ;;  %v6822_v7 = vrot.slane %v6820_v55, 4  ;;  %v11101_v53 = vpop.permute.xlu1 %7115  ;;  %v9317_v12 = vld [vmem:[#allocation4 + $0x78] sm:$0xff]  }
 0x296   : > { %v8875_v45 = vrot.slane %v5661_v58, 9  ;;  %v8857_v63 = vcombine.low %v5277_v2, %v5287_v28  ;;  %v7858_v46 = vsel %vm9659_vm9, %v7856_v21, %v7857_v3  ;;  %v5787_v13 = vrot.slane %v5662_v15, 5 }
 0x297   : > { %v5790_v35 = vrot.slane %v5663_v17, 5  ;;  %v9017_v51 = vcombine.low %v7855_v18, %v7858_v46  ;;  %v6824_v40 = vsel %vm9659_vm9, %v6822_v7, %v6823_v30  ;;  %v7370_v41 = vshrl.u32 %v7195_v27, 16 }
 0x298   : > { %v7373_v24 = vshll.u32 %v7195_v27, 16  ;;  %5586 = vrot.lane.b32.xlu1 %v8857_v63, %s9369_s8  ;;  %v8954_v39 = vcombine.low %v6821_v56, %v6824_v40  ;;  %v5788_v47 = vsel %vm9659_vm9, %v8875_v45, %v5787_v13  ;;  %v5789_v37 = vrot.slane %v5787_v13, 4 }
 0x299   : > { %v7379_v54 = vshll.u32 %v7196_v25, 16  ;;  %7987 = vrot.lane.b32.xlu0 %v9017_v51, %s9373_s12  ;;  %v7372_v31 = vrot.slane %v7370_v41, 4  ;;  %v7383_v8 = vshrl.u32 %v7196_v25, 16  ;;  %v7389_v19 = vshll.u32 %v7197_v50, 16  ;;  %v6077_v50 = vpop.permute.xlu0 %6076  ;;  %v9318_v51 = vld [vmem:[#allocation4 + $0x78] sm:$0xff]  }
 0x29a   : > { %v7375_v60 = vrot.slane %v7373_v24, 5  ;;  %v5791_v2 = vsel %vm9659_vm9, %v5789_v37, %v5790_v35  ;;  %v6353_v6 = vshrl.u32 %v6157_v52, 16  ;;  %v6356_v59 = vshll.u32 %v6157_v52, 16  ;;  %v11132_v24 = vld [vmem:[%s11982_s4] ss:$0 sm:$0xff] }
 0x29b   : > { %v7381_v33 = vrot.slane %v7379_v54, 5  ;;  %v8891_v49 = vcombine.low %v5788_v47, %v5791_v2  ;;  %v7385_v0 = vrot.slane %v7383_v8, 4  ;;  %v7391_v3 = vrot.slane %v7389_v19, 5 }
 0x29c   : > { %v7376_v5 = vor.u32 %v7375_v60, %v7372_v31  ;;  %6950 = vrot.lane.b32.xlu1 %v8955_v38, %s9372_s11  ;;  %v6355_v9 = vrot.slane %v6353_v6, 4  ;;  %v6358_v58 = vrot.slane %v6356_v59, 5  ;;  %v6362_v10 = vshll.u32 %v6158_v22, 16  ;;  %v11119_v38 = vld [vmem:[%s11981_s3] ss:$0 sm:$0xff] }
 0x29d   : > { %v6366_v11 = vshrl.u32 %v6158_v22, 16  ;;  %6948 = vrot.lane.b32.xlu0 %v8954_v39, %s9372_s11  ;;  %v7386_v15 = vor.u32 %v7385_v0, %v7381_v33  ;;  %v6372_v17 = vshll.u32 %v6159_v61, 16  ;;  %v5337_v21 = vshrl.u32 %v11111_v44, 16  ;;  %v5581_v30 = vpop.permute.xlu1 %5580  ;;  %v5121_v22 = vld [vmem:[#allocation4 + $0x64] sm:$0xf] }
 0x29e   : > { %v7377_v55 = vrot.slane %v7376_v5, 4  ;;  %v9183_v18 = vpop.f32.mrb[20].mxu0  ;;  %v6359_v27 = vor.u32 %v6358_v58, %v6355_v9  ;;  %v6364_v28 = vrot.slane %v6362_v10, 5  ;;  %5626 = vst.msk [vmem:[#allocation5 + $0x10] sm:$0xff] %vm1581_vm15, %v5581_v30  ;;  %v5340_v59 = vshll.u32 %v11111_v44, 16 }
 0x29f   : > { %v6368_v56 = vrot.slane %v6366_v11, 4  ;;  %v4288_v7 = vmul.f32 %v11119_v38, %v9183_v18  ;;  %v4212_v45 = vpop.f32.mrb[21].mxu0  ;;  %v7387_v63 = vrot.slane %v7386_v15, 4  ;;  %v6374_v46 = vrot.slane %v6372_v17, 5  ;;  %5946 = vst.msk [vmem:[#allocation5 + $0x10] sm:$0xff] %vm1905_vm1, %v11051_v32 }
 0x2a0   : > { %v7382_v25 = vsel %vm9666_vm10, %v7377_v55, %v7381_v33  ;;  %v4286_v13 = vmul.f32 %v11119_v38, %v4212_v45  ;;  %v9184_v35 = vpop.f32.mrb[22].mxu0  ;;  %5910 = vrot.lane.b32.xlu1 %v8891_v49, %s9368_s30  ;;  %v6360_v40 = vrot.slane %v6359_v27, 4  ;;  %6122 = vst.msk [vmem:[#allocation5 + $0x10] sm:$0xff] %vm2082_vm2, %v6077_v50  ;;  %v5339_v31 = vrot.slane %v5337_v21, 4  ;;  %v5122_v0 = vld [vmem:[#allocation4 + $0x68] sm:$0x1] }
 0x2a1   : > { %v6369_v41 = vor.u32 %v6368_v56, %v6364_v28  ;;  %v4327_v52 = vadd.f32 %v11132_v24, %v4288_v7  ;;  %v4289_v39 = vmul.f32 %v11119_v38, %v9184_v35  ;;  %v4215_v47 = vpop.f32.mrb[23].mxu0  ;;  %7129 = vrot.lane.b32.xlu0 %v9317_v12, %s9371_s10  ;;  %v7392_v32 = vsel %vm9666_vm10, %v7387_v63, %v7391_v3  ;;  %v9320_v55 = vld [vmem:[#allocation4 + $0x6c] sm:$0xff]   ;;  %v9333_v44 = vld [vmem:[%s11980_s2 + $0x10] ss:$0 sps:$4 sm:$0x33]  }
 0x2a2   : > { %v4325_v37 = vadd.f32 %v11132_v24, %v4286_v13  ;;  %v4287_v54 = vmul.f32 %v11119_v38, %v4215_v47  ;;  %v8986_v60 = vcombine.low %v7382_v25, %v7392_v32  ;;  %v6365_v8 = vsel %vm9666_vm10, %v6360_v40, %v6364_v28  ;;  %v4917_v35 = vld [vmem:[#allocation4 + $0x90] sm:$0xf]  ;;  %v4910_v47 = vld [vmem:[#allocation4 + $0x84] sm:$0xf] }
 0x2a3   : > { %v6370_v19 = vrot.slane %v6369_v41, 4  ;;  %v4359_v61 = vmax.f32 %v4327_v52, 0.0  ;;  %v4328_v33 = vadd.f32 %v11132_v24, %v4289_v39  ;;  %v5346_v3 = vshll.u32 %v5121_v22, 16 }
 0x2a4   : > { %v4357_v2 = vmax.f32 %v4325_v37, 0.0  ;;  %v4326_v6 = vadd.f32 %v11132_v24, %v4287_v54  ;;  %6090 = vrot.lane.b32.xlu1 %v9318_v51, %s9370_s9  ;;  %v5350_v9 = vshrl.u32 %v5121_v22, 16  ;;  %v5342_v18 = vrot.slane %v5340_v59, 5  ;;  %v9319_v37 = vld [vmem:[#allocation4 + $0x6c] sm:$0xff]  }
 0x2a5   : > { %v6375_v49 = vsel %vm9666_vm10, %v6370_v19, %v6374_v46  ;;  %v9107_v5 = vpack.c.bf16 %v4359_v61, %v4359_v61  ;;  %7669 = vrot.lane.b32.xlu0 %v8986_v60, %s9375_s14  ;;  %v4360_v11 = vmax.f32 %v4328_v33, 0.0  ;;  %v11154_v21 = vrot.slane %v5346_v3, 5  ;;  %v6155_v33 = vld [vmem:[#allocation4 + $0x58] sm:$0xf] }
 0x2a6   : > { %v8923_v58 = vcombine.low %v6365_v8, %v6375_v49  ;;  %v9105_v10 = vpack.c.bf16 %v4357_v2, %v4357_v2  ;;  %v4358_v12 = vmax.f32 %v4326_v6, 0.0  ;;  %v6617_v30 = vpop.permute.xlu0 %6616  ;;  %vm11999_vm14 = vcmask 1041408   ;;  %v6154_v8 = vld [vmem:[#allocation4 + $0x54] sm:$0xf] }
 0x2a7   : > { %v4707_v15 = vshrl.u32 %v9107_v5, 16  ;;  %v4710_v17 = vshll.u32 %v9107_v5, 16  ;;  %v9108_v56 = vpack.c.bf16 %v4360_v11, %v4360_v11  ;;  %6664 = vst.msk [vmem:[#allocation5] sm:$0xff] %vm2627_vm3, %v6617_v30  ;;  %9232 = vmatprep.subr.msk.bf16.mxu1 %vm11999_vm14, %v9333_v44  ;;  %v5343_v25 = vor.u32 %v5342_v18, %v5339_v31  ;;  %v4914_v5 = vld [vmem:[#allocation4 + $0x8c] sm:$0x1] }
 0x2a8   : > { %v4690_v27 = vshrl.u32 %v9105_v10, 16  ;;  %v4693_v28 = vshll.u32 %v9105_v10, 16  ;;  %v9106_v7 = vpack.c.bf16 %v4358_v12, %v4358_v12  ;;  %6630 = vrot.lane.b32.xlu1 %v8923_v58, %s9374_s13  ;;  %v5352_v63 = vrot.slane %v5350_v9, 4  ;;  %6984 = vst.msk [vmem:[#allocation5] sm:$0xff] %vm2948_vm4, %v11068_v57  ;;  %v5579_v13 = vpop.permute.xlu1 %5578  ;;  %v6156_v9 = vld [vmem:[#allocation4 + $0x5c] sm:$0x1] }
 0x2a9   : > { %v4709_v45 = vrot.slane %v4707_v15, 7  ;;  %v5356_v46 = vshll.u32 %v5122_v0, 16  ;;  %v4715_v51 = vshrl.u32 %v9108_v56, 16  ;;  %v4718_v40 = vshll.u32 %v9108_v56, 16  ;;  %6088 = vrot.lane.b32.xlu0 %v9320_v55, %s9370_s9  ;;  %7161 = vst.msk [vmem:[#allocation5] sm:$0xff] %vm3126_vm5, %v11006_v43 }
 0x2aa   : > { %v4692_v50 = vrot.slane %v4690_v27, 7  ;;  %v4698_v41 = vshrl.u32 %v9106_v7, 16  ;;  %5625 = vst.msk [vmem:[#allocation5 + $0x8] sm:$0xff] %vm1581_vm15, %v5579_v13  ;;  %v4701_v32 = vshll.u32 %v9106_v7, 16  ;;  %v5344_v54 = vrot.slane %v5343_v25, 4  ;;  %v11169_v57 = vpop.permute.xlu0 %7981 }
 0x2ab   : > { %v4712_v52 = vor.u32 %v4710_v17, %v4709_v45  ;;  %v4713_v39 = vrot.slane %v4709_v45, 4  ;;  %7705 = vst.msk [vmem:[#allocation5] sm:$0xff] %vm3671_vm6, %v11107_v62  ;;  %v4717_v60 = vrot.slane %v4715_v51, 7  ;;  %v4921_v62 = vld [vmem:[#allocation4 + $0x98] sm:$0x1]  ;;  %v5353_v61 = vor.u32 %v5352_v63, %v11154_v21 }
 0x2ac   : > { %5945 = vst.msk [vmem:[#allocation5 + $0x8] sm:$0xff] %vm1905_vm1, %v11047_v1  ;;  %v4695_v22 = vor.u32 %v4693_v28, %v4692_v50  ;;  %v4696_v31 = vrot.slane %v4692_v50, 4  ;;  %v4700_v43 = vrot.slane %v4698_v41, 7  ;;  %7127 = vrot.lane.b32.xlu1 %v9319_v37, %s9371_s10  ;;  %v5349_v1 = vsel %vm9666_vm10, %v5344_v54, %v11154_v21  ;;  %v7192_v44 = vld [vmem:[#allocation4 + $0x54] sm:$0xf] }
 0x2ad   : > { %8025 = vst.msk [vmem:[#allocation5] sm:$0xff] %vm3992_vm7, %v11042_v26  ;;  %v4918_v19 = vsel %vm9680_vm12, %v4712_v52, %v4917_v35  ;;  %v5358_v2 = vrot.slane %v5356_v46, 5  ;;  %v11184_v26 = vpop.permute.xlu1 %6942  ;;  %v4720_v6 = vor.u32 %v4718_v40, %v4717_v60  ;;  %v4722_v59 = vrot.slane %v4717_v60, 4  ;;  %v7193_v15 = vld [vmem:[#allocation4 + $0x58] sm:$0xf] }
 0x2ae   : > { %6121 = vst.msk [vmem:[#allocation5 + $0x8] sm:$0xff] %vm2082_vm2, %v11022_v16  ;;  %4919 = vst [vmem:[#allocation4 + $0x90] sm:$0xf] %v4918_v19  ;;  %v4911_v16 = vsel %vm9680_vm12, %v4695_v22, %v4910_v47  ;;  %v4703_v49 = vor.u32 %v4701_v32, %v4700_v43  ;;  %v4705_v0 = vrot.slane %v4700_v43, 4  ;;  %v5354_v3 = vrot.slane %v5353_v61, 4 }
 0x2af   : > { %6665 = vst.msk [vmem:[#allocation5 + $0x8] sm:$0xff] %vm2627_vm3, %v11079_v4  ;;  %4912 = vst [vmem:[#allocation4 + $0x84] sm:$0xf] %v4911_v16  ;;  %v6329_v58 = vshrl.u32 %v6154_v8, 16  ;;  %v6332_v10 = vshll.u32 %v6154_v8, 16  ;;  %v11192_v4 = vpop.permute.xlu0 %5904  ;;  %v4721_v11 = vsel %vm9674_vm11, %v4713_v39, %v4720_v6  ;;  %v4922_v12 = vsel %vm9688_vm13, %v4722_v59, %v4921_v62 }
 0x2b0   : > { %6985 = vst.msk [vmem:[#allocation5 + $0x8] sm:$0xff] %vm2948_vm4, %v11035_v34  ;;  %v4704_v34 = vsel %vm9674_vm11, %v4696_v31, %v4703_v49  ;;  %v6338_v55 = vshll.u32 %v6155_v33, 16  ;;  %4923 = vst [vmem:[#allocation4 + $0x98] sm:$0x1] %v4922_v12  ;;  %v5359_v17 = vsel %vm9666_vm10, %v5354_v3, %v5358_v2  ;;  %v7194_v30 = vld [vmem:[#allocation4 + $0x5c] sm:$0x1] }
 0x2b1   : > { %7162 = vst.msk [vmem:[#allocation5 + $0x8] sm:$0xff] %vm3126_vm5, %v11101_v53  ;;  %v4915_v53 = vsel %vm9688_vm13, %v4705_v0, %v4914_v5  ;;  %v6331_v18 = vrot.slane %v6329_v58, 4  ;;  %v6334_v21 = vrot.slane %v6332_v10, 5  ;;  %v8860_v27 = vcombine.low %v5349_v1, %v5359_v17  ;;  %v7745_v45 = vld [vmem:[#allocation4 + $0x78] sm:$0xe]  ;;  %v11208_v40 = vpop.permute.xlu1 %5902 }
 0x2b2   : > { %4920 = vst.msk [vmem:[#allocation4 + $0x94] sm:$0xf] %vm280_vm0, %v4721_v11  ;;  %4913 = vst.msk [vmem:[#allocation4 + $0x88] sm:$0xf] %vm280_vm0, %v4704_v34  ;;  %v6340_v28 = vrot.slane %v6338_v55, 5  ;;  %v6342_v56 = vshrl.u32 %v6155_v33, 16 }
 0x2b3   : > { %4916 = vst [vmem:[#allocation4 + $0x8c] sm:$0x1] %v4915_v53  ;;  %v6348_v7 = vshll.u32 %v6156_v9, 16  ;;  %v6335_v25 = vor.u32 %v6334_v21, %v6331_v18  ;;  %v7346_v63 = vshrl.u32 %v7192_v44, 16  ;;  %v7349_v46 = vshll.u32 %v7192_v44, 16  ;;  %v11206_v51 = vpop.permute.xlu0 %7979  ;;  %5592 = vrot.lane.b32.xlu1 %v8860_v27, %s9369_s8 }
 0x2b4   : > { %v7355_v13 = vshll.u32 %v7193_v15, 16  ;;  %v7746_v35 = vld [vmem:[#allocation4 + $0x7c] sm:$0xf]  ;;  %v5117_v50 = vld [vmem:[#allocation4 + $0x54] sm:$0xf]  ;;  %v6344_v52 = vrot.slane %v6342_v56, 4 }
 0x2b5   : > { %v8041_v41 = vld [vmem:[#allocation5] sm:$0xff]  ;;  %v6350_v39 = vrot.slane %v6348_v7, 5  ;;  %v7359_v47 = vshrl.u32 %v7193_v15, 16  ;;  %v7365_v32 = vshll.u32 %v7194_v30, 16  ;;  %v7747_v37 = vld [vmem:[#allocation4 + $0x80] sm:$0x1]  ;;  %v11216_v59 = vpop.permute.xlu1 %6082 }
 0x2b6   : > { %v5118_v54 = vld [vmem:[#allocation4 + $0x58] sm:$0xf]  ;;  %9199 = vmatprep.mubr.msk.bf16.mxu1 %vm11988_vm8, %v8041_v41  ;;  %v6336_v22 = vrot.slane %v6335_v25, 4  ;;  %v7348_v31 = vrot.slane %v7346_v63, 4  ;;  %v7351_v60 = vrot.slane %v7349_v46, 5  ;;  %v7357_v43 = vrot.slane %v7355_v13, 5 }
 0x2b7   : > { %v6345_v8 = vor.u32 %v6344_v52, %v6340_v28  ;;  %v7361_v19 = vrot.slane %v7359_v47, 4  ;;  %v7367_v62 = vrot.slane %v7365_v32, 5  ;;  %v9004_v1 = vrot.slane %v7745_v45, 9  ;;  %v11214_v6 = vpop.permute.xlu0 %6940  ;;  %v5119_v0 = vld [vmem:[#allocation4 + $0x5c] sm:$0x1] }
 0x2b8   : > { %v6341_v61 = vsel %vm9666_vm10, %v6336_v22, %v6340_v28  ;;  %v7352_v2 = vor.u32 %v7351_v60, %v7348_v31  ;;  %v7875_v33 = vrot.slane %v7746_v35, 5  ;;  %v7878_v16 = vrot.slane %v7747_v37, 5  ;;  %v5670_v58 = vld [vmem:[#allocation4 + $0x78] sm:$0xe]  ;;  %v5671_v10 = vld [vmem:[#allocation4 + $0x7c] sm:$0xf] }
 0x2b9   : > { %v6346_v49 = vrot.slane %v6345_v8, 4  ;;  %v7362_v5 = vor.u32 %v7361_v19, %v7357_v43  ;;  %v5313_v3 = vshrl.u32 %v5117_v50, 16  ;;  %v5316_v9 = vshll.u32 %v5117_v50, 16  ;;  %v5672_v44 = vld [vmem:[#allocation4 + $0x80] sm:$0x1]  ;;  %v9347_v41 = vld [vmem:[#allocation4 + $0x90] sm:$0xff]  }
 0x2ba   : > { %v7353_v11 = vrot.slane %v7352_v2, 4  ;;  %v7876_v12 = vsel %vm9659_vm9, %v9004_v1, %v7875_v33  ;;  %v7877_v34 = vrot.slane %v7875_v33, 4  ;;  %v5322_v55 = vshll.u32 %v5118_v54, 16  ;;  %v6707_v15 = vld [vmem:[#allocation4 + $0x78] sm:$0xe]  ;;  %v9348_v31 = vld [vmem:[#allocation4 + $0x84] sm:$0xff]  }
 0x2bb   : > { %v6351_v53 = vsel %vm9666_vm10, %v6346_v49, %v6350_v39  ;;  %v7363_v17 = vrot.slane %v7362_v5, 4  ;;  %v5315_v18 = vrot.slane %v5313_v3, 4  ;;  %v5318_v21 = vrot.slane %v5316_v9, 5  ;;  %v6708_v7 = vld [vmem:[#allocation4 + $0x7c] sm:$0xf]  ;;  %v11228_v50 = vpop.permute.xlu0 %7121 }
 0x2bc   : > { %v8922_v30 = vcombine.low %v6341_v61, %v6351_v53  ;;  %v7358_v27 = vsel %vm9666_vm10, %v7353_v11, %v7357_v43  ;;  %v7879_v28 = vsel %vm9659_vm9, %v7877_v34, %v7878_v16  ;;  %v5324_v56 = vrot.slane %v5322_v55, 5  ;;  %v6709_v13 = vld [vmem:[#allocation4 + $0x80] sm:$0x1]  ;;  %v7742_v35 = vld [vmem:[#allocation4 + $0x6c] sm:$0xe]  ;;  %v11231_v22 = vpop.permute.xlu1 %6622 }
 0x2bd   : > { %v7368_v45 = vsel %vm9666_vm10, %v7363_v17, %v7367_v62  ;;  %v9020_v25 = vcombine.low %v7876_v12, %v7879_v28  ;;  %v5319_v63 = vor.u32 %v5318_v21, %v5315_v18  ;;  %v5326_v46 = vshrl.u32 %v5118_v54, 16  ;;  %v7743_v37 = vld [vmem:[#allocation4 + $0x70] sm:$0xf]  ;;  %v7744_v54 = vld [vmem:[#allocation4 + $0x74] sm:$0x1] }
 0x2be   : > { %6628 = vrot.lane.b32.xlu0 %v8922_v30, %s9374_s13  ;;  %v8985_v52 = vcombine.low %v7358_v27, %v7368_v45  ;;  %v5332_v39 = vshll.u32 %v5119_v0, 16  ;;  %v8878_v47 = vrot.slane %v5670_v58, 9  ;;  %v5808_v32 = vrot.slane %v5671_v10, 5  ;;  %v6704_v33 = vld [vmem:[#allocation4 + $0x6c] sm:$0xe] }
 0x2bf   : > { %v5320_v60 = vrot.slane %v5319_v63, 4  ;;  %v5328_v43 = vrot.slane %v5326_v46, 4  ;;  %v5811_v8 = vrot.slane %v5672_v44, 5  ;;  %v8941_v19 = vrot.slane %v6707_v15, 9  ;;  %v6705_v3 = vld [vmem:[#allocation4 + $0x70] sm:$0xf]  ;;  %v11247_v21 = vpop.permute.xlu0 %7661 }
 0x2c0   : > { %vm12000_vm14 = vcmask 31744   ;;  %7667 = vrot.lane.b32.xlu1 %v8985_v52, %s9375_s14  ;;  %v5334_v62 = vrot.slane %v5332_v39, 5  ;;  %v5809_v1 = vsel %vm9659_vm9, %v8878_v47, %v5808_v32  ;;  %v5810_v61 = vrot.slane %v5808_v32, 4  ;;  %v6706_v12 = vld [vmem:[#allocation4 + $0x74] sm:$0x1]  ;;  %v11245_v55 = vpop.permute.xlu1 %7119 }
 0x2c1   : > { %5092 = vst.msk [vmem:[#allocation5 + $0x60] sm:$0xff] %vm12000_vm14, %v9347_v41  ;;  %v6841_v2 = vrot.slane %v6708_v7, 5  ;;  %vm12001_vm8 = vmmov %vm12000_vm14  ;;  %v5325_v16 = vsel %vm9666_vm10, %v5320_v60, %v5324_v56  ;;  %v5329_v49 = vor.u32 %v5328_v43, %v5324_v56  ;;  %v6844_v5 = vrot.slane %v6709_v13, 5  ;;  %v5667_v34 = vld [vmem:[#allocation4 + $0x6c] sm:$0xe] }
 0x2c2   : > { %5091 = vst.msk [vmem:[#allocation5 + $0x58] sm:$0xff] %vm12001_vm8, %v9348_v31  ;;  %v9003_v0 = vrot.slane %v7742_v35, 9  ;;  %7993 = vrot.lane.b32.xlu0 %v9020_v25, %s9373_s12  ;;  %v5812_v9 = vsel %vm9659_vm9, %v5810_v61, %v5811_v8  ;;  %v7868_v11 = vrot.slane %v7743_v37, 5  ;;  %v7871_v53 = vrot.slane %v7744_v54, 5  ;;  %v5668_v18 = vld [vmem:[#allocation4 + $0x70] sm:$0xf]  ;;  %vm12002_vm14 = vmmov %vm12001_vm8 }
 0x2c3   : > { %v6842_v58 = vsel %vm9659_vm9, %v8941_v19, %v6841_v2  ;;  %v6843_v10 = vrot.slane %v6841_v2, 4  ;;  %v5330_v44 = vrot.slane %v5329_v49, 4  ;;  %v8894_v15 = vcombine.low %v5809_v1, %v5812_v9  ;;  %v5669_v7 = vld [vmem:[#allocation4 + $0x74] sm:$0x1]  ;;  %v7201_v45 = vld [vmem:[#allocation4 + $0x78] sm:$0xf] }
 0x2c4   : > { %v8940_v17 = vrot.slane %v6704_v33, 9  ;;  %v7869_v27 = vsel %vm9659_vm9, %v9003_v0, %v7868_v11  ;;  %v7870_v28 = vrot.slane %v7868_v11, 4  ;;  %v6834_v56 = vrot.slane %v6705_v3, 5  ;;  %v7202_v35 = vld [vmem:[#allocation4 + $0x7c] sm:$0xf]  ;;  %v5585_v19 = vpop.permute.xlu1 %5584  ;;  %v6081_v0 = vpop.permute.xlu0 %6080 }
 0x2c5   : > { %v6845_v30 = vsel %vm9659_vm9, %v6843_v10, %v6844_v5  ;;  %v5335_v25 = vsel %vm9666_vm10, %v5330_v44, %v5334_v62  ;;  %v6837_v46 = vrot.slane %v6706_v12, 5  ;;  %v8877_v13 = vrot.slane %v5667_v34, 9  ;;  %v7203_v32 = vld [vmem:[#allocation4 + $0x80] sm:$0x1]  ;;  %v6163_v8 = vld [vmem:[#allocation4 + $0x78] sm:$0xf] }
 0x2c6   : > { %v8957_v63 = vcombine.low %v6842_v58, %v6845_v30  ;;  %v8859_v41 = vcombine.low %v5325_v16, %v5335_v25  ;;  %5916 = vrot.lane.b32.xlu0 %v8894_v15, %s9368_s30  ;;  %v7872_v52 = vsel %vm9659_vm9, %v7870_v28, %v7871_v53  ;;  %v6835_v39 = vsel %vm9659_vm9, %v8940_v17, %v6834_v56  ;;  %v6164_v2 = vld [vmem:[#allocation4 + $0x7c] sm:$0xf]  ;;  %v6165_v12 = vld [vmem:[#allocation4 + $0x80] sm:$0x1] }
 0x2c7   : > { %v6836_v47 = vrot.slane %v6834_v56, 4  ;;  %v9019_v37 = vcombine.low %v7869_v27, %v7872_v52  ;;  %v5801_v31 = vrot.slane %v5668_v18, 5  ;;  %v5804_v60 = vrot.slane %v5669_v7, 5  ;;  %5628 = vst.msk [vmem:[#allocation5 + $0x20] sm:$0xff] %vm1581_vm15, %v5585_v19 }
 0x2c8   : > { %v7418_v43 = vshrl.u32 %v7201_v45, 16  ;;  %5590 = vrot.lane.b32.xlu1 %v8859_v41, %s9369_s8  ;;  %v7421_v62 = vshll.u32 %v7201_v45, 16  ;;  %v7427_v1 = vshll.u32 %v7202_v35, 16  ;;  %v7431_v61 = vshrl.u32 %v7202_v35, 16  ;;  %5948 = vst.msk [vmem:[#allocation5 + $0x20] sm:$0xff] %vm1905_vm1, %v11192_v4 }
 0x2c9   : > { %v6838_v54 = vsel %vm9659_vm9, %v6836_v47, %v6837_v46  ;;  %v5802_v16 = vsel %vm9659_vm9, %v8877_v13, %v5801_v31  ;;  %v5803_v49 = vrot.slane %v5801_v31, 4  ;;  %v7437_v10 = vshll.u32 %v7203_v32, 16  ;;  %6124 = vst.msk [vmem:[#allocation5 + $0x20] sm:$0xff] %vm2082_vm2, %v6081_v0  ;;  %v9322_v46 = vld [vmem:[#allocation4 + $0x90] sm:$0xff]   ;;  %v5126_v31 = vld [vmem:[#allocation4 + $0x78] sm:$0xf] }
 0x2ca   : > { %v8956_v33 = vcombine.low %v6835_v39, %v6838_v54  ;;  %v7420_v5 = vrot.slane %v7418_v43, 4  ;;  %7991 = vrot.lane.b32.xlu0 %v9019_v37, %s9373_s12  ;;  %v7423_v3 = vrot.slane %v7421_v62, 5  ;;  %v7429_v9 = vrot.slane %v7427_v1, 5 }
 0x2cb   : > { %v7433_v58 = vrot.slane %v7431_v61, 4  ;;  %v5805_v11 = vsel %vm9659_vm9, %v5803_v49, %v5804_v60  ;;  %v6401_v34 = vshrl.u32 %v6163_v8, 16  ;;  %v6404_v44 = vshll.u32 %v6163_v8, 16  ;;  %v9187_v53 = vpop.f32.mrb[24].mxu0  ;;  %v9323_v60 = vld [vmem:[#allocation4 + $0x90] sm:$0xff]  }
 0x2cc   : > { %v6410_v15 = vshll.u32 %v6164_v2, 16  ;;  %6954 = vrot.lane.b32.xlu1 %v8957_v63, %s9372_s11  ;;  %v8893_v17 = vcombine.low %v5802_v16, %v5805_v11  ;;  %v7424_v4 = vor.u32 %v7423_v3, %v7420_v5  ;;  %v7439_v30 = vrot.slane %v7437_v10, 5  ;;  %v4228_v27 = vpop.f32.mrb[25].mxu0  ;;  %v11287_v5 = vld [vmem:[#allocation4 + $0x7c] sm:$0xf] }
 0x2cd   : > { %v7434_v18 = vor.u32 %v7433_v58, %v7429_v9  ;;  %v6403_v28 = vrot.slane %v6401_v34, 4  ;;  %v6406_v56 = vrot.slane %v6404_v44, 5  ;;  %v6414_v45 = vshrl.u32 %v6164_v2, 16  ;;  %v9188_v25 = vpop.f32.mrb[26].mxu0 }
 0x2ce   : > { %v6412_v7 = vrot.slane %v6410_v15, 5  ;;  %6952 = vrot.lane.b32.xlu0 %v8956_v33, %s9372_s11  ;;  %v7425_v13 = vrot.slane %v7424_v4, 4  ;;  %v6420_v41 = vshll.u32 %v6165_v12, 16  ;;  %v4292_v52 = vmul.f32 %v11119_v38, %v9187_v53  ;;  %v4231_v39 = vpop.f32.mrb[27].mxu0 }
 0x2cf   : > { %v7435_v35 = vrot.slane %v7434_v18, 4  ;;  %v6407_v63 = vor.u32 %v6406_v56, %v6403_v28  ;;  %v6416_v47 = vrot.slane %v6414_v45, 4  ;;  %v4290_v32 = vmul.f32 %v11119_v38, %v4228_v27  ;;  %v6621_v3 = vpop.permute.xlu0 %6620  ;;  %v4931_v56 = vld [vmem:[#allocation4 + $0xa8] sm:$0xf] }
 0x2d0   : > { %v4293_v37 = vmul.f32 %v11119_v38, %v9188_v25  ;;  %5914 = vrot.lane.b32.xlu1 %v8893_v17, %s9368_s30  ;;  %v7430_v43 = vsel %vm9666_vm10, %v7425_v13, %v7429_v9  ;;  %v6422_v19 = vrot.slane %v6420_v41, 5  ;;  %v4331_v54 = vadd.f32 %v11132_v24, %v4292_v52  ;;  %6666 = vst.msk [vmem:[#allocation5 + $0x10] sm:$0xff] %vm2627_vm3, %v6621_v3  ;;  %v9326_v41 = vld [vmem:[#allocation4 + $0x84] sm:$0xff]  }
 0x2d1   : > { %v7440_v8 = vsel %vm9666_vm10, %v7435_v35, %v7439_v30  ;;  %v6408_v1 = vrot.slane %v6407_v63, 4  ;;  %v6417_v61 = vor.u32 %v6416_v47, %v6412_v7  ;;  %v4329_v2 = vadd.f32 %v11132_v24, %v4290_v32  ;;  %6986 = vst.msk [vmem:[#allocation5 + $0x10] sm:$0xff] %vm2948_vm4, %v11214_v6  ;;  %v4924_v63 = vld [vmem:[#allocation4 + $0x9c] sm:$0xf] }
 0x2d2   : > { %v8988_v62 = vcombine.low %v7430_v43, %v7440_v8  ;;  %7133 = vrot.lane.b32.xlu0 %v9322_v46, %s9371_s10  ;;  %v4363_v33 = vmax.f32 %v4331_v54, 0.0  ;;  %v4332_v16 = vadd.f32 %v11132_v24, %v4293_v37  ;;  %v4291_v49 = vmul.f32 %v11119_v38, %v4231_v39  ;;  %7163 = vst.msk [vmem:[#allocation5 + $0x10] sm:$0xff] %vm3126_vm5, %v11086_v14  ;;  %v5128_v46 = vld [vmem:[#allocation4 + $0x80] sm:$0x1]  ;;  %v4935_v43 = vld [vmem:[#allocation4 + $0xb0] sm:$0x1] }
 0x2d3   : > { %v5385_v0 = vshrl.u32 %v5126_v31, 16  ;;  %v6413_v9 = vsel %vm9666_vm10, %v6408_v1, %v6412_v7  ;;  %v6418_v58 = vrot.slane %v6417_v61, 4  ;;  %v4361_v10 = vmax.f32 %v4329_v2, 0.0  ;;  %7707 = vst.msk [vmem:[#allocation5 + $0x10] sm:$0xff] %vm3671_vm6, %v11247_v21  ;;  %v11305_v6 = vpop.permute.xlu0 %7985  ;;  %v6160_v61 = vld [vmem:[#allocation4 + $0x6c] sm:$0xf] }
 0x2d4   : > { %v5388_v11 = vshll.u32 %v5126_v31, 16  ;;  %6094 = vrot.lane.b32.xlu1 %v9323_v60, %s9370_s9  ;;  %v9111_v12 = vpack.c.bf16 %v4363_v33, %v4363_v33  ;;  %v4364_v34 = vmax.f32 %v4332_v16, 0.0  ;;  %v4330_v44 = vadd.f32 %v11132_v24, %v4291_v49  ;;  %v7660_v18 = vpop.permute.xlu1 %7659  ;;  %8027 = vst.msk [vmem:[#allocation5 + $0x10] sm:$0xff] %vm3992_vm7, %v11169_v57 }
 0x2d5   : > { %v5387_v15 = vrot.slane %v5385_v0, 4  ;;  %v6423_v38 = vsel %vm9666_vm10, %v6418_v58, %v6422_v19  ;;  %v9109_v53 = vpack.c.bf16 %v4361_v10, %v4361_v10  ;;  %v5394_v4 = vshll.u32 %v11287_v5, 16  ;;  %7706 = vst.msk [vmem:[#allocation5 + $0x8] sm:$0xff] %vm3671_vm6, %v7660_v18 }
 0x2d6   : > { %v5390_v17 = vrot.slane %v5388_v11, 5  ;;  %7673 = vrot.lane.b32.xlu0 %v8988_v62, %s9375_s14  ;;  %v8925_v30 = vcombine.low %v6413_v9, %v6423_v38  ;;  %v4741_v27 = vshrl.u32 %v9111_v12, 16  ;;  %v4744_v24 = vshll.u32 %v9111_v12, 16  ;;  %8026 = vst.msk [vmem:[#allocation5 + $0x8] sm:$0xff] %vm3992_vm7, %v11206_v51  ;;  %v9325_v51 = vld [vmem:[#allocation4 + $0x84] sm:$0xff]  }
 0x2d7   : > { %v9112_v28 = vpack.c.bf16 %v4364_v34, %v4364_v34  ;;  %v4724_v7 = vshrl.u32 %v9109_v53, 16  ;;  %v4727_v45 = vshll.u32 %v9109_v53, 16  ;;  %v4362_v25 = vmax.f32 %v4330_v44, 0.0  ;;  %v6162_v12 = vld [vmem:[#allocation4 + $0x74] sm:$0x1] }
 0x2d8   : > { %v5391_v14 = vor.u32 %v5390_v17, %v5387_v15  ;;  %6634 = vrot.lane.b32.xlu1 %v8925_v30, %s9374_s13  ;;  %v4743_v13 = vrot.slane %v4741_v27, 7  ;;  %v11312_v52 = vrot.slane %v5394_v4, 5  ;;  %v5398_v37 = vshrl.u32 %v11287_v5, 16  ;;  %v6161_v5 = vld [vmem:[#allocation4 + $0x70] sm:$0xf] }
 0x2d9   : > { %v4749_v21 = vshrl.u32 %v9112_v28, 16  ;;  %v4752_v35 = vshll.u32 %v9112_v28, 16  ;;  %v4726_v39 = vrot.slane %v4724_v7, 7  ;;  %v9110_v47 = vpack.c.bf16 %v4362_v25, %v4362_v25  ;;  %v11325_v3 = vpop.permute.xlu0 %5908  ;;  %v4928_v15 = vld [vmem:[#allocation4 + $0xa4] sm:$0x1] }
 0x2da   : > { %v11314_v32 = vrot.slane %v5391_v14, 4  ;;  %v4746_v31 = vor.u32 %v4744_v24, %v4743_v13  ;;  %v4747_v57 = vrot.slane %v4743_v13, 4  ;;  %6092 = vrot.lane.b32.xlu0 %v9326_v41, %s9370_s9  ;;  %v5404_v8 = vshll.u32 %v5128_v46, 16  ;;  %v5583_v0 = vpop.permute.xlu1 %5582  ;;  %v7198_v27 = vld [vmem:[#allocation4 + $0x6c] sm:$0xf] }
 0x2db   : > { %v4751_v60 = vrot.slane %v4749_v21, 7  ;;  %v4729_v19 = vor.u32 %v4727_v45, %v4726_v39  ;;  %v4730_v54 = vrot.slane %v4726_v39, 4  ;;  %v4732_v62 = vshrl.u32 %v9110_v47, 16  ;;  %5627 = vst.msk [vmem:[#allocation5 + $0x18] sm:$0xff] %vm1581_vm15, %v5583_v0  ;;  %v7199_v45 = vld [vmem:[#allocation4 + $0x70] sm:$0xf] }
 0x2dc   : > { %v4735_v1 = vshll.u32 %v9110_v47, 16  ;;  %v4932_v2 = vsel %vm9680_vm12, %v4746_v31, %v4931_v56  ;;  %7131 = vrot.lane.b32.xlu1 %v9325_v51, %s9371_s10  ;;  %v5397_v49 = vsel %vm9666_vm10, %v11314_v32, %v11312_v52  ;;  %v5400_v10 = vrot.slane %v5398_v37, 4  ;;  %5947 = vst.msk [vmem:[#allocation5 + $0x18] sm:$0xff] %vm1905_vm1, %v11208_v40  ;;  %v7200_v21 = vld [vmem:[#allocation4 + $0x74] sm:$0x1] }
 0x2dd   : > { %v4754_v33 = vor.u32 %v4752_v35, %v4751_v60  ;;  %v4756_v16 = vrot.slane %v4751_v60, 4  ;;  %4933 = vst [vmem:[#allocation4 + $0xa8] sm:$0xf] %v4932_v2  ;;  %v4925_v9 = vsel %vm9680_vm12, %v4729_v19, %v4924_v63  ;;  %v4734_v58 = vrot.slane %v4732_v62, 7  ;;  %6123 = vst.msk [vmem:[#allocation5 + $0x18] sm:$0xff] %vm2082_vm2, %v11060_v20  ;;  %v11353_v63 = vpop.permute.xlu0 %7983 }
 0x2de   : > { %v5406_v11 = vrot.slane %v5404_v8, 5  ;;  %4926 = vst [vmem:[#allocation4 + $0x9c] sm:$0xf] %v4925_v9  ;;  %v6377_v38 = vshrl.u32 %v6160_v61, 16  ;;  %v6380_v53 = vshll.u32 %v6160_v61, 16  ;;  %v5401_v18 = vor.u32 %v5400_v10, %v11312_v52  ;;  %6667 = vst.msk [vmem:[#allocation5 + $0x18] sm:$0xff] %vm2627_vm3, %v11231_v22  ;;  %v11342_v40 = vpop.permute.xlu1 %6946 }
 0x2df   : > { %v4755_v34 = vsel %vm9674_vm11, %v4747_v57, %v4754_v33  ;;  %v4936_v44 = vsel %vm9688_vm13, %v4756_v16, %v4935_v43  ;;  %v4737_v17 = vor.u32 %v4735_v1, %v4734_v58  ;;  %v4739_v4 = vrot.slane %v4734_v58, 4  ;;  %v7751_v20 = vld [vmem:[#allocation4 + $0x90] sm:$0xe]  ;;  %6987 = vst.msk [vmem:[#allocation5 + $0x18] sm:$0xff] %vm2948_vm4, %v11184_v26  ;;  %v7752_v39 = vld [vmem:[#allocation4 + $0x94] sm:$0xf] }
 0x2e0   : > { %4934 = vst.msk [vmem:[#allocation4 + $0xac] sm:$0xf] %vm280_vm0, %v4755_v34  ;;  %4937 = vst [vmem:[#allocation4 + $0xb0] sm:$0x1] %v4936_v44  ;;  %v6386_v30 = vshll.u32 %v6161_v5, 16  ;;  %v6379_v24 = vrot.slane %v6377_v38, 4 }
 0x2e1   : > { %v6382_v28 = vrot.slane %v6380_v53, 5  ;;  %v6390_v56 = vshrl.u32 %v6161_v5, 16  ;;  %v6396_v7 = vshll.u32 %v6162_v12, 16  ;;  %v4738_v25 = vsel %vm9674_vm11, %v4730_v54, %v4737_v17  ;;  %7164 = vst.msk [vmem:[#allocation5 + $0x18] sm:$0xff] %vm3126_vm5, %v11245_v55  ;;  %v7753_v26 = vld [vmem:[#allocation4 + $0x98] sm:$0x1]  ;;  %v11366_v17 = vpop.permute.xlu0 %6944 }
 0x2e2   : > { %v4929_v46 = vsel %vm9688_vm13, %v4739_v4, %v4928_v15  ;;  %v5402_v14 = vrot.slane %v5401_v18, 4  ;;  %v6388_v13 = vrot.slane %v6386_v30, 5  ;;  %4927 = vst.msk [vmem:[#allocation4 + $0xa0] sm:$0xf] %vm280_vm0, %v4738_v25  ;;  %v7394_v52 = vshrl.u32 %v7198_v27, 16  ;;  %v11357_v19 = vpop.permute.xlu1 %5906 }
 0x2e3   : > { %4930 = vst [vmem:[#allocation4 + $0xa4] sm:$0x1] %v4929_v46  ;;  %v6383_v35 = vor.u32 %v6382_v28, %v6379_v24  ;;  %v6392_v22 = vrot.slane %v6390_v56, 4  ;;  %v6398_v41 = vrot.slane %v6396_v7, 5  ;;  %v7397_v32 = vshll.u32 %v7198_v27, 16 }
 0x2e4   : > { %v5407_v47 = vsel %vm9666_vm10, %v5402_v14, %v5406_v11  ;;  %v7403_v37 = vshll.u32 %v7199_v45, 16  ;;  %v7407_v31 = vshrl.u32 %v7199_v45, 16  ;;  %v5123_v57 = vld [vmem:[#allocation4 + $0x6c] sm:$0xf]  ;;  %v7396_v8 = vrot.slane %v7394_v52, 4 }
 0x2e5   : > { %v8862_v60 = vcombine.low %v5397_v49, %v5407_v47  ;;  %v6384_v43 = vrot.slane %v6383_v35, 4  ;;  %v6393_v51 = vor.u32 %v6392_v22, %v6388_v13  ;;  %v7399_v54 = vrot.slane %v7397_v32, 5  ;;  %v5124_v61 = vld [vmem:[#allocation4 + $0x70] sm:$0xf]  ;;  %v5125_v10 = vld [vmem:[#allocation4 + $0x74] sm:$0x1] }
 0x2e6   : > { %v7405_v62 = vrot.slane %v7403_v37, 5  ;;  %v7409_v1 = vrot.slane %v7407_v31, 4  ;;  %v7413_v55 = vshll.u32 %v7200_v21, 16  ;;  %v9006_v16 = vrot.slane %v7751_v20, 9  ;;  %v5676_v15 = vld [vmem:[#allocation4 + $0x90] sm:$0xe]  ;;  %v11368_v4 = vpop.permute.xlu1 %6086 }
 0x2e7   : > { %5596 = vrot.lane.b32.xlu1 %v8862_v60, %s9369_s8  ;;  %v6389_v2 = vsel %vm9666_vm10, %v6384_v43, %v6388_v13  ;;  %v6394_v33 = vrot.slane %v6393_v51, 4  ;;  %v7889_v5 = vrot.slane %v7752_v39, 5  ;;  %v7400_v0 = vor.u32 %v7399_v54, %v7396_v8  ;;  %v5677_v38 = vld [vmem:[#allocation4 + $0x94] sm:$0xf]  ;;  %v5678_v53 = vld [vmem:[#allocation4 + $0x98] sm:$0x1] }
 0x2e8   : > { %v7410_v49 = vor.u32 %v7409_v1, %v7405_v62  ;;  %v7415_v9 = vrot.slane %v7413_v55, 5  ;;  %v7892_v58 = vrot.slane %v7753_v26, 5  ;;  %v5361_v44 = vshrl.u32 %v5123_v57, 16  ;;  %v6713_v28 = vld [vmem:[#allocation4 + $0x90] sm:$0xe] }
 0x2e9   : > { %v6399_v11 = vsel %vm9666_vm10, %v6394_v33, %v6398_v41  ;;  %v7890_v12 = vsel %vm9659_vm9, %v9006_v16, %v7889_v5  ;;  %v7891_v34 = vrot.slane %v7889_v5, 4  ;;  %v7401_v30 = vrot.slane %v7400_v0, 4  ;;  %v6714_v56 = vld [vmem:[#allocation4 + $0x94] sm:$0xf]  ;;  %v6715_v35 = vld [vmem:[#allocation4 + $0x98] sm:$0x1] }
 0x2ea   : > { %v8924_v18 = vcombine.low %v6389_v2, %v6399_v11  ;;  %v7411_v27 = vrot.slane %v7410_v49, 4  ;;  %v5364_v24 = vshll.u32 %v5123_v57, 16  ;;  %v5363_v45 = vrot.slane %v5361_v44, 4  ;;  %v7748_v22 = vld [vmem:[#allocation4 + $0x84] sm:$0xe]  ;;  %v11377_v37 = vpop.permute.xlu1 %6626  ;;  %v9349_v51 = vld [vmem:[#allocation4 + $0x9c] sm:$0xff]  }
 0x2eb   : > { %v7893_v7 = vsel %vm9659_vm9, %v7891_v34, %v7892_v58  ;;  %v5370_v25 = vshll.u32 %v5124_v61, 16  ;;  %v5374_v46 = vshrl.u32 %v5124_v61, 16  ;;  %v7406_v14 = vsel %vm9666_vm10, %v7401_v30, %v7405_v62  ;;  %v7749_v32 = vld [vmem:[#allocation4 + $0x88] sm:$0xf]  ;;  %v7750_v43 = vld [vmem:[#allocation4 + $0x8c] sm:$0x1]  ;;  %v11380_v61 = vpop.permute.xlu0 %7125 }
 0x2ec   : > { %6632 = vrot.lane.b32.xlu0 %v8924_v18, %s9374_s13  ;;  %v7416_v13 = vsel %vm9666_vm10, %v7411_v27, %v7415_v9  ;;  %v9022_v21 = vcombine.low %v7890_v12, %v7893_v7  ;;  %v5366_v20 = vrot.slane %v5364_v24, 5  ;;  %v5380_v47 = vshll.u32 %v5125_v10, 16  ;;  %v6710_v55 = vld [vmem:[#allocation4 + $0x84] sm:$0xe]  ;;  %v9350_v2 = vld [vmem:[#allocation4 + $0xa8] sm:$0xff]   ;;  %5093 = vst.msk [vmem:[#allocation5 + $0x68] sm:$0xff] %vm12001_vm8, %v9349_v51 }
 0x2ed   : > { %v8987_v41 = vcombine.low %v7406_v14, %v7416_v13  ;;  %v5372_v52 = vrot.slane %v5370_v25, 5  ;;  %v5376_v39 = vrot.slane %v5374_v46, 4  ;;  %v8880_v26 = vrot.slane %v5676_v15, 9  ;;  %v6711_v49 = vld [vmem:[#allocation4 + $0x88] sm:$0xf]  ;;  %5094 = vst.msk [vmem:[#allocation5 + $0x70] sm:$0xff] %vm12002_vm14, %v9350_v2 }
 0x2ee   : > { %v5367_v31 = vor.u32 %v5366_v20, %v5363_v45  ;;  %v5822_v57 = vrot.slane %v5677_v38, 5  ;;  %v5825_v60 = vrot.slane %v5678_v53, 5  ;;  %v5382_v54 = vrot.slane %v5380_v47, 5  ;;  %v6712_v9 = vld [vmem:[#allocation4 + $0x8c] sm:$0x1]  ;;  %v11397_v45 = vpop.permute.xlu1 %7123 }
 0x2ef   : > { %7671 = vrot.lane.b32.xlu1 %v8987_v41, %s9375_s14  ;;  %v5377_v8 = vor.u32 %v5376_v39, %v5372_v52  ;;  %v8943_v62 = vrot.slane %v6713_v28, 9  ;;  %v6855_v1 = vrot.slane %v6714_v56, 5  ;;  %v6858_v0 = vrot.slane %v6715_v35, 5  ;;  %v5673_v53 = vld [vmem:[#allocation4 + $0x84] sm:$0xe]  ;;  %v11402_v39 = vpop.permute.xlu0 %7665 }
 0x2f0   : > { %7997 = vrot.lane.b32.xlu0 %v9022_v21, %s9373_s12  ;;  %v5368_v33 = vrot.slane %v5367_v31, 4  ;;  %v5823_v16 = vsel %vm9659_vm9, %v8880_v26, %v5822_v57  ;;  %v5824_v5 = vrot.slane %v5822_v57, 4  ;;  %v9005_v12 = vrot.slane %v7748_v22, 9  ;;  %v5674_v18 = vld [vmem:[#allocation4 + $0x88] sm:$0xf] }
 0x2f1   : > { %v5378_v58 = vrot.slane %v5377_v8, 4  ;;  %v6856_v10 = vsel %vm9659_vm9, %v8943_v62, %v6855_v1  ;;  %v6857_v11 = vrot.slane %v6855_v1, 4  ;;  %v7882_v15 = vrot.slane %v7749_v32, 5  ;;  %v5675_v56 = vld [vmem:[#allocation4 + $0x8c] sm:$0x1] }
 0x2f2   : > { %v5373_v34 = vsel %vm9666_vm10, %v5368_v33, %v5372_v52  ;;  %v5826_v44 = vsel %vm9659_vm9, %v5824_v5, %v5825_v60  ;;  %v7885_v38 = vrot.slane %v7750_v43, 5  ;;  %v8942_v28 = vrot.slane %v6710_v55, 9  ;;  %v7207_v7 = vld [vmem:[#allocation4 + $0x90] sm:$0xf]  ;;  %v7208_v21 = vld [vmem:[#allocation4 + $0x94] sm:$0xf] }
 0x2f3   : > { %v5383_v30 = vsel %vm9666_vm10, %v5378_v58, %v5382_v54  ;;  %v8896_v27 = vcombine.low %v5823_v16, %v5826_v44  ;;  %v6859_v24 = vsel %vm9659_vm9, %v6857_v11, %v6858_v0  ;;  %v7883_v14 = vsel %vm9659_vm9, %v9005_v12, %v7882_v15  ;;  %v7209_v52 = vld [vmem:[#allocation4 + $0x98] sm:$0x1]  ;;  %v6169_v57 = vld [vmem:[#allocation4 + $0x90] sm:$0xf] }
 0x2f4   : > { %v8861_v25 = vcombine.low %v5373_v34, %v5383_v30  ;;  %v8959_v46 = vcombine.low %v6856_v10, %v6859_v24  ;;  %v7884_v13 = vrot.slane %v7882_v15, 4  ;;  %v6848_v20 = vrot.slane %v6711_v49, 5  ;;  %v6170_v34 = vld [vmem:[#allocation4 + $0x94] sm:$0xf] }
 0x2f5   : > { %5920 = vrot.lane.b32.xlu0 %v8896_v27, %s9368_s30  ;;  %v6851_v35 = vrot.slane %v6712_v9, 5  ;;  %v8879_v22 = vrot.slane %v5673_v53, 9  ;;  %v5815_v41 = vrot.slane %v5674_v18, 5  ;;  %v5818_v32 = vrot.slane %v5675_v56, 5  ;;  %v5589_v49 = vpop.permute.xlu1 %5588  ;;  %v9356_v53 = vld [vmem:[%s11981_s3] ss:$0 sm:$0xff]  ;;  %v6085_v27 = vpop.permute.xlu0 %6084 }
 0x2f6   : > { %5594 = vrot.lane.b32.xlu1 %v8861_v25, %s9369_s8  ;;  %v7886_v47 = vsel %vm9659_vm9, %v7884_v13, %v7885_v38  ;;  %v7466_v31 = vshrl.u32 %v7207_v7, 16  ;;  %v7469_v26 = vshll.u32 %v7207_v7, 16  ;;  %v6849_v43 = vsel %vm9659_vm9, %v8942_v28, %v6848_v20  ;;  %5630 = vst.msk [vmem:[#allocation5 + $0x30] sm:$0xff] %vm1581_vm15, %v5589_v49 }
 0x2f7   : > { %v9021_v60 = vcombine.low %v7883_v14, %v7886_v47  ;;  %v6850_v51 = vrot.slane %v6848_v20, 4  ;;  %v5816_v8 = vsel %vm9659_vm9, %v8879_v22, %v5815_v41  ;;  %v5817_v54 = vrot.slane %v5815_v41, 4  ;;  %5950 = vst.msk [vmem:[#allocation5 + $0x30] sm:$0xff] %vm1905_vm1, %v11325_v3  ;;  %v9357_v14 = vld [vmem:[%s11982_s4] ss:$0 sm:$0xff] }
 0x2f8   : > { %v7468_v62 = vrot.slane %v7466_v31, 4  ;;  %v7471_v1 = vrot.slane %v7469_v26, 5  ;;  %v7475_v55 = vshll.u32 %v7208_v21, 16  ;;  %v7479_v33 = vshrl.u32 %v7208_v21, 16  ;;  %6126 = vst.msk [vmem:[#allocation5 + $0x30] sm:$0xff] %vm2082_vm2, %v6085_v27  ;;  %v9329_v22 = vld [vmem:[#allocation4 + $0xa8] sm:$0xff]  }
 0x2f9   : > { %7995 = vrot.lane.b32.xlu0 %v9021_v60, %s9373_s12  ;;  %v6852_v2 = vsel %vm9659_vm9, %v6850_v51, %v6851_v35  ;;  %v7485_v16 = vshll.u32 %v7209_v52, 16  ;;  %v9191_v5 = vpop.f32.mrb[28].mxu0  ;;  %v6449_v0 = vshrl.u32 %v6169_v57, 16  ;;  %v5819_v58 = vsel %vm9659_vm9, %v5817_v54, %v5818_v32  ;;  %v6171_v21 = vld [vmem:[#allocation4 + $0x98] sm:$0x1] }
 0x2fa   : > { %6958 = vrot.lane.b32.xlu1 %v8959_v46, %s9372_s11  ;;  %v8958_v9 = vcombine.low %v6849_v43, %v6852_v2  ;;  %v7472_v10 = vor.u32 %v7471_v1, %v7468_v62  ;;  %v7477_v11 = vrot.slane %v7475_v55, 5  ;;  %v4244_v12 = vpop.f32.mrb[29].mxu0  ;;  %v8895_v44 = vcombine.low %v5816_v8, %v5819_v58  ;;  %v4949_v27 = vld [vmem:[#allocation4 + $0xc8] sm:$0x1] }
 0x2fb   : > { %v7481_v15 = vrot.slane %v7479_v33, 4  ;;  %v7487_v38 = vrot.slane %v7485_v16, 5  ;;  %v4296_v18 = vmul.f32 %v9356_v53, %v9191_v5  ;;  %v9192_v30 = vpop.f32.mrb[30].mxu0  ;;  %v4294_v28 = vmul.f32 %v9356_v53, %v4244_v12  ;;  %v4945_v12 = vld [vmem:[#allocation4 + $0xc0] sm:$0xf] }
 0x2fc   : > { %v7473_v24 = vrot.slane %v7472_v10, 4  ;;  %v4297_v56 = vmul.f32 %v9356_v53, %v9192_v30  ;;  %v6451_v7 = vrot.slane %v6449_v0, 4  ;;  %v4247_v25 = vpop.f32.mrb[31].mxu0  ;;  %v6452_v20 = vshll.u32 %v6169_v57, 16  ;;  %v4938_v30 = vld [vmem:[#allocation4 + $0xb4] sm:$0xf] }
 0x2fd   : > { %6956 = vrot.lane.b32.xlu0 %v8958_v9, %s9372_s11  ;;  %v7482_v46 = vor.u32 %v7481_v15, %v7477_v11  ;;  %v4335_v13 = vadd.f32 %v9357_v14, %v4296_v18  ;;  %v6458_v35 = vshll.u32 %v6170_v34, 16  ;;  %v4333_v41 = vadd.f32 %v9357_v14, %v4294_v28 }
 0x2fe   : > { %5918 = vrot.lane.b32.xlu1 %v8895_v44, %s9368_s30  ;;  %v7478_v3 = vsel %vm9666_vm10, %v7473_v24, %v7477_v11  ;;  %v4336_v52 = vadd.f32 %v9357_v14, %v4297_v56  ;;  %v6462_v47 = vshrl.u32 %v6170_v34, 16  ;;  %v6454_v26 = vrot.slane %v6452_v20, 5  ;;  %v6166_v11 = vld [vmem:[#allocation4 + $0x84] sm:$0xf] }
 0x2ff   : > { %v7483_v32 = vrot.slane %v7482_v46, 4  ;;  %v4367_v31 = vmax.f32 %v4335_v13, 0.0  ;;  %v6460_v60 = vrot.slane %v6458_v35, 5  ;;  %v4365_v43 = vmax.f32 %v4333_v41, 0.0  ;;  %v6625_v0 = vpop.permute.xlu0 %6624  ;;  %v9331_v46 = vld [vmem:[#allocation4 + $0x9c] sm:$0xff]  }
 0x300   : > { %v4368_v51 = vmax.f32 %v4336_v52, 0.0  ;;  %v6464_v8 = vrot.slane %v6462_v47, 4  ;;  %v6468_v54 = vshll.u32 %v6171_v21, 16  ;;  %v6455_v1 = vor.u32 %v6454_v26, %v6451_v7  ;;  %6668 = vst.msk [vmem:[#allocation5 + $0x20] sm:$0xff] %vm2627_vm3, %v6625_v0  ;;  %v6167_v13 = vld [vmem:[#allocation4 + $0x88] sm:$0xf] }
 0x301   : > { %v7488_v57 = vsel %vm9666_vm10, %v7483_v32, %v7487_v38  ;;  %v9115_v62 = vpack.c.bf16 %v4367_v31, %v4367_v31  ;;  %v4295_v55 = vmul.f32 %v9356_v53, %v4247_v25  ;;  %v9113_v33 = vpack.c.bf16 %v4365_v43, %v4365_v43  ;;  %6988 = vst.msk [vmem:[#allocation5 + $0x20] sm:$0xff] %vm2948_vm4, %v11366_v17  ;;  %v6168_v31 = vld [vmem:[#allocation4 + $0x8c] sm:$0x1]  ;;  %v5134_v0 = vld [vmem:[#allocation4 + $0x98] sm:$0x1] }
 0x302   : > { %v8990_v2 = vcombine.low %v7478_v3, %v7488_v57  ;;  %6098 = vrot.lane.b32.xlu1 %v9329_v22, %s9370_s9  ;;  %v9116_v16 = vpack.c.bf16 %v4368_v51, %v4368_v51  ;;  %v6465_v5 = vor.u32 %v6464_v8, %v6460_v60  ;;  %v6456_v58 = vrot.slane %v6455_v1, 4  ;;  %v7664_v53 = vpop.permute.xlu1 %7663  ;;  %7165 = vst.msk [vmem:[#allocation5 + $0x20] sm:$0xff] %vm3126_vm5, %v11228_v50 }
 0x303   : > { %v4775_v49 = vshrl.u32 %v9115_v62, 16  ;;  %v4778_v9 = vshll.u32 %v9115_v62, 16  ;;  %v6470_v10 = vrot.slane %v6468_v54, 5  ;;  %v4758_v34 = vshrl.u32 %v9113_v33, 16  ;;  %7708 = vst.msk [vmem:[#allocation5 + $0x18] sm:$0xff] %vm3671_vm6, %v7664_v53  ;;  %7709 = vst.msk [vmem:[#allocation5 + $0x20] sm:$0xff] %vm3671_vm6, %v11402_v39  ;;  %v11449_v20 = vpop.permute.xlu0 %7989 }
 0x304   : > { %7677 = vrot.lane.b32.xlu0 %v8990_v2, %s9375_s14  ;;  %v4761_v44 = vshll.u32 %v9113_v33, 16  ;;  %v4783_v15 = vshrl.u32 %v9116_v16, 16  ;;  %v4786_v38 = vshll.u32 %v9116_v16, 16  ;;  %v6461_v24 = vsel %vm9666_vm10, %v6456_v58, %v6460_v60  ;;  %8028 = vst.msk [vmem:[#allocation5 + $0x18] sm:$0xff] %vm3992_vm7, %v11353_v63  ;;  %8029 = vst.msk [vmem:[#allocation5 + $0x20] sm:$0xff] %vm3992_vm7, %v11305_v6 }
 0x305   : > { %v4777_v18 = vrot.slane %v4775_v49, 7  ;;  %v6466_v28 = vrot.slane %v6465_v5, 4  ;;  %v4334_v56 = vadd.f32 %v9357_v14, %v4295_v55  ;;  %v11443_v7 = vrot.slane %v4758_v34, 7  ;;  %v5132_v60 = vld [vmem:[#allocation4 + $0x90] sm:$0xf]  ;;  %v8042_v34 = vld [vmem:[#allocation5 + $0x8] sm:$0xff] }
 0x306   : > { %v4785_v25 = vrot.slane %v4783_v15, 7  ;;  %v6425_v17 = vshrl.u32 %v6166_v11, 16  ;;  %v6428_v21 = vshll.u32 %v6166_v11, 16  ;;  %v6434_v62 = vshll.u32 %v6167_v13, 16  ;;  %v5133_v55 = vld [vmem:[#allocation4 + $0x94] sm:$0xf] }
 0x307   : > { %v4780_v14 = vor.u32 %v4778_v9, %v4777_v18  ;;  %v4781_v35 = vrot.slane %v4777_v18, 4  ;;  %v6471_v50 = vsel %vm9666_vm10, %v6466_v28, %v6470_v10  ;;  %v4366_v3 = vmax.f32 %v4334_v56, 0.0  ;;  %v9358_v16 = vld [vmem:[%s11980_s2 + $0x10] ss:$0 sps:$4 sm:$0x33]   ;;  %v11472_v9 = vpop.permute.xlu0 %5912  ;;  %v9334_v10 = vld [vmem:[#allocation4 + $0x9c] sm:$0xff]  }
 0x308   : > { %v4763_v22 = vor.u32 %v4761_v44, %v11443_v7  ;;  %v4764_v41 = vrot.slane %v11443_v7, 4  ;;  %v4788_v52 = vor.u32 %v4786_v38, %v4785_v25  ;;  %v4790_v39 = vrot.slane %v4785_v25, 4  ;;  %6096 = vrot.lane.b32.xlu0 %v9331_v46, %s9370_s9  ;;  %v7754_v46 = vld [vmem:[#allocation4 + $0x9c] sm:$0xe] }
 0x309   : > { %v4946_v63 = vsel %vm9680_vm12, %v4780_v14, %v4945_v12  ;;  %v8927_v47 = vcombine.low %v6461_v24, %v6471_v50  ;;  %v9114_v32 = vpack.c.bf16 %v4366_v3, %v4366_v3  ;;  %v6427_v26 = vrot.slane %v6425_v17, 4  ;;  %v7756_v50 = vld [vmem:[#allocation4 + $0xa4] sm:$0x1]  ;;  %v8043_v3 = vld [vmem:[#allocation5 + $0x10] sm:$0xff] }
 0x30a   : > { %4947 = vst [vmem:[#allocation4 + $0xc0] sm:$0xf] %v4946_v63  ;;  %v4939_v6 = vsel %vm9680_vm12, %v4763_v22, %v4938_v30  ;;  %v4789_v43 = vsel %vm9674_vm11, %v4781_v35, %v4788_v52  ;;  %v4950_v51 = vsel %vm9688_vm13, %v4790_v39, %v4949_v27  ;;  %v6430_v8 = vrot.slane %v6428_v21, 5  ;;  %v5587_v15 = vpop.permute.xlu1 %5586  ;;  %v7204_v27 = vld [vmem:[#allocation4 + $0x84] sm:$0xf] }
 0x30b   : > { %4940 = vst [vmem:[#allocation4 + $0xb4] sm:$0xf] %v4939_v6  ;;  %4948 = vst.msk [vmem:[#allocation4 + $0xc4] sm:$0xf] %vm280_vm0, %v4789_v43  ;;  %6638 = vrot.lane.b32.xlu1 %v8927_v47, %s9374_s13  ;;  %v4766_v54 = vshrl.u32 %v9114_v32, 16  ;;  %v4769_v57 = vshll.u32 %v9114_v32, 16  ;;  %v11497_v48 = vpop.permute.xlu0 %7987 }
 0x30c   : > { %4951 = vst [vmem:[#allocation4 + $0xc8] sm:$0x1] %v4950_v51  ;;  %v6438_v1 = vshrl.u32 %v6167_v13, 16  ;;  %v6431_v2 = vor.u32 %v6430_v8, %v6427_v26  ;;  %v6444_v33 = vshll.u32 %v6168_v31, 16  ;;  %vm12003_vm12 = vcmask 1041408   ;;  %5629 = vst.msk [vmem:[#allocation5 + $0x28] sm:$0xff] %vm1581_vm15, %v5587_v15 }
 0x30d   : > { %v8126_v5 = vsel %vm12003_vm12, %v9358_v16, 0  ;;  %v5433_v49 = vshrl.u32 %v5132_v60, 16  ;;  %v4768_v58 = vrot.slane %v4766_v54, 7  ;;  %v6436_v11 = vrot.slane %v6434_v62, 5  ;;  %v7755_v13 = vld [vmem:[#allocation4 + $0xa0] sm:$0xf] }
 0x30e   : > { %v6440_v12 = vrot.slane %v6438_v1, 4  ;;  %9198 = vmatpush3.bf16.msra.mxu1 %v8126_v5  ;;  %v5436_v44 = vshll.u32 %v5132_v60, 16  ;;  %v6432_v38 = vrot.slane %v6431_v2, 4  ;;  %v6446_v53 = vrot.slane %v6444_v33, 5  ;;  %5949 = vst.msk [vmem:[#allocation5 + $0x28] sm:$0xff] %vm1905_vm1, %v11357_v19  ;;  %v11492_v47 = vpop.permute.xlu1 %6950 }
 0x30f   : > { %v5435_v18 = vrot.slane %v5433_v49, 4  ;;  %v5442_v30 = vshll.u32 %v5133_v55, 16  ;;  %v4771_v24 = vor.u32 %v4769_v57, %v4768_v58  ;;  %v4773_v28 = vrot.slane %v4768_v58, 4  ;;  %7135 = vrot.lane.b32.xlu1 %v9334_v10, %s9371_s10  ;;  %6125 = vst.msk [vmem:[#allocation5 + $0x28] sm:$0xff] %vm2082_vm2, %v11216_v59  ;;  %v7205_v63 = vld [vmem:[#allocation4 + $0x88] sm:$0xf] }
 0x310   : > { %v6441_v56 = vor.u32 %v6440_v12, %v6436_v11  ;;  %v5438_v25 = vrot.slane %v5436_v44, 5  ;;  %v6437_v17 = vsel %vm9666_vm10, %v6432_v38, %v6436_v11  ;;  %vm12004_vm8 = vcmask 293888   ;;  %6669 = vst.msk [vmem:[#allocation5 + $0x28] sm:$0xff] %vm2627_vm3, %v11377_v37  ;;  %v7206_v32 = vld [vmem:[#allocation4 + $0x8c] sm:$0x1] }
 0x311   : > { %9200 = vmatmul.mubr.msk.bf16.vlgmr.msra.gmra.mrb[0].mxu1 %vm12004_vm8, %v8042_v34  ;;  %v5444_v21 = vrot.slane %v5442_v30, 5  ;;  %v5446_v14 = vshrl.u32 %v5133_v55, 16  ;;  %v5452_v35 = vshll.u32 %v5134_v0, 16  ;;  %v4772_v22 = vsel %vm9674_vm11, %v4764_v41, %v4771_v24  ;;  %vm12005_vm14 = vmmov %vm12004_vm8  ;;  %6989 = vst.msk [vmem:[#allocation5 + $0x28] sm:$0xff] %vm2948_vm4, %v11342_v40  ;;  %v6172_v54 = vld [vmem:[#allocation4 + $0x9c] sm:$0xf] }
 0x312   : > { %v4943_v19 = vsel %vm9688_vm13, %v4773_v28, %v4942_v42  ;;  %v6442_v52 = vrot.slane %v6441_v56, 4  ;;  %v5439_v39 = vor.u32 %v5438_v25, %v5435_v18  ;;  %9203 = vmatprep.mubr.msk.bf16.mxu1 %vm12005_vm14, %v8043_v3  ;;  %4941 = vst.msk [vmem:[#allocation4 + $0xb8] sm:$0xf] %vm280_vm0, %v4772_v22  ;;  %v9007_v36 = vrot.slane %v7754_v46, 9  ;;  %v6173_v55 = vld [vmem:[#allocation4 + $0xa0] sm:$0xf]  ;;  %v11507_v2 = vpop.permute.xlu1 %5910  ;;  %vm12006_vm0 = vmmov %vm12004_vm8  ;;  %v11515_v18 = vpop.permute.xlu0 %6948 }
 0x313   : > { %4944 = vst [vmem:[#allocation4 + $0xbc] sm:$0x1] %v4943_v19  ;;  %v5448_v59 = vrot.slane %v5446_v14, 4  ;;  %v5454_v7 = vrot.slane %v5452_v35, 5  ;;  %v7896_v41 = vrot.slane %v7755_v13, 5  ;;  %v7899_v37 = vrot.slane %v7756_v50, 5  ;;  %vm12007_vm11 = vmmov %vm12006_vm0 }
 0x314   : > { %v6447_v31 = vsel %vm9666_vm10, %v6442_v52, %v6446_v53  ;;  %v5440_v26 = vrot.slane %v5439_v39, 4  ;;  %v7442_v60 = vshrl.u32 %v7204_v27, 16  ;;  %7166 = vst.msk [vmem:[#allocation5 + $0x28] sm:$0xff] %vm3126_vm5, %v11397_v45  ;;  %v7445_v62 = vshll.u32 %v7204_v27, 16  ;;  %v8044_v42 = vld [vmem:[#allocation5 + $0x18] sm:$0xff]  ;;  %v8045_v53 = vld [vmem:[#allocation5 + $0x20] sm:$0xff]  ;;  %vm12009_vm12 = vmmov %vm12006_vm0 }
 0x315   : > { %v8926_v6 = vcombine.low %v6437_v17, %v6447_v31  ;;  %v5449_v43 = vor.u32 %v5448_v59, %v5444_v21  ;;  %v7897_v51 = vsel %vm9659_vm9, %v9007_v36, %v7896_v41  ;;  %v7898_v8 = vrot.slane %v7896_v41, 4  ;;  %v6174_v0 = vld [vmem:[#allocation4 + $0xa4] sm:$0x1]  ;;  %v5130_v56 = vld [vmem:[#allocation4 + $0x88] sm:$0xf]  ;;  %vm12010_vm8 = vmmov %vm12006_vm0 }
 0x316   : > { %v5445_v40 = vsel %vm9666_vm10, %v5440_v26, %v5444_v21  ;;  %v7444_v57 = vrot.slane %v7442_v60, 4  ;;  %v7451_v1 = vshll.u32 %v7205_v63, 16  ;;  %v7455_v16 = vshrl.u32 %v7205_v63, 16  ;;  %v5129_v38 = vld [vmem:[#allocation4 + $0x84] sm:$0xf]  ;;  %v11518_v25 = vpop.permute.xlu1 %6090  ;;  %vm12011_vm14 = vmmov %vm12006_vm0 }
 0x317   : > { %6636 = vrot.lane.b32.xlu0 %v8926_v6, %s9374_s13  ;;  %v5450_v45 = vrot.slane %v5449_v43, 4  ;;  %v7900_v33 = vsel %vm9659_vm9, %v7898_v8, %v7899_v37  ;;  %v7461_v5 = vshll.u32 %v7206_v32, 16  ;;  %v7447_v58 = vrot.slane %v7445_v62, 5  ;;  %v5131_v63 = vld [vmem:[#allocation4 + $0x8c] sm:$0x1] }
 0x318   : > { %v9023_v49 = vcombine.low %v7897_v51, %v7900_v33  ;;  %v7453_v10 = vrot.slane %v7451_v1, 5  ;;  %v6473_v11 = vshrl.u32 %v6172_v54, 16  ;;  %v7457_v34 = vrot.slane %v7455_v16, 4  ;;  %v6716_v32 = vld [vmem:[#allocation4 + $0x9c] sm:$0xe] }
 0x319   : > { %v5455_v12 = vsel %vm9666_vm10, %v5450_v45, %v5454_v7  ;;  %v7463_v44 = vrot.slane %v7461_v5, 5  ;;  %v6476_v15 = vshll.u32 %v6172_v54, 16  ;;  %9204 = vmatmul.mubr.msk.bf16.gmra.mrb[4].mxu1 %vm12006_vm0, %v8044_v42  ;;  %v7448_v27 = vor.u32 %v7447_v58, %v7444_v57  ;;  %v9351_v26 = vld [vmem:[#allocation4 + $0xb4] sm:$0xff]   ;;  %v6717_v51 = vld [vmem:[#allocation4 + $0xa0] sm:$0xf]  ;;  %v11528_v54 = vpop.permute.xlu0 %7129 }
 0x31a   : > { %v8864_v30 = vcombine.low %v5445_v40, %v5455_v12  ;;  %v6475_v24 = vrot.slane %v6473_v11, 4  ;;  %v6482_v28 = vshll.u32 %v6173_v55, 16  ;;  %9207 = vmatprep.mubr.msk.bf16.mxu1 %vm12007_vm11, %v8045_v53  ;;  %v7458_v46 = vor.u32 %v7457_v34, %v7453_v10  ;;  %v11524_v31 = vpop.permute.xlu1 %6630  ;;  %v6718_v8 = vld [vmem:[#allocation4 + $0xa4] sm:$0x1]  ;;  %v5680_v42 = vld [vmem:[#allocation4 + $0xa0] sm:$0xf]  ;;  %vm12014_vm11 = vmmov %vm12006_vm0 }
 0x31b   : > { %7999 = vrot.lane.b32.xlu0 %v9023_v49, %s9373_s12  ;;  %v6478_v13 = vrot.slane %v6476_v15, 5  ;;  %v6486_v17 = vshrl.u32 %v6173_v55, 16  ;;  %v6492_v21 = vshll.u32 %v6174_v0, 16  ;;  %v7449_v14 = vrot.slane %v7448_v27, 4  ;;  %v5679_v55 = vld [vmem:[#allocation4 + $0x9c] sm:$0xe] }
 0x31c   : > { %5600 = vrot.lane.b32.xlu1 %v8864_v30, %s9369_s8  ;;  %v6484_v35 = vrot.slane %v6482_v28, 5  ;;  %v5409_v50 = vshrl.u32 %v5129_v38, 16  ;;  %v5412_v3 = vshll.u32 %v5129_v38, 16  ;;  %v7459_v22 = vrot.slane %v7458_v46, 4  ;;  %v5681_v11 = vld [vmem:[#allocation4 + $0xa4] sm:$0x1] }
 0x31d   : > { %v6479_v19 = vor.u32 %v6478_v13, %v6475_v24  ;;  %v6488_v52 = vrot.slane %v6486_v17, 4  ;;  %v6494_v39 = vrot.slane %v6492_v21, 5  ;;  %v7454_v59 = vsel %vm9666_vm10, %v7449_v14, %v7453_v10  ;;  %v7213_v38 = vld [vmem:[#allocation4 + $0xa8] sm:$0xf]  ;;  %v7214_v53 = vld [vmem:[#allocation4 + $0xac] sm:$0xf] }
 0x31e   : > { %v5411_v7 = vrot.slane %v5409_v50, 4  ;;  %v5414_v36 = vrot.slane %v5412_v3, 5  ;;  %v5418_v41 = vshll.u32 %v5130_v56, 16  ;;  %v7464_v37 = vsel %vm9666_vm10, %v7459_v22, %v7463_v44  ;;  %v11536_v30 = vpop.permute.xlu1 %7127  ;;  %v7215_v14 = vld [vmem:[#allocation4 + $0xb0] sm:$0x1] }
 0x31f   : > { %v6480_v60 = vrot.slane %v6479_v19, 4  ;;  %v6489_v6 = vor.u32 %v6488_v52, %v6484_v35  ;;  %v5422_v43 = vshrl.u32 %v5130_v56, 16  ;;  %v8989_v40 = vcombine.low %v7454_v59, %v7464_v37  ;;  %v6175_v52 = vld [vmem:[#allocation4 + $0xa8] sm:$0xf] }
 0x320   : > { %v5415_v57 = vor.u32 %v5414_v36, %v5411_v7  ;;  %v5420_v62 = vrot.slane %v5418_v41, 5  ;;  %v5428_v1 = vshll.u32 %v5131_v63, 16  ;;  %vm12008_vm13 = vcmask 31744   ;;  %v6176_v36 = vld [vmem:[#allocation4 + $0xac] sm:$0xf] }
 0x321   : > { %5095 = vst.msk [vmem:[#allocation5 + $0x78] sm:$0xff] %vm12008_vm13, %v9351_v26  ;;  %v6485_v45 = vsel %vm9666_vm10, %v6480_v60, %v6484_v35  ;;  %v6490_v33 = vrot.slane %v6489_v6, 4  ;;  %v5424_v16 = vrot.slane %v5422_v43, 4  ;;  %v8944_v5 = vrot.slane %v6716_v32, 9  ;;  %7675 = vrot.lane.b32.xlu1 %v8989_v40, %s9375_s14  ;;  %v11544_v35 = vpop.permute.xlu0 %7669  ;;  %v6177_v41 = vld [vmem:[#allocation4 + $0xb0] sm:$0x1]  ;;  %vm12015_vm13 = vmmov %vm12006_vm0 }
 0x322   : > { %v5416_v0 = vrot.slane %v5415_v57, 4  ;;  %v5430_v49 = vrot.slane %v5428_v1, 5  ;;  %v6862_v58 = vrot.slane %v6717_v51, 5  ;;  %v6865_v10 = vrot.slane %v6718_v8, 5  ;;  %v7757_v40 = vld [vmem:[#allocation4 + $0xa8] sm:$0xe] }
 0x323   : > { %v6495_v12 = vsel %vm9666_vm10, %v6490_v33, %v6494_v39  ;;  %v5425_v34 = vor.u32 %v5424_v16, %v5420_v62  ;;  %v8881_v44 = vrot.slane %v5679_v55, 9  ;;  %v5829_v15 = vrot.slane %v5680_v42, 5  ;;  %v9335_v33 = vld [vmem:[#allocation4 + $0xa8] sm:$0xff]  }
 0x324   : > { %v8928_v27 = vcombine.low %v6485_v45, %v6495_v12  ;;  %v5421_v24 = vsel %vm9666_vm10, %v5416_v0, %v5420_v62  ;;  %v6863_v28 = vsel %vm9659_vm9, %v8944_v5, %v6862_v58  ;;  %v6864_v56 = vrot.slane %v6862_v58, 4  ;;  %v7758_v45 = vld [vmem:[#allocation4 + $0xac] sm:$0xf]  ;;  %v7759_v58 = vld [vmem:[#allocation4 + $0xb0] sm:$0x1] }
 0x325   : > { %v5426_v46 = vrot.slane %v5425_v34, 4  ;;  %v5830_v13 = vsel %vm9659_vm9, %v8881_v44, %v5829_v15  ;;  %v5831_v17 = vrot.slane %v5829_v15, 4  ;;  %v5832_v21 = vrot.slane %v5681_v11, 5  ;;  %v5593_v57 = vpop.permute.xlu1 %5592  ;;  %v7210_v15 = vld [vmem:[#allocation4 + $0x9c] sm:$0xf] }
 0x326   : > { %6640 = vrot.lane.b32.xlu0 %v8928_v27, %s9374_s13  ;;  %v6866_v50 = vsel %vm9659_vm9, %v6864_v56, %v6865_v10  ;;  %v7514_v3 = vshrl.u32 %v7213_v38, 16  ;;  %v7517_v22 = vshll.u32 %v7213_v38, 16  ;;  %v7523_v19 = vshll.u32 %v7214_v53, 16  ;;  %5632 = vst.msk [vmem:[#allocation5 + $0x40] sm:$0xff] %vm1581_vm15, %v5593_v57  ;;  %v6089_v10 = vpop.permute.xlu0 %6088 }
 0x327   : > { %v5431_v39 = vsel %vm9666_vm10, %v5426_v46, %v5430_v49  ;;  %v8960_v63 = vcombine.low %v6863_v28, %v6866_v50  ;;  %v5833_v59 = vsel %vm9659_vm9, %v5831_v17, %v5832_v21  ;;  %v7527_v7 = vshrl.u32 %v7214_v53, 16  ;;  %5952 = vst.msk [vmem:[#allocation5 + $0x40] sm:$0xff] %vm1905_vm1, %v11472_v9  ;;  %v7212_v50 = vld [vmem:[#allocation4 + $0xa4] sm:$0x1] }
 0x328   : > { %v8863_v32 = vcombine.low %v5421_v24, %v5431_v39  ;;  %v8897_v26 = vcombine.low %v5830_v13, %v5833_v59  ;;  %v7516_v37 = vrot.slane %v7514_v3, 4  ;;  %v7519_v60 = vrot.slane %v7517_v22, 5  ;;  %6128 = vst.msk [vmem:[#allocation5 + $0x40] sm:$0xff] %vm2082_vm2, %v6089_v10  ;;  %v7211_v13 = vld [vmem:[#allocation4 + $0xa0] sm:$0xf] }
 0x329   : > { %v7525_v6 = vrot.slane %v7523_v19, 5  ;;  %v7529_v43 = vrot.slane %v7527_v7, 4  ;;  %v7533_v51 = vshll.u32 %v7215_v14, 16  ;;  %v6497_v8 = vshrl.u32 %v6175_v52, 16 }
 0x32a   : > { %5598 = vrot.lane.b32.xlu1 %v8863_v32, %s9369_s8  ;;  %6960 = vrot.lane.b32.xlu0 %v8960_v63, %s9372_s11  ;;  %v7520_v62 = vor.u32 %v7519_v60, %v7516_v37  ;;  %v6500_v1 = vshll.u32 %v6175_v52, 16  ;;  %v6506_v55 = vshll.u32 %v6176_v36, 16  ;;  %v6510_v42 = vshrl.u32 %v6176_v36, 16  ;;  %v5135_v63 = vld [vmem:[#allocation4 + $0x9c] sm:$0xf] }
 0x32b   : > { %v7530_v16 = vor.u32 %v7529_v43, %v7525_v6  ;;  %v7535_v5 = vrot.slane %v7533_v51, 5  ;;  %v6499_v0 = vrot.slane %v6497_v8, 4  ;;  %v6516_v49 = vshll.u32 %v6177_v41, 16  ;;  %v5136_v32 = vld [vmem:[#allocation4 + $0xa0] sm:$0xf] }
 0x32c   : > { %v7521_v11 = vrot.slane %v7520_v62, 4  ;;  %v6502_v12 = vrot.slane %v6500_v1, 5  ;;  %v6508_v34 = vrot.slane %v6506_v55, 5  ;;  %v6512_v44 = vrot.slane %v6510_v42, 4  ;;  %v5137_v43 = vld [vmem:[#allocation4 + $0xa4] sm:$0x1] }
 0x32d   : > { %v7531_v38 = vrot.slane %v7530_v16, 4  ;;  %v6518_v53 = vrot.slane %v6516_v49, 5  ;;  %v9008_v27 = vrot.slane %v7757_v40, 9  ;;  %v7903_v24 = vrot.slane %v7758_v45, 5  ;;  %v7760_v1 = vld [vmem:[#allocation4 + $0xb4] sm:$0xe] }
 0x32e   : > { %7137 = vrot.lane.b32.xlu0 %v9335_v33, %s9371_s10  ;;  %5922 = vrot.lane.b32.xlu1 %v8897_v26, %s9368_s30  ;;  %v7526_v28 = vsel %vm9666_vm10, %v7521_v11, %v7525_v6  ;;  %v6503_v56 = vor.u32 %v6502_v12, %v6499_v0  ;;  %v6513_v9 = vor.u32 %v6512_v44, %v6508_v34  ;;  %v7906_v46 = vrot.slane %v7759_v58, 5  ;;  %v7761_v16 = vld [vmem:[#allocation4 + $0xb8] sm:$0xf]  ;;  %v7762_v12 = vld [vmem:[#allocation4 + $0xbc] sm:$0x1] }
 0x32f   : > { %v7536_v17 = vsel %vm9666_vm10, %v7531_v38, %v7535_v5  ;;  %v7904_v21 = vsel %vm9659_vm9, %v9008_v27, %v7903_v24  ;;  %v7905_v14 = vrot.slane %v7903_v24, 4  ;;  %v7490_v3 = vshrl.u32 %v7210_v15, 16  ;;  %v6719_v5 = vld [vmem:[#allocation4 + $0xa8] sm:$0xe] }
 0x330   : > { %v8992_v22 = vcombine.low %v7526_v28, %v7536_v17  ;;  %v6504_v19 = vrot.slane %v6503_v56, 4  ;;  %v6514_v52 = vrot.slane %v6513_v9, 4  ;;  %v7493_v39 = vshll.u32 %v7210_v15, 16  ;;  %v6629_v51 = vpop.permute.xlu0 %6628  ;;  %v6721_v17 = vld [vmem:[#allocation4 + $0xb0] sm:$0x1] }
 0x331   : > { %v7907_v59 = vsel %vm9659_vm9, %v7905_v14, %v7906_v46  ;;  %v7492_v7 = vrot.slane %v7490_v3, 4  ;;  %v7499_v36 = vshll.u32 %v7211_v13, 16  ;;  %v7503_v41 = vshrl.u32 %v7211_v13, 16  ;;  %6670 = vst.msk [vmem:[#allocation5 + $0x30] sm:$0xff] %vm2627_vm3, %v6629_v51  ;;  %v5683_v3 = vld [vmem:[#allocation4 + $0xac] sm:$0xf] }
 0x332   : > { %7681 = vrot.lane.b32.xlu0 %v8992_v22, %s9375_s14  ;;  %v6509_v26 = vsel %vm9666_vm10, %v6504_v19, %v6508_v34  ;;  %v6519_v37 = vsel %vm9666_vm10, %v6514_v52, %v6518_v53  ;;  %v9024_v60 = vcombine.low %v7904_v21, %v7907_v59  ;;  %v7495_v6 = vrot.slane %v7493_v39, 5  ;;  %6990 = vst.msk [vmem:[#allocation5 + $0x30] sm:$0xff] %vm2948_vm4, %v11515_v18  ;;  %v7668_v0 = vpop.permute.xlu1 %7667  ;;  %v6720_v18 = vld [vmem:[#allocation4 + $0xac] sm:$0xf]  ;;  %v5684_v39 = vld [vmem:[#allocation4 + $0xb0] sm:$0x1] }
 0x333   : > { %v8929_v8 = vcombine.low %v6509_v26, %v6519_v37  ;;  %v7501_v40 = vrot.slane %v7499_v36, 5  ;;  %v7505_v57 = vrot.slane %v7503_v41, 4  ;;  %v7509_v62 = vshll.u32 %v7212_v50, 16  ;;  %7167 = vst.msk [vmem:[#allocation5 + $0x30] sm:$0xff] %vm3126_vm5, %v11380_v61  ;;  %v5682_v50 = vld [vmem:[#allocation4 + $0xa8] sm:$0xe] }
 0x334   : > { %v7496_v55 = vor.u32 %v7495_v6, %v7492_v7  ;;  %v5457_v42 = vshrl.u32 %v5135_v63, 16  ;;  %v5460_v45 = vshll.u32 %v5135_v63, 16  ;;  %v5466_v33 = vshll.u32 %v5136_v32, 16  ;;  %7710 = vst.msk [vmem:[#allocation5 + $0x28] sm:$0xff] %vm3671_vm6, %v7668_v0  ;;  %7711 = vst.msk [vmem:[#allocation5 + $0x30] sm:$0xff] %vm3671_vm6, %v11544_v35  ;;  %v11586_v53 = vpop.permute.xlu0 %7993 }
 0x335   : > { %6642 = vrot.lane.b32.xlu1 %v8929_v8, %s9374_s13  ;;  %v7506_v49 = vor.u32 %v7505_v57, %v7501_v40  ;;  %v7511_v58 = vrot.slane %v7509_v62, 5  ;;  %v5470_v10 = vshrl.u32 %v5136_v32, 16  ;;  %v5476_v11 = vshll.u32 %v5137_v43, 16  ;;  %8030 = vst.msk [vmem:[#allocation5 + $0x28] sm:$0xff] %vm3992_vm7, %v11497_v48  ;;  %8031 = vst.msk [vmem:[#allocation5 + $0x30] sm:$0xff] %vm3992_vm7, %v11449_v20 }
 0x336   : > { %8001 = vrot.lane.b32.xlu0 %v9024_v60, %s9373_s12  ;;  %v7497_v34 = vrot.slane %v7496_v55, 4  ;;  %v5459_v44 = vrot.slane %v5457_v42, 4  ;;  %v5462_v15 = vrot.slane %v5460_v45, 5  ;;  %v5468_v38 = vrot.slane %v5466_v33, 5  ;;  %v7216_v6 = vld [vmem:[#allocation4 + $0xb4] sm:$0xf] }
 0x337   : > { %v7507_v27 = vrot.slane %v7506_v49, 4  ;;  %v5472_v24 = vrot.slane %v5470_v10, 4  ;;  %v5478_v61 = vrot.slane %v5476_v11, 5  ;;  %v9009_v28 = vrot.slane %v7760_v1, 9  ;;  %v7217_v43 = vld [vmem:[#allocation4 + $0xb8] sm:$0xf] }
 0x338   : > { %v7502_v56 = vsel %vm9666_vm10, %v7497_v34, %v7501_v40  ;;  %v5463_v9 = vor.u32 %v5462_v15, %v5459_v44  ;;  %v7910_v46 = vrot.slane %v7761_v16, 5  ;;  %v7913_v13 = vrot.slane %v7762_v12, 5  ;;  %v11598_v41 = vpop.permute.xlu0 %5916  ;;  %v7218_v1 = vld [vmem:[#allocation4 + $0xbc] sm:$0x1]  ;;  %v6178_v55 = vld [vmem:[#allocation4 + $0xb4] sm:$0xf] }
 0x339   : > { %v7512_v35 = vsel %vm9666_vm10, %v7507_v27, %v7511_v58  ;;  %v5473_v48 = vor.u32 %v5472_v24, %v5468_v38  ;;  %v8945_v21 = vrot.slane %v6719_v5, 9  ;;  %v6869_v14 = vrot.slane %v6720_v18, 5  ;;  %v6179_v12 = vld [vmem:[#allocation4 + $0xb8] sm:$0xf]  ;;  %v6180_v44 = vld [vmem:[#allocation4 + $0xbc] sm:$0x1] }
 0x33a   : > { %v8991_v22 = vcombine.low %v7502_v56, %v7512_v35  ;;  %v5464_v19 = vrot.slane %v5463_v9, 4  ;;  %v7911_v20 = vsel %vm9659_vm9, %v9009_v28, %v7910_v46  ;;  %v7912_v52 = vrot.slane %v7910_v46, 4  ;;  %v5591_v51 = vpop.permute.xlu1 %5590  ;;  %v5138_v28 = vld [vmem:[#allocation4 + $0xa8] sm:$0xf] }
 0x33b   : > { %v5474_v63 = vrot.slane %v5473_v48, 4  ;;  %v6870_v59 = vsel %vm9659_vm9, %v8945_v21, %v6869_v14  ;;  %v6871_v7 = vrot.slane %v6869_v14, 4  ;;  %v6872_v36 = vrot.slane %v6721_v17, 5  ;;  %5631 = vst.msk [vmem:[#allocation5 + $0x38] sm:$0xff] %vm1581_vm15, %v5591_v51 }
 0x33c   : > { %7679 = vrot.lane.b32.xlu1 %v8991_v22, %s9375_s14  ;;  %v5469_v32 = vsel %vm9666_vm10, %v5464_v19, %v5468_v38  ;;  %v7914_v26 = vsel %vm9659_vm9, %v7912_v52, %v7913_v13  ;;  %v8882_v37 = vrot.slane %v5682_v50, 9  ;;  %v5836_v60 = vrot.slane %v5683_v3, 5  ;;  %v8046_v42 = vld [vmem:[#allocation5 + $0x28] sm:$0xff]  ;;  %5951 = vst.msk [vmem:[#allocation5 + $0x38] sm:$0xff] %vm1905_vm1, %v11507_v2  ;;  %v8047_v0 = vld [vmem:[#allocation5 + $0x30] sm:$0xff]  ;;  %v11628_v56 = vpop.permute.xlu0 %7991  ;;  %v9339_v52 = vld [vmem:[#allocation4 + $0xb4] sm:$0xff]  }
 0x33d   : > { %v5479_v8 = vsel %vm9666_vm10, %v5474_v63, %v5478_v61  ;;  %v9025_v40 = vcombine.low %v7911_v20, %v7914_v26  ;;  %v6873_v57 = vsel %vm9659_vm9, %v6871_v7, %v6872_v36  ;;  %v5839_v62 = vrot.slane %v5684_v39, 5  ;;  %9208 = vmatmul.mubr.msk.bf16.gmra.mrb[8].mxu1 %vm12009_vm12, %v8046_v42  ;;  %6127 = vst.msk [vmem:[#allocation5 + $0x38] sm:$0xff] %vm2082_vm2, %v11368_v4  ;;  %v5140_v3 = vld [vmem:[#allocation4 + $0xb0] sm:$0x1]  ;;  %v9338_v7 = vld [vmem:[#allocation4 + $0xb4] sm:$0xff]   ;;  %vm12016_vm12 = vmmov %vm12006_vm0 }
 0x33e   : > { %v8865_v45 = vcombine.low %v5469_v32, %v5479_v8  ;;  %v8961_v33 = vcombine.low %v6870_v59, %v6873_v57  ;;  %v5837_v16 = vsel %vm9659_vm9, %v8882_v37, %v5836_v60  ;;  %v5838_v5 = vrot.slane %v5836_v60, 4  ;;  %9211 = vmatprep.mubr.msk.bf16.mxu1 %vm12010_vm8, %v8047_v0  ;;  %6671 = vst.msk [vmem:[#allocation5 + $0x38] sm:$0xff] %vm2627_vm3, %v11524_v31  ;;  %v11624_v18 = vpop.permute.xlu1 %6954  ;;  %v6722_v8 = vld [vmem:[#allocation4 + $0xb4] sm:$0xe]  ;;  %vm12017_vm8 = vmmov %vm12006_vm0 }
 0x33f   : > { %8003 = vrot.lane.b32.xlu0 %v9025_v40, %s9373_s12  ;;  %v7538_v49 = vshrl.u32 %v7216_v6, 16  ;;  %v7541_v58 = vshll.u32 %v7216_v6, 16  ;;  %v7547_v10 = vshll.u32 %v7217_v43, 16  ;;  %v7551_v11 = vshrl.u32 %v7217_v43, 16  ;;  %6991 = vst.msk [vmem:[#allocation5 + $0x38] sm:$0xff] %vm2948_vm4, %v11492_v47 }
 0x340   : > { %5602 = vrot.lane.b32.xlu1 %v8865_v45, %s9369_s8  ;;  %v5840_v2 = vsel %vm9659_vm9, %v5838_v5, %v5839_v62  ;;  %v7557_v34 = vshll.u32 %v7218_v1, 16  ;;  %v6521_v15 = vshrl.u32 %v6178_v55, 16  ;;  %v6524_v38 = vshll.u32 %v6178_v55, 16  ;;  %7168 = vst.msk [vmem:[#allocation5 + $0x38] sm:$0xff] %vm3126_vm5, %v11536_v30  ;;  %v5139_v47 = vld [vmem:[#allocation4 + $0xac] sm:$0xf]  ;;  %v11639_v57 = vpop.permute.xlu0 %6952 }
 0x341   : > { %v8898_v27 = vcombine.low %v5837_v16, %v5840_v2  ;;  %v7540_v24 = vrot.slane %v7538_v49, 4  ;;  %v7543_v61 = vrot.slane %v7541_v58, 5  ;;  %v7549_v4 = vrot.slane %v7547_v10, 5  ;;  %v6723_v40 = vld [vmem:[#allocation4 + $0xb8] sm:$0xf] }
 0x342   : > { %v7553_v9 = vrot.slane %v7551_v11, 4  ;;  %v7559_v46 = vrot.slane %v7557_v34, 5  ;;  %v6523_v13 = vrot.slane %v6521_v15, 4  ;;  %v6526_v17 = vrot.slane %v6524_v38, 5  ;;  %v11634_v20 = vpop.permute.xlu1 %5914  ;;  %v6724_v45 = vld [vmem:[#allocation4 + $0xbc] sm:$0x1] }
 0x343   : > { %5924 = vrot.lane.b32.xlu0 %v8898_v27, %s9368_s30  ;;  %v7544_v31 = vor.u32 %v7543_v61, %v7540_v24  ;;  %v6530_v35 = vshll.u32 %v6179_v12, 16  ;;  %v6534_v48 = vshrl.u32 %v6179_v12, 16  ;;  %v6540_v21 = vshll.u32 %v6180_v44, 16  ;;  %v5142_v34 = vld [vmem:[#allocation4 + $0xb8] sm:$0xf] }
 0x344   : > { %6962 = vrot.lane.b32.xlu1 %v8961_v33, %s9372_s11  ;;  %v7554_v14 = vor.u32 %v7553_v9, %v7549_v4  ;;  %v6527_v50 = vor.u32 %v6526_v17, %v6523_v13  ;;  %v5481_v22 = vshrl.u32 %v5138_v28, 16  ;;  %v5484_v19 = vshll.u32 %v5138_v28, 16  ;;  %v5141_v33 = vld [vmem:[#allocation4 + $0xb4] sm:$0xf]  ;;  %v5143_v27 = vld [vmem:[#allocation4 + $0xbc] sm:$0x1] }
 0x345   : > { %v7545_v39 = vrot.slane %v7544_v31, 4  ;;  %v6532_v63 = vrot.slane %v6530_v35, 5  ;;  %v6536_v30 = vrot.slane %v6534_v48, 4  ;;  %v6542_v59 = vrot.slane %v6540_v21, 5  ;;  %v7219_v61 = vld [vmem:[#allocation4 + $0xc0] sm:$0xf]  ;;  %v11655_v21 = vpop.permute.xlu0 %7133 }
 0x346   : > { %v7555_v36 = vrot.slane %v7554_v14, 4  ;;  %v6528_v32 = vrot.slane %v6527_v50, 4  ;;  %v5483_v26 = vrot.slane %v5481_v22, 4  ;;  %v5486_v37 = vrot.slane %v5484_v19, 5  ;;  %v11646_v16 = vpop.permute.xlu1 %6094  ;;  %v7220_v48 = vld [vmem:[#allocation4 + $0xc4] sm:$0xf] }
 0x347   : > { %6100 = vrot.lane.b32.xlu0 %v9339_v52, %s9370_s9  ;;  %v7550_v60 = vsel %vm9666_vm10, %v7545_v39, %v7549_v4  ;;  %v6537_v6 = vor.u32 %v6536_v30, %v6532_v63  ;;  %v5490_v43 = vshll.u32 %v5139_v47, 16  ;;  %v5494_v51 = vshrl.u32 %v5139_v47, 16 }
 0x348   : > { %7139 = vrot.lane.b32.xlu1 %v9338_v7, %s9371_s10  ;;  %v7560_v62 = vsel %vm9666_vm10, %v7555_v36, %v7559_v46  ;;  %v6533_v1 = vsel %vm9666_vm10, %v6528_v32, %v6532_v63  ;;  %v5487_v55 = vor.u32 %v5486_v37, %v5483_v26  ;;  %v5500_v42 = vshll.u32 %v5140_v3, 16  ;;  %v7221_v3 = vld [vmem:[#allocation4 + $0xc8] sm:$0x1]  ;;  %v5686_v7 = vld [vmem:[#allocation4 + $0xb8] sm:$0xf] }
 0x349   : > { %v8993_v5 = vcombine.low %v7550_v60, %v7560_v62  ;;  %v6538_v0 = vrot.slane %v6537_v6, 4  ;;  %v5492_v49 = vrot.slane %v5490_v43, 5  ;;  %v5496_v58 = vrot.slane %v5494_v51, 4  ;;  %v5687_v60 = vld [vmem:[#allocation4 + $0xbc] sm:$0x1] }
 0x34a   : > { %v5488_v10 = vrot.slane %v5487_v55, 4  ;;  %v5502_v11 = vrot.slane %v5500_v42, 5  ;;  %v8946_v12 = vrot.slane %v6722_v8, 9  ;;  %v6876_v2 = vrot.slane %v6723_v40, 5  ;;  %v11660_v19 = vpop.permute.xlu1 %6634  ;;  %v7763_v40 = vld [vmem:[#allocation4 + $0xc0] sm:$0xe] }
 0x34b   : > { %v6543_v44 = vsel %vm9666_vm10, %v6538_v0, %v6542_v59  ;;  %v5497_v15 = vor.u32 %v5496_v58, %v5492_v49  ;;  %v6879_v38 = vrot.slane %v6724_v45, 5  ;;  %v5505_v24 = vshrl.u32 %v5141_v33, 16  ;;  %v5685_v59 = vld [vmem:[#allocation4 + $0xb4] sm:$0xe]  ;;  %v7764_v45 = vld [vmem:[#allocation4 + $0xc4] sm:$0xf] }
 0x34c   : > { %7683 = vrot.lane.b32.xlu1 %v8993_v5, %s9375_s14  ;;  %v8930_v4 = vcombine.low %v6533_v1, %v6543_v44  ;;  %v5493_v28 = vsel %vm9666_vm10, %v5488_v10, %v5492_v49  ;;  %v6877_v9 = vsel %vm9659_vm9, %v8946_v12, %v6876_v2  ;;  %v6878_v46 = vrot.slane %v6876_v2, 4  ;;  %v7765_v58 = vld [vmem:[#allocation4 + $0xc8] sm:$0x1]  ;;  %v11666_v10 = vpop.permute.xlu0 %7673 }
 0x34d   : > { %v5498_v13 = vrot.slane %v5497_v15, 4  ;;  %v5507_v17 = vrot.slane %v5505_v24, 4  ;;  %v5508_v31 = vshll.u32 %v5141_v33, 16  ;;  %v5514_v35 = vshll.u32 %v5142_v34, 16 }
 0x34e   : > { %6644 = vrot.lane.b32.xlu0 %v8930_v4, %s9374_s13  ;;  %v6880_v14 = vsel %vm9659_vm9, %v6878_v46, %v6879_v38  ;;  %v5518_v50 = vshrl.u32 %v5142_v34, 16  ;;  %v5524_v47 = vshll.u32 %v5143_v27, 16  ;;  %v7562_v22 = vshrl.u32 %v7219_v61, 16  ;;  %v11668_v44 = vpop.permute.xlu1 %7131 }
 0x34f   : > { %v5503_v52 = vsel %vm9666_vm10, %v5498_v13, %v5502_v11  ;;  %v8962_v39 = vcombine.low %v6877_v9, %v6880_v14  ;;  %v5510_v63 = vrot.slane %v5508_v31, 5  ;;  %v5516_v30 = vrot.slane %v5514_v35, 5  ;;  %v9340_v11 = vld [vmem:[#allocation4 + $0xc0] sm:$0xff]  }
 0x350   : > { %v8866_v36 = vcombine.low %v5493_v28, %v5503_v52  ;;  %v5520_v32 = vrot.slane %v5518_v50, 4  ;;  %v5526_v26 = vrot.slane %v5524_v47, 5  ;;  %v7564_v37 = vrot.slane %v7562_v22, 4  ;;  %v6182_v13 = vld [vmem:[#allocation4 + $0xc4] sm:$0xf] }
 0x351   : > { %v5511_v6 = vor.u32 %v5510_v63, %v5507_v17  ;;  %v7565_v43 = vshll.u32 %v7219_v61, 16  ;;  %v7571_v51 = vshll.u32 %v7220_v48, 16  ;;  %v7575_v8 = vshrl.u32 %v7220_v48, 16  ;;  %v6181_v61 = vld [vmem:[#allocation4 + $0xc0] sm:$0xf] }
 0x352   : > { %5604 = vrot.lane.b32.xlu1 %v8866_v36, %s9369_s8  ;;  %6964 = vrot.lane.b32.xlu0 %v8962_v39, %s9372_s11  ;;  %v5521_v62 = vor.u32 %v5520_v32, %v5516_v30  ;;  %v7581_v1 = vshll.u32 %v7221_v3, 16  ;;  %v8883_v55 = vrot.slane %v5685_v59, 9  ;;  %v5843_v42 = vrot.slane %v5686_v7, 5  ;;  %v6183_v3 = vld [vmem:[#allocation4 + $0xc8] sm:$0x1]  ;;  %v6093_v7 = vpop.permute.xlu0 %6092 }
 0x353   : > { %v5512_v33 = vrot.slane %v5511_v6, 4  ;;  %v7567_v5 = vrot.slane %v7565_v43, 5  ;;  %v7573_v0 = vrot.slane %v7571_v51, 5  ;;  %v7577_v49 = vrot.slane %v7575_v8, 4  ;;  %v6726_v59 = vld [vmem:[#allocation4 + $0xc4] sm:$0xf] }
 0x354   : > { %v5522_v12 = vrot.slane %v5521_v62, 4  ;;  %v7583_v2 = vrot.slane %v7581_v1, 5  ;;  %v5845_v34 = vrot.slane %v5843_v42, 4  ;;  %v5846_v24 = vrot.slane %v5687_v60, 5  ;;  %v7222_v60 = vld [vmem:[#allocation4 + $0xcc] sm:$0xf] }
 0x355   : > { %v5517_v15 = vsel %vm9666_vm10, %v5512_v33, %v5516_v30  ;;  %v7568_v38 = vor.u32 %v7567_v5, %v7564_v37  ;;  %v7578_v27 = vor.u32 %v7577_v49, %v7573_v0  ;;  %v9010_v28 = vrot.slane %v7763_v40, 9  ;;  %v7223_v6 = vld [vmem:[#allocation4 + $0xd0] sm:$0xf]  ;;  %v6725_v1 = vld [vmem:[#allocation4 + $0xc0] sm:$0xe] }
 0x356   : > { %7141 = vrot.lane.b32.xlu0 %v9340_v11, %s9371_s10  ;;  %v5527_v4 = vsel %vm9666_vm10, %v5522_v12, %v5526_v26  ;;  %v7917_v9 = vrot.slane %v7764_v45, 5  ;;  %v7920_v46 = vrot.slane %v7765_v58, 5  ;;  %v5844_v48 = vsel %vm9659_vm9, %v8883_v55, %v5843_v42  ;;  %v6727_v5 = vld [vmem:[#allocation4 + $0xc8] sm:$0x1] }
 0x357   : > { %v8867_v17 = vcombine.low %v5517_v15, %v5527_v4  ;;  %v7569_v31 = vrot.slane %v7568_v38, 4  ;;  %v7579_v35 = vrot.slane %v7578_v27, 4  ;;  %v5847_v14 = vsel %vm9659_vm9, %v5845_v34, %v5846_v24  ;;  %v9342_v15 = vld [vmem:[#allocation4 + $0xc0] sm:$0xff]  }
 0x358   : > { %v7918_v50 = vsel %vm9659_vm9, %v9010_v28, %v7917_v9  ;;  %v7919_v47 = vrot.slane %v7917_v9, 4  ;;  %v6545_v22 = vshrl.u32 %v6181_v61, 16  ;;  %v6548_v63 = vshll.u32 %v6181_v61, 16 }
 0x359   : > { %5606 = vrot.lane.b32.xlu1 %v8867_v17, %s9369_s8  ;;  %v7574_v52 = vsel %vm9666_vm10, %v7569_v31, %v7573_v0  ;;  %v7584_v39 = vsel %vm9666_vm10, %v7579_v35, %v7583_v2  ;;  %v6554_v30 = vshll.u32 %v6182_v13, 16  ;;  %v6558_v37 = vshrl.u32 %v6182_v13, 16  ;;  %v5597_v43 = vpop.permute.xlu1 %5596  ;;  %v7224_v2 = vld [vmem:[#allocation4 + $0xd4] sm:$0x1] }
 0x35a   : > { %v8994_v36 = vcombine.low %v7574_v52, %v7584_v39  ;;  %v7921_v32 = vsel %vm9659_vm9, %v7919_v47, %v7920_v46  ;;  %v6547_v26 = vrot.slane %v6545_v22, 4  ;;  %v8899_v51 = vcombine.low %v5844_v48, %v5847_v14  ;;  %5634 = vst.msk [vmem:[#allocation5 + $0x50] sm:$0xff] %vm1581_vm15, %v5597_v43 }
 0x35b   : > { %v6550_v8 = vrot.slane %v6548_v63, 5  ;;  %v6556_v40 = vrot.slane %v6554_v30, 5  ;;  %v6564_v62 = vshll.u32 %v6183_v3, 16  ;;  %v6560_v55 = vrot.slane %v6558_v37, 4  ;;  %5954 = vst.msk [vmem:[#allocation5 + $0x50] sm:$0xff] %vm1905_vm1, %v11598_v41 }
 0x35c   : > { %7685 = vrot.lane.b32.xlu0 %v8994_v36, %s9375_s14  ;;  %v6883_v42 = vrot.slane %v6726_v59, 5  ;;  %v9026_v45 = vcombine.low %v7918_v50, %v7921_v32  ;;  %v7586_v0 = vshrl.u32 %v7222_v60, 16  ;;  %v7589_v49 = vshll.u32 %v7222_v60, 16  ;;  %6130 = vst.msk [vmem:[#allocation5 + $0x50] sm:$0xff] %vm2082_vm2, %v6093_v7  ;;  %v7767_v3 = vld [vmem:[#allocation4 + $0xd0] sm:$0xf] }
 0x35d   : > { %5926 = vrot.lane.b32.xlu1 %v8899_v51, %s9368_s30  ;;  %v6551_v33 = vor.u32 %v6550_v8, %v6547_v26  ;;  %v6561_v58 = vor.u32 %v6560_v55, %v6556_v40  ;;  %v6566_v11 = vrot.slane %v6564_v62, 5  ;;  %v8947_v12 = vrot.slane %v6725_v1, 9  ;;  %v7766_v63 = vld [vmem:[#allocation4 + $0xcc] sm:$0xe]  ;;  %v7768_v7 = vld [vmem:[#allocation4 + $0xd4] sm:$0x1] }
 0x35e   : > { %v7595_v34 = vshll.u32 %v7223_v6, 16  ;;  %v7588_v27 = vrot.slane %v7586_v0, 4  ;;  %v7591_v24 = vrot.slane %v7589_v49, 5  ;;  %v7599_v61 = vshrl.u32 %v7223_v6, 16  ;;  %v6633_v41 = vpop.permute.xlu0 %6632  ;;  %v9344_v36 = vld [vmem:[#allocation4 + $0xcc] sm:$0xff]  }
 0x35f   : > { %v6552_v38 = vrot.slane %v6551_v33, 4  ;;  %v6562_v4 = vrot.slane %v6561_v58, 4  ;;  %v6885_v28 = vrot.slane %v6883_v42, 4  ;;  %v6886_v9 = vrot.slane %v6727_v5, 5  ;;  %6672 = vst.msk [vmem:[#allocation5 + $0x40] sm:$0xff] %vm2627_vm3, %v6633_v41 }
 0x360   : > { %8005 = vrot.lane.b32.xlu0 %v9026_v45, %s9373_s12  ;;  %v7597_v46 = vrot.slane %v7595_v34, 5  ;;  %v7601_v17 = vrot.slane %v7599_v61, 4  ;;  %6992 = vst.msk [vmem:[#allocation5 + $0x40] sm:$0xff] %vm2948_vm4, %v11639_v57  ;;  %v7592_v35 = vor.u32 %v7591_v24, %v7588_v27  ;;  %v7605_v48 = vshll.u32 %v7224_v2, 16 }
 0x361   : > { %6102 = vrot.lane.b32.xlu1 %v9342_v15, %s9370_s9  ;;  %v6557_v13 = vsel %vm9666_vm10, %v6552_v38, %v6556_v40  ;;  %v6567_v31 = vsel %vm9666_vm10, %v6562_v4, %v6566_v11  ;;  %7169 = vst.msk [vmem:[#allocation5 + $0x40] sm:$0xff] %vm3126_vm5, %v11528_v54  ;;  %v7672_v14 = vpop.permute.xlu1 %7671  ;;  %v6884_v57 = vsel %vm9659_vm9, %v8947_v12, %v6883_v42  ;;  %v7924_v30 = vrot.slane %v7767_v3, 5 }
 0x362   : > { %v8931_v50 = vcombine.low %v6557_v13, %v6567_v31  ;;  %v7602_v47 = vor.u32 %v7601_v17, %v7597_v46  ;;  %7713 = vst.msk [vmem:[#allocation5 + $0x40] sm:$0xff] %vm3671_vm6, %v11666_v10  ;;  %7712 = vst.msk [vmem:[#allocation5 + $0x38] sm:$0xff] %vm3671_vm6, %v7672_v14  ;;  %v6887_v22 = vsel %vm9659_vm9, %v6885_v28, %v6886_v9  ;;  %v7998_v54 = vpop.permute.xlu0 %7997  ;;  %v7593_v52 = vrot.slane %v7592_v35, 4 }
 0x363   : > { %8033 = vst.msk [vmem:[#allocation5 + $0x40] sm:$0xff] %vm3992_vm7, %v11586_v53  ;;  %8032 = vst.msk [vmem:[#allocation5 + $0x38] sm:$0xff] %vm3992_vm7, %v11628_v56  ;;  %v7607_v10 = vrot.slane %v7605_v48, 5  ;;  %v8963_v59 = vcombine.low %v6884_v57, %v6887_v22  ;;  %v9011_v32 = vrot.slane %v7766_v63, 9  ;;  %v7926_v37 = vrot.slane %v7924_v30, 4 }
 0x364   : > { %v7603_v39 = vrot.slane %v7602_v47, 4  ;;  %v7598_v53 = vsel %vm9666_vm10, %v7593_v52, %v7597_v46  ;;  %v7927_v60 = vrot.slane %v7768_v7, 5 }
 0x365   : > { %6646 = vrot.lane.b32.xlu1 %v8931_v50, %s9374_s13  ;;  %v7925_v29 = vsel %vm9659_vm9, %v9011_v32, %v7924_v30  ;;  %v11798_v30 = vld [vmem:[%s11983_s5] ss:$0 sm:$0xff]  ;;  %s11823_s13 = scalar_lea.vmem %s11985_s7, %s9051_s26 }
 0x366   : > { %v7608_v56 = vsel %vm9666_vm10, %v7603_v39, %v7607_v10  ;;  %vm12012_vm10 = vmmov %vm12006_vm0 }
 0x367   : > { %v5921_v6 = vpop.permute.xlu0 %5920  ;;  %v8995_v8 = vcombine.low %v7598_v53, %v7608_v56  ;;  %v8369_v53 = vld [vmem:[%s9652_s29 + $0x10] sm:$0xff] }
 0x368   : > { %v5595_v26 = vpop.permute.xlu1 %5594 }
 0x369   : > { %6966 = vrot.lane.b32.xlu1 %v8963_v59, %s9372_s11  ;;  %5633 = vst.msk [vmem:[#allocation5 + $0x48] sm:$0xff] %vm1581_vm15, %v5595_v26 }
 0x36a   : > { %5953 = vst.msk [vmem:[#allocation5 + $0x48] sm:$0xff] %vm1905_vm1, %v11634_v20  ;;  %v8048_v43 = vld [vmem:[#allocation5 + $0x38] sm:$0xff]  ;;  %v8049_v51 = vld [vmem:[#allocation5 + $0x40] sm:$0xff]  ;;  %v7928_v20 = vsel %vm9659_vm9, %v7926_v37, %v7927_v60  ;;  %vm12013_vm9 = vmmov %vm12006_vm0 }
 0x36b   : > { %6129 = vst.msk [vmem:[#allocation5 + $0x48] sm:$0xff] %vm2082_vm2, %v11518_v25  ;;  %9212 = vmatmul.mubr.msk.bf16.gmra.mrb[12].mxu1 %vm12011_vm14, %v8048_v43  ;;  %v9027_v40 = vcombine.low %v7925_v29, %v7928_v20  ;;  %v7996_v62 = vpop.permute.xlu0 %7995  ;;  %v8367_v43 = vld [vmem:[%s9652_s29] sm:$0xff]  ;;  %v8370_v20 = vld [vmem:[%s9652_s29 + $0x18] sm:$0xff] }
 0x36c   : > { %6673 = vst.msk [vmem:[#allocation5 + $0x48] sm:$0xff] %vm2627_vm3, %v11660_v19  ;;  %9215 = vmatprep.mubr.msk.bf16.mxu1 %vm12012_vm10, %v8049_v51  ;;  %v6959_v25 = vpop.permute.xlu1 %6958 }
 0x36d   : > { %7143 = vrot.lane.b32.xlu1 %v9344_v36, %s9371_s10  ;;  %6993 = vst.msk [vmem:[#allocation5 + $0x48] sm:$0xff] %vm2948_vm4, %v11624_v18  ;;  %v11804_v36 = vld [vmem:[%s11984_s6] ss:$0 sm:$0xff] }
 0x36e   : > { %7170 = vst.msk [vmem:[#allocation5 + $0x48] sm:$0xff] %vm3126_vm5, %v11668_v44 }
 0x36f   : > { %v6957_v1 = vpop.permute.xlu0 %6956 }
 0x370   : > { %v5919_v19 = vpop.permute.xlu1 %5918 }
 0x371   : > { %7687 = vrot.lane.b32.xlu1 %v8995_v8, %s9375_s14 }
 0x374   : > { %v6099_v55 = vpop.permute.xlu1 %6098 }
 0x375   : > { %8007 = vrot.lane.b32.xlu1 %v9027_v40, %s9373_s12 }
 0x376   : > { %v7678_v42 = vpop.permute.xlu0 %7677 }
 0x37a   : > { %v6097_v23 = vpop.permute.xlu0 %6096 }
 0x37d   : > { %v6639_v45 = vpop.permute.xlu1 %6638 }
 0x381   : > { %v7136_v33 = vpop.permute.xlu1 %7135 }
 0x389   : > { %v6637_v5 = vpop.permute.xlu0 %6636 }
 0x38a   : > { %6674 = vst.msk [vmem:[#allocation5 + $0x50] sm:$0xff] %vm2627_vm3, %v6637_v5 }
 0x38b   : > { %6994 = vst.msk [vmem:[#allocation5 + $0x50] sm:$0xff] %vm2948_vm4, %v6957_v1 }
 0x38c   : > { %7171 = vst.msk [vmem:[#allocation5 + $0x50] sm:$0xff] %vm3126_vm5, %v11655_v21 }
 0x38d   : > { %7715 = vst.msk [vmem:[#allocation5 + $0x50] sm:$0xff] %vm3671_vm6, %v7678_v42  ;;  %v8000_v44 = vpop.permute.xlu0 %7999 }
 0x38e   : > { %8035 = vst.msk [vmem:[#allocation5 + $0x50] sm:$0xff] %vm3992_vm7, %v7998_v54  ;;  %v5601_v18 = vpop.permute.xlu1 %5600 }
 0x38f   : > { %5636 = vst.msk [vmem:[#allocation5 + $0x60] sm:$0xff] %vm1581_vm15, %v5601_v18 }
 0x390   : > { %5956 = vst.msk [vmem:[#allocation5 + $0x60] sm:$0xff] %vm1905_vm1, %v5921_v6 }
 0x391   : > { %6132 = vst.msk [vmem:[#allocation5 + $0x60] sm:$0xff] %vm2082_vm2, %v6097_v23 }
 0x393   : > { %v7676_v0 = vpop.permute.xlu1 %7675 }
 0x394   : > { %7714 = vst.msk [vmem:[#allocation5 + $0x48] sm:$0xff] %vm3671_vm6, %v7676_v0 }
 0x395   : > { %8034 = vst.msk [vmem:[#allocation5 + $0x48] sm:$0xff] %vm3992_vm7, %v7996_v62  ;;  %v8051_v12 = vld [vmem:[#allocation5 + $0x50] sm:$0xff] }
 0x398   : > { %v6641_v49 = vpop.permute.xlu0 %6640 }
 0x399   : > { %6676 = vst.msk [vmem:[#allocation5 + $0x60] sm:$0xff] %vm2627_vm3, %v6641_v49 }
 0x39c   : > { %v5599_v21 = vpop.permute.xlu1 %5598  ;;  %v6961_v58 = vpop.permute.xlu0 %6960  ;;  %v8050_v11 = vld [vmem:[#allocation5 + $0x48] sm:$0xff] }
 0x39d   : > { %5635 = vst.msk [vmem:[#allocation5 + $0x58] sm:$0xff] %vm1581_vm15, %v5599_v21  ;;  %9216 = vmatmul.mubr.msk.bf16.gmra.mrb[16].mxu1 %vm12013_vm9, %v8050_v11  ;;  %v8373_v21 = vld [vmem:[%s9652_s29 + $0x30] sm:$0xff] }
 0x39e   : > { %6996 = vst.msk [vmem:[#allocation5 + $0x60] sm:$0xff] %vm2948_vm4, %v6961_v58  ;;  %9219 = vmatprep.mubr.msk.bf16.mxu1 %vm12006_vm0, %v8051_v12 }
 0x39f   : > { %5955 = vst.msk [vmem:[#allocation5 + $0x58] sm:$0xff] %vm1905_vm1, %v5919_v19  ;;  %v8368_v19 = vld [vmem:[%s9652_s29 + $0x8] sm:$0xff] }
 0x3a0   : > { %6131 = vst.msk [vmem:[#allocation5 + $0x58] sm:$0xff] %vm2082_vm2, %v11646_v16  ;;  %v7138_v2 = vpop.permute.xlu0 %7137  ;;  %v5923_v34 = vpop.permute.xlu1 %5922 }
 0x3a1   : > { %6675 = vst.msk [vmem:[#allocation5 + $0x58] sm:$0xff] %vm2627_vm3, %v6639_v45 }
 0x3a2   : > { %6995 = vst.msk [vmem:[#allocation5 + $0x58] sm:$0xff] %vm2948_vm4, %v6959_v25 }
 0x3a3   : > { %7173 = vst.msk [vmem:[#allocation5 + $0x60] sm:$0xff] %vm3126_vm5, %v7138_v2  ;;  %7172 = vst.msk [vmem:[#allocation5 + $0x58] sm:$0xff] %vm3126_vm5, %v7136_v33 }
 0x3a4   : > { %v7682_v15 = vpop.permute.xlu0 %7681 }
 0x3a5   : > { %7717 = vst.msk [vmem:[#allocation5 + $0x60] sm:$0xff] %vm3671_vm6, %v7682_v15 }
 0x3a7   : > { %v6643_v38 = vpop.permute.xlu1 %6642 }
 0x3a8   : > { %v8002_v27 = vpop.permute.xlu0 %8001 }
 0x3a9   : > { %8037 = vst.msk [vmem:[#allocation5 + $0x60] sm:$0xff] %vm3992_vm7, %v8002_v27 }
 0x3ae   : > { %v7680_v16 = vpop.permute.xlu1 %7679 }
 0x3af   : > { %7716 = vst.msk [vmem:[#allocation5 + $0x58] sm:$0xff] %vm3671_vm6, %v7680_v16  ;;  %v8374_v16 = vld [vmem:[%s9652_s29 + $0x38] sm:$0xff] }
 0x3b0   : > { %8036 = vst.msk [vmem:[#allocation5 + $0x58] sm:$0xff] %vm3992_vm7, %v8000_v44  ;;  %v8053_v9 = vld [vmem:[#allocation5 + $0x60] sm:$0xff] }
 0x3b1   : > { %v8004_v24 = vpop.permute.xlu0 %8003 }
 0x3b2   : > { %v5603_v61 = vpop.permute.xlu1 %5602 }
 0x3b3   : > { %5637 = vst.msk [vmem:[#allocation5 + $0x68] sm:$0xff] %vm1581_vm15, %v5603_v61 }
 0x3b4   : > { %5957 = vst.msk [vmem:[#allocation5 + $0x68] sm:$0xff] %vm1905_vm1, %v5923_v34  ;;  %v8371_v34 = vld [vmem:[%s9652_s29 + $0x20] sm:$0xff] }
 0x3b5   : > { %6133 = vst.msk [vmem:[#allocation5 + $0x68] sm:$0xff] %vm2082_vm2, %v6099_v55  ;;  %v5925_v41 = vpop.permute.xlu0 %5924 }
 0x3b6   : > { %6677 = vst.msk [vmem:[#allocation5 + $0x68] sm:$0xff] %vm2627_vm3, %v6643_v38  ;;  %v6963_v4 = vpop.permute.xlu1 %6962 }
 0x3b7   : > { %6997 = vst.msk [vmem:[#allocation5 + $0x68] sm:$0xff] %vm2948_vm4, %v6963_v4  ;;  %v8052_v28 = vld [vmem:[#allocation5 + $0x58] sm:$0xff] }
 0x3b8   : > { %9220 = vmatmul.mubr.msk.bf16.gmra.mrb[20].mxu1 %vm12014_vm11, %v8052_v28  ;;  %v8372_v4 = vld [vmem:[%s9652_s29 + $0x28] sm:$0xff] }
 0x3b9   : > { %9223 = vmatprep.mubr.msk.bf16.mxu1 %vm12015_vm13, %v8053_v9  ;;  %v6101_v13 = vpop.permute.xlu0 %6100 }
 0x3ba   : > { %v7140_v46 = vpop.permute.xlu1 %7139 }
 0x3bb   : > { %7174 = vst.msk [vmem:[#allocation5 + $0x68] sm:$0xff] %vm3126_vm5, %v7140_v46 }
 0x3be   : > { %v7684_v17 = vpop.permute.xlu1 %7683 }
 0x3bf   : > { %7718 = vst.msk [vmem:[#allocation5 + $0x68] sm:$0xff] %vm3671_vm6, %v7684_v17 }
 0x3c0   : > { %8038 = vst.msk [vmem:[#allocation5 + $0x68] sm:$0xff] %vm3992_vm7, %v8004_v24  ;;  %v6645_v31 = vpop.permute.xlu0 %6644 }
 0x3c4   : > { %v5605_v35 = vpop.permute.xlu1 %5604  ;;  %v6965_v48 = vpop.permute.xlu0 %6964 }
 0x3c5   : > { %5638 = vst.msk [vmem:[#allocation5 + $0x70] sm:$0xff] %vm1581_vm15, %v5605_v35 }
 0x3c6   : > { %5958 = vst.msk [vmem:[#allocation5 + $0x70] sm:$0xff] %vm1905_vm1, %v5925_v41 }
 0x3c7   : > { %6134 = vst.msk [vmem:[#allocation5 + $0x70] sm:$0xff] %vm2082_vm2, %v6101_v13  ;;  %v8054_v14 = vld [vmem:[#allocation5 + $0x68] sm:$0xff] }
 0x3c8   : > { %6678 = vst.msk [vmem:[#allocation5 + $0x70] sm:$0xff] %vm2627_vm3, %v6645_v31  ;;  %v7142_v50 = vpop.permute.xlu0 %7141  ;;  %9224 = vmatmul.mubr.msk.bf16.gmra.mrb[24].mxu1 %vm12016_vm12, %v8054_v14 }
 0x3c9   : > { %6998 = vst.msk [vmem:[#allocation5 + $0x70] sm:$0xff] %vm2948_vm4, %v6965_v48 }
 0x3ca   : > { %7175 = vst.msk [vmem:[#allocation5 + $0x70] sm:$0xff] %vm3126_vm5, %v7142_v50 }
 0x3cb   : > { %v5607_v47 = vpop.permute.xlu1 %5606 }
 0x3cc   : > { %5639 = vst.msk [vmem:[#allocation5 + $0x78] sm:$0xff] %vm1581_vm15, %v5607_v47  ;;  %vm12018_vm15 = vcmask 31744  }
 0x3ce   : > { %v7686_v3 = vpop.permute.xlu0 %7685 }
 0x3cf   : > { %7719 = vst.msk [vmem:[#allocation5 + $0x70] sm:$0xff] %vm3671_vm6, %v7686_v3  ;;  %v5927_v57 = vpop.permute.xlu1 %5926  ;;  %v8377_v3 = vld [vmem:[%s9652_s29 + $0x50] sm:$0xff] }
 0x3d0   : > { %5959 = vst.msk [vmem:[#allocation5 + $0x78] sm:$0xff] %vm1905_vm1, %v5927_v57  ;;  %vm12019_vm1 = vmmov %vm12018_vm15 }
 0x3d1   : > { %vm12026_vm14 = vmmov %vm12019_vm1 }
 0x3d2   : > { %v8006_v22 = vpop.permute.xlu0 %8005  ;;  %vm12027_vm10 = vmmov %vm12019_vm1 }
 0x3d3   : > { %8039 = vst.msk [vmem:[#allocation5 + $0x70] sm:$0xff] %vm3992_vm7, %v8006_v22  ;;  %v6103_v54 = vpop.permute.xlu1 %6102  ;;  %vm12028_vm9 = vmmov %vm12019_vm1 }
 0x3d4   : > { %6135 = vst.msk [vmem:[#allocation5 + $0x78] sm:$0xff] %vm2082_vm2, %v6103_v54  ;;  %vm12020_vm2 = vmmov %vm12019_vm1 }
 0x3d7   : > { %v6647_v52 = vpop.permute.xlu1 %6646 }
 0x3d8   : > { %6679 = vst.msk [vmem:[#allocation5 + $0x78] sm:$0xff] %vm2627_vm3, %v6647_v52  ;;  %vm12021_vm3 = vmmov %vm12006_vm0  ;;  %v8375_v52 = vld [vmem:[%s9652_s29 + $0x40] sm:$0xff] }
 0x3d9   : > { %vm12029_vm0 = vmmov %vm12019_vm1 }
 0x3da   : > { %v8055_v39 = vld [vmem:[#allocation5 + $0x70] sm:$0xff]  ;;  %vm12030_vm11 = vmmov %vm12029_vm0 }
 0x3db   : > { %v6967_v10 = vpop.permute.xlu1 %6966  ;;  %9227 = vmatprep.mubr.msk.bf16.mxu1 %vm12017_vm8, %v8055_v39  ;;  %vm12031_vm13 = vmmov %vm12029_vm0 }
 0x3dc   : > { %6999 = vst.msk [vmem:[#allocation5 + $0x78] sm:$0xff] %vm2948_vm4, %v6967_v10  ;;  %vm12022_vm4 = vmmov %vm12019_vm1 }
 0x3dd   : > { %vm12032_vm12 = vmmov %vm12029_vm0 }
 0x3de   : > { %vm12033_vm8 = vmmov %vm12029_vm0 }
 0x3df   : > { %v7144_v63 = vpop.permute.xlu1 %7143 }
 0x3e0   : > { %7176 = vst.msk [vmem:[#allocation5 + $0x78] sm:$0xff] %vm3126_vm5, %v7144_v63  ;;  %vm12023_vm5 = vmmov %vm12019_vm1 }
 0x3e3   : > { %v7688_v59 = vpop.permute.xlu1 %7687 }
 0x3e4   : > { %7720 = vst.msk [vmem:[#allocation5 + $0x78] sm:$0xff] %vm3671_vm6, %v7688_v59  ;;  %v9201_v7 = vpop.f32.mrb[0].mxu1  ;;  %vm12024_vm6 = vmmov %vm12019_vm1  ;;  %v8378_v59 = vld [vmem:[%s9652_s29 + $0x58] sm:$0xff] }
 0x3e5   : > { %v8298_v32 = vmul.f32 %v9201_v7, %v11798_v30  ;;  %v8162_v26 = vpop.f32.mrb[1].mxu1 }
 0x3e6   : > { %v8296_v56 = vmul.f32 %v11798_v30, %v8162_v26  ;;  %v9202_v37 = vpop.f32.mrb[2].mxu1 }
 0x3e7   : > { %v8008_v60 = vpop.permute.xlu1 %8007  ;;  %v8337_v6 = vadd.f32 %v11804_v36, %v8298_v32  ;;  %v8299_v51 = vmul.f32 %v9202_v37, %v11798_v30  ;;  %v8165_v8 = vpop.f32.mrb[3].mxu1 }
 0x3e8   : > { %8040 = vst.msk [vmem:[#allocation5 + $0x78] sm:$0xff] %vm3992_vm7, %v8008_v60  ;;  %v8335_v29 = vadd.f32 %v11804_v36, %v8296_v56  ;;  %v8297_v25 = vmul.f32 %v11798_v30, %v8165_v8  ;;  %vm12025_vm7 = vmmov %vm12019_vm1 }
 0x3e9   : > { %v8401_v40 = vadd.f32 %v8369_v53, %v8337_v6  ;;  %v8338_v62 = vadd.f32 %v11804_v36, %v8299_v51  ;;  %v8376_v53 = vld [vmem:[%s9652_s29 + $0x48] sm:$0xff] }
 0x3ea   : > { %v8399_v1 = vadd.f32 %v8367_v43, %v8335_v29  ;;  %v8336_v55 = vadd.f32 %v11804_v36, %v8297_v25 }
 0x3eb   : > { %v8433_v42 = vmax.f32 %v8401_v40, 0.0  ;;  %v8402_v45 = vadd.f32 %v8370_v20, %v8338_v62  ;;  %v8381_v62 = vld [vmem:[%s9652_s29 + $0x70] sm:$0xff] }
 0x3ec   : > { %v8431_v23 = vmax.f32 %v8399_v1, 0.0  ;;  %v8400_v33 = vadd.f32 %v8368_v19, %v8336_v55  ;;  %v9205_v5 = vpop.f32.mrb[4].mxu1 }
 0x3ed   : > { %8465 = vst.msk [vmem:[%s11823_s13 + $0x10] sm:$0xff] %vm12018_vm15, %v8433_v42  ;;  %v8434_v18 = vmax.f32 %v8402_v45, 0.0  ;;  %v8302_v44 = vmul.f32 %v9205_v5, %v11798_v30  ;;  %v8178_v0 = vpop.f32.mrb[5].mxu1  ;;  %v8379_v42 = vld [vmem:[%s9652_s29 + $0x60] sm:$0xff]  ;;  %v8382_v5 = vld [vmem:[%s9652_s29 + $0x78] sm:$0xff]  ;;  %vm12034_vm15 = vmmov %vm12029_vm0 }
 0x3ee   : > { %8463 = vst.msk [vmem:[%s11823_s13] sm:$0xff] %vm12019_vm1, %v8431_v23  ;;  %v8432_v49 = vmax.f32 %v8400_v33, 0.0  ;;  %v8300_v58 = vmul.f32 %v11798_v30, %v8178_v0  ;;  %v9206_v11 = vpop.f32.mrb[6].mxu1  ;;  %vm12035_vm1 = vmmov %vm12029_vm0 }
 0x3ef   : > { %v8056_v12 = vld [vmem:[#allocation5 + $0x78] sm:$0xff]  ;;  %8466 = vst.msk [vmem:[%s11823_s13 + $0x18] sm:$0xff] %vm12020_vm2, %v8434_v18  ;;  %v8341_v2 = vadd.f32 %v11804_v36, %v8302_v44  ;;  %v8303_v15 = vmul.f32 %v9206_v11, %v11798_v30  ;;  %v8181_v38 = vpop.f32.mrb[7].mxu1  ;;  %vm12036_vm2 = vmmov %vm12029_vm0 }
 0x3f0   : > { %9228 = vmatmul.mubr.msk.bf16.gmra.mrb[28].mxu1 %vm12021_vm3, %v8056_v12  ;;  %8464 = vst.msk [vmem:[%s11823_s13 + $0x8] sm:$0xff] %vm12022_vm4, %v8432_v49  ;;  %v8339_v27 = vadd.f32 %v11804_v36, %v8300_v58  ;;  %v8301_v24 = vmul.f32 %v11798_v30, %v8181_v38  ;;  %v8380_v49 = vld [vmem:[%s9652_s29 + $0x68] sm:$0xff]  ;;  %vm12037_vm3 = vmmov %vm12029_vm0 }
 0x3f1   : > { %v8405_v61 = vadd.f32 %v8373_v21, %v8341_v2  ;;  %v8342_v41 = vadd.f32 %v11804_v36, %v8303_v15  ;;  %vm12038_vm4 = vmmov %vm12029_vm0 }
 0x3f2   : > { %v8403_v28 = vadd.f32 %v8371_v34, %v8339_v27  ;;  %v8340_v9 = vadd.f32 %v11804_v36, %v8301_v24 }
 0x3f3   : > { %v8437_v46 = vmax.f32 %v8405_v61, 0.0  ;;  %v8406_v13 = vadd.f32 %v8374_v16, %v8342_v41  ;;  %v8385_v61 = vld [vmem:[%s9652_s29 + $0x90] sm:$0xff] }
 0x3f4   : > { %v8435_v17 = vmax.f32 %v8403_v28, 0.0  ;;  %v8404_v31 = vadd.f32 %v8372_v4, %v8340_v9  ;;  %v8383_v9 = vld [vmem:[%s9652_s29 + $0x80] sm:$0xff] }
 0x3f5   : > { %8469 = vst.msk [vmem:[%s11823_s13 + $0x30] sm:$0xff] %vm12023_vm5, %v8437_v46  ;;  %v8438_v35 = vmax.f32 %v8406_v13, 0.0  ;;  %vm12039_vm5 = vmmov %vm12029_vm0 }
 0x3f6   : > { %8467 = vst.msk [vmem:[%s11823_s13 + $0x20] sm:$0xff] %vm12024_vm6, %v8435_v17  ;;  %v8436_v48 = vmax.f32 %v8404_v31, 0.0  ;;  %v8386_v31 = vld [vmem:[%s9652_s29 + $0x98] sm:$0xff]  ;;  %vm12040_vm6 = vmmov %vm12029_vm0 }
 0x3f7   : > { %8470 = vst.msk [vmem:[%s11823_s13 + $0x38] sm:$0xff] %vm12025_vm7, %v8438_v35  ;;  %vm12041_vm7 = vmmov %vm12029_vm0 }
 0x3f8   : > { %8468 = vst.msk [vmem:[%s11823_s13 + $0x28] sm:$0xff] %vm12026_vm14, %v8436_v48  ;;  %vm12042_vm14 = vmmov %vm12029_vm0 }
 0x410   : > { %v9209_v14 = vpop.f32.mrb[8].mxu1 }
 0x411   : > { %v8306_v50 = vmul.f32 %v9209_v14, %v11798_v30  ;;  %v8194_v47 = vpop.f32.mrb[9].mxu1 }
 0x412   : > { %v8304_v57 = vmul.f32 %v11798_v30, %v8194_v47  ;;  %v9210_v22 = vpop.f32.mrb[10].mxu1 }
 0x413   : > { %v8345_v54 = vadd.f32 %v11804_v36, %v8306_v50  ;;  %v8307_v39 = vmul.f32 %v9210_v22, %v11798_v30  ;;  %v8197_v10 = vpop.f32.mrb[11].mxu1  ;;  %v8384_v50 = vld [vmem:[%s9652_s29 + $0x88] sm:$0xff] }
 0x414   : > { %v8343_v63 = vadd.f32 %v11804_v36, %v8304_v57  ;;  %v8305_v7 = vmul.f32 %v11798_v30, %v8197_v10 }
 0x415   : > { %v8409_v32 = vadd.f32 %v8377_v3, %v8345_v54  ;;  %v8346_v26 = vadd.f32 %v11804_v36, %v8307_v39 }
 0x416   : > { %v8407_v56 = vadd.f32 %v8375_v52, %v8343_v63  ;;  %v8344_v37 = vadd.f32 %v11804_v36, %v8305_v7 }
 0x417   : > { %v8441_v60 = vmax.f32 %v8409_v32, 0.0  ;;  %v8410_v6 = vadd.f32 %v8378_v59, %v8346_v26  ;;  %v8389_v32 = vld [vmem:[%s9652_s29 + $0xb0] sm:$0xff] }
 0x418   : > { %v8439_v43 = vmax.f32 %v8407_v56, 0.0  ;;  %v8408_v51 = vadd.f32 %v8376_v53, %v8344_v37  ;;  %v8387_v37 = vld [vmem:[%s9652_s29 + $0xa0] sm:$0xff] }
 0x419   : > { %8473 = vst.msk [vmem:[%s11823_s13 + $0x50] sm:$0xff] %vm12027_vm10, %v8441_v60  ;;  %v8442_v8 = vmax.f32 %v8410_v6, 0.0  ;;  %vm12043_vm10 = vmmov %vm12029_vm0 }
 0x41a   : > { %8471 = vst.msk [vmem:[%s11823_s13 + $0x40] sm:$0xff] %vm12028_vm9, %v8439_v43  ;;  %v8440_v29 = vmax.f32 %v8408_v51, 0.0  ;;  %v8390_v51 = vld [vmem:[%s9652_s29 + $0xb8] sm:$0xff]  ;;  %vm12044_vm9 = vmmov %vm12029_vm0 }
 0x41b   : > { %8474 = vst.msk [vmem:[%s11823_s13 + $0x58] sm:$0xff] %vm12029_vm0, %v8442_v8 }
 0x41c   : > { %8472 = vst.msk [vmem:[%s11823_s13 + $0x48] sm:$0xff] %vm12030_vm11, %v8440_v29  ;;  %vm12045_vm11 = vmmov %vm12029_vm0 }
 0x43e   : > { %v9213_v20 = vpop.f32.mrb[12].mxu1 }
 0x43f   : > { %v8310_v25 = vmul.f32 %v9213_v20, %v11798_v30  ;;  %v8210_v40 = vpop.f32.mrb[13].mxu1 }
 0x440   : > { %v8308_v19 = vmul.f32 %v11798_v30, %v8210_v40  ;;  %v9214_v1 = vpop.f32.mrb[14].mxu1 }
 0x441   : > { %v8349_v55 = vadd.f32 %v11804_v36, %v8310_v25  ;;  %v8311_v45 = vmul.f32 %v9214_v1, %v11798_v30  ;;  %v8213_v23 = vpop.f32.mrb[15].mxu1  ;;  %v8388_v25 = vld [vmem:[%s9652_s29 + $0xa8] sm:$0xff] }
 0x442   : > { %v8347_v33 = vadd.f32 %v11804_v36, %v8308_v19  ;;  %v8309_v18 = vmul.f32 %v11798_v30, %v8213_v23 }
 0x443   : > { %v8413_v44 = vadd.f32 %v8381_v62, %v8349_v55  ;;  %v8350_v0 = vadd.f32 %v11804_v36, %v8311_v45 }
 0x444   : > { %v8411_v21 = vadd.f32 %v8379_v42, %v8347_v33  ;;  %v8348_v58 = vadd.f32 %v11804_v36, %v8309_v18 }
 0x445   : > { %v8445_v11 = vmax.f32 %v8413_v44, 0.0  ;;  %v8414_v12 = vadd.f32 %v8382_v5, %v8350_v0  ;;  %v8393_v44 = vld [vmem:[%s9652_s29 + $0xd0] sm:$0xff] }
 0x446   : > { %v8443_v2 = vmax.f32 %v8411_v21, 0.0  ;;  %v8412_v34 = vadd.f32 %v8380_v49, %v8348_v58  ;;  %v8391_v58 = vld [vmem:[%s9652_s29 + $0xc0] sm:$0xff] }
 0x447   : > { %8477 = vst.msk [vmem:[%s11823_s13 + $0x70] sm:$0xff] %vm12031_vm13, %v8445_v11  ;;  %v8446_v15 = vmax.f32 %v8414_v12, 0.0  ;;  %vm12046_vm13 = vmmov %vm12029_vm0 }
 0x448   : > { %8475 = vst.msk [vmem:[%s11823_s13 + $0x60] sm:$0xff] %vm12032_vm12, %v8443_v2  ;;  %v8444_v38 = vmax.f32 %v8412_v34, 0.0  ;;  %v8394_v34 = vld [vmem:[%s9652_s29 + $0xd8] sm:$0xff]  ;;  %vm12047_vm12 = vmmov %vm12029_vm0 }
 0x449   : > { %8478 = vst.msk [vmem:[%s11823_s13 + $0x78] sm:$0xff] %vm12033_vm8, %v8446_v15  ;;  %vm12048_vm8 = vmmov %vm12029_vm0 }
 0x44a   : > { %8476 = vst.msk [vmem:[%s11823_s13 + $0x68] sm:$0xff] %vm12034_vm15, %v8444_v38  ;;  %vm12049_vm15 = vmmov %vm12029_vm0 }
 0x470   : > { %v9217_v27 = vpop.f32.mrb[16].mxu1 }
 0x471   : > { %v8314_v16 = vmul.f32 %v9217_v27, %v11798_v30  ;;  %v8226_v24 = vpop.f32.mrb[17].mxu1 }
 0x472   : > { %v8312_v41 = vmul.f32 %v11798_v30, %v8226_v24  ;;  %v9218_v4 = vpop.f32.mrb[18].mxu1 }
 0x473   : > { %v8353_v28 = vadd.f32 %v11804_v36, %v8314_v16  ;;  %v8315_v46 = vmul.f32 %v9218_v4, %v11798_v30  ;;  %v8229_v13 = vpop.f32.mrb[19].mxu1  ;;  %v8392_v16 = vld [vmem:[%s9652_s29 + $0xc8] sm:$0xff] }
 0x474   : > { %v8351_v17 = vadd.f32 %v11804_v36, %v8312_v41  ;;  %v8313_v35 = vmul.f32 %v11798_v30, %v8229_v13 }
 0x475   : > { %v8417_v48 = vadd.f32 %v8385_v61, %v8353_v28  ;;  %v8354_v14 = vadd.f32 %v11804_v36, %v8315_v46 }
 0x476   : > { %v8415_v47 = vadd.f32 %v8383_v9, %v8351_v17  ;;  %v8352_v3 = vadd.f32 %v11804_v36, %v8313_v35 }
 0x477   : > { %v8449_v57 = vmax.f32 %v8417_v48, 0.0  ;;  %v8418_v22 = vadd.f32 %v8386_v31, %v8354_v14  ;;  %v8397_v48 = vld [vmem:[%s9652_s29 + $0xf0] sm:$0xff] }
 0x478   : > { %v8447_v54 = vmax.f32 %v8415_v47, 0.0  ;;  %v8416_v52 = vadd.f32 %v8384_v50, %v8352_v3  ;;  %v8395_v3 = vld [vmem:[%s9652_s29 + $0xe0] sm:$0xff] }
 0x479   : > { %8481 = vst.msk [vmem:[%s11823_s13 + $0x90] sm:$0xff] %vm12035_vm1, %v8449_v57  ;;  %v8450_v39 = vmax.f32 %v8418_v22, 0.0 }
 0x47a   : > { %8479 = vst.msk [vmem:[%s11823_s13 + $0x80] sm:$0xff] %vm12036_vm2, %v8447_v54  ;;  %v8448_v10 = vmax.f32 %v8416_v52, 0.0  ;;  %v8398_v52 = vld [vmem:[%s9652_s29 + $0xf8] sm:$0xff] }
 0x47b   : > { %8482 = vst.msk [vmem:[%s11823_s13 + $0x98] sm:$0xff] %vm12037_vm3, %v8450_v39 }
 0x47c   : > { %8480 = vst.msk [vmem:[%s11823_s13 + $0x88] sm:$0xff] %vm12038_vm4, %v8448_v10 }
 0x48b   : > { %v9221_v63 = vpop.f32.mrb[20].mxu1 }
 0x48c   : > { %v8318_v59 = vmul.f32 %v9221_v63, %v11798_v30  ;;  %v8242_v7 = vpop.f32.mrb[21].mxu1 }
 0x48d   : > { %v8316_v26 = vmul.f32 %v11798_v30, %v8242_v7  ;;  %v9222_v53 = vpop.f32.mrb[22].mxu1 }
 0x48e   : > { %v8357_v56 = vadd.f32 %v11804_v36, %v8318_v59  ;;  %v8319_v60 = vmul.f32 %v9222_v53, %v11798_v30  ;;  %v8245_v6 = vpop.f32.mrb[23].mxu1  ;;  %v8396_v59 = vld [vmem:[%s9652_s29 + $0xe8] sm:$0xff] }
 0x48f   : > { %v8355_v43 = vadd.f32 %v11804_v36, %v8316_v26  ;;  %v8317_v8 = vmul.f32 %v11798_v30, %v8245_v6 }
 0x490   : > { %v8421_v29 = vadd.f32 %v8389_v32, %v8357_v56  ;;  %v8358_v20 = vadd.f32 %v11804_v36, %v8319_v60 }
 0x491   : > { %v8419_v40 = vadd.f32 %v8387_v37, %v8355_v43  ;;  %v8356_v62 = vadd.f32 %v11804_v36, %v8317_v8 }
 0x492   : > { %v8453_v19 = vmax.f32 %v8421_v29, 0.0  ;;  %v8422_v1 = vadd.f32 %v8390_v51, %v8358_v20 }
 0x493   : > { %v8451_v55 = vmax.f32 %v8419_v40, 0.0  ;;  %v8420_v42 = vadd.f32 %v8388_v25, %v8356_v62 }
 0x494   : > { %8485 = vst.msk [vmem:[%s11823_s13 + $0xb0] sm:$0xff] %vm12039_vm5, %v8453_v19  ;;  %v8454_v45 = vmax.f32 %v8422_v1, 0.0 }
 0x495   : > { %8483 = vst.msk [vmem:[%s11823_s13 + $0xa0] sm:$0xff] %vm12040_vm6, %v8451_v55  ;;  %v8452_v23 = vmax.f32 %v8420_v42, 0.0 }
 0x496   : > { %8486 = vst.msk [vmem:[%s11823_s13 + $0xb8] sm:$0xff] %vm12041_vm7, %v8454_v45 }
 0x497   : > { %8484 = vst.msk [vmem:[%s11823_s13 + $0xa8] sm:$0xff] %vm12042_vm14, %v8452_v23 }
 0x49b   : > { %v9225_v33 = vpop.f32.mrb[24].mxu1 }
 0x49c   : > { %v8322_v5 = vmul.f32 %v9225_v33, %v11798_v30  ;;  %v8258_v18 = vpop.f32.mrb[25].mxu1 }
 0x49d   : > { %v8320_v0 = vmul.f32 %v11798_v30, %v8258_v18  ;;  %v9226_v49 = vpop.f32.mrb[26].mxu1 }
 0x49e   : > { %v8361_v21 = vadd.f32 %v11804_v36, %v8322_v5  ;;  %v8323_v11 = vmul.f32 %v9226_v49, %v11798_v30  ;;  %v8261_v12 = vpop.f32.mrb[27].mxu1 }
 0x49f   : > { %v8359_v2 = vadd.f32 %v11804_v36, %v8320_v0  ;;  %v8321_v15 = vmul.f32 %v11798_v30, %v8261_v12 }
 0x4a0   : > { %v8425_v38 = vadd.f32 %v8393_v44, %v8361_v21  ;;  %v8362_v27 = vadd.f32 %v11804_v36, %v8323_v11 }
 0x4a1   : > { %v8423_v24 = vadd.f32 %v8391_v58, %v8359_v2  ;;  %v8360_v61 = vadd.f32 %v11804_v36, %v8321_v15 }
 0x4a2   : > { %v8457_v41 = vmax.f32 %v8425_v38, 0.0  ;;  %v8426_v4 = vadd.f32 %v8394_v34, %v8362_v27 }
 0x4a3   : > { %v8455_v28 = vmax.f32 %v8423_v24, 0.0  ;;  %v8424_v9 = vadd.f32 %v8392_v16, %v8360_v61 }
 0x4a4   : > { %8489 = vst.msk [vmem:[%s11823_s13 + $0xd0] sm:$0xff] %vm12043_vm10, %v8457_v41  ;;  %v8458_v46 = vmax.f32 %v8426_v4, 0.0 }
 0x4a5   : > { %8487 = vst.msk [vmem:[%s11823_s13 + $0xc0] sm:$0xff] %vm12044_vm9, %v8455_v28  ;;  %v8456_v13 = vmax.f32 %v8424_v9, 0.0 }
 0x4a6   : > { %8490 = vst.msk [vmem:[%s11823_s13 + $0xd8] sm:$0xff] %vm12029_vm0, %v8458_v46 }
 0x4a7   : > { %8488 = vst.msk [vmem:[%s11823_s13 + $0xc8] sm:$0xff] %vm12045_vm11, %v8456_v13 }
 0x4c3   : > { %v9229_v17 = vpop.f32.mrb[28].mxu1 }
 0x4c4   : > { %v8326_v31 = vmul.f32 %v9229_v17, %v11798_v30  ;;  %v8274_v35 = vpop.f32.mrb[29].mxu1 }
 0x4c5   : > { %v8324_v14 = vmul.f32 %v11798_v30, %v8274_v35  ;;  %v9230_v50 = vpop.f32.mrb[30].mxu1 }
 0x4c6   : > { %v8365_v47 = vadd.f32 %v11804_v36, %v8326_v31  ;;  %v8327_v57 = vmul.f32 %v9230_v50, %v11798_v30  ;;  %v8277_v22 = vpop.f32.mrb[31].mxu1 }
 0x4c7   : > { %v8363_v54 = vadd.f32 %v11804_v36, %v8324_v14  ;;  %v8325_v39 = vmul.f32 %v11798_v30, %v8277_v22 }
 0x4c8   : > { %v8429_v10 = vadd.f32 %v8397_v48, %v8365_v47  ;;  %v8366_v63 = vadd.f32 %v11804_v36, %v8327_v57 }
 0x4c9   : > { %v8427_v7 = vadd.f32 %v8395_v3, %v8363_v54  ;;  %v8364_v32 = vadd.f32 %v11804_v36, %v8325_v39 }
 0x4ca   : > { %v8461_v26 = vmax.f32 %v8429_v10, 0.0  ;;  %v8430_v53 = vadd.f32 %v8398_v52, %v8366_v63 }
 0x4cb   : > { %v8459_v56 = vmax.f32 %v8427_v7, 0.0  ;;  %v8428_v37 = vadd.f32 %v8396_v59, %v8364_v32 }
 0x4cc   : > { %8493 = vst.msk [vmem:[%s11823_s13 + $0xf0] sm:$0xff] %vm12046_vm13, %v8461_v26  ;;  %v8462_v60 = vmax.f32 %v8430_v53, 0.0 }
 0x4cd   : > { %8491 = vst.msk [vmem:[%s11823_s13 + $0xe0] sm:$0xff] %vm12047_vm12, %v8459_v56  ;;  %v8460_v6 = vmax.f32 %v8428_v37, 0.0 }
 0x4ce   : > { %8494 = vst.msk [vmem:[%s11823_s13 + $0xf8] sm:$0xff] %vm12048_vm8, %v8462_v60 }
 0x4cf   : > { %8492 = vst.msk [vmem:[%s11823_s13 + $0xe8] sm:$0xff] %vm12049_vm15, %v8460_v6 }
 0x4d0 PF: > { %s17_s24 = sadd.s32 1, %s9365_s24  }
 0x4d1   : > { %p14_p4 = scmp.ge.s32.totalorder %s17_s24, 4  }
 0x4d3   :  { %16 = sbr.rel (!%p14_p4) target bundleno = 1 (0x1), region = 82 }

</bundles_post_ra>
